<compile_context>
chip_gen: v6e
topology: v6e:2x2x1
jax: 0.10.0
libtpu: 0.0.40
codegen_flags: <defaults>
</compile_context>

<pallas_src>
import functools

import jax
import jax.numpy as jnp
from jax.experimental import pallas as pl
from jax.experimental.pallas import tpu as pltpu


LANE = 128      # lane width: channel axes are padded to multiples of this
SUBLANE = 8     # sublane granularity for row (M) axes


def _round_up(x, m):
    return (x + m - 1) // m * m


def _pad_axis(a, axis, new_size):
    if a.shape[axis] == new_size:
        return a
    pads = [(0, 0)] * a.ndim
    pads[axis] = (0, new_size - a.shape[axis])
    return jnp.pad(a, pads)


def _pad2(a, shape):
    for ax, s in enumerate(shape):
        a = _pad_axis(a, ax, s)
    return a


def _pick_tile(c, pref=256):
    """Channel-tile width: 256 feeds the 256x256 MXU on v6e/v7x when the
    (128-padded) channel count allows it, else 128 (always fine on v5e)."""
    return pref if c % pref == 0 else LANE


@functools.lru_cache(maxsize=None)
def _vmem_limit_bytes():
    """Per-generation scoped-VMEM limit: ~100 MiB on 128 MiB parts (v5e/v6e),
    ~48 MiB on 64 MiB parts (v7x); safe 48 MiB fallback if the query fails."""
    try:
        cap = int(getattr(pltpu.get_tpu_info(), "vmem_capacity_bytes", 0))
    except Exception:
        cap = 0
    if cap >= 120 * 1024 * 1024:
        return 100 * 1024 * 1024
    if cap > 0:
        return min(48 * 1024 * 1024, (cap * 3) // 4)
    return 48 * 1024 * 1024


def _compiler_params(sem):
    return pltpu.CompilerParams(dimension_semantics=sem,
                                vmem_limit_bytes=_vmem_limit_bytes())


def _gelu(x):
    # TODO(synk): torch.nn.GELU() defaults to the exact erf form; the tanh
    # approximation is used because it lowers to the EUP on all of
    # v5e/v6e/v7x (max abs deviation ~1e-3 from the erf form).
    c = 0.7978845608028654  # sqrt(2/pi)
    return 0.5 * x * (1.0 + jnp.tanh(c * (x + 0.044715 * x * x * x)))


def _in_norm(x):
    # InstanceNorm2d(affine=False, eps=1e-5): biased variance, two-pass stats
    # for better precision than the previous E[x^2]-E[x]^2 formulation.
    inv = 1.0 / x.shape[0]
    mean = jnp.sum(x, axis=0, keepdims=True) * inv
    xc = x - mean
    var = jnp.sum(xc * xc, axis=0, keepdims=True) * inv
    return xc * jax.lax.rsqrt(var + 1e-5)


# -----------------------------------------------------------------------------
# ConvTranspose2d(k=2, s=2) + InstanceNorm + GELU, pixel shuffle fused into the
# output layout (N, H, 2, 2W, C) (free reshape to (N, 2H, 2W, C)).
# -----------------------------------------------------------------------------
def _convt_in_gelu_kernel(x_ref, w_ref, b_ref, o_ref, *, H, W):
    x = x_ref[0]                                       # (HW, cin_p) bf16
    b = b_ref[...].astype(jnp.float32)                 # (1, 2*tn)
    # y_di[(i,j), dj*tn + c] = conv-transpose output at (2i+di, 2j+dj, c).
    # (bias cancels under the following IN, but kept for fidelity)
    y0 = jnp.dot(x, w_ref[0, 0], preferred_element_type=jnp.float32) + b
    y1 = jnp.dot(x, w_ref[1, 0], preferred_element_type=jnp.float32) + b
    tn2 = y0.shape[1]
    tn = tn2 // 2
    inv = 1.0 / (4 * H * W)
    # InstanceNorm stats over the full (2H, 2W) plane = both row planes (di)
    # and both column groups (dj).
    s = jnp.sum(y0 + y1, axis=0, keepdims=True)        # (1, 2*tn)
    s = s[:, :tn] + s[:, tn:]                          # (1, tn)
    mean = jnp.concatenate([s, s], axis=1) * inv       # (1, 2*tn)
    d0 = y0 - mean
    d1 = y1 - mean
    v = jnp.sum(d0 * d0 + d1 * d1, axis=0, keepdims=True)
    v = (v[:, :tn] + v[:, tn:]) * inv
    r = jax.lax.rsqrt(v + 1e-5)
    rstd = jnp.concatenate([r, r], axis=1)
    z0 = _gelu(d0 * rstd)                              # (HW, 2*tn)
    z1 = _gelu(d1 * rstd)
    # (HW, 2*tn) -> (H, 2W, tn): column index (dj*tn + c) interleaves into the
    # 2W axis (2j + dj); pure index remap handled in-VMEM.
    o_ref[0, :, 0, :, :] = z0.reshape(H, 2 * W, tn).astype(o_ref.dtype)
    o_ref[0, :, 1, :, :] = z1.reshape(H, 2 * W, tn).astype(o_ref.dtype)


def conv_transpose2x2_in_gelu(x, w_pt, b, *, cout_p, out_dtype=jnp.bfloat16):
    """x: (N, H, W, cin_p).  w_pt: torch ConvTranspose2d weight (Cin,Cout,2,2).
    Returns (N, 2H, 2W, cout_p) = IN(GELU-normalized) upsample, no HBM
    pixel-shuffle pass."""
    N, H, W, cin_p = x.shape
    HW = H * W
    tn = _pick_tile(cout_p)
    njt = cout_p // tn
    # weight -> (di, jt, cin_p, dj*tn + c)
    w = jnp.transpose(w_pt, (2, 3, 0, 1))              # (di, dj, Cin, Cout)
    w = _pad_axis(_pad_axis(w, 2, cin_p), 3, cout_p)
    w = w.reshape(2, 2, cin_p, njt, tn)
    w = jnp.transpose(w, (0, 3, 2, 1, 4)).reshape(2, njt, cin_p, 2 * tn)
    w = w.astype(jnp.bfloat16)
    bp = _pad_axis(b, 0, cout_p).astype(jnp.float32).reshape(njt, 1, tn)
    bp = jnp.broadcast_to(bp, (njt, 2, tn)).reshape(1, njt * 2 * tn)

    out = pl.pallas_call(
        functools.partial(_convt_in_gelu_kernel, H=H, W=W),
        grid=(N, njt),
        in_specs=[
            pl.BlockSpec((1, HW, cin_p), lambda n, j: (n, 0, 0)),
            pl.BlockSpec((2, 1, cin_p, 2 * tn), lambda n, j: (0, j, 0, 0)),
            pl.BlockSpec((1, 2 * tn), lambda n, j: (0, j)),
        ],
        out_specs=pl.BlockSpec((1, H, 2, 2 * W, tn),
                               lambda n, j: (n, 0, 0, 0, j)),
        out_shape=jax.ShapeDtypeStruct((N, H, 2, 2 * W, cout_p), out_dtype),
        compiler_params=_compiler_params(("parallel", "parallel")),
    )(x.reshape(N, HW, cin_p).astype(jnp.bfloat16), w, bp)
    return out.reshape(N, 2 * H, 2 * W, cout_p)


# -----------------------------------------------------------------------------
# 3x3 conv (replicate padding fused in-kernel) + InstanceNorm + GELU (+ FiLM)
# -----------------------------------------------------------------------------
def _conv3x3_kernel(x_ref, w_ref, b_ref, *rest, H, W, film):
    if film:
        g_ref, fb_ref, o_ref, acc_ref = rest
    else:
        o_ref, acc_ref = rest

    kc = pl.program_id(2)                              # cin-tile (reduction)

    @pl.when(kc == 0)
    def _():
        acc_ref[...] = jnp.zeros_like(acc_ref)

    x = x_ref[0]                                       # (H, W, tkc) bf16
    acc = acc_ref[...]
    # 3 row-shifted bands (replicate edges), each a single dot with K = 3*tkc
    # instead of 9 per-tap dots with K = tkc.
    for ki in range(3):
        if ki == 0:                                    # tap offset -1 (clamp)
            xr = jnp.concatenate([x[:1], x[:-1]], axis=0)
        elif ki == 1:
            xr = x
        else:                                          # tap offset +1 (clamp)
            xr = jnp.concatenate([x[1:], x[-1:]], axis=0)
        left = jnp.concatenate([xr[:, :1], xr[:, :-1]], axis=1)
        right = jnp.concatenate([xr[:, 1:], xr[:, -1:]], axis=1)
        band = jnp.concatenate([left, xr, right], axis=2)   # (H, W, 3*tkc)
        band = band.reshape(H * W, band.shape[-1])
        acc = acc + jnp.dot(band, w_ref[ki, 0],
                            preferred_element_type=jnp.float32)
    acc_ref[...] = acc

    @pl.when(kc == pl.num_programs(2) - 1)
    def _():
        y = acc + b_ref[...].astype(jnp.float32)
        y = _gelu(_in_norm(y))                         # fused IN + GELU
        if film:                                       # fused FiLM injection
            y = (y * (1.0 + g_ref[0].astype(jnp.float32))
                 + fb_ref[0].astype(jnp.float32))
        o_ref[0] = y.astype(o_ref.dtype)


def conv3x3_in_gelu(x, w_pt, b, *, cout_p, out_dtype, gamma=None, beta=None):
    """3x3 Conv2d (padding_mode='replicate') + InstanceNorm2d(affine=False)
    + GELU (+ optional FiLM) fused into one kernel.

    x: (N, H, W, cin_p) channel-padded NHWC.  The full spatial plane of one
    batch element stays resident per grid step (required for in-kernel IN
    stats).  TODO(synk): for very large H*W on v7x (64 MiB VMEM) this would
    need a row-banded two-pass variant."""
    N, H, W, cin_p = x.shape
    HW = H * W
    tn = _pick_tile(cout_p)
    tkc = _pick_tile(cin_p)
    ntk = cin_p // tkc

    # torch weight (Cout, Cin, 3, 3) -> (ki, cin_tile, kj*tkc + c_local, Cout)
    w9 = jnp.transpose(w_pt, (2, 3, 1, 0))             # (ki, kj, Cin, Cout)
    w9 = _pad_axis(_pad_axis(w9, 2, cin_p), 3, cout_p)
    w9 = w9.reshape(3, 3, ntk, tkc, cout_p)
    w9 = jnp.transpose(w9, (0, 2, 1, 3, 4)).reshape(3, ntk, 3 * tkc, cout_p)
    w9 = w9.astype(jnp.bfloat16)
    bp = _pad_axis(b, 0, cout_p).astype(jnp.float32).reshape(1, cout_p)

    film = gamma is not None
    in_specs = [
        pl.BlockSpec((1, H, W, tkc), lambda n, j, k: (n, 0, 0, k)),
        pl.BlockSpec((3, 1, 3 * tkc, tn), lambda n, j, k: (0, k, 0, j)),
        pl.BlockSpec((1, tn), lambda n, j, k: (0, j)),
    ]
    args = [x.astype(jnp.bfloat16), w9, bp]
    if film:
        in_specs += [pl.BlockSpec((1, 1, tn), lambda n, j, k: (n, 0, j)),
                     pl.BlockSpec((1, 1, tn), lambda n, j, k: (n, 0, j))]
        args += [gamma.astype(jnp.float32), beta.astype(jnp.float32)]

    out = pl.pallas_call(
        functools.partial(_conv3x3_kernel, H=H, W=W, film=film),
        grid=(N, cout_p // tn, ntk),
        in_specs=in_specs,
        out_specs=pl.BlockSpec((1, HW, tn), lambda n, j, k: (n, 0, j)),
        out_shape=jax.ShapeDtypeStruct((N, HW, cout_p), out_dtype),
        scratch_shapes=[pltpu.VMEM((HW, tn), jnp.float32)],
        compiler_params=_compiler_params(("parallel", "parallel", "arbitrary")),
    )(*args)
    return out.reshape(N, H, W, cout_p)


# -----------------------------------------------------------------------------
# Dual-source matmul (1x1 fusion conv on the un-materialized concat [a, b])
# -----------------------------------------------------------------------------
def _dual_matmul_bias_kernel(a_ref, b_ref, wa_ref, wb_ref, bias_ref, o_ref):
    acc = jnp.dot(a_ref[...], wa_ref[...], preferred_element_type=jnp.float32)
    acc = acc + jnp.dot(b_ref[...], wb_ref[...],
                        preferred_element_type=jnp.float32)
    o_ref[...] = (acc + bias_ref[...]).astype(o_ref.dtype)


def dual_matmul_bias(a, b, wa, wb, bias, *, out_dtype, tm=512):
    """out = a @ wa + b @ wb + bias.  K (channels per source of a 1x1 conv) is
    small, so it is kept un-tiled; the concat is never built in HBM."""
    M, Ka = a.shape
    Kb = b.shape[1]
    N = wa.shape[1]
    tn = _pick_tile(_round_up(N, LANE))
    tm_e = min(tm, _round_up(M, SUBLANE))
    Mp, Np = _round_up(M, tm_e), _round_up(N, tn)
    Kap, Kbp = _round_up(Ka, LANE), _round_up(Kb, LANE)
    ap = _pad2(a.astype(jnp.bfloat16), (Mp, Kap))
    bp = _pad2(b.astype(jnp.bfloat16), (Mp, Kbp))
    wap = _pad2(wa.astype(jnp.bfloat16), (Kap, Np))
    wbp = _pad2(wb.astype(jnp.bfloat16), (Kbp, Np))
    biasp = _pad2(bias.astype(jnp.float32).reshape(1, N), (1, Np))
    out = pl.pallas_call(
        _dual_matmul_bias_kernel,
        grid=(Mp // tm_e, Np // tn),
        in_specs=[
            pl.BlockSpec((tm_e, Kap), lambda i, j: (i, 0)),
            pl.BlockSpec((tm_e, Kbp), lambda i, j: (i, 0)),
            pl.BlockSpec((Kap, tn), lambda i, j: (0, j)),
            pl.BlockSpec((Kbp, tn), lambda i, j: (0, j)),
            pl.BlockSpec((1, tn), lambda i, j: (0, j)),
        ],
        out_specs=pl.BlockSpec((tm_e, tn), lambda i, j: (i, j)),
        out_shape=jax.ShapeDtypeStruct((Mp, Np), out_dtype),
        compiler_params=_compiler_params(("parallel", "parallel")),
    )(ap, bp, wap, wbp, biasp)
    return out[:M, :N] if (Mp, Np) != (M, N) else out


# -----------------------------------------------------------------------------
# GinkaDecoder forward
# -----------------------------------------------------------------------------
def ginka_decoder_forward(params, x_nchw, feat_nchw, cond, *, in_ch, out_ch):
    mid = in_ch // 2
    in_ch_p = _round_up(in_ch, LANE)
    mid_p = _round_up(mid, LANE)
    out_ch_p = _round_up(out_ch, LANE)

    # NCHW -> NHWC (channels on the lane axis), pad channels to 128 lanes.
    # TODO(synk): for genuinely sub-128 channel counts (as in this demo) the
    # lane padding wastes MXU work; real nets with >=128 channels pay nothing.
    x = _pad_axis(jnp.transpose(x_nchw, (0, 2, 3, 1)), 3, in_ch_p)
    feat = _pad_axis(jnp.transpose(feat_nchw, (0, 2, 3, 1)), 3, mid_p)
    N, H, W, _ = x.shape
    H2, W2 = 2 * H, 2 * W
    M = N * H2 * W2

    # ---- GinkaUpSample(in_ch, in_ch // 2): ConvT(2,2,s2)+IN+GELU fused (pixel
    # shuffle folded into the output layout), then Conv3x3(replicate)+IN+GELU.
    h = conv_transpose2x2_in_gelu(x, params["up_ct_w"], params["up_ct_b"],
                                  cout_p=mid_p, out_dtype=jnp.bfloat16)
    h = conv3x3_in_gelu(h, params["up_c3_w"], params["up_c3_b"],
                        cout_p=mid_p, out_dtype=jnp.bfloat16)

    # ---- fusion = Conv2d(in_ch, in_ch, 1) on cat([h, feat], dim=1) ----
    # The concat is never materialized: the 1x1 conv's K axis is split over
    # the two sources and accumulated inside one kernel.
    wf = params["fusion_w"][:, :, 0, 0]                 # (in_ch, in_ch)
    wa = _pad2(jnp.transpose(wf[:, :mid], (1, 0)), (mid_p, in_ch_p))
    wb = _pad2(jnp.transpose(wf[:, mid:], (1, 0)), (mid_p, in_ch_p))
    bf_ = _pad_axis(params["fusion_b"], 0, in_ch_p)
    h = dual_matmul_bias(h.reshape(M, mid_p), feat.reshape(M, mid_p),
                         wa, wb, bf_, out_dtype=jnp.bfloat16)
    h = h.reshape(N, H2, W2, in_ch_p)

    # ---- ConvFusionModule(in_ch, out_ch, out_ch, w, h) ----
    # TODO(synk): ConvFusionModule source not provided; implemented as
    # Conv3x3(replicate)+IN+GELU -> Conv3x3(replicate)+IN+GELU.
    h = conv3x3_in_gelu(h, params["cf1_w"], params["cf1_b"],
                        cout_p=out_ch_p, out_dtype=jnp.bfloat16)

    # ---- ConditionInjector(256, out_ch) ----
    # TODO(synk): ConditionInjector source not provided; implemented as FiLM:
    # Linear(256 -> 2*out_ch) -> (gamma, beta); y = x * (1 + gamma) + beta.
    # The Linear is tiny (M=batch, K=256) -> plain XLA dot; gamma/beta are
    # fused into the last conv's epilogue (no separate elementwise kernel).
    gb = cond.astype(jnp.float32) @ params["inj_w"].T + params["inj_b"]
    gamma = _pad_axis(gb[:, :out_ch], 1, out_ch_p).reshape(N, 1, out_ch_p)
    beta = _pad_axis(gb[:, out_ch:], 1, out_ch_p).reshape(N, 1, out_ch_p)

    h = conv3x3_in_gelu(h, params["cf2_w"], params["cf2_b"],
                        cout_p=out_ch_p, out_dtype=jnp.float32,
                        gamma=gamma, beta=beta)

    # crop the lane padding, back to NCHW
    h = h[..., :out_ch]
    return jnp.transpose(h, (0, 3, 1, 2))


# -----------------------------------------------------------------------------
# Deterministic parameters + example run
# -----------------------------------------------------------------------------
def make_params(key, in_ch, out_ch):
    ks = jax.random.split(key, 12)
    mid = in_ch // 2
    n01 = lambda k, s: (0.1 * jax.random.normal(k, s)).astype(jnp.float32)
    return {
        # ConvTranspose2d(in_ch, in_ch//2, 2, stride=2): weight (Cin, Cout, 2, 2)
        "up_ct_w": n01(ks[0], (in_ch, mid, 2, 2)),
        "up_ct_b": n01(ks[1], (mid,)),
        # Conv2d(mid, mid, 3, padding=1, replicate)
        "up_c3_w": n01(ks[2], (mid, mid, 3, 3)),
        "up_c3_b": n01(ks[3], (mid,)),
        # fusion Conv2d(in_ch, in_ch, 1)
        "fusion_w": n01(ks[4], (in_ch, in_ch, 1, 1)),
        "fusion_b": n01(ks[5], (in_ch,)),
        # ConvFusionModule (assumed)
        "cf1_w": n01(ks[6], (out_ch, in_ch, 3, 3)),
        "cf1_b": n01(ks[7], (out_ch,)),
        "cf2_w": n01(ks[8], (out_ch, out_ch, 3, 3)),
        "cf2_b": n01(ks[9], (out_ch,)),
        # ConditionInjector: Linear(256, 2*out_ch) (assumed FiLM)
        "inj_w": n01(ks[10], (2 * out_ch, 256)),
        "inj_b": n01(ks[11], (2 * out_ch,)),
    }


if __name__ == "__main__":
    N, in_ch, out_ch, H, W = 2, 8, 4, 8, 8   # decoder output spatial = (16, 16)

    key = jax.random.PRNGKey(0)
    kp, kx, kf, kc = jax.random.split(key, 4)
    params = make_params(kp, in_ch, out_ch)

    x = jax.random.normal(kx, (N, in_ch, H, W), jnp.float32)               # NCHW
    feat = jax.random.normal(kf, (N, in_ch // 2, 2 * H, 2 * W), jnp.float32)
    cond = jax.random.normal(kc, (N, 256), jnp.float32)

    fwd = jax.jit(functools.partial(ginka_decoder_forward,
                                    in_ch=in_ch, out_ch=out_ch))
    out = jax.block_until_ready(fwd(params, x, feat, cond))

    assert out.shape == (N, out_ch, 2 * H, 2 * W), out.shape
    assert out.dtype == jnp.float32
    print("KERNEL_OK")
</pallas_src>

<mosaic_0001>
module attributes {stable_mosaic.version = 11 : i64} {
  func.func @_convt_in_gelu_kernel(%arg0: i32, %arg1: i32, %arg2: memref<1x64x128xbf16, #tpu.memory_space<vmem>>, %arg3: memref<2x1x128x256xbf16, #tpu.memory_space<vmem>>, %arg4: memref<1x256xf32, #tpu.memory_space<vmem>>, %arg5: memref<1x8x2x16x128xbf16, #tpu.memory_space<vmem>>) attributes {dimension_semantics = [#tpu.dimension_semantics<parallel>, #tpu.dimension_semantics<parallel>], iteration_bounds = array<i64: 2, 1>, scalar_prefetch = 0 : i64, scratch_operands = 0 : i64, tpu.core_type = #tpu.core_type<tc>, window_params = [{transform_indices = @transform_0, window_bounds = array<i64: 1, 64, 128>}, {transform_indices = @transform_1, window_bounds = array<i64: 2, 1, 128, 256>}, {transform_indices = @transform_2, window_bounds = array<i64: 1, 256>}, {transform_indices = @transform_3, window_bounds = array<i64: 1, 8, 2, 16, 128>}]} {
    %c0 = arith.constant 0 : index
    %c0_0 = arith.constant 0 : index
    %c0_1 = arith.constant 0 : index
    %0 = vector.load %arg2[%c0, %c0_0, %c0_1] : memref<1x64x128xbf16, #tpu.memory_space<vmem>>, vector<1x64x128xbf16>
    %1 = vector.shape_cast %0 : vector<1x64x128xbf16> to vector<64x128xbf16>
    %c0_2 = arith.constant 0 : index
    %c0_3 = arith.constant 0 : index
    %2 = vector.load %arg4[%c0_2, %c0_3] : memref<1x256xf32, #tpu.memory_space<vmem>>, vector<1x256xf32>
    %c0_4 = arith.constant 0 : index
    %c0_5 = arith.constant 0 : index
    %c0_6 = arith.constant 0 : index
    %c0_7 = arith.constant 0 : index
    %3 = vector.load %arg3[%c0_4, %c0_5, %c0_6, %c0_7] : memref<2x1x128x256xbf16, #tpu.memory_space<vmem>>, vector<1x1x128x256xbf16>
    %4 = vector.shape_cast %3 : vector<1x1x128x256xbf16> to vector<128x256xbf16>
    %cst = arith.constant dense<0.000000e+00> : vector<64x256xf32>
    %5 = tpu.matmul %1, %4, %cst {dimension_numbers = #tpu.dot_dimension_numbers<[1], [0], [0], [1], [0, 0, 1, 1], [], []>} : vector<64x128xbf16>, vector<128x256xbf16>, vector<64x256xf32> -> vector<64x256xf32>
    %6 = vector.broadcast %2 : vector<1x256xf32> to vector<64x256xf32>
    %7 = arith.addf %5, %6 : vector<64x256xf32>
    %c1 = arith.constant 1 : index
    %c0_8 = arith.constant 0 : index
    %c0_9 = arith.constant 0 : index
    %c0_10 = arith.constant 0 : index
    %8 = vector.load %arg3[%c1, %c0_8, %c0_9, %c0_10] : memref<2x1x128x256xbf16, #tpu.memory_space<vmem>>, vector<1x1x128x256xbf16>
    %9 = vector.shape_cast %8 : vector<1x1x128x256xbf16> to vector<128x256xbf16>
    %cst_11 = arith.constant dense<0.000000e+00> : vector<64x256xf32>
    %10 = tpu.matmul %1, %9, %cst_11 {dimension_numbers = #tpu.dot_dimension_numbers<[1], [0], [0], [1], [0, 0, 1, 1], [], []>} : vector<64x128xbf16>, vector<128x256xbf16>, vector<64x256xf32> -> vector<64x256xf32>
    %11 = vector.broadcast %2 : vector<1x256xf32> to vector<64x256xf32>
    %12 = arith.addf %10, %11 : vector<64x256xf32>
    %13 = arith.addf %7, %12 : vector<64x256xf32>
    %cst_12 = arith.constant dense<0.000000e+00> : vector<256xf32>
    %14 = vector.multi_reduction <add>, %13, %cst_12 [0] : vector<64x256xf32> to vector<256xf32>
    %15 = vector.shape_cast %14 : vector<256xf32> to vector<1x256xf32>
    %16 = vector.extract_strided_slice %15 {offsets = [0, 0], sizes = [1, 128], strides = [1, 1]} : vector<1x256xf32> to vector<1x128xf32>
    %17 = vector.extract_strided_slice %15 {offsets = [0, 128], sizes = [1, 128], strides = [1, 1]} : vector<1x256xf32> to vector<1x128xf32>
    %18 = arith.addf %16, %17 : vector<1x128xf32>
    %19 = tpu.concatenate %18, %18 in 1 : vector<1x128xf32>, vector<1x128xf32> -> vector<1x256xf32>
    %cst_13 = arith.constant 3.906250e-03 : f32
    %20 = vector.broadcast %cst_13 : f32 to vector<1x256xf32>
    %21 = arith.mulf %19, %20 : vector<1x256xf32>
    %22 = vector.broadcast %21 : vector<1x256xf32> to vector<64x256xf32>
    %23 = arith.subf %7, %22 : vector<64x256xf32>
    %24 = vector.broadcast %21 : vector<1x256xf32> to vector<64x256xf32>
    %25 = arith.subf %12, %24 : vector<64x256xf32>
    %26 = arith.mulf %23, %23 : vector<64x256xf32>
    %27 = arith.mulf %25, %25 : vector<64x256xf32>
    %28 = arith.addf %26, %27 : vector<64x256xf32>
    %cst_14 = arith.constant dense<0.000000e+00> : vector<256xf32>
    %29 = vector.multi_reduction <add>, %28, %cst_14 [0] : vector<64x256xf32> to vector<256xf32>
    %30 = vector.shape_cast %29 : vector<256xf32> to vector<1x256xf32>
    %31 = vector.extract_strided_slice %30 {offsets = [0, 0], sizes = [1, 128], strides = [1, 1]} : vector<1x256xf32> to vector<1x128xf32>
    %32 = vector.extract_strided_slice %30 {offsets = [0, 128], sizes = [1, 128], strides = [1, 1]} : vector<1x256xf32> to vector<1x128xf32>
    %33 = arith.addf %31, %32 : vector<1x128xf32>
    %cst_15 = arith.constant 3.906250e-03 : f32
    %34 = vector.broadcast %cst_15 : f32 to vector<1x128xf32>
    %35 = arith.mulf %33, %34 : vector<1x128xf32>
    %cst_16 = arith.constant 9.99999974E-6 : f32
    %36 = vector.broadcast %cst_16 : f32 to vector<1x128xf32>
    %37 = arith.addf %35, %36 : vector<1x128xf32>
    %38 = math.rsqrt %37 : vector<1x128xf32>
    %39 = tpu.concatenate %38, %38 in 1 : vector<1x128xf32>, vector<1x128xf32> -> vector<1x256xf32>
    %40 = vector.broadcast %39 : vector<1x256xf32> to vector<64x256xf32>
    %41 = arith.mulf %23, %40 : vector<64x256xf32>
    %cst_17 = arith.constant 5.000000e-01 : f32
    %42 = vector.broadcast %cst_17 : f32 to vector<64x256xf32>
    %43 = arith.mulf %42, %41 : vector<64x256xf32>
    %cst_18 = arith.constant 4.471500e-02 : f32
    %44 = vector.broadcast %cst_18 : f32 to vector<64x256xf32>
    %45 = arith.mulf %44, %41 : vector<64x256xf32>
    %46 = arith.mulf %45, %41 : vector<64x256xf32>
    %47 = arith.mulf %46, %41 : vector<64x256xf32>
    %48 = arith.addf %41, %47 : vector<64x256xf32>
    %cst_19 = arith.constant 0.797884583 : f32
    %49 = vector.broadcast %cst_19 : f32 to vector<64x256xf32>
    %50 = arith.mulf %49, %48 : vector<64x256xf32>
    %51 = math.tanh %50 : vector<64x256xf32>
    %cst_20 = arith.constant 1.000000e+00 : f32
    %52 = vector.broadcast %cst_20 : f32 to vector<64x256xf32>
    %53 = arith.addf %52, %51 : vector<64x256xf32>
    %54 = arith.mulf %43, %53 : vector<64x256xf32>
    %55 = vector.broadcast %39 : vector<1x256xf32> to vector<64x256xf32>
    %56 = arith.mulf %25, %55 : vector<64x256xf32>
    %cst_21 = arith.constant 5.000000e-01 : f32
    %57 = vector.broadcast %cst_21 : f32 to vector<64x256xf32>
    %58 = arith.mulf %57, %56 : vector<64x256xf32>
    %cst_22 = arith.constant 4.471500e-02 : f32
    %59 = vector.broadcast %cst_22 : f32 to vector<64x256xf32>
    %60 = arith.mulf %59, %56 : vector<64x256xf32>
    %61 = arith.mulf %60, %56 : vector<64x256xf32>
    %62 = arith.mulf %61, %56 : vector<64x256xf32>
    %63 = arith.addf %56, %62 : vector<64x256xf32>
    %cst_23 = arith.constant 0.797884583 : f32
    %64 = vector.broadcast %cst_23 : f32 to vector<64x256xf32>
    %65 = arith.mulf %64, %63 : vector<64x256xf32>
    %66 = math.tanh %65 : vector<64x256xf32>
    %cst_24 = arith.constant 1.000000e+00 : f32
    %67 = vector.broadcast %cst_24 : f32 to vector<64x256xf32>
    %68 = arith.addf %67, %66 : vector<64x256xf32>
    %69 = arith.mulf %58, %68 : vector<64x256xf32>
    %70 = vector.shape_cast %54 : vector<64x256xf32> to vector<8x16x128xf32>
    %71 = arith.truncf %70 : vector<8x16x128xf32> to vector<8x16x128xbf16>
    %c0_25 = arith.constant 0 : index
    %c0_26 = arith.constant 0 : index
    %c0_27 = arith.constant 0 : index
    %c0_28 = arith.constant 0 : index
    %c0_29 = arith.constant 0 : index
    %72 = vector.load %arg5[%c0_25, %c0_26, %c0_27, %c0_28, %c0_29] : memref<1x8x2x16x128xbf16, #tpu.memory_space<vmem>>, vector<1x8x1x16x128xbf16>
    %73 = vector.shape_cast %72 : vector<1x8x1x16x128xbf16> to vector<8x16x128xbf16>
    %74 = vector.shape_cast %71 : vector<8x16x128xbf16> to vector<1x8x1x16x128xbf16>
    tpu.vector_store %arg5[%c0_25, %c0_26, %c0_27, %c0_28, %c0_29], %74 {strides = array<i32>} : memref<1x8x2x16x128xbf16, #tpu.memory_space<vmem>>, vector<1x8x1x16x128xbf16>,
    %75 = vector.shape_cast %69 : vector<64x256xf32> to vector<8x16x128xf32>
    %76 = arith.truncf %75 : vector<8x16x128xf32> to vector<8x16x128xbf16>
    %c0_30 = arith.constant 0 : index
    %c0_31 = arith.constant 0 : index
    %c1_32 = arith.constant 1 : index
    %c0_33 = arith.constant 0 : index
    %c0_34 = arith.constant 0 : index
    %77 = vector.load %arg5[%c0_30, %c0_31, %c1_32, %c0_33, %c0_34] : memref<1x8x2x16x128xbf16, #tpu.memory_space<vmem>>, vector<1x8x1x16x128xbf16>
    %78 = vector.shape_cast %77 : vector<1x8x1x16x128xbf16> to vector<8x16x128xbf16>
    %79 = vector.shape_cast %76 : vector<8x16x128xbf16> to vector<1x8x1x16x128xbf16>
    tpu.vector_store %arg5[%c0_30, %c0_31, %c1_32, %c0_33, %c0_34], %79 {strides = array<i32>} : memref<1x8x2x16x128xbf16, #tpu.memory_space<vmem>>, vector<1x8x1x16x128xbf16>,
    return
  }
  func.func @transform_0(%arg0: i32, %arg1: i32) -> (i32, i32, i32) {
    %c0_i32 = arith.constant 0 : i32
    %c0_i32_0 = arith.constant 0 : i32
    %c0_i32_1 = arith.constant 0 : i32
    return %arg0, %c0_i32, %c0_i32_0 : i32, i32, i32
  }
  func.func @transform_1(%arg0: i32, %arg1: i32) -> (i32, i32, i32, i32) {
    %c0_i32 = arith.constant 0 : i32
    %c0_i32_0 = arith.constant 0 : i32
    %c0_i32_1 = arith.constant 0 : i32
    %c0_i32_2 = arith.constant 0 : i32
    return %c0_i32, %arg1, %c0_i32_0, %c0_i32_1 : i32, i32, i32, i32
  }
  func.func @transform_2(%arg0: i32, %arg1: i32) -> (i32, i32) {
    %c0_i32 = arith.constant 0 : i32
    %c0_i32_0 = arith.constant 0 : i32
    return %c0_i32, %arg1 : i32, i32
  }
  func.func @transform_3(%arg0: i32, %arg1: i32) -> (i32, i32, i32, i32, i32) {
    %c0_i32 = arith.constant 0 : i32
    %c0_i32_0 = arith.constant 0 : i32
    %c0_i32_1 = arith.constant 0 : i32
    %c0_i32_2 = arith.constant 0 : i32
    return %arg0, %c0_i32, %c0_i32_0, %c0_i32_1, %arg1 : i32, i32, i32, i32, i32
  }
}

module attributes {stable_mosaic.version = 11 : i64} {
  func.func @_conv3x3_kernel(%arg0: i32, %arg1: i32, %arg2: i32, %arg3: memref<1x16x16x128xbf16, #tpu.memory_space<vmem>>, %arg4: memref<3x1x384x128xbf16, #tpu.memory_space<vmem>>, %arg5: memref<1x128xf32, #tpu.memory_space<vmem>>, %arg6: memref<1x256x128xbf16, #tpu.memory_space<vmem>>, %arg7: memref<256x128xf32, #tpu.memory_space<vmem>>) attributes {dimension_semantics = [#tpu.dimension_semantics<parallel>, #tpu.dimension_semantics<parallel>, #tpu.dimension_semantics<arbitrary>], iteration_bounds = array<i64: 2, 1, 1>, scalar_prefetch = 0 : i64, scratch_operands = 1 : i64, tpu.core_type = #tpu.core_type<tc>, window_params = [{transform_indices = @transform_0, window_bounds = array<i64: 1, 16, 16, 128>}, {transform_indices = @transform_1, window_bounds = array<i64: 3, 1, 384, 128>}, {transform_indices = @transform_2, window_bounds = array<i64: 1, 128>}, {transform_indices = @transform_3, window_bounds = array<i64: 1, 256, 128>}]} {
    %c0_i32 = arith.constant 0 : i32
    %0 = arith.cmpi eq, %arg2, %c0_i32 : i32
    %1 = arith.extui %0 : i1 to i32
    %c0_i32_0 = arith.constant 0 : i32
    %2 = arith.cmpi ne, %1, %c0_i32_0 : i32
    scf.if %2 {
      %cst_22 = arith.constant 0.000000e+00 : f32
      %52 = vector.broadcast %cst_22 : f32 to vector<256x128xf32>
      %c0_23 = arith.constant 0 : index
      %c0_24 = arith.constant 0 : index
      %53 = vector.load %arg7[%c0_23, %c0_24] : memref<256x128xf32, #tpu.memory_space<vmem>>, vector<256x128xf32>
      tpu.vector_store %arg7[%c0_23, %c0_24], %52 {strides = array<i32>} : memref<256x128xf32, #tpu.memory_space<vmem>>, vector<256x128xf32>,
    } else {
    }
    %c0 = arith.constant 0 : index
    %c0_1 = arith.constant 0 : index
    %c0_2 = arith.constant 0 : index
    %c0_3 = arith.constant 0 : index
    %3 = vector.load %arg3[%c0, %c0_1, %c0_2, %c0_3] : memref<1x16x16x128xbf16, #tpu.memory_space<vmem>>, vector<1x16x16x128xbf16>
    %4 = vector.shape_cast %3 : vector<1x16x16x128xbf16> to vector<16x16x128xbf16>
    %c0_4 = arith.constant 0 : index
    %c0_5 = arith.constant 0 : index
    %5 = vector.load %arg7[%c0_4, %c0_5] : memref<256x128xf32, #tpu.memory_space<vmem>>, vector<256x128xf32>
    %6 = vector.extract_strided_slice %4 {offsets = [0, 0, 0], sizes = [1, 16, 128], strides = [1, 1, 1]} : vector<16x16x128xbf16> to vector<1x16x128xbf16>
    %7 = vector.extract_strided_slice %4 {offsets = [0, 0, 0], sizes = [15, 16, 128], strides = [1, 1, 1]} : vector<16x16x128xbf16> to vector<15x16x128xbf16>
    %8 = tpu.concatenate %6, %7 in 0 : vector<1x16x128xbf16>, vector<15x16x128xbf16> -> vector<16x16x128xbf16>
    %9 = vector.extract_strided_slice %8 {offsets = [0, 0, 0], sizes = [16, 1, 128], strides = [1, 1, 1]} : vector<16x16x128xbf16> to vector<16x1x128xbf16>
    %10 = vector.extract_strided_slice %8 {offsets = [0, 0, 0], sizes = [16, 15, 128], strides = [1, 1, 1]} : vector<16x16x128xbf16> to vector<16x15x128xbf16>
    %11 = tpu.concatenate %9, %10 in 1 : vector<16x1x128xbf16>, vector<16x15x128xbf16> -> vector<16x16x128xbf16>
    %12 = vector.extract_strided_slice %8 {offsets = [0, 1, 0], sizes = [16, 15, 128], strides = [1, 1, 1]} : vector<16x16x128xbf16> to vector<16x15x128xbf16>
    %13 = vector.extract_strided_slice %8 {offsets = [0, 15, 0], sizes = [16, 1, 128], strides = [1, 1, 1]} : vector<16x16x128xbf16> to vector<16x1x128xbf16>
    %14 = tpu.concatenate %12, %13 in 1 : vector<16x15x128xbf16>, vector<16x1x128xbf16> -> vector<16x16x128xbf16>
    %15 = tpu.concatenate %11, %8, %14 in 2 : vector<16x16x128xbf16>, vector<16x16x128xbf16>, vector<16x16x128xbf16> -> vector<16x16x384xbf16>
    %16 = vector.shape_cast %15 : vector<16x16x384xbf16> to vector<256x384xbf16>
    %c0_6 = arith.constant 0 : index
    %c0_7 = arith.constant 0 : index
    %c0_8 = arith.constant 0 : index
    %c0_9 = arith.constant 0 : index
    %17 = vector.load %arg4[%c0_6, %c0_7, %c0_8, %c0_9] : memref<3x1x384x128xbf16, #tpu.memory_space<vmem>>, vector<1x1x384x128xbf16>
    %18 = vector.shape_cast %17 : vector<1x1x384x128xbf16> to vector<384x128xbf16>
    %cst = arith.constant dense<0.000000e+00> : vector<256x128xf32>
    %19 = tpu.matmul %16, %18, %cst {dimension_numbers = #tpu.dot_dimension_numbers<[1], [0], [0], [1], [0, 0, 1, 1], [], []>} : vector<256x384xbf16>, vector<384x128xbf16>, vector<256x128xf32> -> vector<256x128xf32>
    %20 = arith.addf %5, %19 : vector<256x128xf32>
    %21 = vector.extract_strided_slice %4 {offsets = [0, 0, 0], sizes = [16, 1, 128], strides = [1, 1, 1]} : vector<16x16x128xbf16> to vector<16x1x128xbf16>
    %22 = vector.extract_strided_slice %4 {offsets = [0, 0, 0], sizes = [16, 15, 128], strides = [1, 1, 1]} : vector<16x16x128xbf16> to vector<16x15x128xbf16>
    %23 = tpu.concatenate %21, %22 in 1 : vector<16x1x128xbf16>, vector<16x15x128xbf16> -> vector<16x16x128xbf16>
    %24 = vector.extract_strided_slice %4 {offsets = [0, 1, 0], sizes = [16, 15, 128], strides = [1, 1, 1]} : vector<16x16x128xbf16> to vector<16x15x128xbf16>
    %25 = vector.extract_strided_slice %4 {offsets = [0, 15, 0], sizes = [16, 1, 128], strides = [1, 1, 1]} : vector<16x16x128xbf16> to vector<16x1x128xbf16>
    %26 = tpu.concatenate %24, %25 in 1 : vector<16x15x128xbf16>, vector<16x1x128xbf16> -> vector<16x16x128xbf16>
    %27 = tpu.concatenate %23, %4, %26 in 2 : vector<16x16x128xbf16>, vector<16x16x128xbf16>, vector<16x16x128xbf16> -> vector<16x16x384xbf16>
    %28 = vector.shape_cast %27 : vector<16x16x384xbf16> to vector<256x384xbf16>
    %c1 = arith.constant 1 : index
    %c0_10 = arith.constant 0 : index
    %c0_11 = arith.constant 0 : index
    %c0_12 = arith.constant 0 : index
    %29 = vector.load %arg4[%c1, %c0_10, %c0_11, %c0_12] : memref<3x1x384x128xbf16, #tpu.memory_space<vmem>>, vector<1x1x384x128xbf16>
    %30 = vector.shape_cast %29 : vector<1x1x384x128xbf16> to vector<384x128xbf16>
    %cst_13 = arith.constant dense<0.000000e+00> : vector<256x128xf32>
    %31 = tpu.matmul %28, %30, %cst_13 {dimension_numbers = #tpu.dot_dimension_numbers<[1], [0], [0], [1], [0, 0, 1, 1], [], []>} : vector<256x384xbf16>, vector<384x128xbf16>, vector<256x128xf32> -> vector<256x128xf32>
    %32 = arith.addf %20, %31 : vector<256x128xf32>
    %33 = vector.extract_strided_slice %4 {offsets = [1, 0, 0], sizes = [15, 16, 128], strides = [1, 1, 1]} : vector<16x16x128xbf16> to vector<15x16x128xbf16>
    %34 = vector.extract_strided_slice %4 {offsets = [15, 0, 0], sizes = [1, 16, 128], strides = [1, 1, 1]} : vector<16x16x128xbf16> to vector<1x16x128xbf16>
    %35 = tpu.concatenate %33, %34 in 0 : vector<15x16x128xbf16>, vector<1x16x128xbf16> -> vector<16x16x128xbf16>
    %36 = vector.extract_strided_slice %35 {offsets = [0, 0, 0], sizes = [16, 1, 128], strides = [1, 1, 1]} : vector<16x16x128xbf16> to vector<16x1x128xbf16>
    %37 = vector.extract_strided_slice %35 {offsets = [0, 0, 0], sizes = [16, 15, 128], strides = [1, 1, 1]} : vector<16x16x128xbf16> to vector<16x15x128xbf16>
    %38 = tpu.concatenate %36, %37 in 1 : vector<16x1x128xbf16>, vector<16x15x128xbf16> -> vector<16x16x128xbf16>
    %39 = vector.extract_strided_slice %35 {offsets = [0, 1, 0], sizes = [16, 15, 128], strides = [1, 1, 1]} : vector<16x16x128xbf16> to vector<16x15x128xbf16>
    %40 = vector.extract_strided_slice %35 {offsets = [0, 15, 0], sizes = [16, 1, 128], strides = [1, 1, 1]} : vector<16x16x128xbf16> to vector<16x1x128xbf16>
    %41 = tpu.concatenate %39, %40 in 1 : vector<16x15x128xbf16>, vector<16x1x128xbf16> -> vector<16x16x128xbf16>
    %42 = tpu.concatenate %38, %35, %41 in 2 : vector<16x16x128xbf16>, vector<16x16x128xbf16>, vector<16x16x128xbf16> -> vector<16x16x384xbf16>
    %43 = vector.shape_cast %42 : vector<16x16x384xbf16> to vector<256x384xbf16>
    %c2 = arith.constant 2 : index
    %c0_14 = arith.constant 0 : index
    %c0_15 = arith.constant 0 : index
    %c0_16 = arith.constant 0 : index
    %44 = vector.load %arg4[%c2, %c0_14, %c0_15, %c0_16] : memref<3x1x384x128xbf16, #tpu.memory_space<vmem>>, vector<1x1x384x128xbf16>
    %45 = vector.shape_cast %44 : vector<1x1x384x128xbf16> to vector<384x128xbf16>
    %cst_17 = arith.constant dense<0.000000e+00> : vector<256x128xf32>
    %46 = tpu.matmul %43, %45, %cst_17 {dimension_numbers = #tpu.dot_dimension_numbers<[1], [0], [0], [1], [0, 0, 1, 1], [], []>} : vector<256x384xbf16>, vector<384x128xbf16>, vector<256x128xf32> -> vector<256x128xf32>
    %47 = arith.addf %32, %46 : vector<256x128xf32>
    %c0_18 = arith.constant 0 : index
    %c0_19 = arith.constant 0 : index
    %48 = vector.load %arg7[%c0_18, %c0_19] : memref<256x128xf32, #tpu.memory_space<vmem>>, vector<256x128xf32>
    tpu.vector_store %arg7[%c0_18, %c0_19], %47 {strides = array<i32>} : memref<256x128xf32, #tpu.memory_space<vmem>>, vector<256x128xf32>,
    %c0_i32_20 = arith.constant 0 : i32
    %49 = arith.cmpi eq, %arg2, %c0_i32_20 : i32
    %50 = arith.extui %49 : i1 to i32
    %c0_i32_21 = arith.constant 0 : i32
    %51 = arith.cmpi ne, %50, %c0_i32_21 : i32
    scf.if %51 {
      %c0_22 = arith.constant 0 : index
      %c0_23 = arith.constant 0 : index
      %52 = vector.load %arg5[%c0_22, %c0_23] : memref<1x128xf32, #tpu.memory_space<vmem>>, vector<1x128xf32>
      %53 = vector.broadcast %52 : vector<1x128xf32> to vector<256x128xf32>
      %54 = arith.addf %47, %53 : vector<256x128xf32>
      %cst_24 = arith.constant dense<0.000000e+00> : vector<128xf32>
      %55 = vector.multi_reduction <add>, %54, %cst_24 [0] : vector<256x128xf32> to vector<128xf32>
      %56 = vector.shape_cast %55 : vector<128xf32> to vector<1x128xf32>
      %cst_25 = arith.constant 3.906250e-03 : f32
      %57 = vector.broadcast %cst_25 : f32 to vector<1x128xf32>
      %58 = arith.mulf %56, %57 : vector<1x128xf32>
      %59 = vector.broadcast %58 : vector<1x128xf32> to vector<256x128xf32>
      %60 = arith.subf %54, %59 : vector<256x128xf32>
      %61 = arith.mulf %60, %60 : vector<256x128xf32>
      %cst_26 = arith.constant dense<0.000000e+00> : vector<128xf32>
      %62 = vector.multi_reduction <add>, %61, %cst_26 [0] : vector<256x128xf32> to vector<128xf32>
      %63 = vector.shape_cast %62 : vector<128xf32> to vector<1x128xf32>
      %cst_27 = arith.constant 3.906250e-03 : f32
      %64 = vector.broadcast %cst_27 : f32 to vector<1x128xf32>
      %65 = arith.mulf %63, %64 : vector<1x128xf32>
      %cst_28 = arith.constant 9.99999974E-6 : f32
      %66 = vector.broadcast %cst_28 : f32 to vector<1x128xf32>
      %67 = arith.addf %65, %66 : vector<1x128xf32>
      %68 = math.rsqrt %67 : vector<1x128xf32>
      %69 = vector.broadcast %68 : vector<1x128xf32> to vector<256x128xf32>
      %70 = arith.mulf %60, %69 : vector<256x128xf32>
      %cst_29 = arith.constant 5.000000e-01 : f32
      %71 = vector.broadcast %cst_29 : f32 to vector<256x128xf32>
      %72 = arith.mulf %71, %70 : vector<256x128xf32>
      %cst_30 = arith.constant 4.471500e-02 : f32
      %73 = vector.broadcast %cst_30 : f32 to vector<256x128xf32>
      %74 = arith.mulf %73, %70 : vector<256x128xf32>
      %75 = arith.mulf %74, %70 : vector<256x128xf32>
      %76 = arith.mulf %75, %70 : vector<256x128xf32>
      %77 = arith.addf %70, %76 : vector<256x128xf32>
      %cst_31 = arith.constant 0.797884583 : f32
      %78 = vector.broadcast %cst_31 : f32 to vector<256x128xf32>
      %79 = arith.mulf %78, %77 : vector<256x128xf32>
      %80 = math.tanh %79 : vector<256x128xf32>
      %cst_32 = arith.constant 1.000000e+00 : f32
      %81 = vector.broadcast %cst_32 : f32 to vector<256x128xf32>
      %82 = arith.addf %81, %80 : vector<256x128xf32>
      %83 = arith.mulf %72, %82 : vector<256x128xf32>
      %84 = arith.truncf %83 : vector<256x128xf32> to vector<256x128xbf16>
      %c0_33 = arith.constant 0 : index
      %c0_34 = arith.constant 0 : index
      %c0_35 = arith.constant 0 : index
      %85 = vector.load %arg6[%c0_33, %c0_34, %c0_35] : memref<1x256x128xbf16, #tpu.memory_space<vmem>>, vector<1x256x128xbf16>
      %86 = vector.shape_cast %85 : vector<1x256x128xbf16> to vector<256x128xbf16>
      %87 = vector.shape_cast %84 : vector<256x128xbf16> to vector<1x256x128xbf16>
      tpu.vector_store %arg6[%c0_33, %c0_34, %c0_35], %87 {strides = array<i32>} : memref<1x256x128xbf16, #tpu.memory_space<vmem>>, vector<1x256x128xbf16>,
    } else {
    }
    return
  }
  func.func @transform_0(%arg0: i32, %arg1: i32, %arg2: i32) -> (i32, i32, i32, i32) {
    %c0_i32 = arith.constant 0 : i32
    %c0_i32_0 = arith.constant 0 : i32
    %c0_i32_1 = arith.constant 0 : i32
    return %arg0, %c0_i32, %c0_i32_0, %arg2 : i32, i32, i32, i32
  }
  func.func @transform_1(%arg0: i32, %arg1: i32, %arg2: i32) -> (i32, i32, i32, i32) {
    %c0_i32 = arith.constant 0 : i32
    %c0_i32_0 = arith.constant 0 : i32
    %c0_i32_1 = arith.constant 0 : i32
    return %c0_i32, %arg2, %c0_i32_0, %arg1 : i32, i32, i32, i32
  }
  func.func @transform_2(%arg0: i32, %arg1: i32, %arg2: i32) -> (i32, i32) {
    %c0_i32 = arith.constant 0 : i32
    %c0_i32_0 = arith.constant 0 : i32
    return %c0_i32, %arg1 : i32, i32
  }
  func.func @transform_3(%arg0: i32, %arg1: i32, %arg2: i32) -> (i32, i32, i32) {
    %c0_i32 = arith.constant 0 : i32
    %c0_i32_0 = arith.constant 0 : i32
    return %arg0, %c0_i32, %arg1 : i32, i32, i32
  }
}

module attributes {stable_mosaic.version = 11 : i64} {
  func.func @_dual_matmul_bias_kernel(%arg0: i32, %arg1: i32, %arg2: memref<512x128xbf16, #tpu.memory_space<vmem>>, %arg3: memref<512x128xbf16, #tpu.memory_space<vmem>>, %arg4: memref<128x128xbf16, #tpu.memory_space<vmem>>, %arg5: memref<128x128xbf16, #tpu.memory_space<vmem>>, %arg6: memref<1x128xf32, #tpu.memory_space<vmem>>, %arg7: memref<512x128xbf16, #tpu.memory_space<vmem>>) attributes {dimension_semantics = [#tpu.dimension_semantics<parallel>, #tpu.dimension_semantics<parallel>], iteration_bounds = array<i64: 1, 1>, scalar_prefetch = 0 : i64, scratch_operands = 0 : i64, tpu.core_type = #tpu.core_type<tc>, window_params = [{transform_indices = @transform_0, window_bounds = array<i64: 512, 128>}, {transform_indices = @transform_1, window_bounds = array<i64: 512, 128>}, {transform_indices = @transform_2, window_bounds = array<i64: 128, 128>}, {transform_indices = @transform_3, window_bounds = array<i64: 128, 128>}, {transform_indices = @transform_4, window_bounds = array<i64: 1, 128>}, {transform_indices = @transform_5, window_bounds = array<i64: 512, 128>}]} {
    %c0 = arith.constant 0 : index
    %c0_0 = arith.constant 0 : index
    %0 = vector.load %arg2[%c0, %c0_0] : memref<512x128xbf16, #tpu.memory_space<vmem>>, vector<512x128xbf16>
    %c0_1 = arith.constant 0 : index
    %c0_2 = arith.constant 0 : index
    %1 = vector.load %arg4[%c0_1, %c0_2] : memref<128x128xbf16, #tpu.memory_space<vmem>>, vector<128x128xbf16>
    %cst = arith.constant dense<0.000000e+00> : vector<512x128xf32>
    %2 = tpu.matmul %0, %1, %cst {dimension_numbers = #tpu.dot_dimension_numbers<[1], [0], [0], [1], [0, 0, 1, 1], [], []>} : vector<512x128xbf16>, vector<128x128xbf16>, vector<512x128xf32> -> vector<512x128xf32>
    %c0_3 = arith.constant 0 : index
    %c0_4 = arith.constant 0 : index
    %3 = vector.load %arg3[%c0_3, %c0_4] : memref<512x128xbf16, #tpu.memory_space<vmem>>, vector<512x128xbf16>
    %c0_5 = arith.constant 0 : index
    %c0_6 = arith.constant 0 : index
    %4 = vector.load %arg5[%c0_5, %c0_6] : memref<128x128xbf16, #tpu.memory_space<vmem>>, vector<128x128xbf16>
    %cst_7 = arith.constant dense<0.000000e+00> : vector<512x128xf32>
    %5 = tpu.matmul %3, %4, %cst_7 {dimension_numbers = #tpu.dot_dimension_numbers<[1], [0], [0], [1], [0, 0, 1, 1], [], []>} : vector<512x128xbf16>, vector<128x128xbf16>, vector<512x128xf32> -> vector<512x128xf32>
    %6 = arith.addf %2, %5 : vector<512x128xf32>
    %c0_8 = arith.constant 0 : index
    %c0_9 = arith.constant 0 : index
    %7 = vector.load %arg6[%c0_8, %c0_9] : memref<1x128xf32, #tpu.memory_space<vmem>>, vector<1x128xf32>
    %8 = vector.broadcast %7 : vector<1x128xf32> to vector<512x128xf32>
    %9 = arith.addf %6, %8 : vector<512x128xf32>
    %10 = arith.truncf %9 : vector<512x128xf32> to vector<512x128xbf16>
    %c0_10 = arith.constant 0 : index
    %c0_11 = arith.constant 0 : index
    %11 = vector.load %arg7[%c0_10, %c0_11] : memref<512x128xbf16, #tpu.memory_space<vmem>>, vector<512x128xbf16>
    tpu.vector_store %arg7[%c0_10, %c0_11], %10 {strides = array<i32>} : memref<512x128xbf16, #tpu.memory_space<vmem>>, vector<512x128xbf16>,
    return
  }
  func.func @transform_0(%arg0: i32, %arg1: i32) -> (i32, i32) {
    %c0_i32 = arith.constant 0 : i32
    %c0_i32_0 = arith.constant 0 : i32
    return %arg0, %c0_i32 : i32, i32
  }
  func.func @transform_1(%arg0: i32, %arg1: i32) -> (i32, i32) {
    %c0_i32 = arith.constant 0 : i32
    %c0_i32_0 = arith.constant 0 : i32
    return %arg0, %c0_i32 : i32, i32
  }
  func.func @transform_2(%arg0: i32, %arg1: i32) -> (i32, i32) {
    %c0_i32 = arith.constant 0 : i32
    %c0_i32_0 = arith.constant 0 : i32
    return %c0_i32, %arg1 : i32, i32
  }
  func.func @transform_3(%arg0: i32, %arg1: i32) -> (i32, i32) {
    %c0_i32 = arith.constant 0 : i32
    %c0_i32_0 = arith.constant 0 : i32
    return %c0_i32, %arg1 : i32, i32
  }
  func.func @transform_4(%arg0: i32, %arg1: i32) -> (i32, i32) {
    %c0_i32 = arith.constant 0 : i32
    %c0_i32_0 = arith.constant 0 : i32
    return %c0_i32, %arg1 : i32, i32
  }
  func.func @transform_5(%arg0: i32, %arg1: i32) -> (i32, i32) {
    %c0_i32 = arith.constant 0 : i32
    return %arg0, %arg1 : i32, i32
  }
}

module attributes {stable_mosaic.version = 11 : i64} {
  func.func @_conv3x3_kernel(%arg0: i32, %arg1: i32, %arg2: i32, %arg3: memref<1x16x16x128xbf16, #tpu.memory_space<vmem>>, %arg4: memref<3x1x384x128xbf16, #tpu.memory_space<vmem>>, %arg5: memref<1x128xf32, #tpu.memory_space<vmem>>, %arg6: memref<1x1x128xf32, #tpu.memory_space<vmem>>, %arg7: memref<1x1x128xf32, #tpu.memory_space<vmem>>, %arg8: memref<1x256x128xf32, #tpu.memory_space<vmem>>, %arg9: memref<256x128xf32, #tpu.memory_space<vmem>>) attributes {dimension_semantics = [#tpu.dimension_semantics<parallel>, #tpu.dimension_semantics<parallel>, #tpu.dimension_semantics<arbitrary>], iteration_bounds = array<i64: 2, 1, 1>, scalar_prefetch = 0 : i64, scratch_operands = 1 : i64, tpu.core_type = #tpu.core_type<tc>, window_params = [{transform_indices = @transform_0, window_bounds = array<i64: 1, 16, 16, 128>}, {transform_indices = @transform_1, window_bounds = array<i64: 3, 1, 384, 128>}, {transform_indices = @transform_2, window_bounds = array<i64: 1, 128>}, {transform_indices = @transform_3, window_bounds = array<i64: 1, 1, 128>}, {transform_indices = @transform_4, window_bounds = array<i64: 1, 1, 128>}, {transform_indices = @transform_5, window_bounds = array<i64: 1, 256, 128>}]} {
    %c0_i32 = arith.constant 0 : i32
    %0 = arith.cmpi eq, %arg2, %c0_i32 : i32
    %1 = arith.extui %0 : i1 to i32
    %c0_i32_0 = arith.constant 0 : i32
    %2 = arith.cmpi ne, %1, %c0_i32_0 : i32
    scf.if %2 {
      %cst_22 = arith.constant 0.000000e+00 : f32
      %52 = vector.broadcast %cst_22 : f32 to vector<256x128xf32>
      %c0_23 = arith.constant 0 : index
      %c0_24 = arith.constant 0 : index
      %53 = vector.load %arg9[%c0_23, %c0_24] : memref<256x128xf32, #tpu.memory_space<vmem>>, vector<256x128xf32>
      tpu.vector_store %arg9[%c0_23, %c0_24], %52 {strides = array<i32>} : memref<256x128xf32, #tpu.memory_space<vmem>>, vector<256x128xf32>,
    } else {
    }
    %c0 = arith.constant 0 : index
    %c0_1 = arith.constant 0 : index
    %c0_2 = arith.constant 0 : index
    %c0_3 = arith.constant 0 : index
    %3 = vector.load %arg3[%c0, %c0_1, %c0_2, %c0_3] : memref<1x16x16x128xbf16, #tpu.memory_space<vmem>>, vector<1x16x16x128xbf16>
    %4 = vector.shape_cast %3 : vector<1x16x16x128xbf16> to vector<16x16x128xbf16>
    %c0_4 = arith.constant 0 : index
    %c0_5 = arith.constant 0 : index
    %5 = vector.load %arg9[%c0_4, %c0_5] : memref<256x128xf32, #tpu.memory_space<vmem>>, vector<256x128xf32>
    %6 = vector.extract_strided_slice %4 {offsets = [0, 0, 0], sizes = [1, 16, 128], strides = [1, 1, 1]} : vector<16x16x128xbf16> to vector<1x16x128xbf16>
    %7 = vector.extract_strided_slice %4 {offsets = [0, 0, 0], sizes = [15, 16, 128], strides = [1, 1, 1]} : vector<16x16x128xbf16> to vector<15x16x128xbf16>
    %8 = tpu.concatenate %6, %7 in 0 : vector<1x16x128xbf16>, vector<15x16x128xbf16> -> vector<16x16x128xbf16>
    %9 = vector.extract_strided_slice %8 {offsets = [0, 0, 0], sizes = [16, 1, 128], strides = [1, 1, 1]} : vector<16x16x128xbf16> to vector<16x1x128xbf16>
    %10 = vector.extract_strided_slice %8 {offsets = [0, 0, 0], sizes = [16, 15, 128], strides = [1, 1, 1]} : vector<16x16x128xbf16> to vector<16x15x128xbf16>
    %11 = tpu.concatenate %9, %10 in 1 : vector<16x1x128xbf16>, vector<16x15x128xbf16> -> vector<16x16x128xbf16>
    %12 = vector.extract_strided_slice %8 {offsets = [0, 1, 0], sizes = [16, 15, 128], strides = [1, 1, 1]} : vector<16x16x128xbf16> to vector<16x15x128xbf16>
    %13 = vector.extract_strided_slice %8 {offsets = [0, 15, 0], sizes = [16, 1, 128], strides = [1, 1, 1]} : vector<16x16x128xbf16> to vector<16x1x128xbf16>
    %14 = tpu.concatenate %12, %13 in 1 : vector<16x15x128xbf16>, vector<16x1x128xbf16> -> vector<16x16x128xbf16>
    %15 = tpu.concatenate %11, %8, %14 in 2 : vector<16x16x128xbf16>, vector<16x16x128xbf16>, vector<16x16x128xbf16> -> vector<16x16x384xbf16>
    %16 = vector.shape_cast %15 : vector<16x16x384xbf16> to vector<256x384xbf16>
    %c0_6 = arith.constant 0 : index
    %c0_7 = arith.constant 0 : index
    %c0_8 = arith.constant 0 : index
    %c0_9 = arith.constant 0 : index
    %17 = vector.load %arg4[%c0_6, %c0_7, %c0_8, %c0_9] : memref<3x1x384x128xbf16, #tpu.memory_space<vmem>>, vector<1x1x384x128xbf16>
    %18 = vector.shape_cast %17 : vector<1x1x384x128xbf16> to vector<384x128xbf16>
    %cst = arith.constant dense<0.000000e+00> : vector<256x128xf32>
    %19 = tpu.matmul %16, %18, %cst {dimension_numbers = #tpu.dot_dimension_numbers<[1], [0], [0], [1], [0, 0, 1, 1], [], []>} : vector<256x384xbf16>, vector<384x128xbf16>, vector<256x128xf32> -> vector<256x128xf32>
    %20 = arith.addf %5, %19 : vector<256x128xf32>
    %21 = vector.extract_strided_slice %4 {offsets = [0, 0, 0], sizes = [16, 1, 128], strides = [1, 1, 1]} : vector<16x16x128xbf16> to vector<16x1x128xbf16>
    %22 = vector.extract_strided_slice %4 {offsets = [0, 0, 0], sizes = [16, 15, 128], strides = [1, 1, 1]} : vector<16x16x128xbf16> to vector<16x15x128xbf16>
    %23 = tpu.concatenate %21, %22 in 1 : vector<16x1x128xbf16>, vector<16x15x128xbf16> -> vector<16x16x128xbf16>
    %24 = vector.extract_strided_slice %4 {offsets = [0, 1, 0], sizes = [16, 15, 128], strides = [1, 1, 1]} : vector<16x16x128xbf16> to vector<16x15x128xbf16>
    %25 = vector.extract_strided_slice %4 {offsets = [0, 15, 0], sizes = [16, 1, 128], strides = [1, 1, 1]} : vector<16x16x128xbf16> to vector<16x1x128xbf16>
    %26 = tpu.concatenate %24, %25 in 1 : vector<16x15x128xbf16>, vector<16x1x128xbf16> -> vector<16x16x128xbf16>
    %27 = tpu.concatenate %23, %4, %26 in 2 : vector<16x16x128xbf16>, vector<16x16x128xbf16>, vector<16x16x128xbf16> -> vector<16x16x384xbf16>
    %28 = vector.shape_cast %27 : vector<16x16x384xbf16> to vector<256x384xbf16>
    %c1 = arith.constant 1 : index
    %c0_10 = arith.constant 0 : index
    %c0_11 = arith.constant 0 : index
    %c0_12 = arith.constant 0 : index
    %29 = vector.load %arg4[%c1, %c0_10, %c0_11, %c0_12] : memref<3x1x384x128xbf16, #tpu.memory_space<vmem>>, vector<1x1x384x128xbf16>
    %30 = vector.shape_cast %29 : vector<1x1x384x128xbf16> to vector<384x128xbf16>
    %cst_13 = arith.constant dense<0.000000e+00> : vector<256x128xf32>
    %31 = tpu.matmul %28, %30, %cst_13 {dimension_numbers = #tpu.dot_dimension_numbers<[1], [0], [0], [1], [0, 0, 1, 1], [], []>} : vector<256x384xbf16>, vector<384x128xbf16>, vector<256x128xf32> -> vector<256x128xf32>
    %32 = arith.addf %20, %31 : vector<256x128xf32>
    %33 = vector.extract_strided_slice %4 {offsets = [1, 0, 0], sizes = [15, 16, 128], strides = [1, 1, 1]} : vector<16x16x128xbf16> to vector<15x16x128xbf16>
    %34 = vector.extract_strided_slice %4 {offsets = [15, 0, 0], sizes = [1, 16, 128], strides = [1, 1, 1]} : vector<16x16x128xbf16> to vector<1x16x128xbf16>
    %35 = tpu.concatenate %33, %34 in 0 : vector<15x16x128xbf16>, vector<1x16x128xbf16> -> vector<16x16x128xbf16>
    %36 = vector.extract_strided_slice %35 {offsets = [0, 0, 0], sizes = [16, 1, 128], strides = [1, 1, 1]} : vector<16x16x128xbf16> to vector<16x1x128xbf16>
    %37 = vector.extract_strided_slice %35 {offsets = [0, 0, 0], sizes = [16, 15, 128], strides = [1, 1, 1]} : vector<16x16x128xbf16> to vector<16x15x128xbf16>
    %38 = tpu.concatenate %36, %37 in 1 : vector<16x1x128xbf16>, vector<16x15x128xbf16> -> vector<16x16x128xbf16>
    %39 = vector.extract_strided_slice %35 {offsets = [0, 1, 0], sizes = [16, 15, 128], strides = [1, 1, 1]} : vector<16x16x128xbf16> to vector<16x15x128xbf16>
    %40 = vector.extract_strided_slice %35 {offsets = [0, 15, 0], sizes = [16, 1, 128], strides = [1, 1, 1]} : vector<16x16x128xbf16> to vector<16x1x128xbf16>
    %41 = tpu.concatenate %39, %40 in 1 : vector<16x15x128xbf16>, vector<16x1x128xbf16> -> vector<16x16x128xbf16>
    %42 = tpu.concatenate %38, %35, %41 in 2 : vector<16x16x128xbf16>, vector<16x16x128xbf16>, vector<16x16x128xbf16> -> vector<16x16x384xbf16>
    %43 = vector.shape_cast %42 : vector<16x16x384xbf16> to vector<256x384xbf16>
    %c2 = arith.constant 2 : index
    %c0_14 = arith.constant 0 : index
    %c0_15 = arith.constant 0 : index
    %c0_16 = arith.constant 0 : index
    %44 = vector.load %arg4[%c2, %c0_14, %c0_15, %c0_16] : memref<3x1x384x128xbf16, #tpu.memory_space<vmem>>, vector<1x1x384x128xbf16>
    %45 = vector.shape_cast %44 : vector<1x1x384x128xbf16> to vector<384x128xbf16>
    %cst_17 = arith.constant dense<0.000000e+00> : vector<256x128xf32>
    %46 = tpu.matmul %43, %45, %cst_17 {dimension_numbers = #tpu.dot_dimension_numbers<[1], [0], [0], [1], [0, 0, 1, 1], [], []>} : vector<256x384xbf16>, vector<384x128xbf16>, vector<256x128xf32> -> vector<256x128xf32>
    %47 = arith.addf %32, %46 : vector<256x128xf32>
    %c0_18 = arith.constant 0 : index
    %c0_19 = arith.constant 0 : index
    %48 = vector.load %arg9[%c0_18, %c0_19] : memref<256x128xf32, #tpu.memory_space<vmem>>, vector<256x128xf32>
    tpu.vector_store %arg9[%c0_18, %c0_19], %47 {strides = array<i32>} : memref<256x128xf32, #tpu.memory_space<vmem>>, vector<256x128xf32>,
    %c0_i32_20 = arith.constant 0 : i32
    %49 = arith.cmpi eq, %arg2, %c0_i32_20 : i32
    %50 = arith.extui %49 : i1 to i32
    %c0_i32_21 = arith.constant 0 : i32
    %51 = arith.cmpi ne, %50, %c0_i32_21 : i32
    scf.if %51 {
      %c0_22 = arith.constant 0 : index
      %c0_23 = arith.constant 0 : index
      %52 = vector.load %arg5[%c0_22, %c0_23] : memref<1x128xf32, #tpu.memory_space<vmem>>, vector<1x128xf32>
      %53 = vector.broadcast %52 : vector<1x128xf32> to vector<256x128xf32>
      %54 = arith.addf %47, %53 : vector<256x128xf32>
      %cst_24 = arith.constant dense<0.000000e+00> : vector<128xf32>
      %55 = vector.multi_reduction <add>, %54, %cst_24 [0] : vector<256x128xf32> to vector<128xf32>
      %56 = vector.shape_cast %55 : vector<128xf32> to vector<1x128xf32>
      %cst_25 = arith.constant 3.906250e-03 : f32
      %57 = vector.broadcast %cst_25 : f32 to vector<1x128xf32>
      %58 = arith.mulf %56, %57 : vector<1x128xf32>
      %59 = vector.broadcast %58 : vector<1x128xf32> to vector<256x128xf32>
      %60 = arith.subf %54, %59 : vector<256x128xf32>
      %61 = arith.mulf %60, %60 : vector<256x128xf32>
      %cst_26 = arith.constant dense<0.000000e+00> : vector<128xf32>
      %62 = vector.multi_reduction <add>, %61, %cst_26 [0] : vector<256x128xf32> to vector<128xf32>
      %63 = vector.shape_cast %62 : vector<128xf32> to vector<1x128xf32>
      %cst_27 = arith.constant 3.906250e-03 : f32
      %64 = vector.broadcast %cst_27 : f32 to vector<1x128xf32>
      %65 = arith.mulf %63, %64 : vector<1x128xf32>
      %cst_28 = arith.constant 9.99999974E-6 : f32
      %66 = vector.broadcast %cst_28 : f32 to vector<1x128xf32>
      %67 = arith.addf %65, %66 : vector<1x128xf32>
      %68 = math.rsqrt %67 : vector<1x128xf32>
      %69 = vector.broadcast %68 : vector<1x128xf32> to vector<256x128xf32>
      %70 = arith.mulf %60, %69 : vector<256x128xf32>
      %cst_29 = arith.constant 5.000000e-01 : f32
      %71 = vector.broadcast %cst_29 : f32 to vector<256x128xf32>
      %72 = arith.mulf %71, %70 : vector<256x128xf32>
      %cst_30 = arith.constant 4.471500e-02 : f32
      %73 = vector.broadcast %cst_30 : f32 to vector<256x128xf32>
      %74 = arith.mulf %73, %70 : vector<256x128xf32>
      %75 = arith.mulf %74, %70 : vector<256x128xf32>
      %76 = arith.mulf %75, %70 : vector<256x128xf32>
      %77 = arith.addf %70, %76 : vector<256x128xf32>
      %cst_31 = arith.constant 0.797884583 : f32
      %78 = vector.broadcast %cst_31 : f32 to vector<256x128xf32>
      %79 = arith.mulf %78, %77 : vector<256x128xf32>
      %80 = math.tanh %79 : vector<256x128xf32>
      %cst_32 = arith.constant 1.000000e+00 : f32
      %81 = vector.broadcast %cst_32 : f32 to vector<256x128xf32>
      %82 = arith.addf %81, %80 : vector<256x128xf32>
      %83 = arith.mulf %72, %82 : vector<256x128xf32>
      %c0_33 = arith.constant 0 : index
      %c0_34 = arith.constant 0 : index
      %c0_35 = arith.constant 0 : index
      %84 = vector.load %arg6[%c0_33, %c0_34, %c0_35] : memref<1x1x128xf32, #tpu.memory_space<vmem>>, vector<1x1x128xf32>
      %85 = vector.shape_cast %84 : vector<1x1x128xf32> to vector<1x128xf32>
      %cst_36 = arith.constant 1.000000e+00 : f32
      %86 = vector.broadcast %cst_36 : f32 to vector<1x128xf32>
      %87 = arith.addf %86, %85 : vector<1x128xf32>
      %88 = vector.broadcast %87 : vector<1x128xf32> to vector<256x128xf32>
      %89 = arith.mulf %83, %88 : vector<256x128xf32>
      %c0_37 = arith.constant 0 : index
      %c0_38 = arith.constant 0 : index
      %c0_39 = arith.constant 0 : index
      %90 = vector.load %arg7[%c0_37, %c0_38, %c0_39] : memref<1x1x128xf32, #tpu.memory_space<vmem>>, vector<1x1x128xf32>
      %91 = vector.shape_cast %90 : vector<1x1x128xf32> to vector<1x128xf32>
      %92 = vector.broadcast %91 : vector<1x128xf32> to vector<256x128xf32>
      %93 = arith.addf %89, %92 : vector<256x128xf32>
      %c0_40 = arith.constant 0 : index
      %c0_41 = arith.constant 0 : index
      %c0_42 = arith.constant 0 : index
      %94 = vector.load %arg8[%c0_40, %c0_41, %c0_42] : memref<1x256x128xf32, #tpu.memory_space<vmem>>, vector<1x256x128xf32>
      %95 = vector.shape_cast %94 : vector<1x256x128xf32> to vector<256x128xf32>
      %96 = vector.shape_cast %93 : vector<256x128xf32> to vector<1x256x128xf32>
      tpu.vector_store %arg8[%c0_40, %c0_41, %c0_42], %96 {strides = array<i32>} : memref<1x256x128xf32, #tpu.memory_space<vmem>>, vector<1x256x128xf32>,
    } else {
    }
    return
  }
  func.func @transform_0(%arg0: i32, %arg1: i32, %arg2: i32) -> (i32, i32, i32, i32) {
    %c0_i32 = arith.constant 0 : i32
    %c0_i32_0 = arith.constant 0 : i32
    %c0_i32_1 = arith.constant 0 : i32
    return %arg0, %c0_i32, %c0_i32_0, %arg2 : i32, i32, i32, i32
  }
  func.func @transform_1(%arg0: i32, %arg1: i32, %arg2: i32) -> (i32, i32, i32, i32) {
    %c0_i32 = arith.constant 0 : i32
    %c0_i32_0 = arith.constant 0 : i32
    %c0_i32_1 = arith.constant 0 : i32
    return %c0_i32, %arg2, %c0_i32_0, %arg1 : i32, i32, i32, i32
  }
  func.func @transform_2(%arg0: i32, %arg1: i32, %arg2: i32) -> (i32, i32) {
    %c0_i32 = arith.constant 0 : i32
    %c0_i32_0 = arith.constant 0 : i32
    return %c0_i32, %arg1 : i32, i32
  }
  func.func @transform_3(%arg0: i32, %arg1: i32, %arg2: i32) -> (i32, i32, i32) {
    %c0_i32 = arith.constant 0 : i32
    %c0_i32_0 = arith.constant 0 : i32
    return %arg0, %c0_i32, %arg1 : i32, i32, i32
  }
  func.func @transform_4(%arg0: i32, %arg1: i32, %arg2: i32) -> (i32, i32, i32) {
    %c0_i32 = arith.constant 0 : i32
    %c0_i32_0 = arith.constant 0 : i32
    return %arg0, %c0_i32, %arg1 : i32, i32, i32
  }
  func.func @transform_5(%arg0: i32, %arg1: i32, %arg2: i32) -> (i32, i32, i32) {
    %c0_i32 = arith.constant 0 : i32
    %c0_i32_0 = arith.constant 0 : i32
    return %arg0, %c0_i32, %arg1 : i32, i32, i32
  }
}

</mosaic_0001>

<bundles_post_ra>
// kernel: ginka_decoder_forward.5
= control target key start
LH: loop header
LB: loop body
LE: loop exit
PB: predicated region body
PF: predicated region fallthrough
CT: control target
= control target key end

     0   :  { %s2114_s12 = smov 0   ;;  %s2116_s13 = smov 0   ;;  %s3038_s0 = inlined_call_operand.vmem [shape: bf16[2,64,128], index: 0, kind: input, shape index: {}]   ;;  %s3039_s1 = inlined_call_operand.vmem [shape: bf16[2,1,128,256], index: 1, kind: input, shape index: {}]   ;;  %s3040_s2 = inlined_call_operand.vmem [shape: f32[1,256], index: 2, kind: input, shape index: {}]   ;;  %s3041_s3 = inlined_call_operand.vmem [shape: bf16[2,8,2,16,128], index: 3, kind: output, shape index: {}]  }
   0x1   :  { %s2118_s14 = smov 0  }
   0x2 LB: > { %s25_s15 = sadd.s32 1, %s2086_s13  ;;  %p1688_p0 = scmp.ge.s32.totalorder %s2090_s14, 1  ;;  %s2090_s14 = sphi %s2118_s14, %s13_s14   ;;  %s2086_s13 = sphi %s2116_s13, %s3088_s13   ;;  %s2082_s12 = sphi %s2114_s12, %s3087_s12  }
   0x3   : > { %p27_p1 = scmp.ge.s32.totalorder %s25_s15, 2  ;;  %p171_p2 = scmp.lt.s32.totalorder %s2090_s14, 3 }
   0x5   : > { %s3090_s15 = smov (%p27_p1, %s25_s15), 0  ;;  %p172_p3 = pnand %p1688_p0, %p171_p2 }
   0x7   : > { %175 = sbr.rel (%p172_p3) target bundleno = 461 (0x1cd), region = 32 }
   0xc   : > { %v1950_v0 = vld [vmem:[%s3039_s1 + $0x74] ss:$8 sps:$4 sm:$0xff]   ;;  %v2092_v2 = vmov 0   ;;  %v1954_v3 = vld [vmem:[%s3039_s1 + $0x70] ss:$8 sps:$4 sm:$0xff]   ;;  %p207_p4 = scmp.lt.s32.totalorder %s2082_s12, 1  ;;  %v257_v37 = vlaneseq }
   0xd   : > { %v1952_v1 = vld [vmem:[%s3039_s1 + $0xf4] ss:$8 sps:$4 sm:$0xff]   ;;  %403 = vmatprep.mubr.bf16.mxu0 %v2092_v2  ;;  %573 = vmatprep.mubr.bf16.mxu1 %v2092_v2  ;;  %v1955_v4 = vld [vmem:[%s3039_s1 + $0xf0] ss:$8 sps:$4 sm:$0xff]   ;;  %v1956_v5 = vld [vmem:[%s3039_s1 + $0x64] ss:$8 sps:$4 sm:$0xff]  }
   0xe   : > { %371 = vmatprep.subr.bf16.mxu0 %v1950_v0  ;;  %541 = vmatprep.subr.bf16.mxu1 %v1952_v1  ;;  %v1958_v6 = vld [vmem:[%s3039_s1 + $0xe4] ss:$8 sps:$4 sm:$0xff]   ;;  %v1960_v7 = vld [vmem:[%s3039_s1 + $0x60] ss:$8 sps:$4 sm:$0xff]   ;;  %v1962_v9 = vld [vmem:[%s3039_s1 + $0x54] ss:$8 sps:$4 sm:$0xff]  }
   0xf   : > { %372 = vmatpush1.bf16.msra.mxu0 %v1954_v3  ;;  %542 = vmatpush1.bf16.msra.mxu1 %v1955_v4  ;;  %v1961_v8 = vld [vmem:[%s3039_s1 + $0xe0] ss:$8 sps:$4 sm:$0xff]   ;;  %v1964_v10 = vld [vmem:[%s3039_s1 + $0xd4] ss:$8 sps:$4 sm:$0xff]   ;;  %v1966_v11 = vld [vmem:[%s3039_s1 + $0x50] ss:$8 sps:$4 sm:$0xff]  }
  0x10   : > { %373 = vmatprep.subr.bf16.mxu0 %v1956_v5  ;;  %543 = vmatprep.subr.bf16.mxu1 %v1958_v6  ;;  %v1967_v12 = vld [vmem:[%s3039_s1 + $0xd0] ss:$8 sps:$4 sm:$0xff]   ;;  %v1968_v13 = vld [vmem:[%s3039_s1 + $0x44] ss:$8 sps:$4 sm:$0xff]   ;;  %v1972_v15 = vld [vmem:[%s3039_s1 + $0x40] ss:$8 sps:$4 sm:$0xff]  }
  0x11   : > { %v1970_v14 = vld [vmem:[%s3039_s1 + $0xc4] ss:$8 sps:$4 sm:$0xff]   ;;  %v1973_v16 = vld [vmem:[%s3039_s1 + $0xc0] ss:$8 sps:$4 sm:$0xff]   ;;  %v1974_v17 = vld [vmem:[%s3039_s1 + $0x34] ss:$8 sps:$4 sm:$0xff]  }
  0x12   : > { %v1976_v18 = vld [vmem:[%s3039_s1 + $0xb4] ss:$8 sps:$4 sm:$0xff]   ;;  %s3092_s12 = smov (!%p207_p4, %s2082_s12), 1  ;;  %v1978_v19 = vld [vmem:[%s3039_s1 + $0x30] ss:$8 sps:$4 sm:$0xff]   ;;  %v2252_v42 = vshrl.u32 %v257_v37, 7 }
  0x13   : > { %374 = vmatpush1.bf16.msra.mxu0 %v1960_v7  ;;  %544 = vmatpush1.bf16.msra.mxu1 %v1961_v8  ;;  %v1979_v20 = vld [vmem:[%s3039_s1 + $0xb0] ss:$8 sps:$4 sm:$0xff]   ;;  %v1980_v21 = vld [vmem:[%s3039_s1 + $0x24] ss:$8 sps:$4 sm:$0xff]   ;;  %s1795_s10 = sshll.u32 %s3092_s12, 5  ;;  %s1796_s17 = sshll.u32 %s3092_s12, 7 }
  0x14   : > { %375 = vmatprep.subr.bf16.mxu0 %v1962_v9  ;;  %545 = vmatprep.subr.bf16.mxu1 %v1964_v10  ;;  %v1982_v22 = vld [vmem:[%s3039_s1 + $0xa4] ss:$8 sps:$4 sm:$0xff]   ;;  %v1984_v23 = vld [vmem:[%s3039_s1 + $0x20] ss:$8 sps:$4 sm:$0xff]   ;;  %v1986_v25 = vld [vmem:[%s3039_s1 + $0x14] ss:$8 sps:$4 sm:$0xff]   ;;  %s2219_s23 = scalar_lea.vmem %s3038_s0, %s1795_s10  ;;  %s2975_s19 = scalar_lea.vmem %s3041_s3, %s1796_s17 }
  0x15   : > { %v1985_v24 = vld [vmem:[%s3039_s1 + $0xa0] ss:$8 sps:$4 sm:$0xff]   ;;  %v1988_v26 = vld [vmem:[%s3039_s1 + $0x94] ss:$8 sps:$4 sm:$0xff]   ;;  %v1990_v27 = vld [vmem:[%s3039_s1 + $0x10] ss:$8 sps:$4 sm:$0xff]  }
  0x16   : > { %v1991_v28 = vld [vmem:[%s3039_s1 + $0x90] ss:$8 sps:$4 sm:$0xff]   ;;  %v1992_v29 = vld [vmem:[%s3039_s1 + $0x4] ss:$8 sps:$4 sm:$0xff]   ;;  %v1996_v31 = vld [vmem:[%s3039_s1] ss:$8 sps:$4 sm:$0xff]  }
  0x17   : > { %376 = vmatpush1.bf16.msra.mxu0 %v1966_v11  ;;  %546 = vmatpush1.bf16.msra.mxu1 %v1967_v12  ;;  %v1994_v30 = vld [vmem:[%s3039_s1 + $0x84] ss:$8 sps:$4 sm:$0xff]   ;;  %v1997_v32 = vld [vmem:[%s3039_s1 + $0x80] ss:$8 sps:$4 sm:$0xff]   ;;  %v2000_v35 = vld [vmem:[%s2219_s23 + $0x10] sm:$0xff]   ;;  %v2255_v47 = vsub.s32 0, %v2252_v42 }
  0x18   : > { %377 = vmatprep.subr.bf16.mxu0 %v1968_v13  ;;  %547 = vmatprep.subr.bf16.mxu1 %v1970_v14  ;;  %v1998_v33 = vld [vmem:[%s2219_s23] sm:$0xff]   ;;  %v1999_v34 = vld [vmem:[%s2219_s23 + $0x8] sm:$0xff]   ;;  %v2001_v36 = vld [vmem:[%s2219_s23 + $0x18] sm:$0xff]   ;;  %v263_v49 = vsub.s32 1, %v2252_v42 }
  0x19   : > { %v239_v48 = vld [vmem:[%s3040_s2] sm:$0x3] }
  0x1a   : > { %v2262_v54 = vrot.slane %v239_v48, %v2255_v47  ;;  %v2264_v55 = vrot.slane %v239_v48, %v263_v49 }
  0x1b   : > { %378 = vmatpush1.bf16.msra.mxu0 %v1972_v15  ;;  %548 = vmatpush1.bf16.msra.mxu1 %v1973_v16 }
  0x1c   : > { %379 = vmatprep.subr.bf16.mxu0 %v1974_v17  ;;  %549 = vmatprep.subr.bf16.mxu1 %v1976_v18 }
  0x1f   : > { %380 = vmatpush1.bf16.msra.mxu0 %v1978_v19  ;;  %550 = vmatpush1.bf16.msra.mxu1 %v1979_v20 }
  0x20   : > { %381 = vmatprep.subr.bf16.mxu0 %v1980_v21  ;;  %551 = vmatprep.subr.bf16.mxu1 %v1982_v22 }
  0x23   : > { %382 = vmatpush1.bf16.msra.mxu0 %v1984_v23  ;;  %552 = vmatpush1.bf16.msra.mxu1 %v1985_v24 }
  0x24   : > { %383 = vmatprep.subr.bf16.mxu0 %v1986_v25  ;;  %553 = vmatprep.subr.bf16.mxu1 %v1988_v26 }
  0x27   : > { %384 = vmatpush1.bf16.msra.mxu0 %v1990_v27  ;;  %554 = vmatpush1.bf16.msra.mxu1 %v1991_v28 }
  0x28   : > { %385 = vmatprep.subr.bf16.mxu0 %v1992_v29  ;;  %555 = vmatprep.subr.bf16.mxu1 %v1994_v30 }
  0x2b   : > { %386 = vmatpush1.bf16.msra.mxu0 %v1996_v31  ;;  %556 = vmatpush1.bf16.msra.mxu1 %v1997_v32 }
  0x2e   : > { %404 = vmatmul.mubr.bf16.vlgmr.msra.gmra.mxu0 %v1998_v33  ;;  %574 = vmatmul.mubr.bf16.vlgmr.msra.gmra.mxu1 %v1998_v33 }
  0x2f   : > { %413 = vmatprep.mubr.bf16.mxu0 %v2092_v2  ;;  %583 = vmatprep.mubr.bf16.mxu1 %v2092_v2 }
  0x36   : > { %414 = vmatmul.mubr.bf16.gmra.mxu0 %v1999_v34  ;;  %584 = vmatmul.mubr.bf16.gmra.mxu1 %v1999_v34 }
  0x37   : > { %423 = vmatprep.mubr.bf16.mxu0 %v2092_v2  ;;  %593 = vmatprep.mubr.bf16.mxu1 %v2092_v2 }
  0x3e   : > { %424 = vmatmul.mubr.bf16.gmra.mxu0 %v2000_v35  ;;  %594 = vmatmul.mubr.bf16.gmra.mxu1 %v2000_v35 }
  0x3f   : > { %433 = vmatprep.mubr.bf16.mxu0 %v2092_v2  ;;  %603 = vmatprep.mubr.bf16.mxu1 %v2092_v2 }
  0x46   : > { %434 = vmatmul.mubr.bf16.gmra.mxu0 %v2001_v36  ;;  %604 = vmatmul.mubr.bf16.gmra.mxu1 %v2001_v36 }
  0xee   : > { %v405_v38 = vpop.f32.mrf.mxu0  ;;  %v575_v39 = vpop.f32.mrf.mxu1 }
  0xef   : > { %v2279_v0 = vadd.f32 %v405_v38, %v2262_v54  ;;  %v2282_v1 = vadd.f32 %v575_v39, %v2262_v54 }
  0xf0   : > { %v407_v40 = vpop.f32.mrf.mxu0  ;;  %v577_v41 = vpop.f32.mrf.mxu1 }
  0xf1   : > { %v2291_v4 = vadd.f32 %v407_v40, %v2264_v55  ;;  %v2294_v5 = vadd.f32 %v577_v41, %v2264_v55  ;;  %v614_v18 = vadd.f32 %v2282_v1, %v2279_v0 }
  0xf2   : > { %v409_v43 = vpop.f32.mrf.mxu0  ;;  %v579_v44 = vpop.f32.mrf.mxu1 }
  0xf3   : > { %v2267_v58 = vadd.f32 %v409_v43, %v2262_v54  ;;  %v2270_v59 = vadd.f32 %v579_v44, %v2262_v54  ;;  %v615_v22 = vadd.f32 %v2294_v5, %v2291_v4 }
  0xf4   : > { %v411_v45 = vpop.f32.mrf.mxu0  ;;  %v581_v46 = vpop.f32.mrf.mxu1 }
  0xf5   : > { %v2273_v60 = vadd.f32 %v411_v45, %v2264_v55  ;;  %v2276_v61 = vadd.f32 %v581_v46, %v2264_v55  ;;  %v616_v10 = vadd.f32 %v2270_v59, %v2267_v58 }
  0xf6   : > { %v415_v50 = vpop.f32.mrf.mxu0  ;;  %v585_v51 = vpop.f32.mrf.mxu1 }
  0xf7   : > { %v2285_v2 = vadd.f32 %v415_v50, %v2262_v54  ;;  %v2288_v3 = vadd.f32 %v585_v51, %v2262_v54  ;;  %v617_v13 = vadd.f32 %v2276_v61, %v2273_v60  ;;  %v630_v28 = vadd.f32 %v616_v10, %v614_v18 }
  0xf8   : > { %v417_v52 = vpop.f32.mrf.mxu0  ;;  %v587_v53 = vpop.f32.mrf.mxu1 }
  0xf9   : > { %v2297_v6 = vadd.f32 %v417_v52, %v2264_v55  ;;  %v2300_v7 = vadd.f32 %v587_v53, %v2264_v55  ;;  %v618_v19 = vadd.f32 %v2288_v3, %v2285_v2  ;;  %v643_v32 = vadd.f32 %v617_v13, %v615_v22 }
  0xfa   : > { %v419_v56 = vpop.f32.mrf.mxu0  ;;  %v589_v57 = vpop.f32.mrf.mxu1 }
  0xfb   : > { %v2305_v11 = vadd.f32 %v419_v56, %v2262_v54  ;;  %v2308_v12 = vadd.f32 %v589_v57, %v2262_v54  ;;  %v619_v23 = vadd.f32 %v2300_v7, %v2297_v6  ;;  %v631_v36 = vadd.f32 %v630_v28, %v618_v19 }
  0xfc   : > { %v421_v62 = vpop.f32.mrf.mxu0  ;;  %v591_v63 = vpop.f32.mrf.mxu1 }
  0xfd   : > { %v2313_v14 = vadd.f32 %v421_v62, %v2264_v55  ;;  %v2316_v15 = vadd.f32 %v591_v63, %v2264_v55  ;;  %v620_v29 = vadd.f32 %v2308_v12, %v2305_v11  ;;  %v644_v40 = vadd.f32 %v643_v32, %v619_v23 }
  0xfe   : > { %v425_v8 = vpop.f32.mrf.mxu0  ;;  %v595_v9 = vpop.f32.mrf.mxu1 }
  0xff   : > { %v2323_v20 = vadd.f32 %v425_v8, %v2262_v54  ;;  %v2326_v21 = vadd.f32 %v595_v9, %v2262_v54  ;;  %v621_v33 = vadd.f32 %v2316_v15, %v2313_v14  ;;  %v632_v45 = vadd.f32 %v631_v36, %v620_v29 }
 0x100   : > { %v427_v16 = vpop.f32.mrf.mxu0  ;;  %v597_v17 = vpop.f32.mrf.mxu1 }
 0x101   : > { %v2333_v24 = vadd.f32 %v427_v16, %v2264_v55  ;;  %v2336_v25 = vadd.f32 %v597_v17, %v2264_v55  ;;  %v622_v37 = vadd.f32 %v2326_v21, %v2323_v20  ;;  %v645_v50 = vadd.f32 %v644_v40, %v621_v33 }
 0x102   : > { %v429_v26 = vpop.f32.mrf.mxu0  ;;  %v599_v27 = vpop.f32.mrf.mxu1 }
 0x103   : > { %v2341_v30 = vadd.f32 %v429_v26, %v2262_v54  ;;  %v2344_v31 = vadd.f32 %v599_v27, %v2262_v54  ;;  %v623_v41 = vadd.f32 %v2336_v25, %v2333_v24  ;;  %v633_v56 = vadd.f32 %v632_v45, %v622_v37 }
 0x104   : > { %v431_v34 = vpop.f32.mrf.mxu0  ;;  %v601_v35 = vpop.f32.mrf.mxu1 }
 0x105   : > { %v2351_v38 = vadd.f32 %v431_v34, %v2264_v55  ;;  %v2354_v39 = vadd.f32 %v601_v35, %v2264_v55  ;;  %v624_v46 = vadd.f32 %v2344_v31, %v2341_v30  ;;  %v646_v8 = vadd.f32 %v645_v50, %v623_v41 }
 0x106   : > { %v435_v43 = vpop.f32.mrf.mxu0  ;;  %v605_v44 = vpop.f32.mrf.mxu1 }
 0x107   : > { %v436_v48 = vadd.f32 %v435_v43, %v2262_v54  ;;  %v2362_v49 = vadd.f32 %v605_v44, %v2262_v54  ;;  %v625_v51 = vadd.f32 %v2354_v39, %v2351_v38  ;;  %v634_v13 = vadd.f32 %v633_v56, %v624_v46 }
 0x108   : > { %v437_v52 = vpop.f32.mrf.mxu0  ;;  %v607_v53 = vpop.f32.mrf.mxu1 }
 0x109   : > { %v626_v57 = vadd.f32 %v2362_v49, %v436_v48  ;;  %v438_v62 = vadd.f32 %v437_v52, %v2264_v55  ;;  %v2369_v63 = vadd.f32 %v607_v53, %v2264_v55  ;;  %v647_v19 = vadd.f32 %v646_v8, %v625_v51 }
 0x10a   : > { %v439_v9 = vpop.f32.mrf.mxu0  ;;  %v609_v10 = vpop.f32.mrf.mxu1 }
 0x10b   : > { %v627_v16 = vadd.f32 %v2369_v63, %v438_v62  ;;  %v440_v17 = vadd.f32 %v439_v9, %v2262_v54  ;;  %v2374_v18 = vadd.f32 %v609_v10, %v2262_v54  ;;  %v635_v26 = vadd.f32 %v634_v13, %v626_v57 }
 0x10c   : > { %v441_v22 = vpop.f32.mrf.mxu0  ;;  %v611_v23 = vpop.f32.mrf.mxu1 }
 0x10d   : > { %v628_v27 = vadd.f32 %v2374_v18, %v440_v17  ;;  %v442_v28 = vadd.f32 %v441_v22, %v2264_v55  ;;  %v2379_v29 = vadd.f32 %v611_v23, %v2264_v55  ;;  %v648_v32 = vadd.f32 %v647_v19, %v627_v16 }
 0x10f   : > { %v636_v33 = vadd.f32 %v635_v26, %v628_v27  ;;  %v629_v34 = vadd.f32 %v2379_v29, %v442_v28 }
 0x111   : > { %v637_v35 = vrot.slane %v636_v33, 4  ;;  %v649_v36 = vadd.f32 %v648_v32, %v629_v34 }
 0x113   : > { %v638_v37 = vadd.f32 %v637_v35, %v636_v33  ;;  %v650_v54 = vrot.slane %v649_v36, 4 }
 0x115   : > { %v639_v40 = vrot.slane %v638_v37, 2  ;;  %v651_v41 = vadd.f32 %v650_v54, %v649_v36 }
 0x117   : > { %v640_v43 = vadd.f32 %v639_v40, %v638_v37  ;;  %v652_v44 = vrot.slane %v651_v41, 2 }
 0x119   : > { %v641_v45 = vrot.slane %v640_v43, 1  ;;  %v653_v46 = vadd.f32 %v652_v44, %v651_v41 }
 0x11b   : > { %v654_v50 = vrot.slane %v653_v46, 1  ;;  %v642_v51 = vadd.f32 %v641_v45, %v640_v43 }
 0x11d   : > { %v655_v52 = vadd.f32 %v654_v50, %v653_v46 }
 0x11f   : > { %v656_v53 = vadd.f32 %v655_v52, %v642_v51 }
 0x121   : > { %v657_v55 = vmul.f32 0.00390625, %v656_v53 }
 0x123   : > { %v661_v56 = vrot.slane %v657_v55, %v2255_v47 }
 0x125   : > { %v2384_v57 = vsub.f32 %v2279_v0, %v661_v56  ;;  %v2387_v8 = vsub.f32 %v2291_v4, %v661_v56  ;;  %v2390_v9 = vsub.f32 %v2267_v58, %v661_v56  ;;  %v2393_v10 = vsub.f32 %v2273_v60, %v661_v56 }
 0x126   : > { %v2396_v13 = vsub.f32 %v2285_v2, %v661_v56  ;;  %v2399_v16 = vsub.f32 %v2297_v6, %v661_v56  ;;  %v2402_v19 = vsub.f32 %v2305_v11, %v661_v56  ;;  %v2405_v0 = vsub.f32 %v2313_v14, %v661_v56 }
 0x127   : > { %v2408_v4 = vsub.f32 %v2282_v1, %v661_v56  ;;  %v2411_v58 = vsub.f32 %v2294_v5, %v661_v56  ;;  %v2414_v60 = vsub.f32 %v2270_v59, %v661_v56  ;;  %v2417_v2 = vsub.f32 %v2276_v61, %v661_v56 }
 0x128   : > { %v2420_v6 = vsub.f32 %v2323_v20, %v661_v56  ;;  %v2423_v11 = vsub.f32 %v2333_v24, %v661_v56  ;;  %v2426_v14 = vsub.f32 %v2341_v30, %v661_v56  ;;  %v2429_v1 = vsub.f32 %v2351_v38, %v661_v56 }
 0x129   : > { %v2431_v5 = vsub.f32 %v436_v48, %v661_v56  ;;  %v2433_v22 = vsub.f32 %v438_v62, %v661_v56  ;;  %v2436_v59 = vsub.f32 %v2288_v3, %v661_v56  ;;  %v2439_v61 = vsub.f32 %v2300_v7, %v661_v56 }
 0x12a   : > { %v694_v20 = vmul.f32 %v2384_v57, %v2384_v57  ;;  %v695_v24 = vmul.f32 %v2387_v8, %v2387_v8  ;;  %v696_v30 = vmul.f32 %v2390_v9, %v2390_v9  ;;  %v697_v38 = vmul.f32 %v2393_v10, %v2393_v10 }
 0x12b   : > { %v710_v48 = vmul.f32 %v2408_v4, %v2408_v4  ;;  %v711_v3 = vmul.f32 %v2411_v58, %v2411_v58  ;;  %v712_v7 = vmul.f32 %v2414_v60, %v2414_v60  ;;  %v713_v62 = vmul.f32 %v2417_v2, %v2417_v2 }
 0x12c   : > { %v2457_v23 = vsub.f32 %v440_v17, %v661_v56  ;;  %v2459_v26 = vsub.f32 %v442_v28, %v661_v56  ;;  %v2462_v27 = vsub.f32 %v2308_v12, %v661_v56  ;;  %v2465_v32 = vsub.f32 %v2316_v15, %v661_v56 }
 0x12d   : > { %v2468_v33 = vsub.f32 %v2326_v21, %v661_v56  ;;  %v2471_v34 = vsub.f32 %v2336_v25, %v661_v56  ;;  %v2474_v35 = vsub.f32 %v2344_v31, %v661_v56  ;;  %v2477_v17 = vsub.f32 %v2354_v39, %v661_v56 }
 0x12e   : > { %v698_v28 = vmul.f32 %v2396_v13, %v2396_v13  ;;  %v699_v12 = vmul.f32 %v2399_v16, %v2399_v16  ;;  %v714_v15 = vmul.f32 %v2436_v59, %v2436_v59  ;;  %v715_v21 = vmul.f32 %v2439_v61, %v2439_v61 }
 0x12f   : > { %3049 = vst [vmem:[#allocation2_spill] sm:$0xff] %v2474_v35  ;;  %3050 = vst [vmem:[#allocation3_spill] sm:$0xff] %v2477_v17  ;;  %v726_v25 = vadd.f32 %v710_v48, %v694_v20  ;;  %v727_v36 = vadd.f32 %v711_v3, %v695_v24  ;;  %v728_v37 = vadd.f32 %v712_v7, %v696_v30 }
 0x130   : > { %v729_v31 = vadd.f32 %v713_v62, %v697_v38  ;;  %v2488_v54 = vsub.f32 %v2362_v49, %v661_v56  ;;  %v2491_v39 = vsub.f32 %v2369_v63, %v661_v56  ;;  %v2494_v40 = vsub.f32 %v2374_v18, %v661_v56 }
 0x131   : > { %v2497_v41 = vsub.f32 %v2379_v29, %v661_v56  ;;  %v700_v43 = vmul.f32 %v2402_v19, %v2402_v19  ;;  %v701_v44 = vmul.f32 %v2405_v0, %v2405_v0  ;;  %v716_v45 = vmul.f32 %v2462_v27, %v2462_v27 }
 0x132   : > { %3051 = vst [vmem:[#allocation4_spill] sm:$0xff] %v2488_v54  ;;  %3052 = vst [vmem:[#allocation5_spill] sm:$0xff] %v2491_v39  ;;  %v717_v49 = vmul.f32 %v2465_v32, %v2465_v32  ;;  %v702_v63 = vmul.f32 %v2420_v6, %v2420_v6  ;;  %v703_v18 = vmul.f32 %v2423_v11, %v2423_v11 }
 0x133   : > { %3053 = vst [vmem:[#allocation6_spill] sm:$0xff] %v2494_v40  ;;  %3054 = vst [vmem:[#allocation7_spill] sm:$0xff] %v2497_v41  ;;  %v718_v29 = vmul.f32 %v2468_v33, %v2468_v33  ;;  %v719_v46 = vmul.f32 %v2471_v34, %v2471_v34  ;;  %v730_v50 = vadd.f32 %v714_v15, %v698_v28 }
 0x134   : > { %v731_v51 = vadd.f32 %v715_v21, %v699_v12  ;;  %v742_v52 = vadd.f32 %v728_v37, %v726_v25  ;;  %v755_v53 = vadd.f32 %v729_v31, %v727_v36  ;;  %v704_v55 = vmul.f32 %v2426_v14, %v2426_v14 }
 0x135   : > { %v705_v56 = vmul.f32 %v2429_v1, %v2429_v1  ;;  %v720_v20 = vmul.f32 %v2474_v35, %v2474_v35  ;;  %v721_v24 = vmul.f32 %v2477_v17, %v2477_v17  ;;  %v732_v30 = vadd.f32 %v716_v45, %v700_v43 }
 0x136   : > { %v733_v38 = vadd.f32 %v717_v49, %v701_v44  ;;  %v743_v48 = vadd.f32 %v742_v52, %v730_v50  ;;  %v756_v3 = vadd.f32 %v755_v53, %v731_v51  ;;  %v706_v7 = vmul.f32 %v2431_v5, %v2431_v5 }
 0x137   : > { %v707_v62 = vmul.f32 %v2433_v22, %v2433_v22  ;;  %v722_v28 = vmul.f32 %v2488_v54, %v2488_v54  ;;  %v723_v12 = vmul.f32 %v2491_v39, %v2491_v39  ;;  %v734_v15 = vadd.f32 %v718_v29, %v702_v63 }
 0x138   : > { %v735_v21 = vadd.f32 %v719_v46, %v703_v18  ;;  %v744_v25 = vadd.f32 %v743_v48, %v732_v30  ;;  %v757_v36 = vadd.f32 %v756_v3, %v733_v38  ;;  %v708_v37 = vmul.f32 %v2457_v23, %v2457_v23 }
 0x139   : > { %v709_v31 = vmul.f32 %v2459_v26, %v2459_v26  ;;  %v724_v43 = vmul.f32 %v2494_v40, %v2494_v40  ;;  %v725_v44 = vmul.f32 %v2497_v41, %v2497_v41  ;;  %v736_v45 = vadd.f32 %v720_v20, %v704_v55 }
 0x13a   : > { %v737_v49 = vadd.f32 %v721_v24, %v705_v56  ;;  %v745_v50 = vadd.f32 %v744_v25, %v734_v15  ;;  %v758_v51 = vadd.f32 %v757_v36, %v735_v21  ;;  %v738_v63 = vadd.f32 %v722_v28, %v706_v7 }
 0x13b   : > { %v739_v18 = vadd.f32 %v723_v12, %v707_v62  ;;  %v740_v52 = vadd.f32 %v724_v43, %v708_v37  ;;  %v741_v53 = vadd.f32 %v725_v44, %v709_v31  ;;  %v2093_v21 = vmov 1935823168  }
 0x13c   : > { %v746_v29 = vadd.f32 %v745_v50, %v736_v45  ;;  %v759_v46 = vadd.f32 %v758_v51, %v737_v49  ;;  %v1145_v25 = vunpack.c.l.s4 %v2093_v21 }
 0x13e   : > { %v747_v30 = vadd.f32 %v746_v29, %v738_v63  ;;  %v760_v38 = vadd.f32 %v759_v46, %v739_v18  ;;  %v1146_v37 = vunpack.c.0.s8 %v1145_v25 }
 0x140   : > { %v748_v48 = vadd.f32 %v747_v30, %v740_v52  ;;  %v761_v3 = vadd.f32 %v760_v38, %v741_v53 }
 0x142   : > { %v749_v39 = vrot.slane %v748_v48, 4  ;;  %v762_v54 = vrot.slane %v761_v3, 4 }
 0x144   : > { %v750_v40 = vadd.f32 %v749_v39, %v748_v48  ;;  %v763_v17 = vadd.f32 %v762_v54, %v761_v3  ;;  %v2543_v54 = vsub.s32 %v1146_v37, %v2252_v42 }
 0x146   : > { %v751_v35 = vrot.slane %v750_v40, 2  ;;  %v764_v41 = vrot.slane %v763_v17, 2  ;;  %3055 = vst [vmem:[#allocation8_spill] sm:$0xff] %v2543_v54 }
 0x148   : > { %v752_v55 = vadd.f32 %v751_v35, %v750_v40  ;;  %v765_v56 = vadd.f32 %v764_v41, %v763_v17 }
 0x14a   : > { %v753_v20 = vrot.slane %v752_v55, 1  ;;  %v766_v24 = vrot.slane %v765_v56, 1 }
 0x14c   : > { %v754_v7 = vadd.f32 %v753_v20, %v752_v55  ;;  %v767_v62 = vadd.f32 %v766_v24, %v765_v56 }
 0x14e   : > { %v768_v28 = vadd.f32 %v767_v62, %v754_v7 }
 0x150   : > { %v769_v12 = vmul.f32 0.00390625, %v768_v28 }
 0x152   : > { %v770_v15 = vadd.f32 1e-05, %v769_v12 }
 0x154   : > { %2002 = vrsqrt.f32 %v770_v15 }
 0x161   : > { %v2003_v36 = vpop.eup %2002 }
 0x162   : > { %v2540_v31 = vrot.slane %v2003_v36, %v2255_v47 }
 0x164   : > { %v2547_v35 = vmul.f32 %v2540_v31, %v2384_v57  ;;  %v2551_v17 = vmul.f32 %v2540_v31, %v2387_v8  ;;  %v2555_v39 = vmul.f32 %v2540_v31, %v2390_v9  ;;  %v2559_v40 = vmul.f32 %v2540_v31, %v2393_v10 }
 0x165   : > { %v2563_v42 = vmul.f32 %v2540_v31, %v2396_v13  ;;  %v2567_v47 = vmul.f32 %v2540_v31, %v2399_v16  ;;  %v2571_v57 = vmul.f32 %v2540_v31, %v2402_v19  ;;  %v2575_v8 = vmul.f32 %v2540_v31, %v2405_v0 }
 0x166   : > { %v2579_v9 = vmul.f32 %v2540_v31, %v2420_v6  ;;  %v2583_v10 = vmul.f32 %v2540_v31, %v2423_v11  ;;  %v2587_v13 = vmul.f32 %v2540_v31, %v2426_v14  ;;  %v2591_v16 = vmul.f32 %v2540_v31, %v2429_v1 }
 0x167   : > { %v2595_v19 = vmul.f32 %v2540_v31, %v2431_v5  ;;  %v2599_v0 = vmul.f32 %v2540_v31, %v2433_v22  ;;  %v2603_v6 = vmul.f32 %v2540_v31, %v2457_v23  ;;  %v2607_v11 = vmul.f32 %v2540_v31, %v2459_v26 }
 0x168   : > { %v2610_v14 = vmul.f32 0.5, %v2547_v35  ;;  %v2613_v1 = vmul.f32 0.5, %v2551_v17  ;;  %v2616_v5 = vmul.f32 0.5, %v2555_v39  ;;  %v2619_v22 = vmul.f32 0.5, %v2559_v40 }
 0x169   : > { %v2622_v41 = vmul.f32 0.5, %v2563_v42  ;;  %v2625_v23 = vmul.f32 0.5, %v2567_v47  ;;  %v2628_v26 = vmul.f32 0.5, %v2571_v57  ;;  %v2631_v43 = vmul.f32 0.5, %v2575_v8 }
 0x16a   : > { %v2634_v44 = vmul.f32 0.5, %v2579_v9  ;;  %v2637_v45 = vmul.f32 0.5, %v2583_v10  ;;  %v2640_v49 = vmul.f32 0.5, %v2587_v13  ;;  %v2643_v50 = vmul.f32 0.5, %v2591_v16 }
 0x16b   : > { %v808_v51 = vmul.f32 0.044715, %v2547_v35  ;;  %v809_v63 = vmul.f32 0.044715, %v2551_v17  ;;  %v2648_v18 = vmul.f32 0.5, %v2595_v19  ;;  %v2651_v29 = vmul.f32 0.5, %v2599_v0 }
 0x16c   : > { %3056 = vst [vmem:[#allocation9_spill] sm:$0xff] %v2643_v50  ;;  %v810_v46 = vmul.f32 0.044715, %v2555_v39  ;;  %v811_v52 = vmul.f32 0.044715, %v2559_v40  ;;  %v2656_v53 = vmul.f32 0.5, %v2603_v6  ;;  %v2664_v48 = vmul.f32 %v2540_v31, %v2408_v4 }
 0x16d   : > { %3057 = vst [vmem:[#allocation10_spill] sm:$0xff] %v2648_v18  ;;  %3058 = vst [vmem:[#allocation11_spill] sm:$0xff] %v2651_v29  ;;  %v2659_v30 = vmul.f32 0.5, %v2607_v11  ;;  %v812_v38 = vmul.f32 0.044715, %v2563_v42  ;;  %v2671_v20 = vmul.f32 %v2540_v31, %v2411_v58  ;;  %v824_v62 = vmul.f32 %v808_v51, %v2547_v35 }
 0x16e   : > { %3059 = vst [vmem:[#allocation12_spill] sm:$0xff] %v2656_v53  ;;  %v813_v3 = vmul.f32 0.044715, %v2567_v47  ;;  %v814_v55 = vmul.f32 0.044715, %v2571_v57  ;;  %v825_v28 = vmul.f32 %v809_v63, %v2551_v17  ;;  %v826_v15 = vmul.f32 %v810_v46, %v2555_v39 }
 0x16f   : > { %3060 = vst [vmem:[#allocation13_spill] sm:$0xff] %v2659_v30  ;;  %v815_v56 = vmul.f32 0.044715, %v2575_v8  ;;  %v816_v24 = vmul.f32 0.044715, %v2579_v9  ;;  %v827_v21 = vmul.f32 %v811_v52, %v2559_v40  ;;  %v828_v37 = vmul.f32 %v812_v38, %v2563_v42 }
 0x170   : > { %v817_v7 = vmul.f32 0.044715, %v2583_v10  ;;  %v818_v4 = vmul.f32 0.044715, %v2587_v13  ;;  %v819_v12 = vmul.f32 0.044715, %v2591_v16  ;;  %v829_v63 = vmul.f32 %v813_v3, %v2567_v47 }
 0x171   : > { %v820_v25 = vmul.f32 0.044715, %v2595_v19  ;;  %v821_v58 = vmul.f32 0.044715, %v2599_v0  ;;  %v822_v36 = vmul.f32 0.044715, %v2603_v6  ;;  %v830_v54 = vmul.f32 %v814_v55, %v2571_v57 }
 0x172   : > { %v823_v51 = vmul.f32 0.044715, %v2607_v11  ;;  %v831_v30 = vmul.f32 %v815_v56, %v2575_v8  ;;  %v832_v46 = vmul.f32 %v816_v24, %v2579_v9  ;;  %v833_v52 = vmul.f32 %v817_v7, %v2583_v10 }
 0x173   : > { %v840_v53 = vmul.f32 %v824_v62, %v2547_v35  ;;  %v841_v29 = vmul.f32 %v825_v28, %v2551_v17  ;;  %v834_v18 = vmul.f32 %v818_v4, %v2587_v13  ;;  %v835_v38 = vmul.f32 %v819_v12, %v2591_v16 }
 0x174   : > { %v842_v50 = vmul.f32 %v826_v15, %v2555_v39  ;;  %v843_v3 = vmul.f32 %v827_v21, %v2559_v40  ;;  %v836_v55 = vmul.f32 %v820_v25, %v2595_v19  ;;  %v837_v56 = vmul.f32 %v821_v58, %v2599_v0 }
 0x175   : > { %v838_v24 = vmul.f32 %v822_v36, %v2603_v6  ;;  %v844_v7 = vmul.f32 %v828_v37, %v2563_v42  ;;  %v839_v62 = vmul.f32 %v823_v51, %v2607_v11  ;;  %v845_v28 = vmul.f32 %v829_v63, %v2567_v47 }
 0x176   : > { %v846_v4 = vmul.f32 %v830_v54, %v2571_v57  ;;  %v847_v12 = vmul.f32 %v831_v30, %v2575_v8  ;;  %v848_v15 = vmul.f32 %v832_v46, %v2579_v9  ;;  %v849_v21 = vmul.f32 %v833_v52, %v2583_v10 }
 0x177   : > { %v856_v25 = vadd.f32 %v840_v53, %v2547_v35  ;;  %v857_v58 = vadd.f32 %v841_v29, %v2551_v17  ;;  %v850_v36 = vmul.f32 %v834_v18, %v2587_v13  ;;  %v851_v37 = vmul.f32 %v835_v38, %v2591_v16 }
 0x178   : > { %v858_v51 = vadd.f32 %v842_v50, %v2555_v39  ;;  %v859_v63 = vadd.f32 %v843_v3, %v2559_v40  ;;  %v852_v54 = vmul.f32 %v836_v55, %v2595_v19  ;;  %v853_v30 = vmul.f32 %v837_v56, %v2599_v0 }
 0x179   : > { %v854_v46 = vmul.f32 %v838_v24, %v2603_v6  ;;  %v860_v52 = vadd.f32 %v844_v7, %v2563_v42  ;;  %v855_v35 = vmul.f32 %v839_v62, %v2607_v11  ;;  %v861_v17 = vadd.f32 %v845_v28, %v2567_v47 }
 0x17a   : > { %v862_v18 = vadd.f32 %v846_v4, %v2571_v57  ;;  %v863_v29 = vadd.f32 %v847_v12, %v2575_v8  ;;  %v864_v39 = vadd.f32 %v848_v15, %v2579_v9  ;;  %v865_v40 = vadd.f32 %v849_v21, %v2583_v10 }
 0x17b   : > { %v872_v50 = vmul.f32 0.7978846, %v856_v25  ;;  %v873_v53 = vmul.f32 0.7978846, %v857_v58  ;;  %v866_v38 = vadd.f32 %v850_v36, %v2587_v13  ;;  %v867_v3 = vadd.f32 %v851_v37, %v2591_v16  ;;  %v3063_v37 = vld [vmem:[#allocation4_spill] sm:$0xff] }
 0x17c   : > { %v874_v55 = vmul.f32 0.7978846, %v858_v51  ;;  %v875_v42 = vmul.f32 0.7978846, %v859_v63  ;;  %v868_v56 = vadd.f32 %v852_v54, %v2595_v19  ;;  %v869_v47 = vadd.f32 %v853_v30, %v2599_v0  ;;  %v3066_v54 = vld [vmem:[#allocation7_spill] sm:$0xff] }
 0x17d   : > { %v876_v24 = vmul.f32 0.7978846, %v860_v52  ;;  %2004 = vtanh.f32 %v872_v50  ;;  %v870_v57 = vadd.f32 %v854_v46, %v2603_v6  ;;  %v871_v8 = vadd.f32 %v855_v35, %v2607_v11 }
 0x17e   : > { %v877_v9 = vmul.f32 0.7978846, %v861_v17  ;;  %2006 = vtanh.f32 %v873_v53  ;;  %v878_v10 = vmul.f32 0.7978846, %v862_v18  ;;  %v879_v7 = vmul.f32 0.7978846, %v863_v29 }
 0x17f   : > { %2008 = vtanh.f32 %v874_v55  ;;  %v2731_v13 = vmul.f32 %v2540_v31, %v2414_v60  ;;  %v880_v16 = vmul.f32 0.7978846, %v864_v39  ;;  %v881_v62 = vmul.f32 0.7978846, %v865_v40 }
 0x180   : > { %v882_v19 = vmul.f32 0.7978846, %v866_v38  ;;  %2010 = vtanh.f32 %v875_v42  ;;  %v883_v0 = vmul.f32 0.7978846, %v867_v3  ;;  %v884_v28 = vmul.f32 0.7978846, %v868_v56 }
 0x181   : > { %v885_v4 = vmul.f32 0.7978846, %v869_v47  ;;  %2012 = vtanh.f32 %v876_v24  ;;  %v886_v6 = vmul.f32 0.7978846, %v870_v57  ;;  %v887_v12 = vmul.f32 0.7978846, %v871_v8 }
 0x182   : > { %2014 = vtanh.f32 %v877_v9  ;;  %v2735_v11 = vmul.f32 %v2540_v31, %v2417_v2  ;;  %v2739_v60 = vmul.f32 %v2540_v31, %v2436_v59  ;;  %v2743_v15 = vmul.f32 %v2540_v31, %v2439_v61  ;;  %v3061_v61 = vld [vmem:[#allocation2_spill] sm:$0xff] }
 0x183   : > { %2016 = vtanh.f32 %v878_v10  ;;  %v2747_v21 = vmul.f32 %v2540_v31, %v2462_v27  ;;  %v2751_v25 = vmul.f32 %v2540_v31, %v2465_v32  ;;  %v2755_v2 = vmul.f32 %v2540_v31, %v2468_v33  ;;  %v3062_v27 = vld [vmem:[#allocation3_spill] sm:$0xff]  ;;  %v3064_v33 = vld [vmem:[#allocation5_spill] sm:$0xff] }
 0x184   : > { %2018 = vtanh.f32 %v879_v7  ;;  %v2759_v59 = vmul.f32 %v2540_v31, %v2471_v34  ;;  %v2763_v58 = vmul.f32 %v2540_v31, %v3061_v61  ;;  %v2767_v36 = vmul.f32 %v2540_v31, %v3062_v27  ;;  %v3065_v34 = vld [vmem:[#allocation6_spill] sm:$0xff] }
 0x185   : > { %2020 = vtanh.f32 %v880_v16  ;;  %v2771_v32 = vmul.f32 %v2540_v31, %v3063_v37  ;;  %v2775_v51 = vmul.f32 %v2540_v31, %v3064_v33  ;;  %v2779_v63 = vmul.f32 %v2540_v31, %v3065_v34 }
 0x186   : > { %2022 = vtanh.f32 %v881_v62  ;;  %v2783_v30 = vmul.f32 %v2540_v31, %v3066_v54  ;;  %v2786_v46 = vmul.f32 0.5, %v2664_v48  ;;  %v2789_v52 = vmul.f32 0.5, %v2671_v20 }
 0x187   : > { %2024 = vtanh.f32 %v882_v19  ;;  %v2792_v35 = vmul.f32 0.5, %v2731_v13  ;;  %v2795_v17 = vmul.f32 0.5, %v2735_v11  ;;  %v2798_v18 = vmul.f32 0.5, %v2739_v60 }
 0x188   : > { %2026 = vtanh.f32 %v883_v0  ;;  %v2801_v31 = vmul.f32 0.5, %v2743_v15  ;;  %v2804_v29 = vmul.f32 0.5, %v2747_v21  ;;  %v2807_v39 = vmul.f32 0.5, %v2751_v25 }
 0x189   : > { %3067 = vst [vmem:[#allocation2_spill] sm:$0xff] %v2795_v17  ;;  %3068 = vst [vmem:[#allocation3_spill] sm:$0xff] %v2798_v18  ;;  %2028 = vtanh.f32 %v884_v28  ;;  %v2810_v40 = vmul.f32 0.5, %v2755_v2  ;;  %v2813_v53 = vmul.f32 0.5, %v2759_v59  ;;  %v968_v38 = vmul.f32 0.044715, %v2664_v48 }
 0x18a   : > { %3069 = vst [vmem:[#allocation4_spill] sm:$0xff] %v2801_v31  ;;  %3070 = vst [vmem:[#allocation5_spill] sm:$0xff] %v2804_v29  ;;  %v2005_v50 = vpop.eup %2004  ;;  %2030 = vtanh.f32 %v885_v4  ;;  %v969_v3 = vmul.f32 0.044715, %v2671_v20  ;;  %v970_v56 = vmul.f32 0.044715, %v2731_v13 }
 0x18b   : > { %3071 = vst [vmem:[#allocation6_spill] sm:$0xff] %v2807_v39  ;;  %3072 = vst [vmem:[#allocation7_spill] sm:$0xff] %v2810_v40  ;;  %v2007_v55 = vpop.eup %2006  ;;  %2032 = vtanh.f32 %v886_v6  ;;  %v904_v42 = vadd.f32 1.0, %v2005_v50  ;;  %v971_v47 = vmul.f32 0.044715, %v2735_v11  ;;  %v3074_v31 = vld [vmem:[#allocation9_spill] sm:$0xff] }
 0x18c   : > { %3073 = vst [vmem:[#allocation14_spill] sm:$0xff] %v2813_v53  ;;  %v2009_v24 = vpop.eup %2008  ;;  %2034 = vtanh.f32 %v887_v12  ;;  %v905_v57 = vadd.f32 1.0, %v2007_v55  ;;  %v972_v8 = vmul.f32 0.044715, %v2739_v60  ;;  %v973_v9 = vmul.f32 0.044715, %v2743_v15 }
 0x18d   : > { %v2011_v10 = vpop.eup %2010  ;;  %v906_v7 = vadd.f32 1.0, %v2009_v24  ;;  %v2822_v16 = vmul.f32 %v904_v42, %v2610_v14  ;;  %v974_v62 = vmul.f32 0.044715, %v2747_v21  ;;  %v975_v19 = vmul.f32 0.044715, %v2751_v25  ;;  %v3075_v18 = vld [vmem:[#allocation10_spill] sm:$0xff] }
 0x18e   : > { %v2013_v0 = vpop.eup %2012  ;;  %v907_v28 = vadd.f32 1.0, %v2011_v10  ;;  %v2827_v4 = vmul.f32 %v905_v57, %v2613_v1  ;;  %v976_v6 = vmul.f32 0.044715, %v2755_v2  ;;  %v977_v12 = vmul.f32 0.044715, %v2759_v59 }
 0x18f   : > { %v2015_v61 = vpop.eup %2014  ;;  %v908_v27 = vadd.f32 1.0, %v2013_v0  ;;  %v2832_v37 = vmul.f32 %v906_v7, %v2616_v5  ;;  %v978_v14 = vmul.f32 0.044715, %v2763_v58  ;;  %v979_v33 = vmul.f32 0.044715, %v2767_v36 }
 0x190   : > { %v2017_v34 = vpop.eup %2016  ;;  %v909_v54 = vadd.f32 1.0, %v2015_v61  ;;  %v2837_v50 = vmul.f32 %v907_v28, %v2619_v22  ;;  %v980_v1 = vmul.f32 0.044715, %v2771_v32  ;;  %v981_v55 = vmul.f32 0.044715, %v2775_v51 }
 0x191   : > { %v2019_v42 = vpop.eup %2018  ;;  %v910_v24 = vadd.f32 1.0, %v2017_v34  ;;  %v2842_v57 = vmul.f32 %v908_v27, %v2622_v41  ;;  %v982_v5 = vmul.f32 0.044715, %v2779_v63  ;;  %v983_v10 = vmul.f32 0.044715, %v2783_v30 }
 0x192   : > { %v2021_v7 = vpop.eup %2020  ;;  %v911_v0 = vadd.f32 1.0, %v2019_v42  ;;  %v2847_v61 = vmul.f32 %v909_v54, %v2625_v23  ;;  %v984_v22 = vmul.f32 %v968_v38, %v2664_v48  ;;  %v985_v28 = vmul.f32 %v969_v3, %v2671_v20 }
 0x193   : > { %v2023_v53 = vpop.eup %2022  ;;  %v912_v40 = vadd.f32 1.0, %v2021_v7  ;;  %v2852_v34 = vmul.f32 %v910_v24, %v2628_v26  ;;  %v986_v41 = vmul.f32 %v970_v56, %v2731_v13  ;;  %v987_v27 = vmul.f32 %v971_v47, %v2735_v11 }
 0x194   : > { %v2025_v39 = vpop.eup %2024  ;;  %v913_v29 = vadd.f32 1.0, %v2023_v53  ;;  %v2857_v42 = vmul.f32 %v911_v0, %v2631_v43  ;;  %v988_v23 = vmul.f32 %v972_v8, %v2739_v60  ;;  %v989_v38 = vmul.f32 %v973_v9, %v2743_v15 }
 0x195   : > { %v2027_v54 = vpop.eup %2026  ;;  %v914_v3 = vadd.f32 1.0, %v2025_v39  ;;  %v2862_v7 = vmul.f32 %v912_v40, %v2634_v44  ;;  %v990_v26 = vmul.f32 %v974_v62, %v2747_v21  ;;  %v991_v56 = vmul.f32 %v975_v19, %v2751_v25 }
 0x196   : > { %v2029_v24 = vpop.eup %2028  ;;  %v915_v47 = vadd.f32 1.0, %v2027_v54  ;;  %v2867_v53 = vmul.f32 %v913_v29, %v2637_v45  ;;  %v992_v43 = vmul.f32 %v976_v6, %v2755_v2  ;;  %v993_v8 = vmul.f32 %v977_v12, %v2759_v59 }
 0x197   : > { %v2031_v0 = vpop.eup %2030  ;;  %v916_v9 = vadd.f32 1.0, %v2029_v24  ;;  %v2872_v39 = vmul.f32 %v914_v3, %v2640_v49  ;;  %v994_v44 = vmul.f32 %v978_v14, %v2763_v58  ;;  %v995_v40 = vmul.f32 %v979_v33, %v2767_v36  ;;  %v3076_v33 = vld [vmem:[#allocation11_spill] sm:$0xff] }
 0x198   : > { %v2033_v62 = vpop.eup %2032  ;;  %v917_v19 = vadd.f32 1.0, %v2031_v0  ;;  %v2877_v54 = vmul.f32 %v915_v47, %v3074_v31  ;;  %v996_v45 = vmul.f32 %v980_v1, %v2771_v32  ;;  %v997_v29 = vmul.f32 %v981_v55, %v2775_v51  ;;  %v3077_v1 = vld [vmem:[#allocation12_spill] sm:$0xff] }
 0x199   : > { %v2035_v6 = vpop.eup %2034  ;;  %v918_v12 = vadd.f32 1.0, %v2033_v62  ;;  %v2882_v24 = vmul.f32 %v916_v9, %v3075_v18  ;;  %v998_v49 = vmul.f32 %v982_v5, %v2779_v63  ;;  %v999_v14 = vmul.f32 %v983_v10, %v2783_v30  ;;  %v3078_v5 = vld [vmem:[#allocation13_spill] sm:$0xff] }
 0x19a   : > { %v919_v3 = vadd.f32 1.0, %v2035_v6  ;;  %v2887_v17 = vmul.f32 %v917_v19, %v3076_v33  ;;  %v1000_v31 = vmul.f32 %v984_v22, %v2664_v48  ;;  %v1001_v47 = vmul.f32 %v985_v28, %v2671_v20 }
 0x19b   : > { %v2892_v0 = vmul.f32 %v918_v12, %v3077_v1  ;;  %v1002_v55 = vmul.f32 %v986_v41, %v2731_v13  ;;  %v1003_v18 = vmul.f32 %v987_v27, %v2735_v11  ;;  %v1004_v9 = vmul.f32 %v988_v23, %v2739_v60 }
 0x19c   : > { %v2898_v62 = vmul.f32 %v919_v3, %v3078_v5  ;;  %v1005_v10 = vmul.f32 %v989_v38, %v2743_v15  ;;  %v1006_v19 = vmul.f32 %v990_v26, %v2747_v21  ;;  %v1007_v22 = vmul.f32 %v991_v56, %v2751_v25 }
 0x19d   : > { %v1008_v28 = vmul.f32 %v992_v43, %v2755_v2  ;;  %v1009_v6 = vmul.f32 %v993_v8, %v2759_v59  ;;  %v1010_v12 = vmul.f32 %v994_v44, %v2763_v58  ;;  %v1011_v41 = vmul.f32 %v995_v40, %v2767_v36 }
 0x19e   : > { %v1012_v27 = vmul.f32 %v996_v45, %v2771_v32  ;;  %v1013_v23 = vmul.f32 %v997_v29, %v2775_v51  ;;  %v1014_v3 = vmul.f32 %v998_v49, %v2779_v63  ;;  %v1015_v38 = vmul.f32 %v999_v14, %v2783_v30 }
 0x19f   : > { %v1016_v26 = vadd.f32 %v1000_v31, %v2664_v48  ;;  %v1017_v56 = vadd.f32 %v1001_v47, %v2671_v20  ;;  %v1018_v43 = vadd.f32 %v1002_v55, %v2731_v13  ;;  %v1019_v8 = vadd.f32 %v1003_v18, %v2735_v11 }
 0x1a0   : > { %v1020_v44 = vadd.f32 %v1004_v9, %v2739_v60  ;;  %v1021_v40 = vadd.f32 %v1005_v10, %v2743_v15  ;;  %v1022_v45 = vadd.f32 %v1006_v19, %v2747_v21  ;;  %v1023_v29 = vadd.f32 %v1007_v22, %v2751_v25 }
 0x1a1   : > { %v1024_v49 = vadd.f32 %v1008_v28, %v2755_v2  ;;  %v1025_v14 = vadd.f32 %v1009_v6, %v2759_v59  ;;  %v1026_v48 = vadd.f32 %v1010_v12, %v2763_v58  ;;  %v1027_v20 = vadd.f32 %v1011_v41, %v2767_v36 }
 0x1a2   : > { %v1028_v13 = vadd.f32 %v1012_v27, %v2771_v32  ;;  %v1029_v11 = vadd.f32 %v1013_v23, %v2775_v51  ;;  %v1030_v60 = vadd.f32 %v1014_v3, %v2779_v63  ;;  %v1031_v15 = vadd.f32 %v1015_v38, %v2783_v30 }
 0x1a3   : > { %v1032_v33 = vmul.f32 0.7978846, %v1016_v26  ;;  %v1033_v21 = vmul.f32 0.7978846, %v1017_v56  ;;  %v1034_v31 = vmul.f32 0.7978846, %v1018_v43  ;;  %v1112_v25 = vcombine.low %v2822_v16, %v2827_v4 }
 0x1a4   : > { %v1035_v2 = vmul.f32 0.7978846, %v1019_v8  ;;  %v1036_v59 = vmul.f32 0.7978846, %v1020_v44  ;;  %v1037_v47 = vmul.f32 0.7978846, %v1021_v40  ;;  %v1113_v1 = vcombine.high %v2822_v16, %v2827_v4 }
 0x1a5   : > { %v1038_v55 = vmul.f32 0.7978846, %v1022_v45  ;;  %v1039_v18 = vmul.f32 0.7978846, %v1023_v29  ;;  %v1040_v9 = vmul.f32 0.7978846, %v1024_v49  ;;  %2036 = vtanh.f32 %v1032_v33 }
 0x1a6   : > { %v1041_v5 = vmul.f32 0.7978846, %v1025_v14  ;;  %v1042_v10 = vmul.f32 0.7978846, %v1026_v48  ;;  %v1043_v19 = vmul.f32 0.7978846, %v1027_v20  ;;  %2038 = vtanh.f32 %v1033_v21 }
 0x1a7   : > { %v1044_v22 = vmul.f32 0.7978846, %v1028_v13  ;;  %v1045_v28 = vmul.f32 0.7978846, %v1029_v11  ;;  %v1046_v6 = vmul.f32 0.7978846, %v1030_v60  ;;  %2040 = vtanh.f32 %v1034_v31 }
 0x1a8   : > { %v1047_v12 = vmul.f32 0.7978846, %v1031_v15  ;;  %2042 = vtanh.f32 %v1035_v2  ;;  %v1114_v41 = vcombine.low %v2832_v37, %v2837_v50  ;;  %v1115_v16 = vcombine.high %v2832_v37, %v2837_v50 }
 0x1a9   : > { %2044 = vtanh.f32 %v1036_v59  ;;  %v1116_v4 = vcombine.low %v2842_v57, %v2847_v61  ;;  %v1117_v27 = vcombine.high %v2842_v57, %v2847_v61  ;;  %v1118_v23 = vcombine.low %v2852_v34, %v2857_v42 }
 0x1aa   : > { %2046 = vtanh.f32 %v1037_v47  ;;  %v1119_v3 = vcombine.high %v2852_v34, %v2857_v42  ;;  %v1120_v38 = vcombine.low %v2862_v7, %v2867_v53  ;;  %v1121_v37 = vcombine.high %v2862_v7, %v2867_v53  ;;  %v3079_v53 = vld [vmem:[#allocation8_spill] sm:$0xff] }
 0x1ab   : > { %2048 = vtanh.f32 %v1038_v55  ;;  %v1122_v50 = vcombine.low %v2872_v39, %v2877_v54  ;;  %v1123_v57 = vcombine.high %v2872_v39, %v2877_v54  ;;  %v1124_v61 = vcombine.low %v2882_v24, %v2887_v17 }
 0x1ac   : > { %2050 = vtanh.f32 %v1039_v18  ;;  %v1125_v34 = vcombine.high %v2882_v24, %v2887_v17  ;;  %v1126_v42 = vcombine.low %v2892_v0, %v2898_v62  ;;  %v1127_v7 = vcombine.high %v2892_v0, %v2898_v62 }
 0x1ad   : > { %2052 = vtanh.f32 %v1040_v9  ;;  %v1150_v26 = vrot.slane %v1112_v25, %v3079_v53  ;;  %v1157_v56 = vrot.slane %v1113_v1, %v3079_v53  ;;  %v1164_v39 = vrot.slane %v1114_v41, %v3079_v53 }
 0x1ae   : > { %2054 = vtanh.f32 %v1041_v5  ;;  %v1171_v54 = vrot.slane %v1115_v16, %v3079_v53  ;;  %v1178_v43 = vrot.slane %v1116_v4, %v3079_v53  ;;  %v1185_v17 = vrot.slane %v1117_v27, %v3079_v53 }
 0x1af   : > { %2056 = vtanh.f32 %v1042_v10  ;;  %v1192_v24 = vrot.slane %v1118_v23, %v3079_v53  ;;  %v1199_v0 = vrot.slane %v1119_v3, %v3079_v53  ;;  %v1206_v62 = vrot.slane %v1120_v38, %v3079_v53 }
 0x1b0   : > { %2058 = vtanh.f32 %v1043_v19  ;;  %v1213_v8 = vrot.slane %v1121_v37, %v3079_v53  ;;  %v1220_v44 = vrot.slane %v1122_v50, %v3079_v53  ;;  %v1227_v40 = vrot.slane %v1123_v57, %v3079_v53 }
 0x1b1   : > { %2060 = vtanh.f32 %v1044_v22  ;;  %v1234_v45 = vrot.slane %v1124_v61, %v3079_v53  ;;  %v1241_v29 = vrot.slane %v1125_v34, %v3079_v53  ;;  %v1248_v49 = vrot.slane %v1126_v42, %v3079_v53  ;;  %v3082_v61 = vld [vmem:[#allocation4_spill] sm:$0xff] }
 0x1b2   : > { %v2037_v14 = vpop.eup %2036  ;;  %2062 = vtanh.f32 %v1045_v28  ;;  %v1255_v48 = vrot.slane %v1127_v7, %v3079_v53  ;;  %v1832_v20 = vpack.c.bf16 %v1157_v56, %v1150_v26  ;;  %v1837_v13 = vpack.c.bf16 %v1171_v54, %v1164_v39  ;;  %v3083_v56 = vld [vmem:[#allocation5_spill] sm:$0xff] }
 0x1b3   : > { %v2039_v11 = vpop.eup %2038  ;;  %2064 = vtanh.f32 %v1046_v6  ;;  %v1064_v60 = vadd.f32 1.0, %v2037_v14  ;;  %v1842_v15 = vpack.c.bf16 %v1185_v17, %v1178_v43  ;;  %v1847_v33 = vpack.c.bf16 %v1199_v0, %v1192_v24 }
 0x1b4   : > { %v2041_v21 = vpop.eup %2040  ;;  %2066 = vtanh.f32 %v1047_v12  ;;  %v1065_v31 = vadd.f32 1.0, %v2039_v11  ;;  %1833 = vst [vmem:[%s2975_s19] sm:$0xff] %v1832_v20   ;;  %1909 = vst [vmem:[%s2975_s19 + $0x10] sm:$0xff] %v1837_v13   ;;  %v1852_v25 = vpack.c.bf16 %v1213_v8, %v1206_v62  ;;  %v1857_v2 = vpack.c.bf16 %v1227_v40, %v1220_v44  ;;  %v3085_v40 = vld [vmem:[#allocation7_spill] sm:$0xff]  ;;  %v3086_v20 = vld [vmem:[#allocation14_spill] sm:$0xff] }
 0x1b5   : > { %v2043_v59 = vpop.eup %2042  ;;  %v1066_v47 = vadd.f32 1.0, %v2041_v21  ;;  %v1080_v1 = vmul.f32 %v1064_v60, %v2786_v46  ;;  %1910 = vst [vmem:[%s2975_s19 + $0x20] sm:$0xff] %v1842_v15   ;;  %1911 = vst [vmem:[%s2975_s19 + $0x30] sm:$0xff] %v1847_v33   ;;  %v1862_v55 = vpack.c.bf16 %v1241_v29, %v1234_v45  ;;  %v1867_v18 = vpack.c.bf16 %v1255_v48, %v1248_v49 }
 0x1b6   : > { %v2045_v9 = vpop.eup %2044  ;;  %v962_v5 = vmul.f32 0.5, %v2763_v58  ;;  %v963_v10 = vmul.f32 0.5, %v2767_v36  ;;  %v1067_v19 = vadd.f32 1.0, %v2043_v59  ;;  %v1081_v22 = vmul.f32 %v1065_v31, %v2789_v52  ;;  %1912 = vst [vmem:[%s2975_s19 + $0x40] sm:$0xff] %v1852_v25   ;;  %1913 = vst [vmem:[%s2975_s19 + $0x50] sm:$0xff] %v1857_v2   ;;  %v3080_v58 = vld [vmem:[#allocation2_spill] sm:$0xff] }
 0x1b7   : > { %v2047_v28 = vpop.eup %2046  ;;  %v964_v6 = vmul.f32 0.5, %v2771_v32  ;;  %v965_v46 = vmul.f32 0.5, %v2775_v51  ;;  %v1068_v12 = vadd.f32 1.0, %v2045_v9  ;;  %v1082_v41 = vmul.f32 %v1066_v47, %v2792_v35  ;;  %1914 = vst [vmem:[%s2975_s19 + $0x60] sm:$0xff] %v1862_v55   ;;  %1915 = vst [vmem:[%s2975_s19 + $0x70] sm:$0xff] %v1867_v18   ;;  %v3081_v32 = vld [vmem:[#allocation3_spill] sm:$0xff] }
 0x1b8   : > { %v2049_v16 = vpop.eup %2048  ;;  %v1069_v4 = vadd.f32 1.0, %v2047_v28  ;;  %v1083_v27 = vmul.f32 %v1067_v19, %v3080_v58  ;;  %v1352_v36 = vcombine.low %v1080_v1, %v1081_v22  ;;  %v1353_v23 = vcombine.high %v1080_v1, %v1081_v22 }
 0x1b9   : > { %v2051_v3 = vpop.eup %2050  ;;  %v966_v52 = vmul.f32 0.5, %v2779_v63  ;;  %v967_v38 = vmul.f32 0.5, %v2783_v30  ;;  %v1070_v37 = vadd.f32 1.0, %v2049_v16  ;;  %v1084_v50 = vmul.f32 %v1068_v12, %v3081_v32  ;;  %v3084_v30 = vld [vmem:[#allocation6_spill] sm:$0xff] }
 0x1ba   : > { %v2053_v51 = vpop.eup %2052  ;;  %v1071_v57 = vadd.f32 1.0, %v2051_v3  ;;  %v1085_v35 = vmul.f32 %v1069_v4, %v3082_v61  ;;  %v1354_v34 = vcombine.low %v1082_v41, %v1083_v27  ;;  %v1355_v42 = vcombine.high %v1082_v41, %v1083_v27 }
 0x1bb   : > { %v2055_v7 = vpop.eup %2054  ;;  %v1072_v26 = vadd.f32 1.0, %v2053_v51  ;;  %v1086_v39 = vmul.f32 %v1070_v37, %v3083_v56  ;;  %v1390_v54 = vrot.slane %v1352_v36, %v3079_v53  ;;  %v1397_v43 = vrot.slane %v1353_v23, %v3079_v53 }
 0x1bc   : > { %v2057_v63 = vpop.eup %2056  ;;  %v1073_v17 = vadd.f32 1.0, %v2055_v7  ;;  %v1087_v24 = vmul.f32 %v1071_v57, %v3084_v30  ;;  %v1356_v0 = vcombine.low %v1084_v50, %v1085_v35  ;;  %v1357_v62 = vcombine.high %v1084_v50, %v1085_v35 }
 0x1bd   : > { %v2059_v8 = vpop.eup %2058  ;;  %v1074_v44 = vadd.f32 1.0, %v2057_v63  ;;  %v1088_v45 = vmul.f32 %v1072_v26, %v3085_v40  ;;  %v1404_v29 = vrot.slane %v1354_v34, %v3079_v53  ;;  %v1411_v49 = vrot.slane %v1355_v42, %v3079_v53 }
 0x1be   : > { %v2061_v14 = vpop.eup %2060  ;;  %v1075_v48 = vadd.f32 1.0, %v2059_v8  ;;  %v1089_v13 = vmul.f32 %v1073_v17, %v3086_v20  ;;  %v1358_v11 = vcombine.low %v1086_v39, %v1087_v24  ;;  %v1359_v60 = vcombine.high %v1086_v39, %v1087_v24 }
 0x1bf   : > { %v2063_v15 = vpop.eup %2062  ;;  %v1076_v33 = vadd.f32 1.0, %v2061_v14  ;;  %v1090_v21 = vmul.f32 %v1074_v44, %v962_v5  ;;  %v1418_v31 = vrot.slane %v1356_v0, %v3079_v53  ;;  %v1425_v25 = vrot.slane %v1357_v62, %v3079_v53 }
 0x1c0   : > { %v2065_v2 = vpop.eup %2064  ;;  %v1077_v59 = vadd.f32 1.0, %v2063_v15  ;;  %v1091_v47 = vmul.f32 %v1075_v48, %v963_v10  ;;  %v1360_v1 = vcombine.low %v1088_v45, %v1089_v13  ;;  %v1361_v55 = vcombine.high %v1088_v45, %v1089_v13 }
 0x1c1   : > { %v2067_v18 = vpop.eup %2066  ;;  %v1078_v9 = vadd.f32 1.0, %v2065_v2  ;;  %v1092_v19 = vmul.f32 %v1076_v33, %v964_v6  ;;  %v1432_v22 = vrot.slane %v1358_v11, %v3079_v53  ;;  %v1439_v28 = vrot.slane %v1359_v60, %v3079_v53 }
 0x1c2   : > { %v1079_v12 = vadd.f32 1.0, %v2067_v18  ;;  %v1093_v41 = vmul.f32 %v1077_v59, %v965_v46  ;;  %v1362_v5 = vcombine.low %v1090_v21, %v1091_v47  ;;  %v1363_v16 = vcombine.high %v1090_v21, %v1091_v47 }
 0x1c3   : > { %v1094_v4 = vmul.f32 %v1078_v9, %v966_v52  ;;  %v1446_v58 = vrot.slane %v1360_v1, %v3079_v53  ;;  %v1453_v10 = vrot.slane %v1361_v55, %v3079_v53  ;;  %v1872_v27 = vpack.c.bf16 %v1397_v43, %v1390_v54 }
 0x1c4   : > { %v1095_v36 = vmul.f32 %v1079_v12, %v967_v38  ;;  %v1364_v6 = vcombine.low %v1092_v19, %v1093_v41  ;;  %v1365_v23 = vcombine.high %v1092_v19, %v1093_v41  ;;  %v1460_v3 = vrot.slane %v1362_v5, %v3079_v53 }
 0x1c5   : > { %v1467_v37 = vrot.slane %v1363_v16, %v3079_v53  ;;  %1916 = vst [vmem:[%s2975_s19 + $0x8] sm:$0xff] %v1872_v27   ;;  %v1877_v46 = vpack.c.bf16 %v1411_v49, %v1404_v29  ;;  %v1882_v52 = vpack.c.bf16 %v1425_v25, %v1418_v31  ;;  %v1887_v32 = vpack.c.bf16 %v1439_v28, %v1432_v22 }
 0x1c6   : > { %v1366_v50 = vcombine.low %v1094_v4, %v1095_v36  ;;  %v1367_v51 = vcombine.high %v1094_v4, %v1095_v36  ;;  %v1474_v57 = vrot.slane %v1364_v6, %v3079_v53  ;;  %v1481_v38 = vrot.slane %v1365_v23, %v3079_v53 }
 0x1c7   : > { %1917 = vst [vmem:[%s2975_s19 + $0x18] sm:$0xff] %v1877_v46   ;;  %1918 = vst [vmem:[%s2975_s19 + $0x28] sm:$0xff] %v1882_v52   ;;  %v1892_v61 = vpack.c.bf16 %v1453_v10, %v1446_v58  ;;  %v1897_v35 = vpack.c.bf16 %v1467_v37, %v1460_v3 }
 0x1c8   : > { %1919 = vst [vmem:[%s2975_s19 + $0x38] sm:$0xff] %v1887_v32   ;;  %v1488_v34 = vrot.slane %v1366_v50, %v3079_v53  ;;  %v1495_v42 = vrot.slane %v1367_v51, %v3079_v53  ;;  %v1902_v7 = vpack.c.bf16 %v1481_v38, %v1474_v57 }
 0x1c9   : > { %1920 = vst [vmem:[%s2975_s19 + $0x48] sm:$0xff] %v1892_v61   ;;  %1921 = vst [vmem:[%s2975_s19 + $0x58] sm:$0xff] %v1897_v35  }
 0x1ca   : > { %1922 = vst [vmem:[%s2975_s19 + $0x68] sm:$0xff] %v1902_v7   ;;  %v1907_v26 = vpack.c.bf16 %v1495_v42, %v1488_v34 }
 0x1cc   : > { %1923 = vst [vmem:[%s2975_s19 + $0x78] sm:$0xff] %v1907_v26  }
 0x1cd PF: > { %s13_s14 = sadd.s32 1, %s2090_s14   ;;  %s3087_s12 = smov %s2086_s13 }
 0x1ce   : > { %p10_p5 = scmp.ge.s32.totalorder %s13_s14, 4   ;;  %s3088_s13 = smov %s3090_s15 }
 0x1d0   :  { %12 = sbr.rel (!%p10_p5) target bundleno = 2 (0x2), region = 70 }

// kernel: ginka_decoder_forward.7
= control target key start
LH: loop header
LB: loop body
LE: loop exit
PB: predicated region body
PF: predicated region fallthrough
CT: control target
= control target key end

     0   :  { %s2789_s3 = inlined_call_operand.vmem [shape: bf16[128,128], index: 3, kind: input, shape index: {}]   ;;  %s2790_s2 = inlined_call_operand.vmem [shape: bf16[128,128], index: 2, kind: input, shape index: {}]   ;;  %s2791_s1 = inlined_call_operand.vmem [shape: bf16[512,128], index: 1, kind: input, shape index: {}]   ;;  %s2792_s0 = inlined_call_operand.vmem [shape: bf16[512,128], index: 0, kind: input, shape index: {}]   ;;  %s2793_s4 = inlined_call_operand.vmem [shape: f32[1,128], index: 4, kind: input, shape index: {}]   ;;  %s2794_s5 = inlined_call_operand.vmem [shape: bf16[512,128], index: 5, kind: output, shape index: {}]  }
   0x1   :  { %v2274_v0 = vld [vmem:[%s2789_s3 + $0x38] sm:$0xff]   ;;  %v2276_v2 = vld [vmem:[%s2789_s3 + $0x30] sm:$0xff]   ;;  %v2278_v4 = vld [vmem:[%s2789_s3 + $0x28] sm:$0xff]  }
   0x2   :  { %v2275_v1 = vld [vmem:[%s2790_s2 + $0x38] sm:$0xff]   ;;  %2114 = vmatprep.subr.bf16.mxu0 %v2274_v0  ;;  %v2277_v3 = vld [vmem:[%s2790_s2 + $0x30] sm:$0xff]   ;;  %v2279_v5 = vld [vmem:[%s2790_s2 + $0x28] sm:$0xff]  }
   0x3   :  { %2194 = vmatprep.subr.bf16.mxu1 %v2275_v1  ;;  %2115 = vmatpush3.bf16.msra.mxu0 %v2274_v0  ;;  %v2280_v6 = vld [vmem:[%s2789_s3 + $0x20] sm:$0xff]   ;;  %v2282_v8 = vld [vmem:[%s2789_s3 + $0x18] sm:$0xff]   ;;  %v2284_v10 = vld [vmem:[%s2789_s3 + $0x10] sm:$0xff]  }
   0x4   :  { %2195 = vmatpush3.bf16.msra.mxu1 %v2275_v1  ;;  %2116 = vmatprep.subr.bf16.mxu0 %v2276_v2  ;;  %v2281_v7 = vld [vmem:[%s2790_s2 + $0x20] sm:$0xff]   ;;  %v2283_v9 = vld [vmem:[%s2790_s2 + $0x18] sm:$0xff]   ;;  %v2285_v11 = vld [vmem:[%s2790_s2 + $0x10] sm:$0xff]  }
   0x5   :  { %2196 = vmatprep.subr.bf16.mxu1 %v2277_v3  ;;  %v2290_v12 = vld [vmem:[%s2791_s1] sm:$0xff]   ;;  %v2286_v14 = vld [vmem:[%s2789_s3 + $0x8] sm:$0xff]   ;;  %v2294_v20 = vld [vmem:[%s2791_s1 + $0x10] sm:$0xff]  }
   0x6   :  { %v2291_v13 = vld [vmem:[%s2792_s0] sm:$0xff]   ;;  %2130 = vmatprep.mubr.bf16.mxu0 %v2290_v12  ;;  %v2287_v15 = vld [vmem:[%s2790_s2 + $0x8] sm:$0xff]   ;;  %v2295_v21 = vld [vmem:[%s2792_s0 + $0x10] sm:$0xff]  }
   0x7   :  { %2117 = vmatpush3.bf16.msra.mxu0 %v2276_v2  ;;  %2210 = vmatprep.mubr.bf16.mxu1 %v2291_v13  ;;  %v2288_v16 = vld [vmem:[%s2789_s3] sm:$0xff]   ;;  %v2292_v18 = vld [vmem:[%s2791_s1 + $0x8] sm:$0xff]   ;;  %v2296_v22 = vld [vmem:[%s2791_s1 + $0x18] sm:$0xff]  }
   0x8   :  { %2197 = vmatpush3.bf16.msra.mxu1 %v2277_v3  ;;  %2118 = vmatprep.subr.bf16.mxu0 %v2278_v4  ;;  %v2289_v17 = vld [vmem:[%s2790_s2] sm:$0xff]   ;;  %v2293_v19 = vld [vmem:[%s2792_s0 + $0x8] sm:$0xff]   ;;  %v2297_v23 = vld [vmem:[%s2792_s0 + $0x18] sm:$0xff]  }
   0x9   :  { %2198 = vmatprep.subr.bf16.mxu1 %v2279_v5  ;;  %v2298_v24 = vld [vmem:[%s2791_s1 + $0x20] sm:$0xff]   ;;  %v2300_v26 = vld [vmem:[%s2791_s1 + $0x28] sm:$0xff]   ;;  %v2302_v28 = vld [vmem:[%s2791_s1 + $0x30] sm:$0xff]  }
   0xa   :  { %v2299_v25 = vld [vmem:[%s2792_s0 + $0x20] sm:$0xff]   ;;  %v2301_v27 = vld [vmem:[%s2792_s0 + $0x28] sm:$0xff]   ;;  %v2303_v29 = vld [vmem:[%s2792_s0 + $0x30] sm:$0xff]  }
   0xb   :  { %2119 = vmatpush3.bf16.msra.mxu0 %v2278_v4  ;;  %v2304_v30 = vld [vmem:[%s2791_s1 + $0x38] sm:$0xff]   ;;  %v2306_v32 = vld [vmem:[%s2791_s1 + $0x40] sm:$0xff]   ;;  %v2308_v34 = vld [vmem:[%s2791_s1 + $0x48] sm:$0xff]  }
   0xc   :  { %2199 = vmatpush3.bf16.msra.mxu1 %v2279_v5  ;;  %2120 = vmatprep.subr.bf16.mxu0 %v2280_v6  ;;  %v2305_v31 = vld [vmem:[%s2792_s0 + $0x38] sm:$0xff]   ;;  %v2307_v33 = vld [vmem:[%s2792_s0 + $0x40] sm:$0xff]   ;;  %v2309_v35 = vld [vmem:[%s2792_s0 + $0x48] sm:$0xff]  }
   0xd   :  { %2200 = vmatprep.subr.bf16.mxu1 %v2281_v7  ;;  %v2310_v36 = vld [vmem:[%s2791_s1 + $0x50] sm:$0xff]   ;;  %v2312_v38 = vld [vmem:[%s2791_s1 + $0x58] sm:$0xff]   ;;  %v2314_v40 = vld [vmem:[%s2791_s1 + $0x60] sm:$0xff]  }
   0xe   :  { %v2311_v37 = vld [vmem:[%s2792_s0 + $0x50] sm:$0xff]   ;;  %v2313_v39 = vld [vmem:[%s2792_s0 + $0x58] sm:$0xff]   ;;  %v2315_v41 = vld [vmem:[%s2792_s0 + $0x60] sm:$0xff]  }
   0xf   :  { %2121 = vmatpush3.bf16.msra.mxu0 %v2280_v6  ;;  %v2316_v42 = vld [vmem:[%s2791_s1 + $0x68] sm:$0xff]   ;;  %v2318_v44 = vld [vmem:[%s2791_s1 + $0x70] sm:$0xff]   ;;  %v2320_v46 = vld [vmem:[%s2791_s1 + $0x78] sm:$0xff]  }
  0x10   :  { %2201 = vmatpush3.bf16.msra.mxu1 %v2281_v7  ;;  %2122 = vmatprep.subr.bf16.mxu0 %v2282_v8  ;;  %v2317_v43 = vld [vmem:[%s2792_s0 + $0x68] sm:$0xff]   ;;  %v2319_v45 = vld [vmem:[%s2792_s0 + $0x70] sm:$0xff]   ;;  %v2321_v47 = vld [vmem:[%s2792_s0 + $0x78] sm:$0xff]  }
  0x11   :  { %2202 = vmatprep.subr.bf16.mxu1 %v2283_v9  ;;  %v2322_v48 = vld [vmem:[%s2791_s1 + $0x80] sm:$0xff]   ;;  %v2324_v50 = vld [vmem:[%s2791_s1 + $0x88] sm:$0xff]   ;;  %v2326_v52 = vld [vmem:[%s2791_s1 + $0x90] sm:$0xff]  }
  0x12   :  { %v2323_v49 = vld [vmem:[%s2792_s0 + $0x80] sm:$0xff]   ;;  %v2325_v51 = vld [vmem:[%s2792_s0 + $0x88] sm:$0xff]   ;;  %v2327_v53 = vld [vmem:[%s2792_s0 + $0x90] sm:$0xff]  }
  0x13   :  { %2123 = vmatpush3.bf16.msra.mxu0 %v2282_v8  ;;  %v2328_v54 = vld [vmem:[%s2791_s1 + $0x98] sm:$0xff]   ;;  %v2330_v56 = vld [vmem:[%s2791_s1 + $0xa0] sm:$0xff]   ;;  %v2332_v58 = vld [vmem:[%s2791_s1 + $0xa8] sm:$0xff]  }
  0x14   :  { %2203 = vmatpush3.bf16.msra.mxu1 %v2283_v9  ;;  %2124 = vmatprep.subr.bf16.mxu0 %v2284_v10  ;;  %v2329_v55 = vld [vmem:[%s2792_s0 + $0x98] sm:$0xff]   ;;  %v2331_v57 = vld [vmem:[%s2792_s0 + $0xa0] sm:$0xff]   ;;  %v2333_v59 = vld [vmem:[%s2792_s0 + $0xa8] sm:$0xff]  }
  0x15   :  { %2204 = vmatprep.subr.bf16.mxu1 %v2285_v11  ;;  %v2334_v60 = vld [vmem:[%s2791_s1 + $0xb0] sm:$0xff]   ;;  %v2336_v62 = vld [vmem:[%s2791_s1 + $0xb8] sm:$0xff]   ;;  %v2338_v0 = vld [vmem:[%s2791_s1 + $0xc0] sm:$0xff]  }
  0x16   :  { %v2335_v61 = vld [vmem:[%s2792_s0 + $0xb0] sm:$0xff]   ;;  %v2337_v63 = vld [vmem:[%s2792_s0 + $0xb8] sm:$0xff]   ;;  %v2339_v1 = vld [vmem:[%s2792_s0 + $0xc0] sm:$0xff]  }
  0x17   :  { %2125 = vmatpush3.bf16.msra.mxu0 %v2284_v10  ;;  %v2340_v2 = vld [vmem:[%s2791_s1 + $0xc8] sm:$0xff]   ;;  %v2342_v4 = vld [vmem:[%s2791_s1 + $0xd0] sm:$0xff]   ;;  %v2344_v6 = vld [vmem:[%s2791_s1 + $0xd8] sm:$0xff]  }
  0x18   :  { %2205 = vmatpush3.bf16.msra.mxu1 %v2285_v11  ;;  %2126 = vmatprep.subr.bf16.mxu0 %v2286_v14  ;;  %v2341_v3 = vld [vmem:[%s2792_s0 + $0xc8] sm:$0xff]   ;;  %v2343_v5 = vld [vmem:[%s2792_s0 + $0xd0] sm:$0xff]   ;;  %v2345_v7 = vld [vmem:[%s2792_s0 + $0xd8] sm:$0xff]  }
  0x19   :  { %2206 = vmatprep.subr.bf16.mxu1 %v2287_v15  ;;  %v2346_v8 = vld [vmem:[%s2791_s1 + $0xe0] sm:$0xff]   ;;  %v2348_v10 = vld [vmem:[%s2791_s1 + $0xe8] sm:$0xff]   ;;  %v2350_v12 = vld [vmem:[%s2791_s1 + $0xf0] sm:$0xff]  }
  0x1a   :  { %v2347_v9 = vld [vmem:[%s2792_s0 + $0xe0] sm:$0xff]   ;;  %v2349_v11 = vld [vmem:[%s2792_s0 + $0xe8] sm:$0xff]   ;;  %v2351_v13 = vld [vmem:[%s2792_s0 + $0xf0] sm:$0xff]  }
  0x1b   :  { %2127 = vmatpush3.bf16.msra.mxu0 %v2286_v14  ;;  %v2352_v14 = vld [vmem:[%s2791_s1 + $0xf8] sm:$0xff]  }
  0x1c   :  { %2207 = vmatpush3.bf16.msra.mxu1 %v2287_v15  ;;  %2128 = vmatprep.subr.bf16.mxu0 %v2288_v16  ;;  %v2353_v15 = vld [vmem:[%s2792_s0 + $0xf8] sm:$0xff]  }
  0x1d   :  { %2208 = vmatprep.subr.bf16.mxu1 %v2289_v17 }
  0x1f   :  { %2129 = vmatpush3.bf16.msra.mxu0 %v2288_v16 }
  0x20   :  { %2209 = vmatpush3.bf16.msra.mxu1 %v2289_v17 }
  0x22   :  { %2131 = vmatmul.mubr.bf16.vlgmr.msra.gmra.mxu0 %v2292_v18 }
  0x23   :  { %2211 = vmatmul.mubr.bf16.vlgmr.msra.gmra.mxu1 %v2293_v19  ;;  %2134 = vmatprep.mubr.bf16.mxu0 %v2294_v20 }
  0x24   :  { %2214 = vmatprep.mubr.bf16.mxu1 %v2295_v21 }
  0x2a   :  { %2135 = vmatmul.mubr.bf16.gmra.mxu0 %v2296_v22  ;;  %v2627_v22 = vld [vmem:[%s2793_s4] ss:$0 sm:$0xff] }
  0x2b   :  { %2215 = vmatmul.mubr.bf16.gmra.mxu1 %v2297_v23  ;;  %2138 = vmatprep.mubr.bf16.mxu0 %v2298_v24 }
  0x2c   :  { %2218 = vmatprep.mubr.bf16.mxu1 %v2299_v25 }
  0x32   :  { %2139 = vmatmul.mubr.bf16.gmra.mxu0 %v2300_v26 }
  0x33   :  { %2219 = vmatmul.mubr.bf16.gmra.mxu1 %v2301_v27  ;;  %2142 = vmatprep.mubr.bf16.mxu0 %v2302_v28 }
  0x34   :  { %2222 = vmatprep.mubr.bf16.mxu1 %v2303_v29 }
  0x3a   :  { %2143 = vmatmul.mubr.bf16.gmra.mxu0 %v2304_v30 }
  0x3b   :  { %2223 = vmatmul.mubr.bf16.gmra.mxu1 %v2305_v31  ;;  %2146 = vmatprep.mubr.bf16.mxu0 %v2306_v32 }
  0x3c   :  { %2226 = vmatprep.mubr.bf16.mxu1 %v2307_v33 }
  0x42   :  { %2147 = vmatmul.mubr.bf16.gmra.mxu0 %v2308_v34 }
  0x43   :  { %2227 = vmatmul.mubr.bf16.gmra.mxu1 %v2309_v35  ;;  %2150 = vmatprep.mubr.bf16.mxu0 %v2310_v36 }
  0x44   :  { %2230 = vmatprep.mubr.bf16.mxu1 %v2311_v37 }
  0x4a   :  { %2151 = vmatmul.mubr.bf16.gmra.mxu0 %v2312_v38 }
  0x4b   :  { %2231 = vmatmul.mubr.bf16.gmra.mxu1 %v2313_v39  ;;  %2154 = vmatprep.mubr.bf16.mxu0 %v2314_v40 }
  0x4c   :  { %2234 = vmatprep.mubr.bf16.mxu1 %v2315_v41 }
  0x52   :  { %2155 = vmatmul.mubr.bf16.gmra.mxu0 %v2316_v42 }
  0x53   :  { %2235 = vmatmul.mubr.bf16.gmra.mxu1 %v2317_v43  ;;  %2158 = vmatprep.mubr.bf16.mxu0 %v2318_v44 }
  0x54   :  { %2238 = vmatprep.mubr.bf16.mxu1 %v2319_v45 }
  0x5a   :  { %2159 = vmatmul.mubr.bf16.gmra.mxu0 %v2320_v46 }
  0x5b   :  { %2239 = vmatmul.mubr.bf16.gmra.mxu1 %v2321_v47  ;;  %2162 = vmatprep.mubr.bf16.mxu0 %v2322_v48 }
  0x5c   :  { %2242 = vmatprep.mubr.bf16.mxu1 %v2323_v49 }
  0x62   :  { %2163 = vmatmul.mubr.bf16.gmra.mxu0 %v2324_v50 }
  0x63   :  { %2243 = vmatmul.mubr.bf16.gmra.mxu1 %v2325_v51  ;;  %2166 = vmatprep.mubr.bf16.mxu0 %v2326_v52 }
  0x64   :  { %2246 = vmatprep.mubr.bf16.mxu1 %v2327_v53 }
  0x6a   :  { %2167 = vmatmul.mubr.bf16.gmra.mxu0 %v2328_v54 }
  0x6b   :  { %2247 = vmatmul.mubr.bf16.gmra.mxu1 %v2329_v55  ;;  %2170 = vmatprep.mubr.bf16.mxu0 %v2330_v56 }
  0x6c   :  { %2250 = vmatprep.mubr.bf16.mxu1 %v2331_v57 }
  0x72   :  { %2171 = vmatmul.mubr.bf16.gmra.mxu0 %v2332_v58 }
  0x73   :  { %2251 = vmatmul.mubr.bf16.gmra.mxu1 %v2333_v59  ;;  %2174 = vmatprep.mubr.bf16.mxu0 %v2334_v60 }
  0x74   :  { %2254 = vmatprep.mubr.bf16.mxu1 %v2335_v61 }
  0x7a   :  { %2175 = vmatmul.mubr.bf16.gmra.mxu0 %v2336_v62 }
  0x7b   :  { %2255 = vmatmul.mubr.bf16.gmra.mxu1 %v2337_v63  ;;  %2178 = vmatprep.mubr.bf16.mxu0 %v2338_v0 }
  0x7c   :  { %2258 = vmatprep.mubr.bf16.mxu1 %v2339_v1 }
  0x82   :  { %2179 = vmatmul.mubr.bf16.gmra.mxu0 %v2340_v2 }
  0x83   :  { %2259 = vmatmul.mubr.bf16.gmra.mxu1 %v2341_v3  ;;  %2182 = vmatprep.mubr.bf16.mxu0 %v2342_v4 }
  0x84   :  { %2262 = vmatprep.mubr.bf16.mxu1 %v2343_v5 }
  0x8a   :  { %2183 = vmatmul.mubr.bf16.gmra.mxu0 %v2344_v6 }
  0x8b   :  { %2263 = vmatmul.mubr.bf16.gmra.mxu1 %v2345_v7  ;;  %2186 = vmatprep.mubr.bf16.mxu0 %v2346_v8 }
  0x8c   :  { %2266 = vmatprep.mubr.bf16.mxu1 %v2347_v9 }
  0x92   :  { %2187 = vmatmul.mubr.bf16.gmra.mxu0 %v2348_v10 }
  0x93   :  { %2267 = vmatmul.mubr.bf16.gmra.mxu1 %v2349_v11  ;;  %2190 = vmatprep.mubr.bf16.mxu0 %v2350_v12 }
  0x94   :  { %2270 = vmatprep.mubr.bf16.mxu1 %v2351_v13 }
  0x9a   :  { %2191 = vmatmul.mubr.bf16.gmra.mxu0 %v2352_v14 }
  0x9b   :  { %2271 = vmatmul.mubr.bf16.gmra.mxu1 %v2353_v15 }
  0xe2   :  { %v2132_v16 = vpop.f32.mrf.mxu0 }
  0xe3   :  { %v2212_v17 = vpop.f32.mrf.mxu1 }
  0xe4   :  { %v455_v18 = vpop.f32.mrf.mxu0  ;;  %v993_v20 = vadd.f32 %v2212_v17, %v2132_v16 }
  0xe5   :  { %v984_v19 = vpop.f32.mrf.mxu1 }
  0xe6   :  { %v2133_v21 = vpop.f32.mrf.mxu0  ;;  %v985_v24 = vadd.f32 %v984_v19, %v455_v18  ;;  %v1248_v28 = vadd.f32 %v2627_v22, %v993_v20 }
  0xe7   :  { %v2213_v23 = vpop.f32.mrf.mxu1 }
  0xe8   :  { %v996_v25 = vadd.f32 %v2213_v23, %v2133_v21  ;;  %v458_v26 = vpop.f32.mrf.mxu0  ;;  %v1246_v33 = vadd.f32 %v2627_v22, %v985_v24 }
  0xe9   :  { %v987_v27 = vpop.f32.mrf.mxu1 }
  0xea   :  { %v1249_v29 = vadd.f32 %v2627_v22, %v996_v25  ;;  %v988_v30 = vadd.f32 %v987_v27, %v458_v26  ;;  %v2136_v31 = vpop.f32.mrf.mxu0 }
  0xeb   :  { %v2216_v32 = vpop.f32.mrf.mxu1 }
  0xec   :  { %v1851_v34 = vpack.c.bf16 %v1249_v29, %v1248_v28  ;;  %v1247_v35 = vadd.f32 %v2627_v22, %v988_v30  ;;  %v471_v36 = vpop.f32.mrf.mxu0  ;;  %v1009_v39 = vadd.f32 %v2216_v32, %v2136_v31 }
  0xed   :  { %v1000_v37 = vpop.f32.mrf.mxu1 }
  0xee   :  { %2003 = vst [vmem:[%s2794_s5 + $0x8] sm:$0xff] %v1851_v34   ;;  %v1846_v38 = vpack.c.bf16 %v1247_v35, %v1246_v33  ;;  %v2137_v40 = vpop.f32.mrf.mxu0  ;;  %v1001_v42 = vadd.f32 %v1000_v37, %v471_v36  ;;  %v1252_v46 = vadd.f32 %v2627_v22, %v1009_v39 }
  0xef   :  { %v2217_v41 = vpop.f32.mrf.mxu1 }
  0xf0   :  { %1847 = vst [vmem:[%s2794_s5] sm:$0xff] %v1846_v38   ;;  %v1012_v43 = vadd.f32 %v2217_v41, %v2137_v40  ;;  %v474_v44 = vpop.f32.mrf.mxu0  ;;  %v1250_v51 = vadd.f32 %v2627_v22, %v1001_v42 }
  0xf1   :  { %v1003_v45 = vpop.f32.mrf.mxu1 }
  0xf2   :  { %v1253_v47 = vadd.f32 %v2627_v22, %v1012_v43  ;;  %v1004_v48 = vadd.f32 %v1003_v45, %v474_v44  ;;  %v2140_v49 = vpop.f32.mrf.mxu0 }
  0xf3   :  { %v2220_v50 = vpop.f32.mrf.mxu1 }
  0xf4   :  { %v1861_v52 = vpack.c.bf16 %v1253_v47, %v1252_v46  ;;  %v1251_v53 = vadd.f32 %v2627_v22, %v1004_v48  ;;  %v487_v54 = vpop.f32.mrf.mxu0  ;;  %v1025_v57 = vadd.f32 %v2220_v50, %v2140_v49 }
  0xf5   :  { %v1016_v55 = vpop.f32.mrf.mxu1 }
  0xf6   :  { %2005 = vst [vmem:[%s2794_s5 + $0x18] sm:$0xff] %v1861_v52   ;;  %v1856_v56 = vpack.c.bf16 %v1251_v53, %v1250_v51  ;;  %v2141_v58 = vpop.f32.mrf.mxu0  ;;  %v1017_v60 = vadd.f32 %v1016_v55, %v487_v54  ;;  %v1256_v0 = vadd.f32 %v2627_v22, %v1025_v57 }
  0xf7   :  { %v2221_v59 = vpop.f32.mrf.mxu1 }
  0xf8   :  { %2004 = vst [vmem:[%s2794_s5 + $0x10] sm:$0xff] %v1856_v56   ;;  %v1028_v61 = vadd.f32 %v2221_v59, %v2141_v58  ;;  %v490_v62 = vpop.f32.mrf.mxu0  ;;  %v1254_v5 = vadd.f32 %v2627_v22, %v1017_v60 }
  0xf9   :  { %v1019_v63 = vpop.f32.mrf.mxu1 }
  0xfa   :  { %v1257_v1 = vadd.f32 %v2627_v22, %v1028_v61  ;;  %v1020_v2 = vadd.f32 %v1019_v63, %v490_v62  ;;  %v2144_v3 = vpop.f32.mrf.mxu0 }
  0xfb   :  { %v2224_v4 = vpop.f32.mrf.mxu1 }
  0xfc   :  { %v1871_v6 = vpack.c.bf16 %v1257_v1, %v1256_v0  ;;  %v1255_v7 = vadd.f32 %v2627_v22, %v1020_v2  ;;  %v503_v8 = vpop.f32.mrf.mxu0  ;;  %v1041_v11 = vadd.f32 %v2224_v4, %v2144_v3 }
  0xfd   :  { %v1032_v9 = vpop.f32.mrf.mxu1 }
  0xfe   :  { %2007 = vst [vmem:[%s2794_s5 + $0x28] sm:$0xff] %v1871_v6   ;;  %v1866_v10 = vpack.c.bf16 %v1255_v7, %v1254_v5  ;;  %v2145_v12 = vpop.f32.mrf.mxu0  ;;  %v1033_v14 = vadd.f32 %v1032_v9, %v503_v8  ;;  %v1260_v18 = vadd.f32 %v2627_v22, %v1041_v11 }
  0xff   :  { %v2225_v13 = vpop.f32.mrf.mxu1 }
 0x100   :  { %2006 = vst [vmem:[%s2794_s5 + $0x20] sm:$0xff] %v1866_v10   ;;  %v1044_v15 = vadd.f32 %v2225_v13, %v2145_v12  ;;  %v506_v16 = vpop.f32.mrf.mxu0  ;;  %v1258_v24 = vadd.f32 %v2627_v22, %v1033_v14 }
 0x101   :  { %v1035_v17 = vpop.f32.mrf.mxu1 }
 0x102   :  { %v1261_v19 = vadd.f32 %v2627_v22, %v1044_v15  ;;  %v1036_v20 = vadd.f32 %v1035_v17, %v506_v16  ;;  %v2148_v21 = vpop.f32.mrf.mxu0 }
 0x103   :  { %v2228_v23 = vpop.f32.mrf.mxu1 }
 0x104   :  { %v1881_v25 = vpack.c.bf16 %v1261_v19, %v1260_v18  ;;  %v1259_v26 = vadd.f32 %v2627_v22, %v1036_v20  ;;  %v519_v27 = vpop.f32.mrf.mxu0  ;;  %v1057_v30 = vadd.f32 %v2228_v23, %v2148_v21 }
 0x105   :  { %v1048_v28 = vpop.f32.mrf.mxu1 }
 0x106   :  { %2009 = vst [vmem:[%s2794_s5 + $0x38] sm:$0xff] %v1881_v25   ;;  %v1876_v29 = vpack.c.bf16 %v1259_v26, %v1258_v24  ;;  %v2149_v31 = vpop.f32.mrf.mxu0  ;;  %v1049_v33 = vadd.f32 %v1048_v28, %v519_v27  ;;  %v1264_v37 = vadd.f32 %v2627_v22, %v1057_v30 }
 0x107   :  { %v2229_v32 = vpop.f32.mrf.mxu1 }
 0x108   :  { %2008 = vst [vmem:[%s2794_s5 + $0x30] sm:$0xff] %v1876_v29   ;;  %v1060_v34 = vadd.f32 %v2229_v32, %v2149_v31  ;;  %v522_v35 = vpop.f32.mrf.mxu0  ;;  %v1262_v42 = vadd.f32 %v2627_v22, %v1049_v33 }
 0x109   :  { %v1051_v36 = vpop.f32.mrf.mxu1 }
 0x10a   :  { %v1265_v38 = vadd.f32 %v2627_v22, %v1060_v34  ;;  %v1052_v39 = vadd.f32 %v1051_v36, %v522_v35  ;;  %v2152_v40 = vpop.f32.mrf.mxu0 }
 0x10b   :  { %v2232_v41 = vpop.f32.mrf.mxu1 }
 0x10c   :  { %v1891_v43 = vpack.c.bf16 %v1265_v38, %v1264_v37  ;;  %v1263_v44 = vadd.f32 %v2627_v22, %v1052_v39  ;;  %v535_v45 = vpop.f32.mrf.mxu0  ;;  %v1073_v48 = vadd.f32 %v2232_v41, %v2152_v40 }
 0x10d   :  { %v1064_v46 = vpop.f32.mrf.mxu1 }
 0x10e   :  { %2011 = vst [vmem:[%s2794_s5 + $0x48] sm:$0xff] %v1891_v43   ;;  %v1886_v47 = vpack.c.bf16 %v1263_v44, %v1262_v42  ;;  %v2153_v49 = vpop.f32.mrf.mxu0  ;;  %v1065_v51 = vadd.f32 %v1064_v46, %v535_v45  ;;  %v1268_v55 = vadd.f32 %v2627_v22, %v1073_v48 }
 0x10f   :  { %v2233_v50 = vpop.f32.mrf.mxu1 }
 0x110   :  { %2010 = vst [vmem:[%s2794_s5 + $0x40] sm:$0xff] %v1886_v47   ;;  %v1076_v52 = vadd.f32 %v2233_v50, %v2153_v49  ;;  %v538_v53 = vpop.f32.mrf.mxu0  ;;  %v1266_v60 = vadd.f32 %v2627_v22, %v1065_v51 }
 0x111   :  { %v1067_v54 = vpop.f32.mrf.mxu1 }
 0x112   :  { %v1269_v56 = vadd.f32 %v2627_v22, %v1076_v52  ;;  %v1068_v57 = vadd.f32 %v1067_v54, %v538_v53  ;;  %v2156_v58 = vpop.f32.mrf.mxu0 }
 0x113   :  { %v2236_v59 = vpop.f32.mrf.mxu1 }
 0x114   :  { %v1901_v61 = vpack.c.bf16 %v1269_v56, %v1268_v55  ;;  %v1267_v62 = vadd.f32 %v2627_v22, %v1068_v57  ;;  %v551_v63 = vpop.f32.mrf.mxu0  ;;  %v1089_v2 = vadd.f32 %v2236_v59, %v2156_v58 }
 0x115   :  { %v1080_v0 = vpop.f32.mrf.mxu1 }
 0x116   :  { %2013 = vst [vmem:[%s2794_s5 + $0x58] sm:$0xff] %v1901_v61   ;;  %v1896_v1 = vpack.c.bf16 %v1267_v62, %v1266_v60  ;;  %v2157_v3 = vpop.f32.mrf.mxu0  ;;  %v1081_v5 = vadd.f32 %v1080_v0, %v551_v63  ;;  %v1272_v9 = vadd.f32 %v2627_v22, %v1089_v2 }
 0x117   :  { %v2237_v4 = vpop.f32.mrf.mxu1 }
 0x118   :  { %2012 = vst [vmem:[%s2794_s5 + $0x50] sm:$0xff] %v1896_v1   ;;  %v1092_v6 = vadd.f32 %v2237_v4, %v2157_v3  ;;  %v554_v7 = vpop.f32.mrf.mxu0  ;;  %v1270_v14 = vadd.f32 %v2627_v22, %v1081_v5 }
 0x119   :  { %v1083_v8 = vpop.f32.mrf.mxu1 }
 0x11a   :  { %v1273_v10 = vadd.f32 %v2627_v22, %v1092_v6  ;;  %v1084_v11 = vadd.f32 %v1083_v8, %v554_v7  ;;  %v2160_v12 = vpop.f32.mrf.mxu0 }
 0x11b   :  { %v2240_v13 = vpop.f32.mrf.mxu1 }
 0x11c   :  { %v1911_v15 = vpack.c.bf16 %v1273_v10, %v1272_v9  ;;  %v1271_v16 = vadd.f32 %v2627_v22, %v1084_v11  ;;  %v567_v17 = vpop.f32.mrf.mxu0  ;;  %v1105_v20 = vadd.f32 %v2240_v13, %v2160_v12 }
 0x11d   :  { %v1096_v18 = vpop.f32.mrf.mxu1 }
 0x11e   :  { %2015 = vst [vmem:[%s2794_s5 + $0x68] sm:$0xff] %v1911_v15   ;;  %v1906_v19 = vpack.c.bf16 %v1271_v16, %v1270_v14  ;;  %v2161_v21 = vpop.f32.mrf.mxu0  ;;  %v1097_v24 = vadd.f32 %v1096_v18, %v567_v17  ;;  %v1276_v28 = vadd.f32 %v2627_v22, %v1105_v20 }
 0x11f   :  { %v2241_v23 = vpop.f32.mrf.mxu1 }
 0x120   :  { %2014 = vst [vmem:[%s2794_s5 + $0x60] sm:$0xff] %v1906_v19   ;;  %v1108_v25 = vadd.f32 %v2241_v23, %v2161_v21  ;;  %v570_v26 = vpop.f32.mrf.mxu0  ;;  %v1274_v33 = vadd.f32 %v2627_v22, %v1097_v24 }
 0x121   :  { %v1099_v27 = vpop.f32.mrf.mxu1 }
 0x122   :  { %v1277_v29 = vadd.f32 %v2627_v22, %v1108_v25  ;;  %v1100_v30 = vadd.f32 %v1099_v27, %v570_v26  ;;  %v2164_v31 = vpop.f32.mrf.mxu0 }
 0x123   :  { %v2244_v32 = vpop.f32.mrf.mxu1 }
 0x124   :  { %v1921_v34 = vpack.c.bf16 %v1277_v29, %v1276_v28  ;;  %v1275_v35 = vadd.f32 %v2627_v22, %v1100_v30  ;;  %v583_v36 = vpop.f32.mrf.mxu0  ;;  %v1121_v39 = vadd.f32 %v2244_v32, %v2164_v31 }
 0x125   :  { %v1112_v37 = vpop.f32.mrf.mxu1 }
 0x126   :  { %2017 = vst [vmem:[%s2794_s5 + $0x78] sm:$0xff] %v1921_v34   ;;  %v1916_v38 = vpack.c.bf16 %v1275_v35, %v1274_v33  ;;  %v2165_v40 = vpop.f32.mrf.mxu0  ;;  %v1113_v42 = vadd.f32 %v1112_v37, %v583_v36  ;;  %v1280_v46 = vadd.f32 %v2627_v22, %v1121_v39 }
 0x127   :  { %v2245_v41 = vpop.f32.mrf.mxu1 }
 0x128   :  { %2016 = vst [vmem:[%s2794_s5 + $0x70] sm:$0xff] %v1916_v38   ;;  %v1124_v43 = vadd.f32 %v2245_v41, %v2165_v40  ;;  %v586_v44 = vpop.f32.mrf.mxu0  ;;  %v1278_v51 = vadd.f32 %v2627_v22, %v1113_v42 }
 0x129   :  { %v1115_v45 = vpop.f32.mrf.mxu1 }
 0x12a   :  { %v1281_v47 = vadd.f32 %v2627_v22, %v1124_v43  ;;  %v1116_v48 = vadd.f32 %v1115_v45, %v586_v44  ;;  %v2168_v49 = vpop.f32.mrf.mxu0 }
 0x12b   :  { %v2248_v50 = vpop.f32.mrf.mxu1 }
 0x12c   :  { %v1931_v52 = vpack.c.bf16 %v1281_v47, %v1280_v46  ;;  %v1279_v53 = vadd.f32 %v2627_v22, %v1116_v48  ;;  %v599_v54 = vpop.f32.mrf.mxu0  ;;  %v1137_v57 = vadd.f32 %v2248_v50, %v2168_v49 }
 0x12d   :  { %v1128_v55 = vpop.f32.mrf.mxu1 }
 0x12e   :  { %2019 = vst [vmem:[%s2794_s5 + $0x88] sm:$0xff] %v1931_v52   ;;  %v1926_v56 = vpack.c.bf16 %v1279_v53, %v1278_v51  ;;  %v2169_v58 = vpop.f32.mrf.mxu0  ;;  %v1129_v60 = vadd.f32 %v1128_v55, %v599_v54  ;;  %v1284_v0 = vadd.f32 %v2627_v22, %v1137_v57 }
 0x12f   :  { %v2249_v59 = vpop.f32.mrf.mxu1 }
 0x130   :  { %2018 = vst [vmem:[%s2794_s5 + $0x80] sm:$0xff] %v1926_v56   ;;  %v1140_v61 = vadd.f32 %v2249_v59, %v2169_v58  ;;  %v602_v62 = vpop.f32.mrf.mxu0  ;;  %v1282_v5 = vadd.f32 %v2627_v22, %v1129_v60 }
 0x131   :  { %v1131_v63 = vpop.f32.mrf.mxu1 }
 0x132   :  { %v1285_v1 = vadd.f32 %v2627_v22, %v1140_v61  ;;  %v1132_v2 = vadd.f32 %v1131_v63, %v602_v62  ;;  %v2172_v3 = vpop.f32.mrf.mxu0 }
 0x133   :  { %v2252_v4 = vpop.f32.mrf.mxu1 }
 0x134   :  { %v1941_v6 = vpack.c.bf16 %v1285_v1, %v1284_v0  ;;  %v1283_v7 = vadd.f32 %v2627_v22, %v1132_v2  ;;  %v615_v8 = vpop.f32.mrf.mxu0  ;;  %v1153_v11 = vadd.f32 %v2252_v4, %v2172_v3 }
 0x135   :  { %v1144_v9 = vpop.f32.mrf.mxu1 }
 0x136   :  { %2021 = vst [vmem:[%s2794_s5 + $0x98] sm:$0xff] %v1941_v6   ;;  %v1936_v10 = vpack.c.bf16 %v1283_v7, %v1282_v5  ;;  %v2173_v12 = vpop.f32.mrf.mxu0  ;;  %v1145_v14 = vadd.f32 %v1144_v9, %v615_v8  ;;  %v1288_v18 = vadd.f32 %v2627_v22, %v1153_v11 }
 0x137   :  { %v2253_v13 = vpop.f32.mrf.mxu1 }
 0x138   :  { %2020 = vst [vmem:[%s2794_s5 + $0x90] sm:$0xff] %v1936_v10   ;;  %v1156_v15 = vadd.f32 %v2253_v13, %v2173_v12  ;;  %v618_v16 = vpop.f32.mrf.mxu0  ;;  %v1286_v24 = vadd.f32 %v2627_v22, %v1145_v14 }
 0x139   :  { %v1147_v17 = vpop.f32.mrf.mxu1 }
 0x13a   :  { %v1289_v19 = vadd.f32 %v2627_v22, %v1156_v15  ;;  %v1148_v20 = vadd.f32 %v1147_v17, %v618_v16  ;;  %v2176_v21 = vpop.f32.mrf.mxu0 }
 0x13b   :  { %v2256_v23 = vpop.f32.mrf.mxu1 }
 0x13c   :  { %v1951_v25 = vpack.c.bf16 %v1289_v19, %v1288_v18  ;;  %v1287_v26 = vadd.f32 %v2627_v22, %v1148_v20  ;;  %v631_v27 = vpop.f32.mrf.mxu0  ;;  %v1169_v30 = vadd.f32 %v2256_v23, %v2176_v21 }
 0x13d   :  { %v1160_v28 = vpop.f32.mrf.mxu1 }
 0x13e   :  { %2023 = vst [vmem:[%s2794_s5 + $0xa8] sm:$0xff] %v1951_v25   ;;  %v1946_v29 = vpack.c.bf16 %v1287_v26, %v1286_v24  ;;  %v2177_v31 = vpop.f32.mrf.mxu0  ;;  %v1161_v33 = vadd.f32 %v1160_v28, %v631_v27  ;;  %v1292_v37 = vadd.f32 %v2627_v22, %v1169_v30 }
 0x13f   :  { %v2257_v32 = vpop.f32.mrf.mxu1 }
 0x140   :  { %2022 = vst [vmem:[%s2794_s5 + $0xa0] sm:$0xff] %v1946_v29   ;;  %v1172_v34 = vadd.f32 %v2257_v32, %v2177_v31  ;;  %v634_v35 = vpop.f32.mrf.mxu0  ;;  %v1290_v42 = vadd.f32 %v2627_v22, %v1161_v33 }
 0x141   :  { %v1163_v36 = vpop.f32.mrf.mxu1 }
 0x142   :  { %v1293_v38 = vadd.f32 %v2627_v22, %v1172_v34  ;;  %v1164_v39 = vadd.f32 %v1163_v36, %v634_v35  ;;  %v2180_v40 = vpop.f32.mrf.mxu0 }
 0x143   :  { %v2260_v41 = vpop.f32.mrf.mxu1 }
 0x144   :  { %v1961_v43 = vpack.c.bf16 %v1293_v38, %v1292_v37  ;;  %v1291_v44 = vadd.f32 %v2627_v22, %v1164_v39  ;;  %v647_v45 = vpop.f32.mrf.mxu0  ;;  %v1185_v48 = vadd.f32 %v2260_v41, %v2180_v40 }
 0x145   :  { %v1176_v46 = vpop.f32.mrf.mxu1 }
 0x146   :  { %2025 = vst [vmem:[%s2794_s5 + $0xb8] sm:$0xff] %v1961_v43   ;;  %v1956_v47 = vpack.c.bf16 %v1291_v44, %v1290_v42  ;;  %v2181_v49 = vpop.f32.mrf.mxu0  ;;  %v1177_v51 = vadd.f32 %v1176_v46, %v647_v45  ;;  %v1296_v55 = vadd.f32 %v2627_v22, %v1185_v48 }
 0x147   :  { %v2261_v50 = vpop.f32.mrf.mxu1 }
 0x148   :  { %2024 = vst [vmem:[%s2794_s5 + $0xb0] sm:$0xff] %v1956_v47   ;;  %v1188_v52 = vadd.f32 %v2261_v50, %v2181_v49  ;;  %v650_v53 = vpop.f32.mrf.mxu0  ;;  %v1294_v60 = vadd.f32 %v2627_v22, %v1177_v51 }
 0x149   :  { %v1179_v54 = vpop.f32.mrf.mxu1 }
 0x14a   :  { %v1297_v56 = vadd.f32 %v2627_v22, %v1188_v52  ;;  %v1180_v57 = vadd.f32 %v1179_v54, %v650_v53  ;;  %v2184_v58 = vpop.f32.mrf.mxu0 }
 0x14b   :  { %v2264_v59 = vpop.f32.mrf.mxu1 }
 0x14c   :  { %v1971_v61 = vpack.c.bf16 %v1297_v56, %v1296_v55  ;;  %v1295_v62 = vadd.f32 %v2627_v22, %v1180_v57  ;;  %v663_v63 = vpop.f32.mrf.mxu0  ;;  %v1201_v2 = vadd.f32 %v2264_v59, %v2184_v58 }
 0x14d   :  { %v1192_v0 = vpop.f32.mrf.mxu1 }
 0x14e   :  { %2027 = vst [vmem:[%s2794_s5 + $0xc8] sm:$0xff] %v1971_v61   ;;  %v1966_v1 = vpack.c.bf16 %v1295_v62, %v1294_v60  ;;  %v2185_v3 = vpop.f32.mrf.mxu0  ;;  %v1193_v5 = vadd.f32 %v1192_v0, %v663_v63  ;;  %v1300_v9 = vadd.f32 %v2627_v22, %v1201_v2 }
 0x14f   :  { %v2265_v4 = vpop.f32.mrf.mxu1 }
 0x150   :  { %2026 = vst [vmem:[%s2794_s5 + $0xc0] sm:$0xff] %v1966_v1   ;;  %v1204_v6 = vadd.f32 %v2265_v4, %v2185_v3  ;;  %v666_v7 = vpop.f32.mrf.mxu0  ;;  %v1298_v14 = vadd.f32 %v2627_v22, %v1193_v5 }
 0x151   :  { %v1195_v8 = vpop.f32.mrf.mxu1 }
 0x152   :  { %v1301_v10 = vadd.f32 %v2627_v22, %v1204_v6  ;;  %v1196_v11 = vadd.f32 %v1195_v8, %v666_v7  ;;  %v2188_v12 = vpop.f32.mrf.mxu0 }
 0x153   :  { %v2268_v13 = vpop.f32.mrf.mxu1 }
 0x154   :  { %v1981_v15 = vpack.c.bf16 %v1301_v10, %v1300_v9  ;;  %v1299_v16 = vadd.f32 %v2627_v22, %v1196_v11  ;;  %v679_v17 = vpop.f32.mrf.mxu0  ;;  %v1217_v20 = vadd.f32 %v2268_v13, %v2188_v12 }
 0x155   :  { %v1208_v18 = vpop.f32.mrf.mxu1 }
 0x156   :  { %2029 = vst [vmem:[%s2794_s5 + $0xd8] sm:$0xff] %v1981_v15   ;;  %v1976_v19 = vpack.c.bf16 %v1299_v16, %v1298_v14  ;;  %v2189_v21 = vpop.f32.mrf.mxu0  ;;  %v1209_v24 = vadd.f32 %v1208_v18, %v679_v17  ;;  %v1304_v28 = vadd.f32 %v2627_v22, %v1217_v20 }
 0x157   :  { %v2269_v23 = vpop.f32.mrf.mxu1 }
 0x158   :  { %2028 = vst [vmem:[%s2794_s5 + $0xd0] sm:$0xff] %v1976_v19   ;;  %v1220_v25 = vadd.f32 %v2269_v23, %v2189_v21  ;;  %v682_v26 = vpop.f32.mrf.mxu0  ;;  %v1302_v33 = vadd.f32 %v2627_v22, %v1209_v24 }
 0x159   :  { %v1211_v27 = vpop.f32.mrf.mxu1 }
 0x15a   :  { %v1305_v29 = vadd.f32 %v2627_v22, %v1220_v25  ;;  %v1212_v30 = vadd.f32 %v1211_v27, %v682_v26  ;;  %v2192_v31 = vpop.f32.mrf.mxu0 }
 0x15b   :  { %v2272_v32 = vpop.f32.mrf.mxu1 }
 0x15c   :  { %v1991_v34 = vpack.c.bf16 %v1305_v29, %v1304_v28  ;;  %v1303_v35 = vadd.f32 %v2627_v22, %v1212_v30  ;;  %v695_v36 = vpop.f32.mrf.mxu0  ;;  %v1233_v39 = vadd.f32 %v2272_v32, %v2192_v31 }
 0x15d   :  { %v1224_v37 = vpop.f32.mrf.mxu1 }
 0x15e   :  { %2031 = vst [vmem:[%s2794_s5 + $0xe8] sm:$0xff] %v1991_v34   ;;  %v1986_v38 = vpack.c.bf16 %v1303_v35, %v1302_v33  ;;  %v2193_v40 = vpop.f32.mrf.mxu0  ;;  %v1225_v42 = vadd.f32 %v1224_v37, %v695_v36  ;;  %v1308_v46 = vadd.f32 %v2627_v22, %v1233_v39 }
 0x15f   :  { %v2273_v41 = vpop.f32.mrf.mxu1 }
 0x160   :  { %2030 = vst [vmem:[%s2794_s5 + $0xe0] sm:$0xff] %v1986_v38   ;;  %v1236_v43 = vadd.f32 %v2273_v41, %v2193_v40  ;;  %v698_v44 = vpop.f32.mrf.mxu0  ;;  %v1306_v49 = vadd.f32 %v2627_v22, %v1225_v42 }
 0x161   :  { %v1227_v45 = vpop.f32.mrf.mxu1 }
 0x162   :  { %v1309_v47 = vadd.f32 %v2627_v22, %v1236_v43  ;;  %v1228_v48 = vadd.f32 %v1227_v45, %v698_v44 }
 0x164   :  { %v2001_v50 = vpack.c.bf16 %v1309_v47, %v1308_v46  ;;  %v1307_v51 = vadd.f32 %v2627_v22, %v1228_v48 }
 0x166   :  { %2033 = vst [vmem:[%s2794_s5 + $0xf8] sm:$0xff] %v2001_v50   ;;  %v1996_v52 = vpack.c.bf16 %v1307_v51, %v1306_v49 }
 0x168   :  { %2032 = vst [vmem:[%s2794_s5 + $0xf0] sm:$0xff] %v1996_v52  }

// kernel: ginka_decoder_forward.6
= control target key start
LH: loop header
LB: loop body
LE: loop exit
PB: predicated region body
PF: predicated region fallthrough
CT: control target
= control target key end

     0   :  { %s4334_s12 = smov 0   ;;  %s4336_s13 = smov 0   ;;  %s6158_s0 = inlined_call_operand.vmem [shape: bf16[2,16,16,128], index: 0, kind: input, shape index: {}]   ;;  %s6159_s1 = inlined_call_operand.vmem [shape: bf16[3,1,384,128], index: 1, kind: input, shape index: {}]   ;;  %s6160_s2 = inlined_call_operand.vmem [shape: f32[1,128], index: 2, kind: input, shape index: {}]   ;;  %s6161_s3 = inlined_call_operand.vmem [shape: bf16[2,256,128], index: 3, kind: output, shape index: {}]  }
   0x1   :  { %s4338_s14 = smov 0  }
   0x2 LB: > { %s32_s15 = sadd.s32 1, %s4308_s13  ;;  %p3159_p0 = scmp.ge.s32.totalorder %s4312_s14, 1  ;;  %s4312_s14 = sphi %s4338_s14, %s13_s14   ;;  %s4308_s13 = sphi %s4336_s13, %s6337_s13   ;;  %s4304_s12 = sphi %s4334_s12, %s6336_s12  }
   0x3   : > { %p34_p1 = scmp.ge.s32.totalorder %s32_s15, 2  ;;  %p186_p2 = scmp.lt.s32.totalorder %s4312_s14, 3 }
   0x5   : > { %s6339_s15 = smov (%p34_p1, %s32_s15), 0  ;;  %p187_p3 = pnand %p3159_p0, %p186_p2 }
   0x7   : > { %190 = sbr.rel (%p187_p3) target bundleno = 745 (0x2e9), region = 32 }
   0xc   : > { %v4120_v0 = vld [vmem:[%s6159_s1 + $0x78] sm:$0xff]   ;;  %v4122_v2 = vld [vmem:[%s6159_s1 + $0x70] sm:$0xff]   ;;  %p227_p4 = scmp.lt.s32.totalorder %s4304_s12, 1  ;;  %v4124_v4 = vld [vmem:[%s6159_s1 + $0x68] sm:$0xff]   ;;  %vm550_vm0 = vcmask 1040384   ;;  %vm643_vm3 = vcmask 1047552  }
   0xd   : > { %v4121_v1 = vld [vmem:[%s6159_s1 + $0x38] sm:$0xff]   ;;  %3528 = vmatprep.subr.bf16.mxu0 %v4120_v0  ;;  %4080 = vmatprep.subr.bf16.mxu1 %v4120_v0  ;;  %v4123_v3 = vld [vmem:[%s6159_s1 + $0x30] sm:$0xff]   ;;  %v4125_v5 = vld [vmem:[%s6159_s1 + $0x28] sm:$0xff]   ;;  %vm551_vm1 = vsmask.f32 256 }
   0xe   : > { %3529 = vmatpush3.bf16.msra.mxu0 %v4121_v1  ;;  %4088 = vmatpush3.bf16.msra.mxu1 %v4121_v1  ;;  %s6341_s12 = smov (!%p227_p4, %s4304_s12), 1  ;;  %v4126_v6 = vld [vmem:[%s6159_s1 + $0x60] sm:$0xff]   ;;  %v4128_v8 = vld [vmem:[%s6159_s1 + $0x58] sm:$0xff]   ;;  %v4130_v10 = vld [vmem:[%s6159_s1 + $0x50] sm:$0xff]   ;;  %vm644_vm4 = vsmask.f32 7424 }
   0xf   : > { %3530 = vmatprep.subr.bf16.mxu0 %v4122_v2  ;;  %4081 = vmatprep.subr.bf16.mxu1 %v4122_v2  ;;  %s3399_s30 = sshll.u32 %s6341_s12, 7  ;;  %v4127_v7 = vld [vmem:[%s6159_s1 + $0x20] sm:$0xff]   ;;  %v4129_v9 = vld [vmem:[%s6159_s1 + $0x18] sm:$0xff]   ;;  %v4131_v17 = vld [vmem:[%s6159_s1 + $0x10] sm:$0xff]  }
  0x10   : > { %s4387_s10 = scalar_lea.vmem %s6158_s0, %s3399_s30  ;;  %v4132_v19 = vld [vmem:[%s6159_s1 + $0x48] sm:$0xff]   ;;  %v4134_v29 = vld [vmem:[%s6159_s1 + $0x40] sm:$0xff]   ;;  %vm4451_vm2 = vmand %vm550_vm0, %vm551_vm1  ;;  %s6099_s16 = scalar_lea.vmem %s6161_s3, %s3399_s30 }
  0x11   : > { %v291_v11 = vld [vmem:[%s4387_s10] sm:$0xf]  ;;  %v4397_v12 = vld [vmem:[%s4387_s10 + $0x4] sm:$0xf]  ;;  %v313_v13 = vld [vmem:[%s4387_s10 + $0x58] sm:$0xf] }
  0x12   : > { %3531 = vmatpush3.bf16.msra.mxu0 %v4123_v3  ;;  %4089 = vmatpush3.bf16.msra.mxu1 %v4123_v3  ;;  %v4401_v14 = vcombine.low %v291_v11, %v4397_v12  ;;  %v4404_v15 = vld [vmem:[%s4387_s10 + $0x5c] sm:$0xf]  ;;  %v4133_v21 = vld [vmem:[%s6159_s1 + $0x8] sm:$0xff]   ;;  %v315_v24 = vld [vmem:[%s4387_s10 + $0x60] sm:$0xf] }
  0x13   : > { %3532 = vmatprep.subr.bf16.mxu0 %v4124_v4  ;;  %4082 = vmatprep.subr.bf16.mxu1 %v4124_v4  ;;  %v4407_v16 = vcombine.low %v313_v13, %v4404_v15  ;;  %v4430_v27 = vld [vmem:[%s4387_s10 + $0x64] sm:$0xf]  ;;  %v4442_v31 = vld [vmem:[%s4387_s10 + $0x8] sm:$0xf]  ;;  %v4445_v32 = vld [vmem:[%s4387_s10 + $0xc] sm:$0xf] }
  0x14   : > { %v431_v18 = vshrl.u32 %v4401_v14, 16  ;;  %900 = vmatprep.mubr.bf16.mxu0 %v4401_v14  ;;  %v434_v22 = vshll.u32 %v4401_v14, 16  ;;  %v4433_v28 = vcombine.low %v315_v24, %v4430_v27  ;;  %v4135_v30 = vld [vmem:[%s6159_s1] sm:$0xff]   ;;  %v4138_v35 = vld [vmem:[%s6159_s1 + $0xb8] sm:$0xff]   ;;  %v4466_v39 = vcombine.low %v4442_v31, %v4445_v32  ;;  %v4469_v40 = vld [vmem:[%s4387_s10 + $0x68] sm:$0xf] }
  0x15   : > { %v508_v20 = vshrl.u32 %v4407_v16, 16  ;;  %996 = vmatprep.mubr.bf16.mxu1 %v4407_v16  ;;  %v511_v23 = vshll.u32 %v4407_v16, 16  ;;  %v4139_v37 = vld [vmem:[%s6159_s1 + $0x178] sm:$0xff]   ;;  %v4472_v41 = vld [vmem:[%s4387_s10 + $0x6c] sm:$0xf]  ;;  %v4140_v43 = vld [vmem:[%s6159_s1 + $0xb0] sm:$0xff]  }
  0x16   : > { %3533 = vmatpush3.bf16.msra.mxu0 %v4125_v5  ;;  %4090 = vmatpush3.bf16.msra.mxu1 %v4125_v5  ;;  %v433_v25 = vrot.slane %v431_v18, 7  ;;  %v515_v38 = vshrl.u32 %v4433_v28, 16  ;;  %v518_v46 = vshll.u32 %v4433_v28, 16  ;;  %v4490_v47 = vcombine.low %v4469_v40, %v4472_v41  ;;  %v4144_v48 = vld [vmem:[%s6159_s1 + $0x170] sm:$0xff]   ;;  %v4142_v51 = vld [vmem:[%s6159_s1 + $0xa8] sm:$0xff]   ;;  %v4143_v1 = vld [vmem:[%s6159_s1 + $0xa0] sm:$0xff]  }
  0x17   : > { %3534 = vmatprep.subr.bf16.mxu0 %v4126_v6  ;;  %4083 = vmatprep.subr.bf16.mxu1 %v4126_v6  ;;  %v510_v26 = vrot.slane %v508_v20, 7  ;;  %v438_v49 = vshrl.u32 %v4466_v39, 16  ;;  %v4497_v50 = vld [vmem:[%s4387_s10 + $0x10] sm:$0xf]  ;;  %v4505_v52 = vld [vmem:[%s4387_s10 + $0x14] sm:$0xf]  ;;  %vm4619_vm5 = vmand %vm643_vm3, %vm644_vm4 }
  0x18   : > { %v436_v33 = vor.u32 %v434_v22, %v433_v25  ;;  %v517_v45 = vrot.slane %v515_v38, 7  ;;  %v4508_v53 = vld [vmem:[%s4387_s10 + $0x70] sm:$0xf]  ;;  %v4511_v54 = vld [vmem:[%s4387_s10 + $0x74] sm:$0xf]  ;;  %v522_v56 = vshrl.u32 %v4490_v47, 16  ;;  %v4523_v58 = vcombine.low %v4497_v50, %v4505_v52 }
  0x19   : > { %v513_v36 = vor.u32 %v511_v23, %v510_v26  ;;  %v4152_v57 = vld [vmem:[%s6159_s1 + $0x168] sm:$0xff]   ;;  %v441_v59 = vshll.u32 %v4466_v39, 16  ;;  %v525_v60 = vshll.u32 %v4490_v47, 16  ;;  %v4529_v61 = vcombine.low %v4508_v53, %v4511_v54  ;;  %v4158_v4 = vld [vmem:[%s6159_s1 + $0x160] sm:$0xff]   ;;  %v4148_v25 = vld [vmem:[%s6159_s1 + $0x90] sm:$0xff]  }
  0x1a   : > { %3535 = vmatpush3.bf16.msra.mxu0 %v4127_v7  ;;  %4091 = vmatpush3.bf16.msra.mxu1 %v4127_v7  ;;  %v4476_v42 = vsel %vm4451_vm2, %v291_v11, %v436_v33  ;;  %v520_v55 = vor.u32 %v518_v46, %v517_v45  ;;  %v440_v63 = vrot.slane %v438_v49, 7  ;;  %v524_v0 = vrot.slane %v522_v56, 7  ;;  %v4555_v7 = vld [vmem:[%s4387_s10 + $0x18] sm:$0xf]  ;;  %v4599_v33 = vld [vmem:[%s4387_s10 + $0x24] sm:$0xf] }
  0x1b   : > { %3536 = vmatprep.subr.bf16.mxu0 %v4128_v8  ;;  %4084 = vmatprep.subr.bf16.mxu1 %v4128_v8  ;;  %v4483_v44 = vsel %vm4451_vm2, %v313_v13, %v513_v36  ;;  %v445_v2 = vshrl.u32 %v4523_v58, 16  ;;  %v529_v3 = vshrl.u32 %v4529_v61, 16  ;;  %v4558_v8 = vld [vmem:[%s4387_s10 + $0x1c] sm:$0xf]  ;;  %v568_v26 = vrot.slane %v434_v22, 1  ;;  %v4175_v22 = vld [vmem:[%s6159_s1 + $0x150] sm:$0xff]  }
  0x1c   : > { %v4533_v62 = vsel %vm4451_vm2, %v315_v24, %v520_v55  ;;  %v443_v5 = vor.u32 %v441_v59, %v440_v63  ;;  %v527_v6 = vor.u32 %v525_v60, %v524_v0  ;;  %v3190_v63 = vcombine.low %v4404_v15, %v4404_v15  ;;  %v4203_v34 = vld [vmem:[%s6159_s1 + $0x230] sm:$0xff]  }
  0x1d   : > { %v447_v11 = vrot.slane %v445_v2, 7  ;;  %v531_v13 = vrot.slane %v529_v3, 7 }
  0x1e   : > { %3537 = vmatpush3.bf16.msra.mxu0 %v4129_v9  ;;  %4092 = vmatpush3.bf16.msra.mxu1 %v4129_v9  ;;  %v4147_v9 = vld [vmem:[%s6159_s1 + $0x98] sm:$0xff]   ;;  %v4582_v24 = vsel %vm4451_vm2, %v4469_v40, %v527_v6  ;;  %v569_v40 = vor.u32 %v568_v26, %v431_v18  ;;  %v4668_v6 = vld [vmem:[%s4387_s10 + $0x2c] sm:$0xf] }
  0x1f   : > { %3538 = vmatprep.subr.bf16.mxu0 %v4130_v10  ;;  %4085 = vmatprep.subr.bf16.mxu1 %v4130_v10  ;;  %v448_v10 = vshll.u32 %v4523_v58, 16 }
  0x22   : > { %3539 = vmatpush3.bf16.msra.mxu0 %v4131_v17  ;;  %4093 = vmatpush3.bf16.msra.mxu1 %v4131_v17  ;;  %v532_v17 = vshll.u32 %v4529_v61, 16 }
  0x23   : > { %3540 = vmatprep.subr.bf16.mxu0 %v4132_v19  ;;  %4086 = vmatprep.subr.bf16.mxu1 %v4132_v19  ;;  %v4572_v19 = vcombine.low %v4555_v7, %v4558_v8 }
  0x24   : > { %v534_v36 = vor.u32 %v532_v17, %v531_v13  ;;  %v572_v13 = vrot.slane %v448_v10, 1 }
  0x26   : > { %3541 = vmatpush3.bf16.msra.mxu0 %v4133_v21  ;;  %4094 = vmatpush3.bf16.msra.mxu1 %v4133_v21  ;;  %v4577_v21 = vsel %vm4451_vm2, %v4442_v31, %v443_v5  ;;  %v452_v31 = vshrl.u32 %v4572_v19, 16  ;;  %v4637_v18 = vsel %vm4451_vm2, %v4508_v53, %v534_v36  ;;  %v3180_v5 = vcombine.low %v4445_v32, %v4445_v32 }
  0x27   : > { %3542 = vmatprep.subr.bf16.mxu0 %v4134_v29  ;;  %4087 = vmatprep.subr.bf16.mxu1 %v4134_v29  ;;  %v4590_v29 = vld [vmem:[%s4387_s10 + $0x20] sm:$0xf] }
  0x28   : > { %v454_v55 = vrot.slane %v452_v31, 7 }
  0x2a   : > { %3543 = vmatpush3.bf16.msra.mxu0 %v4135_v30  ;;  %4095 = vmatpush3.bf16.msra.mxu1 %v4135_v30  ;;  %v4169_v30 = vld [vmem:[%s6159_s1 + $0x158] sm:$0xff]  }
  0x2b   : > { %3936 = vmatprep.subr.bf16.mxu1 %v4138_v35  ;;  %3984 = vmatprep.subr.bf16.mxu0 %v4139_v37 }
  0x2d   : > { %901 = vmatmul.mubr.bf16.vlgmr.msra.gmra.mxu0 %v4476_v42  ;;  %997 = vmatmul.mubr.bf16.vlgmr.msra.gmra.mxu1 %v4483_v44 }
  0x2e   : > { %3937 = vmatpush3.bf16.msra.mxu1 %v4138_v35  ;;  %3985 = vmatpush3.bf16.msra.mxu0 %v4139_v37  ;;  %v450_v35 = vor.u32 %v448_v10, %v447_v11  ;;  %v4151_v37 = vld [vmem:[%s6159_s1 + $0x88] sm:$0xff]   ;;  %v4156_v11 = vld [vmem:[%s6159_s1 + $0x138] sm:$0xff]   ;;  %v594_v10 = vrot.slane %v525_v60, 1 }
  0x2f   : > { %3938 = vmatprep.subr.bf16.mxu1 %v4140_v43  ;;  %908 = vmatprep.mubr.bf16.mxu0 %v4401_v14 }
  0x30   : > { %1004 = vmatprep.mubr.bf16.mxu1 %v4433_v28  ;;  %3986 = vmatprep.subr.bf16.mxu0 %v4144_v48 }
  0x32   : > { %3939 = vmatpush3.bf16.msra.mxu1 %v4140_v43  ;;  %3987 = vmatpush3.bf16.msra.mxu0 %v4144_v48  ;;  %v3179_v43 = vcombine.low %v4397_v12, %v4397_v12  ;;  %v4625_v48 = vcombine.low %v4590_v29, %v4599_v33  ;;  %v4632_v12 = vsel %vm4451_vm2, %v4497_v50, %v450_v35  ;;  %v570_v50 = vrot.slane %v441_v59, 1 }
  0x33   : > { %3940 = vmatprep.subr.bf16.mxu1 %v4142_v51  ;;  %3988 = vmatprep.subr.bf16.mxu0 %v4152_v57 }
  0x34   : > { %v4651_v53 = vsel %vm4619_vm5, %v569_v40, %v3179_v43  ;;  %v459_v0 = vshrl.u32 %v4625_v48, 16  ;;  %v462_v26 = vshll.u32 %v4625_v48, 16  ;;  %v595_v43 = vor.u32 %v594_v10, %v522_v56  ;;  %v4193_v56 = vld [vmem:[%s6159_s1 + $0x140] sm:$0xff]  }
  0x35   : > { %909 = vmatmul.mubr.bf16.gmra.mxu0 %v4476_v42  ;;  %1005 = vmatmul.mubr.bf16.gmra.mxu1 %v4533_v62 }
  0x36   : > { %3941 = vmatpush3.bf16.msra.mxu1 %v4142_v51  ;;  %916 = vmatprep.mubr.bf16.mxu0 %v4466_v39  ;;  %v590_v51 = vrot.slane %v511_v23, 1  ;;  %v4153_v23 = vld [vmem:[%s6159_s1 + $0x80] sm:$0xff]   ;;  %v461_v35 = vrot.slane %v459_v0, 7 }
  0x37   : > { %3942 = vmatprep.subr.bf16.mxu1 %v4143_v1  ;;  %1012 = vmatprep.mubr.bf16.mxu1 %v4490_v47 }
  0x38   : > { %3989 = vmatpush3.bf16.msra.mxu0 %v4152_v57  ;;  %v455_v57 = vshll.u32 %v4572_v19, 16  ;;  %v591_v59 = vor.u32 %v590_v51, %v508_v20  ;;  %v571_v20 = vor.u32 %v570_v50, %v438_v49  ;;  %v592_v49 = vrot.slane %v518_v46, 1  ;;  %v4720_v51 = vld [vmem:[%s4387_s10 + $0x34] sm:$0xf] }
  0x39   : > { %3990 = vmatprep.subr.bf16.mxu0 %v4158_v4  ;;  %v3193_v46 = vcombine.low %v4511_v54, %v4511_v54 }
  0x3a   : > { %3943 = vmatpush3.bf16.msra.mxu1 %v4143_v1  ;;  %v4657_v1 = vld [vmem:[%s4387_s10 + $0x28] sm:$0xf]  ;;  %v457_v15 = vor.u32 %v455_v57, %v454_v55  ;;  %v4682_v32 = vsel %vm4619_vm5, %v591_v59, %v3190_v63  ;;  %v593_v40 = vor.u32 %v592_v49, %v515_v38  ;;  %v464_v63 = vor.u32 %v462_v26, %v461_v35  ;;  %v4802_v35 = vld [vmem:[%s4387_s10 + $0x40] sm:$0xf] }
  0x3b   : > { %3944 = vmatprep.subr.bf16.mxu1 %v4147_v9  ;;  %v4701_v36 = vcombine.low %v4657_v1, %v4668_v6  ;;  %v3181_v59 = vcombine.low %v4505_v52, %v4505_v52  ;;  %v4771_v52 = vld [vmem:[%s4387_s10 + $0x38] sm:$0xf] }
  0x3c   : > { %3991 = vmatpush3.bf16.msra.mxu0 %v4158_v4  ;;  %v4188_v4 = vld [vmem:[%s6159_s1 + $0x148] sm:$0xff]   ;;  %v4710_v60 = vsel %vm4451_vm2, %v4555_v7, %v457_v15  ;;  %v4163_v7 = vld [vmem:[%s6159_s1 + $0xf0] sm:$0xff]  }
  0x3d   : > { %917 = vmatmul.mubr.bf16.gmra.mxu0 %v4577_v21  ;;  %1013 = vmatmul.mubr.bf16.gmra.mxu1 %v4582_v24  ;;  %v466_v55 = vshrl.u32 %v4701_v36, 16  ;;  %v469_v15 = vshll.u32 %v4701_v36, 16 }
  0x3e   : > { %3945 = vmatpush3.bf16.msra.mxu1 %v4147_v9  ;;  %924 = vmatprep.mubr.bf16.mxu0 %v4523_v58  ;;  %v3191_v9 = vcombine.low %v4430_v27, %v4430_v27  ;;  %v3192_v27 = vcombine.low %v4472_v41, %v4472_v41  ;;  %v4162_v41 = vld [vmem:[%s6159_s1 + $0x130] sm:$0xff]  }
  0x3f   : > { %3946 = vmatprep.subr.bf16.mxu1 %v4148_v25  ;;  %1020 = vmatprep.mubr.bf16.mxu1 %v4529_v61 }
  0x40   : > { %3992 = vmatprep.subr.bf16.mxu0 %v4169_v30  ;;  %v4733_v38 = vsel %vm4619_vm5, %v593_v40, %v3191_v9 }
  0x41   : > { %3993 = vmatpush3.bf16.msra.mxu0 %v4169_v30  ;;  %v574_v30 = vrot.slane %v455_v57, 1  ;;  %v576_v57 = vrot.slane %v462_v26, 1  ;;  %v4173_v26 = vld [vmem:[%s6159_s1 + $0x120] sm:$0xff]  }
  0x42   : > { %3947 = vmatpush3.bf16.msra.mxu1 %v4148_v25  ;;  %3994 = vmatprep.subr.bf16.mxu0 %v4175_v22  ;;  %v4157_v25 = vld [vmem:[%s6159_s1 + $0xf8] sm:$0xff]  }
  0x43   : > { %3948 = vmatprep.subr.bf16.mxu1 %v4151_v37  ;;  %v575_v9 = vor.u32 %v574_v30, %v452_v31  ;;  %v577_v40 = vor.u32 %v576_v57, %v459_v0  ;;  %v4832_v57 = vld [vmem:[%s4387_s10 + $0x4c] sm:$0xf] }
  0x45   : > { %925 = vmatmul.mubr.bf16.gmra.mxu0 %v4632_v12  ;;  %1021 = vmatmul.mubr.bf16.gmra.mxu1 %v4637_v18 }
  0x46   : > { %3949 = vmatpush3.bf16.msra.mxu1 %v4151_v37  ;;  %932 = vmatprep.mubr.bf16.mxu0 %v4572_v19  ;;  %v4713_v37 = vld [vmem:[%s4387_s10 + $0x30] sm:$0xf] }
  0x47   : > { %3950 = vmatprep.subr.bf16.mxu1 %v4153_v23  ;;  %3952 = vmatprep.mubr.bf16.mxu1 %v4651_v53 }
  0x48   : > { %3995 = vmatpush3.bf16.msra.mxu0 %v4175_v22  ;;  %v596_v22 = vrot.slane %v532_v17, 1  ;;  %v4726_v17 = vsel %vm4619_vm5, %v571_v20, %v3180_v5  ;;  %v4199_v5 = vld [vmem:[%s6159_s1 + $0x1f8] sm:$0xff]  }
  0x49   : > { %3996 = vmatprep.subr.bf16.mxu0 %v4188_v4  ;;  %v4774_v20 = vld [vmem:[%s4387_s10 + $0x3c] sm:$0xf] }
  0x4a   : > { %3951 = vmatpush3.bf16.msra.mxu1 %v4153_v23  ;;  %v597_v54 = vor.u32 %v596_v22, %v529_v3  ;;  %v4740_v3 = vsel %vm4619_vm5, %v595_v43, %v3192_v27  ;;  %v4167_v23 = vld [vmem:[%s6159_s1 + $0x128] sm:$0xff]   ;;  %v4799_v10 = vcombine.low %v4771_v52, %v4774_v20  ;;  %v4810_v22 = vld [vmem:[%s4387_s10 + $0x44] sm:$0xf]  ;;  %v3183_v43 = vcombine.low %v4599_v33, %v4599_v33 }
  0x4b   : > { %3664 = vmatprep.subr.bf16.mxu1 %v4156_v11  ;;  %v3182_v11 = vcombine.low %v4558_v8, %v4558_v8  ;;  %v4168_v27 = vld [vmem:[%s6159_s1 + $0xe8] sm:$0xff]   ;;  %v4782_v8 = vsel %vm4451_vm2, %v4590_v29, %v464_v63  ;;  %v4180_v63 = vld [vmem:[%s6159_s1 + $0x118] sm:$0xff]   ;;  %v4829_v0 = vcombine.low %v4802_v35, %v4810_v22 }
  0x4c   : > { %3997 = vmatpush3.bf16.msra.mxu0 %v4188_v4  ;;  %v4750_v50 = vsel %vm4619_vm5, %v597_v54, %v3193_v46  ;;  %v573_v4 = vor.u32 %v572_v13, %v445_v2  ;;  %v4768_v2 = vcombine.low %v4713_v37, %v4720_v51  ;;  %v468_v13 = vrot.slane %v466_v55, 7  ;;  %v4819_v54 = vld [vmem:[%s4387_s10 + $0x48] sm:$0xf] }
  0x4d   : > { %933 = vmatmul.mubr.bf16.gmra.mxu0 %v4710_v60  ;;  %3953 = vmatmul.mubr.bf16.vlgmr.msra.gmra.mxu1 %v4651_v53  ;;  %v4793_v30 = vsel %vm4619_vm5, %v575_v9, %v3182_v11  ;;  %v490_v11 = vshll.u32 %v4829_v0, 16 }
  0x4e   : > { %3665 = vmatpush3.bf16.msra.mxu1 %v4157_v25  ;;  %940 = vmatprep.mubr.bf16.mxu0 %v4625_v48  ;;  %v4786_v31 = vsel %vm4619_vm5, %v573_v4, %v3181_v59  ;;  %v578_v25 = vrot.slane %v469_v15, 1  ;;  %v473_v29 = vshrl.u32 %v4768_v2, 16  ;;  %v476_v49 = vshll.u32 %v4768_v2, 16  ;;  %v4181_v59 = vld [vmem:[%s6159_s1 + $0xd8] sm:$0xff]  }
  0x4f   : > { %3956 = vmatprep.mubr.bf16.mxu1 %v4726_v17  ;;  %3666 = vmatprep.subr.bf16.mxu1 %v4162_v41  ;;  %v4174_v41 = vld [vmem:[%s6159_s1 + $0xe0] sm:$0xff]   ;;  %v471_v46 = vor.u32 %v469_v15, %v468_v13  ;;  %v4186_v13 = vld [vmem:[%s6159_s1 + $0x110] sm:$0xff]  }
  0x50   : > { %3998 = vmatprep.subr.bf16.mxu0 %v4193_v56  ;;  %v475_v33 = vrot.slane %v473_v29, 7  ;;  %v580_v4 = vrot.slane %v476_v49, 1 }
  0x51   : > { %3999 = vmatpush3.bf16.msra.mxu0 %v4193_v56  ;;  %v3184_v56 = vcombine.low %v4668_v6, %v4668_v6  ;;  %v4841_v6 = vsel %vm4619_vm5, %v577_v40, %v3183_v43  ;;  %v3186_v43 = vcombine.low %v4774_v20, %v4774_v20 }
  0x52   : > { %3667 = vmatpush3.bf16.msra.mxu1 %v4163_v7  ;;  %3800 = vmatprep.subr.bf16.mxu0 %v4199_v5  ;;  %v579_v7 = vor.u32 %v578_v25, %v466_v55  ;;  %v4837_v55 = vsel %vm4451_vm2, %v4657_v1, %v471_v46  ;;  %v480_v5 = vshrl.u32 %v4799_v10, 16  ;;  %v4853_v1 = vcombine.low %v4819_v54, %v4832_v57  ;;  %v4862_v25 = vld [vmem:[%s4387_s10 + $0x50] sm:$0xf]  ;;  %v312_v46 = vld [vmem:[%s4387_s10 + $0x54] sm:$0xf] }
  0x53   : > { %3668 = vmatprep.subr.bf16.mxu1 %v4167_v23  ;;  %v483_v23 = vshll.u32 %v4799_v10, 16 }
  0x54   : > { %v4848_v15 = vsel %vm4619_vm5, %v579_v7, %v3184_v56  ;;  %v497_v7 = vshll.u32 %v4853_v1, 16  ;;  %v487_v56 = vshrl.u32 %v4829_v0, 16 }
  0x55   : > { %941 = vmatmul.mubr.bf16.gmra.mxu0 %v4782_v8  ;;  %3957 = vmatmul.mubr.bf16.gmra.mxu1 %v4786_v31  ;;  %v582_v9 = vrot.slane %v483_v23, 1 }
  0x56   : > { %948 = vmatprep.mubr.bf16.mxu0 %v4701_v36  ;;  %3960 = vmatprep.mubr.bf16.mxu1 %v4793_v30 }
  0x57   : > { %3669 = vmatpush3.bf16.msra.mxu1 %v4168_v27  ;;  %v478_v27 = vor.u32 %v476_v49, %v475_v33  ;;  %v583_v40 = vor.u32 %v582_v9, %v480_v5  ;;  %v4187_v49 = vld [vmem:[%s6159_s1 + $0xd0] sm:$0xff]   ;;  %v584_v33 = vrot.slane %v490_v11, 1  ;;  %v494_v9 = vshrl.u32 %v4853_v1, 16 }
  0x58   : > { %3670 = vmatprep.subr.bf16.mxu1 %v4173_v26  ;;  %v581_v26 = vor.u32 %v580_v4, %v473_v29  ;;  %v4191_v29 = vld [vmem:[%s6159_s1 + $0x108] sm:$0xff]   ;;  %v4889_v4 = vcombine.low %v4862_v25, %v312_v46 }
  0x5b   : > { %3671 = vmatpush3.bf16.msra.mxu1 %v4174_v41  ;;  %v3185_v41 = vcombine.low %v4720_v51, %v4720_v51  ;;  %v4882_v51 = vsel %vm4451_vm2, %v4713_v37, %v478_v27  ;;  %v4192_v37 = vld [vmem:[%s6159_s1 + $0xc8] sm:$0xff]  }
  0x5c   : > { %3672 = vmatprep.subr.bf16.mxu1 %v4180_v63  ;;  %v482_v63 = vrot.slane %v480_v5, 7  ;;  %v4196_v5 = vld [vmem:[%s6159_s1 + $0x100] sm:$0xff]  }
  0x5d   : > { %949 = vmatmul.mubr.bf16.gmra.mxu0 %v4837_v55  ;;  %3961 = vmatmul.mubr.bf16.gmra.mxu1 %v4841_v6  ;;  %v4886_v20 = vsel %vm4619_vm5, %v581_v26, %v3185_v41  ;;  %v585_v26 = vor.u32 %v584_v33, %v487_v56  ;;  %v3187_v41 = vcombine.low %v4810_v22, %v4810_v22 }
  0x5e   : > { %956 = vmatprep.mubr.bf16.mxu0 %v4768_v2  ;;  %3964 = vmatprep.mubr.bf16.mxu1 %v4848_v15  ;;  %v485_v27 = vor.u32 %v483_v23, %v482_v63  ;;  %v4198_v23 = vld [vmem:[%s6159_s1 + $0x238] sm:$0xff]   ;;  %v489_v63 = vrot.slane %v487_v56, 7 }
  0x5f   : > { %3673 = vmatpush3.bf16.msra.mxu1 %v4181_v59  ;;  %v4893_v59 = vsel %vm4619_vm5, %v583_v40, %v3186_v43  ;;  %v504_v40 = vshll.u32 %v4889_v4, 16  ;;  %v4924_v33 = vsel %vm4619_vm5, %v585_v26, %v3187_v41  ;;  %v496_v41 = vrot.slane %v494_v9, 7 }
  0x60   : > { %3674 = vmatprep.subr.bf16.mxu1 %v4186_v13  ;;  %v586_v13 = vrot.slane %v497_v7, 1  ;;  %v4920_v22 = vsel %vm4451_vm2, %v4771_v52, %v485_v27  ;;  %v492_v52 = vor.u32 %v490_v11, %v489_v63 }
  0x61   : > { %v499_v11 = vor.u32 %v497_v7, %v496_v41  ;;  %v4207_v41 = vld [vmem:[%s6159_s1 + $0x1a0] sm:$0xff]  }
  0x62   : > { %v587_v43 = vor.u32 %v586_v13, %v494_v9  ;;  %v588_v13 = vrot.slane %v504_v40, 1  ;;  %v4938_v27 = vsel %vm4451_vm2, %v4802_v35, %v492_v52 }
  0x63   : > { %3675 = vmatpush3.bf16.msra.mxu1 %v4187_v49  ;;  %v3188_v49 = vcombine.low %v4832_v57, %v4832_v57  ;;  %v501_v57 = vshrl.u32 %v4889_v4, 16  ;;  %v4955_v35 = vsel %vm4451_vm2, %v4819_v54, %v499_v11  ;;  %v4209_v11 = vld [vmem:[%s6159_s1 + $0x1d8] sm:$0xff]  }
  0x64   : > { %3676 = vmatprep.subr.bf16.mxu1 %v4191_v29  ;;  %v4197_v29 = vld [vmem:[%s6159_s1 + $0xc0] sm:$0xff]  }
  0x65   : > { %957 = vmatmul.mubr.bf16.gmra.mxu0 %v4882_v51  ;;  %3965 = vmatmul.mubr.bf16.gmra.mxu1 %v4886_v20  ;;  %v589_v56 = vor.u32 %v588_v13, %v501_v57 }
  0x66   : > { %964 = vmatprep.mubr.bf16.mxu0 %v4799_v10  ;;  %3968 = vmatprep.mubr.bf16.mxu1 %v4893_v59 }
  0x67   : > { %3677 = vmatpush3.bf16.msra.mxu1 %v4192_v37  ;;  %v4929_v37 = vsel %vm4619_vm5, %v587_v43, %v3188_v49  ;;  %v4950_v43 = vld [vmem:[%s4387_s10 + $0x7c] sm:$0xf]  ;;  %v503_v49 = vrot.slane %v501_v57, 7 }
  0x68   : > { %3678 = vmatprep.subr.bf16.mxu1 %v4196_v5  ;;  %v3189_v5 = vcombine.low %v312_v46, %v312_v46  ;;  %v321_v46 = vld [vmem:[%s4387_s10 + $0x78] sm:$0xf] }
  0x69   : > { %v4958_v9 = vcombine.low %v321_v46, %v4950_v43  ;;  %v506_v7 = vor.u32 %v504_v40, %v503_v49  ;;  %v4201_v40 = vld [vmem:[%s6159_s1 + $0x1f0] sm:$0xff]   ;;  %v4210_v49 = vld [vmem:[%s6159_s1 + $0x198] sm:$0xff]  }
  0x6a   : > { %v4942_v26 = vsel %vm4619_vm5, %v589_v56, %v3189_v5  ;;  %v4206_v56 = vld [vmem:[%s6159_s1 + $0x1e0] sm:$0xff]  }
  0x6b   : > { %3679 = vmatpush3.bf16.msra.mxu1 %v4197_v29  ;;  %v1228_v29 = vshrl.u32 %v4958_v9, 16  ;;  %v1231_v63 = vshll.u32 %v4958_v9, 16  ;;  %v4971_v57 = vsel %vm4451_vm2, %v4862_v25, %v506_v7  ;;  %v4200_v25 = vld [vmem:[%s6159_s1 + $0x1b8] sm:$0xff]   ;;  %v4213_v5 = vld [vmem:[%s6159_s1 + $0x220] sm:$0xff]   ;;  %v4211_v7 = vld [vmem:[%s6159_s1 + $0x1d0] sm:$0xff]  }
  0x6c   : > { %4032 = vmatprep.subr.bf16.mxu1 %v4198_v23 }
  0x6d   : > { %965 = vmatmul.mubr.bf16.gmra.mxu0 %v4920_v22  ;;  %3969 = vmatmul.mubr.bf16.gmra.mxu1 %v4924_v33  ;;  %v1230_v54 = vrot.slane %v1228_v29, 7 }
  0x6e   : > { %972 = vmatprep.mubr.bf16.mxu0 %v4829_v0  ;;  %3972 = vmatprep.mubr.bf16.mxu1 %v4929_v37 }
  0x6f   : > { %v1233_v13 = vor.u32 %v1231_v63, %v1230_v54  ;;  %v4221_v54 = vld [vmem:[%s6159_s1 + $0x210] sm:$0xff]  }
  0x71   : > { %v4977_v52 = vsel %vm4451_vm2, %v321_v46, %v1233_v13  ;;  %v4220_v46 = vld [vmem:[%s6159_s1 + $0x218] sm:$0xff]   ;;  %v4212_v13 = vld [vmem:[%s6159_s1 + $0x190] sm:$0xff]  }
  0x75   : > { %973 = vmatmul.mubr.bf16.gmra.mxu0 %v4938_v27  ;;  %3973 = vmatmul.mubr.bf16.gmra.mxu1 %v4942_v26 }
  0x76   : > { %980 = vmatprep.mubr.bf16.mxu0 %v4853_v1  ;;  %3976 = vmatprep.mubr.bf16.mxu1 %v4682_v32 }
  0x7d   : > { %981 = vmatmul.mubr.bf16.gmra.mxu0 %v4955_v35  ;;  %3977 = vmatmul.mubr.bf16.gmra.mxu1 %v4733_v38 }
  0x7e   : > { %988 = vmatprep.mubr.bf16.mxu0 %v4889_v4  ;;  %3980 = vmatprep.mubr.bf16.mxu1 %v4740_v3 }
  0x85   : > { %989 = vmatmul.mubr.bf16.gmra.mxu0 %v4971_v57  ;;  %3981 = vmatmul.mubr.bf16.gmra.mxu1 %v4750_v50 }
  0x86   : > { %1468 = vmatprep.mubr.bf16.mxu1 %v4401_v14  ;;  %4000 = vmatprep.mubr.bf16.mxu0 %v4651_v53  ;;  %v4202_v14 = vld [vmem:[%s6159_s1 + $0x1b0] sm:$0xff]   ;;  %v4204_v53 = vld [vmem:[%s6159_s1 + $0x1e8] sm:$0xff]  }
  0x8d   : > { %1469 = vmatmul.mubr.bf16.vlgmr.msra.gmra.mxu1 %v4476_v42  ;;  %4001 = vmatmul.mubr.bf16.vlgmr.msra.gmra.mxu0 %v4726_v17  ;;  %v4208_v42 = vld [vmem:[%s6159_s1 + $0x228] sm:$0xff]  }
  0x8e   : > { %4033 = vmatpush3.bf16.msra.mxu1 %v4198_v23  ;;  %3801 = vmatpush3.bf16.msra.mxu0 %v4200_v25  ;;  %v4205_v23 = vld [vmem:[%s6159_s1 + $0x1a8] sm:$0xff]  }
  0x8f   : > { %1476 = vmatprep.mubr.bf16.mxu1 %v4466_v39  ;;  %4004 = vmatprep.mubr.bf16.mxu0 %v4786_v31  ;;  %v4214_v25 = vld [vmem:[%s6159_s1 + $0x1c8] sm:$0xff]  }
  0x90   : > { %3802 = vmatprep.subr.bf16.mxu0 %v4201_v40  ;;  %4034 = vmatprep.subr.bf16.mxu1 %v4203_v34  ;;  %v4222_v40 = vld [vmem:[%s6159_s1 + $0x208] sm:$0xff]  }
  0x92   : > { %3803 = vmatpush3.bf16.msra.mxu0 %v4202_v14  ;;  %4035 = vmatpush3.bf16.msra.mxu1 %v4203_v34  ;;  %v4215_v34 = vld [vmem:[%s6159_s1 + $0x188] sm:$0xff]   ;;  %v4218_v14 = vld [vmem:[%s6159_s1 + $0x1c0] sm:$0xff]  }
  0x93   : > { %3804 = vmatprep.subr.bf16.mxu0 %v4204_v53  ;;  %4036 = vmatprep.subr.bf16.mxu1 %v4208_v42  ;;  %v4223_v53 = vld [vmem:[%s6159_s1 + $0x200] sm:$0xff]  }
  0x95   : > { %1477 = vmatmul.mubr.bf16.gmra.mxu1 %v4577_v21  ;;  %4005 = vmatmul.mubr.bf16.gmra.mxu0 %v4793_v30 }
  0x96   : > { %1484 = vmatprep.mubr.bf16.mxu1 %v4523_v58  ;;  %4008 = vmatprep.mubr.bf16.mxu0 %v4841_v6 }
  0x97   : > { %3805 = vmatpush3.bf16.msra.mxu0 %v4205_v23  ;;  %4037 = vmatpush3.bf16.msra.mxu1 %v4208_v42  ;;  %v4219_v42 = vld [vmem:[%s6159_s1 + $0x180] sm:$0xff]   ;;  %v1236_v23 = vrot.slane %v1231_v63, 1 }
  0x98   : > { %3806 = vmatprep.subr.bf16.mxu0 %v4206_v56  ;;  %4038 = vmatprep.subr.bf16.mxu1 %v4213_v5 }
  0x99   : > { %v1237_v56 = vor.u32 %v1236_v23, %v1228_v29 }
  0x9b   : > { %3807 = vmatpush3.bf16.msra.mxu0 %v4207_v41  ;;  %4039 = vmatpush3.bf16.msra.mxu1 %v4213_v5  ;;  %v3219_v5 = vcombine.low %v4950_v43, %v4950_v43 }
  0x9c   : > { %3808 = vmatprep.subr.bf16.mxu0 %v4209_v11  ;;  %4040 = vmatprep.subr.bf16.mxu1 %v4220_v46 }
  0x9d   : > { %1485 = vmatmul.mubr.bf16.gmra.mxu1 %v4632_v12  ;;  %4009 = vmatmul.mubr.bf16.gmra.mxu0 %v4848_v15  ;;  %v5085_v41 = vsel %vm4619_vm5, %v1237_v56, %v3219_v5 }
  0x9e   : > { %1492 = vmatprep.mubr.bf16.mxu1 %v4572_v19  ;;  %4012 = vmatprep.mubr.bf16.mxu0 %v4886_v20 }
  0x9f   : > { %3809 = vmatpush3.bf16.msra.mxu0 %v4210_v49  ;;  %4041 = vmatpush3.bf16.msra.mxu1 %v4220_v46 }
  0xa0   : > { %3810 = vmatprep.subr.bf16.mxu0 %v4211_v7  ;;  %4042 = vmatprep.subr.bf16.mxu1 %v4221_v54 }
  0xa3   : > { %3811 = vmatpush3.bf16.msra.mxu0 %v4212_v13  ;;  %4043 = vmatpush3.bf16.msra.mxu1 %v4221_v54 }
  0xa4   : > { %3812 = vmatprep.subr.bf16.mxu0 %v4214_v25  ;;  %4044 = vmatprep.subr.bf16.mxu1 %v4222_v40 }
  0xa5   : > { %1493 = vmatmul.mubr.bf16.gmra.mxu1 %v4710_v60  ;;  %4013 = vmatmul.mubr.bf16.gmra.mxu0 %v4893_v59 }
  0xa6   : > { %1500 = vmatprep.mubr.bf16.mxu1 %v4625_v48  ;;  %4016 = vmatprep.mubr.bf16.mxu0 %v4924_v33 }
  0xa7   : > { %3813 = vmatpush3.bf16.msra.mxu0 %v4215_v34  ;;  %4045 = vmatpush3.bf16.msra.mxu1 %v4222_v40 }
  0xa8   : > { %3814 = vmatprep.subr.bf16.mxu0 %v4218_v14  ;;  %4046 = vmatprep.subr.bf16.mxu1 %v4223_v53 }
  0xab   : > { %3815 = vmatpush3.bf16.msra.mxu0 %v4219_v42  ;;  %4047 = vmatpush3.bf16.msra.mxu1 %v4223_v53 }
  0xad   : > { %1501 = vmatmul.mubr.bf16.gmra.mxu1 %v4782_v8  ;;  %4017 = vmatmul.mubr.bf16.gmra.mxu0 %v4929_v37 }
  0xae   : > { %1508 = vmatprep.mubr.bf16.mxu1 %v4701_v36  ;;  %4020 = vmatprep.mubr.bf16.mxu0 %v4942_v26 }
  0xb5   : > { %1509 = vmatmul.mubr.bf16.gmra.mxu1 %v4837_v55  ;;  %4021 = vmatmul.mubr.bf16.gmra.mxu0 %v4682_v32 }
  0xb6   : > { %1516 = vmatprep.mubr.bf16.mxu1 %v4768_v2  ;;  %4024 = vmatprep.mubr.bf16.mxu0 %v4733_v38 }
  0xbd   : > { %1517 = vmatmul.mubr.bf16.gmra.mxu1 %v4882_v51  ;;  %4025 = vmatmul.mubr.bf16.gmra.mxu0 %v4740_v3 }
  0xbe   : > { %1524 = vmatprep.mubr.bf16.mxu1 %v4799_v10  ;;  %4028 = vmatprep.mubr.bf16.mxu0 %v4750_v50 }
  0xc5   : > { %1525 = vmatmul.mubr.bf16.gmra.mxu1 %v4920_v22  ;;  %4029 = vmatmul.mubr.bf16.gmra.mxu0 %v5085_v41 }
  0xc6   : > { %1532 = vmatprep.mubr.bf16.mxu1 %v4829_v0  ;;  %2015 = vmatprep.mubr.bf16.mxu0 %v4466_v39 }
  0xcd   : > { %1533 = vmatmul.mubr.bf16.gmra.mxu1 %v4938_v27  ;;  %2016 = vmatmul.mubr.bf16.vlgmr.msra.gmra.mxu0 %v4577_v21 }
  0xce   : > { %1540 = vmatprep.mubr.bf16.mxu1 %v4853_v1  ;;  %2023 = vmatprep.mubr.bf16.mxu0 %v4523_v58 }
  0xd5   : > { %1541 = vmatmul.mubr.bf16.gmra.mxu1 %v4955_v35  ;;  %2024 = vmatmul.mubr.bf16.gmra.mxu0 %v4632_v12 }
  0xd6   : > { %1548 = vmatprep.mubr.bf16.mxu1 %v4889_v4  ;;  %2031 = vmatprep.mubr.bf16.mxu0 %v4572_v19 }
  0xdd   : > { %1549 = vmatmul.mubr.bf16.gmra.mxu1 %v4971_v57  ;;  %2032 = vmatmul.mubr.bf16.gmra.mxu0 %v4710_v60 }
  0xde   : > { %1556 = vmatprep.mubr.bf16.mxu1 %v4407_v16  ;;  %2039 = vmatprep.mubr.bf16.mxu0 %v4625_v48 }
  0xe5   : > { %1557 = vmatmul.mubr.bf16.gmra.mxu1 %v4483_v44  ;;  %2040 = vmatmul.mubr.bf16.gmra.mxu0 %v4782_v8 }
  0xe6   : > { %1564 = vmatprep.mubr.bf16.mxu1 %v4433_v28  ;;  %2047 = vmatprep.mubr.bf16.mxu0 %v4701_v36 }
  0xed   : > { %v3544_v39 = vpop.f32.mrf.mxu0  ;;  %v3616_v58 = vpop.f32.mrf.mxu1  ;;  %1565 = vmatmul.mubr.bf16.gmra.mxu1 %v4533_v62  ;;  %2048 = vmatmul.mubr.bf16.gmra.mxu0 %v4837_v55 }
  0xee   : > { %1572 = vmatprep.mubr.bf16.mxu1 %v4490_v47  ;;  %2055 = vmatprep.mubr.bf16.mxu0 %v4768_v2 }
  0xef   : > { %v3545_v19 = vpop.f32.mrf.mxu0  ;;  %v3617_v21 = vpop.f32.mrf.mxu1 }
  0xf0   : > { %v5111_v45 = vadd.f32 %v3545_v19, %v3544_v39  ;;  %v5113_v48 = vadd.f32 %v3617_v21, %v3616_v58 }
  0xf1   : > { %v3547_v12 = vpop.f32.mrf.mxu0  ;;  %v3619_v60 = vpop.f32.mrf.mxu1 }
  0xf3   : > { %v3548_v8 = vpop.f32.mrf.mxu0  ;;  %v3620_v36 = vpop.f32.mrf.mxu1 }
  0xf4   : > { %v5115_v43 = vadd.f32 %v3548_v8, %v3547_v12  ;;  %v5117_v29 = vadd.f32 %v3620_v36, %v3619_v60 }
  0xf5   : > { %v3550_v63 = vpop.f32.mrf.mxu0  ;;  %v3622_v55 = vpop.f32.mrf.mxu1  ;;  %1573 = vmatmul.mubr.bf16.gmra.mxu1 %v4582_v24  ;;  %2056 = vmatmul.mubr.bf16.gmra.mxu0 %v4882_v51 }
  0xf6   : > { %1580 = vmatprep.mubr.bf16.mxu1 %v4529_v61  ;;  %2063 = vmatprep.mubr.bf16.mxu0 %v4799_v10 }
  0xf7   : > { %v3551_v2 = vpop.f32.mrf.mxu0  ;;  %v3623_v11 = vpop.f32.mrf.mxu1 }
  0xf8   : > { %v3552_v46 = vadd.f32 %v3551_v2, %v3550_v63  ;;  %v5123_v49 = vadd.f32 %v3623_v11, %v3622_v55 }
  0xf9   : > { %v3553_v7 = vpop.f32.mrf.mxu0  ;;  %v3625_v54 = vpop.f32.mrf.mxu1 }
  0xfb   : > { %v3554_v13 = vpop.f32.mrf.mxu0  ;;  %v3626_v25 = vpop.f32.mrf.mxu1 }
  0xfc   : > { %v3555_v40 = vadd.f32 %v3554_v13, %v3553_v7  ;;  %v5125_v34 = vadd.f32 %v3626_v25, %v3625_v54 }
  0xfd   : > { %v3556_v14 = vpop.f32.mrf.mxu0  ;;  %v3628_v53 = vpop.f32.mrf.mxu1  ;;  %1581 = vmatmul.mubr.bf16.gmra.mxu1 %v4637_v18  ;;  %2064 = vmatmul.mubr.bf16.gmra.mxu0 %v4920_v22 }
  0xfe   : > { %1588 = vmatprep.mubr.bf16.mxu1 %v4958_v9  ;;  %2071 = vmatprep.mubr.bf16.mxu0 %v4829_v0 }
  0xff   : > { %v3557_v10 = vpop.f32.mrf.mxu0  ;;  %v3629_v51 = vpop.f32.mrf.mxu1 }
 0x100   : > { %v3558_v42 = vadd.f32 %v3557_v10, %v3556_v14  ;;  %v5131_v23 = vadd.f32 %v3629_v51, %v3628_v53 }
 0x101   : > { %v3559_v56 = vpop.f32.mrf.mxu0  ;;  %v3631_v5 = vpop.f32.mrf.mxu1 }
 0x103   : > { %v3560_v39 = vpop.f32.mrf.mxu0  ;;  %v3632_v58 = vpop.f32.mrf.mxu1 }
 0x104   : > { %v3561_v19 = vadd.f32 %v3560_v39, %v3559_v56  ;;  %v5133_v21 = vadd.f32 %v3632_v58, %v3631_v5 }
 0x105   : > { %v3562_v12 = vpop.f32.mrf.mxu0  ;;  %v3634_v60 = vpop.f32.mrf.mxu1  ;;  %1589 = vmatmul.mubr.bf16.gmra.mxu1 %v4977_v52  ;;  %2072 = vmatmul.mubr.bf16.gmra.mxu0 %v4938_v27 }
 0x106   : > { %2079 = vmatprep.mubr.bf16.mxu0 %v4853_v1  ;;  %4048 = vmatprep.mubr.bf16.mxu1 %v4726_v17 }
 0x107   : > { %v3563_v0 = vpop.f32.mrf.mxu0  ;;  %v3635_v22 = vpop.f32.mrf.mxu1 }
 0x108   : > { %v3564_v8 = vadd.f32 %v3563_v0, %v3562_v12  ;;  %v5139_v36 = vadd.f32 %v3635_v22, %v3634_v60 }
 0x109   : > { %v3565_v63 = vpop.f32.mrf.mxu0  ;;  %v3637_v55 = vpop.f32.mrf.mxu1 }
 0x10b   : > { %v3566_v2 = vpop.f32.mrf.mxu0  ;;  %v3638_v11 = vpop.f32.mrf.mxu1 }
 0x10c   : > { %v3567_v7 = vadd.f32 %v3566_v2, %v3565_v63  ;;  %v5141_v54 = vadd.f32 %v3638_v11, %v3637_v55 }
 0x10d   : > { %v3568_v13 = vpop.f32.mrf.mxu0  ;;  %v3954_v25 = vpop.f32.mrf.mxu1  ;;  %2080 = vmatmul.mubr.bf16.gmra.mxu0 %v4955_v35  ;;  %4049 = vmatmul.mubr.bf16.vlgmr.msra.gmra.mxu1 %v4786_v31 }
 0x10e   : > { %v5145_v1 = vadd.f32 %v3954_v25, %v3552_v46  ;;  %2087 = vmatprep.mubr.bf16.mxu0 %v4889_v4  ;;  %4052 = vmatprep.mubr.bf16.mxu1 %v4793_v30 }
 0x10f   : > { %v3569_v17 = vpop.f32.mrf.mxu0  ;;  %v1063_v27 = vpop.f32.mrf.mxu1 }
 0x110   : > { %v3570_v14 = vadd.f32 %v3569_v17, %v3568_v13  ;;  %v5150_v53 = vadd.f32 %v5111_v45, %v1063_v27 }
 0x111   : > { %v3571_v10 = vpop.f32.mrf.mxu0  ;;  %v3955_v51 = vpop.f32.mrf.mxu1 }
 0x112   : > { %v5152_v56 = vadd.f32 %v3955_v51, %v3555_v40 }
 0x113   : > { %v3572_v5 = vpop.f32.mrf.mxu0  ;;  %v1066_v35 = vpop.f32.mrf.mxu1 }
 0x114   : > { %v3573_v39 = vadd.f32 %v3572_v5, %v3571_v10  ;;  %v5155_v31 = vadd.f32 %v5115_v43, %v1066_v35 }
 0x115   : > { %v3574_v46 = vpop.f32.mrf.mxu0  ;;  %v3958_v4 = vpop.f32.mrf.mxu1  ;;  %2088 = vmatmul.mubr.bf16.gmra.mxu0 %v4971_v57  ;;  %4053 = vmatmul.mubr.bf16.gmra.mxu1 %v4841_v6 }
 0x116   : > { %v5159_v30 = vadd.f32 %v3958_v4, %v3564_v8  ;;  %2095 = vmatprep.mubr.bf16.mxu0 %v4407_v16  ;;  %4056 = vmatprep.mubr.bf16.mxu1 %v4848_v15 }
 0x117   : > { %v3575_v45 = vpop.f32.mrf.mxu0  ;;  %v1079_v40 = vpop.f32.mrf.mxu1 }
 0x118   : > { %v3576_v58 = vadd.f32 %v3575_v45, %v3574_v46  ;;  %v5163_v12 = vadd.f32 %v3558_v42, %v1079_v40 }
 0x119   : > { %v3577_v60 = vpop.f32.mrf.mxu0  ;;  %v3959_v43 = vpop.f32.mrf.mxu1 }
 0x11a   : > { %v5165_v0 = vadd.f32 %v3959_v43, %v3567_v7 }
 0x11b   : > { %v3578_v22 = vpop.f32.mrf.mxu0  ;;  %v1082_v63 = vpop.f32.mrf.mxu1 }
 0x11c   : > { %v3579_v57 = vadd.f32 %v3578_v22, %v3577_v60  ;;  %v5167_v55 = vadd.f32 %v3561_v19, %v1082_v63 }
 0x11d   : > { %v3580_v6 = vpop.f32.mrf.mxu0  ;;  %v3962_v8 = vpop.f32.mrf.mxu1  ;;  %2096 = vmatmul.mubr.bf16.gmra.mxu0 %v4483_v44  ;;  %4057 = vmatmul.mubr.bf16.gmra.mxu1 %v4886_v20 }
 0x11e   : > { %v5171_v16 = vadd.f32 %v3962_v8, %v3576_v58  ;;  %2103 = vmatprep.mubr.bf16.mxu0 %v4433_v28  ;;  %4060 = vmatprep.mubr.bf16.mxu1 %v4893_v59 }
 0x11f   : > { %v3581_v15 = vpop.f32.mrf.mxu0  ;;  %v1095_v42 = vpop.f32.mrf.mxu1 }
 0x120   : > { %v3582_v2 = vadd.f32 %v3581_v15, %v3580_v6  ;;  %v5175_v11 = vadd.f32 %v3570_v14, %v1095_v42 }
 0x121   : > { %v3583_v7 = vpop.f32.mrf.mxu0  ;;  %v3963_v19 = vpop.f32.mrf.mxu1 }
 0x122   : > { %v5177_v13 = vadd.f32 %v3963_v19, %v3579_v57 }
 0x123   : > { %v3584_v25 = vpop.f32.mrf.mxu0  ;;  %v1098_v17 = vpop.f32.mrf.mxu1 }
 0x124   : > { %v3585_v44 = vadd.f32 %v3584_v25, %v3583_v7  ;;  %v5179_v27 = vadd.f32 %v3573_v39, %v1098_v17 }
 0x125   : > { %v3586_v20 = vpop.f32.mrf.mxu0  ;;  %v3966_v10 = vpop.f32.mrf.mxu1  ;;  %2104 = vmatmul.mubr.bf16.gmra.mxu0 %v4533_v62  ;;  %4061 = vmatmul.mubr.bf16.gmra.mxu1 %v4924_v33 }
 0x126   : > { %2111 = vmatprep.mubr.bf16.mxu0 %v4490_v47  ;;  %4064 = vmatprep.mubr.bf16.mxu1 %v4929_v37 }
 0x127   : > { %v3587_v28 = vpop.f32.mrf.mxu0  ;;  %v1111_v59 = vpop.f32.mrf.mxu1 }
 0x128   : > { %v3588_v14 = vadd.f32 %v3587_v28, %v3586_v20  ;;  %v5185_v51 = vadd.f32 %v3582_v2, %v1111_v59 }
 0x129   : > { %v3589_v5 = vpop.f32.mrf.mxu0  ;;  %v3967_v35 = vpop.f32.mrf.mxu1 }
 0x12a   : > { %v5187_v46 = vadd.f32 %v3966_v10, %v3588_v14 }
 0x12b   : > { %v3590_v39 = vpop.f32.mrf.mxu0  ;;  %v1114_v4 = vpop.f32.mrf.mxu1 }
 0x12c   : > { %v3591_v45 = vadd.f32 %v3590_v39, %v3589_v5  ;;  %v5189_v40 = vadd.f32 %v3585_v44, %v1114_v4 }
 0x12d   : > { %v3592_v62 = vpop.f32.mrf.mxu0  ;;  %v3970_v33 = vpop.f32.mrf.mxu1  ;;  %2112 = vmatmul.mubr.bf16.gmra.mxu0 %v4582_v24  ;;  %4065 = vmatmul.mubr.bf16.gmra.mxu1 %v4942_v26 }
 0x12e   : > { %v5193_v47 = vadd.f32 %v3967_v35, %v3591_v45  ;;  %2119 = vmatprep.mubr.bf16.mxu0 %v4529_v61  ;;  %4068 = vmatprep.mubr.bf16.mxu1 %v4682_v32 }
 0x12f   : > { %v3593_v37 = vpop.f32.mrf.mxu0  ;;  %v1127_v58 = vpop.f32.mrf.mxu1 }
 0x130   : > { %v3594_v60 = vadd.f32 %v3593_v37, %v3592_v62 }
 0x131   : > { %v3595_v43 = vpop.f32.mrf.mxu0  ;;  %v3971_v22 = vpop.f32.mrf.mxu1 }
 0x132   : > { %v5197_v63 = vadd.f32 %v3594_v60, %v1127_v58 }
 0x133   : > { %v3596_v57 = vpop.f32.mrf.mxu0  ;;  %v1130_v6 = vpop.f32.mrf.mxu1 }
 0x134   : > { %v3597_v8 = vadd.f32 %v3596_v57, %v3595_v43 }
 0x135   : > { %v3598_v15 = vpop.f32.mrf.mxu0  ;;  %v3974_v24 = vpop.f32.mrf.mxu1  ;;  %2120 = vmatmul.mubr.bf16.gmra.mxu0 %v4637_v18  ;;  %4069 = vmatmul.mubr.bf16.gmra.mxu1 %v4733_v38 }
 0x136   : > { %v5201_v26 = vadd.f32 %v3597_v8, %v1130_v6  ;;  %2127 = vmatprep.mubr.bf16.mxu0 %v4958_v9  ;;  %4072 = vmatprep.mubr.bf16.mxu1 %v4740_v3 }
 0x137   : > { %v3599_v61 = vpop.f32.mrf.mxu0  ;;  %v1143_v32 = vpop.f32.mrf.mxu1 }
 0x138   : > { %v3600_v42 = vadd.f32 %v3599_v61, %v3598_v15 }
 0x139   : > { %v3601_v2 = vpop.f32.mrf.mxu0  ;;  %v3975_v7 = vpop.f32.mrf.mxu1 }
 0x13a   : > { %v5205_v19 = vadd.f32 %v3970_v33, %v3600_v42 }
 0x13b   : > { %v3602_v25 = vpop.f32.mrf.mxu0  ;;  %v1146_v17 = vpop.f32.mrf.mxu1 }
 0x13c   : > { %v3603_v44 = vadd.f32 %v3602_v25, %v3601_v2 }
 0x13d   : > { %v3604_v20 = vpop.f32.mrf.mxu0  ;;  %v3978_v18 = vpop.f32.mrf.mxu1  ;;  %2128 = vmatmul.mubr.bf16.gmra.mxu0 %v4977_v52  ;;  %4073 = vmatmul.mubr.bf16.gmra.mxu1 %v4750_v50 }
 0x13e   : > { %v5209_v38 = vadd.f32 %v3971_v22, %v3603_v44  ;;  %v5212_v3 = vadd.f32 %v3978_v18, %v5123_v49  ;;  %2135 = vmatprep.mubr.bf16.mxu0 %v4958_v9  ;;  %4076 = vmatprep.mubr.bf16.mxu1 %v5085_v41 }
 0x13f   : > { %v3605_v10 = vpop.f32.mrf.mxu0  ;;  %v1159_v28 = vpop.f32.mrf.mxu1 }
 0x140   : > { %v3606_v59 = vadd.f32 %v3605_v10, %v3604_v20  ;;  %v5217_v14 = vadd.f32 %v5113_v48, %v1159_v28 }
 0x141   : > { %v3607_v5 = vpop.f32.mrf.mxu0  ;;  %v3979_v35 = vpop.f32.mrf.mxu1 }
 0x142   : > { %v5219_v39 = vadd.f32 %v3606_v59, %v1143_v32  ;;  %v5222_v50 = vadd.f32 %v3979_v35, %v5125_v34 }
 0x143   : > { %v3608_v4 = vpop.f32.mrf.mxu0  ;;  %v1162_v49 = vpop.f32.mrf.mxu1 }
 0x144   : > { %v3609_v45 = vadd.f32 %v3608_v4, %v3607_v5  ;;  %v5225_v9 = vadd.f32 %v5117_v29, %v1162_v49 }
 0x145   : > { %v3610_v62 = vpop.f32.mrf.mxu0  ;;  %v3982_v33 = vpop.f32.mrf.mxu1  ;;  %2136 = vmatmul.mubr.bf16.gmra.mxu0 %v4977_v52  ;;  %4077 = vmatmul.mubr.bf16.gmra.mxu1 %v5085_v41 }
 0x146   : > { %v5229_v48 = vadd.f32 %v3609_v45, %v1146_v17  ;;  %v5232_v37 = vadd.f32 %v3982_v33, %v5139_v36 }
 0x147   : > { %v3611_v58 = vpop.f32.mrf.mxu0  ;;  %v1175_v34 = vpop.f32.mrf.mxu1 }
 0x148   : > { %v3612_v60 = vadd.f32 %v3611_v58, %v3610_v62  ;;  %v5235_v43 = vadd.f32 %v5131_v23, %v1175_v34 }
 0x149   : > { %v3613_v22 = vpop.f32.mrf.mxu0  ;;  %v3983_v29 = vpop.f32.mrf.mxu1 }
 0x14a   : > { %v5237_v57 = vadd.f32 %v3974_v24, %v3612_v60  ;;  %v5240_v6 = vadd.f32 %v3983_v29, %v5141_v54 }
 0x14b   : > { %v3614_v52 = vpop.f32.mrf.mxu0  ;;  %v1178_v41 = vpop.f32.mrf.mxu1 }
 0x14c   : > { %v3615_v8 = vadd.f32 %v3614_v52, %v3613_v22  ;;  %v5243_v15 = vadd.f32 %v5133_v21, %v1178_v41 }
 0x14d   : > { %v3680_v36 = vpop.f32.mrf.mxu1  ;;  %v4002_v61 = vpop.f32.mrf.mxu0 }
 0x14e   : > { %v5245_v32 = vadd.f32 %v3975_v7, %v3615_v8 }
 0x14f   : > { %v3681_v42 = vpop.f32.mrf.mxu1  ;;  %v1631_v23 = vpop.f32.mrf.mxu0 }
 0x150   : > { %v3682_v2 = vadd.f32 %v3681_v42, %v3680_v36 }
 0x151   : > { %v3683_v25 = vpop.f32.mrf.mxu1  ;;  %v4003_v17 = vpop.f32.mrf.mxu0 }
 0x152   : > { %v1632_v24 = vadd.f32 %v3682_v2, %v1631_v23 }
 0x153   : > { %v3684_v44 = vpop.f32.mrf.mxu1  ;;  %v1634_v20 = vpop.f32.mrf.mxu0 }
 0x154   : > { %v5248_v54 = vadd.f32 %v1632_v24, %v5150_v53  ;;  %v3685_v18 = vadd.f32 %v3684_v44, %v3683_v25 }
 0x155   : > { %v3686_v10 = vpop.f32.mrf.mxu1  ;;  %v4006_v28 = vpop.f32.mrf.mxu0 }
 0x156   : > { %v1635_v21 = vadd.f32 %v3685_v18, %v1634_v20 }
 0x157   : > { %v3687_v59 = vpop.f32.mrf.mxu1  ;;  %v1647_v5 = vpop.f32.mrf.mxu0 }
 0x158   : > { %v5251_v7 = vadd.f32 %v1635_v21, %v5155_v31  ;;  %v3688_v35 = vadd.f32 %v3687_v59, %v3686_v10 }
 0x159   : > { %v3689_v4 = vpop.f32.mrf.mxu1  ;;  %v4007_v49 = vpop.f32.mrf.mxu0 }
 0x15a   : > { %v1640_v45 = vadd.f32 %v4002_v61, %v3688_v35 }
 0x15b   : > { %v3690_v62 = vpop.f32.mrf.mxu1  ;;  %v1650_v33 = vpop.f32.mrf.mxu0 }
 0x15c   : > { %v3691_v58 = vadd.f32 %v3690_v62, %v3689_v4  ;;  %v5254_v34 = vadd.f32 %v1640_v45, %v5145_v1 }
 0x15d   : > { %v3692_v53 = vpop.f32.mrf.mxu1  ;;  %v4010_v60 = vpop.f32.mrf.mxu0 }
 0x15e   : > { %v1643_v22 = vadd.f32 %v4003_v17, %v3691_v58 }
 0x15f   : > { %v3693_v29 = vpop.f32.mrf.mxu1  ;;  %v1663_v52 = vpop.f32.mrf.mxu0 }
 0x160   : > { %v3694_v41 = vadd.f32 %v3693_v29, %v3692_v53  ;;  %v5257_v8 = vadd.f32 %v1643_v22, %v5152_v56 }
 0x161   : > { %v3695_v31 = vpop.f32.mrf.mxu1  ;;  %v4011_v36 = vpop.f32.mrf.mxu0 }
 0x162   : > { %v1648_v42 = vadd.f32 %v3694_v41, %v1647_v5 }
 0x163   : > { %v3696_v23 = vpop.f32.mrf.mxu1  ;;  %v1666_v61 = vpop.f32.mrf.mxu0 }
 0x164   : > { %v3697_v2 = vadd.f32 %v3696_v23, %v3695_v31  ;;  %v5260_v25 = vadd.f32 %v1648_v42, %v5163_v12 }
 0x165   : > { %v3698_v1 = vpop.f32.mrf.mxu1  ;;  %v5262_v24 = vpop.f32.mrf.mxu0 }
 0x166   : > { %v1651_v44 = vadd.f32 %v3697_v2, %v1650_v33 }
 0x167   : > { %v3699_v17 = vpop.f32.mrf.mxu1  ;;  %v1679_v20 = vpop.f32.mrf.mxu0 }
 0x168   : > { %v3700_v18 = vadd.f32 %v3699_v17, %v3698_v1  ;;  %v5265_v10 = vadd.f32 %v1651_v44, %v5167_v55 }
 0x169   : > { %v3701_v56 = vpop.f32.mrf.mxu1  ;;  %v5267_v21 = vpop.f32.mrf.mxu0 }
 0x16a   : > { %v1656_v59 = vadd.f32 %v4006_v28, %v3700_v18 }
 0x16b   : > { %v3702_v5 = vpop.f32.mrf.mxu1  ;;  %v1682_v35 = vpop.f32.mrf.mxu0 }
 0x16c   : > { %v3703_v4 = vadd.f32 %v3702_v5, %v3701_v56  ;;  %v5270_v12 = vadd.f32 %v1656_v59, %v5159_v30 }
 0x16d   : > { %v3704_v45 = vpop.f32.mrf.mxu1  ;;  %v5272_v62 = vpop.f32.mrf.mxu0 }
 0x16e   : > { %v1659_v33 = vadd.f32 %v4007_v49, %v3703_v4 }
 0x16f   : > { %v3705_v58 = vpop.f32.mrf.mxu1  ;;  %v1695_v53 = vpop.f32.mrf.mxu0 }
 0x170   : > { %v3706_v22 = vadd.f32 %v3705_v58, %v3704_v45  ;;  %v5275_v55 = vadd.f32 %v1659_v33, %v5165_v0 }
 0x171   : > { %v3707_v29 = vpop.f32.mrf.mxu1  ;;  %v5277_v41 = vpop.f32.mrf.mxu0 }
 0x172   : > { %v1664_v28 = vadd.f32 %v3706_v22, %v1663_v52 }
 0x173   : > { %v3708_v31 = vpop.f32.mrf.mxu1  ;;  %v1698_v42 = vpop.f32.mrf.mxu0 }
 0x174   : > { %v3709_v23 = vadd.f32 %v3708_v31, %v3707_v29  ;;  %v5280_v30 = vadd.f32 %v1664_v28, %v5175_v11 }
 0x175   : > { %v3710_v2 = vpop.f32.mrf.mxu1  ;;  %v5282_v1 = vpop.f32.mrf.mxu0 }
 0x176   : > { %v1667_v49 = vadd.f32 %v3709_v23, %v1666_v61 }
 0x177   : > { %v3711_v44 = vpop.f32.mrf.mxu1  ;;  %v5284_v17 = vpop.f32.mrf.mxu0 }
 0x178   : > { %v3712_v18 = vadd.f32 %v3711_v44, %v3710_v2  ;;  %v5287_v0 = vadd.f32 %v1667_v49, %v5179_v27 }
 0x179   : > { %v3713_v56 = vpop.f32.mrf.mxu1  ;;  %v5289_v59 = vpop.f32.mrf.mxu0 }
 0x17a   : > { %v1672_v52 = vadd.f32 %v4010_v60, %v3712_v18 }
 0x17b   : > { %v3714_v5 = vpop.f32.mrf.mxu1  ;;  %v5291_v4 = vpop.f32.mrf.mxu0 }
 0x17c   : > { %v3715_v11 = vadd.f32 %v3714_v5, %v3713_v56  ;;  %v5294_v45 = vadd.f32 %v1672_v52, %v5171_v16 }
 0x17d   : > { %v3716_v33 = vpop.f32.mrf.mxu1  ;;  %v5296_v61 = vpop.f32.mrf.mxu0 }
 0x17e   : > { %v1675_v58 = vadd.f32 %v4011_v36, %v3715_v11 }
 0x17f   : > { %v3717_v22 = vpop.f32.mrf.mxu1  ;;  %v5298_v29 = vpop.f32.mrf.mxu0 }
 0x180   : > { %v3718_v27 = vadd.f32 %v3717_v22, %v3716_v33  ;;  %v5301_v28 = vadd.f32 %v1675_v58, %v5177_v13 }
 0x181   : > { %v3719_v31 = vpop.f32.mrf.mxu1  ;;  %v5303_v60 = vpop.f32.mrf.mxu0 }
 0x182   : > { %v1680_v23 = vadd.f32 %v3718_v27, %v1679_v20 }
 0x183   : > { %v3720_v2 = vpop.f32.mrf.mxu1  ;;  %v5305_v49 = vpop.f32.mrf.mxu0 }
 0x184   : > { %v3721_v16 = vadd.f32 %v3720_v2, %v3719_v31  ;;  %v5308_v44 = vadd.f32 %v1680_v23, %v5185_v51 }
 0x185   : > { %v3722_v18 = vpop.f32.mrf.mxu1  ;;  %v5310_v36 = vpop.f32.mrf.mxu0 }
 0x186   : > { %v1683_v56 = vadd.f32 %v3721_v16, %v1682_v35 }
 0x187   : > { %v3723_v52 = vpop.f32.mrf.mxu1  ;;  %v5312_v5 = vpop.f32.mrf.mxu0 }
 0x188   : > { %v3724_v13 = vadd.f32 %v3723_v52, %v3722_v18  ;;  %v5315_v11 = vadd.f32 %v1683_v56, %v5189_v40 }
 0x189   : > { %v3725_v33 = vpop.f32.mrf.mxu1  ;;  %v5317_v20 = vpop.f32.mrf.mxu0 }
 0x18a   : > { %6217 = vst [vmem:[#allocation3_spill] sm:$0xff] %v5315_v11  ;;  %v1688_v58 = vadd.f32 %v5262_v24, %v3724_v13 }
 0x18b   : > { %v3726_v22 = vpop.f32.mrf.mxu1  ;;  %v5320_v27 = vpop.f32.mrf.mxu0 }
 0x18c   : > { %v3727_v51 = vadd.f32 %v3726_v22, %v3725_v33  ;;  %v5323_v31 = vadd.f32 %v1688_v58, %v5187_v46 }
 0x18d   : > { %v3728_v35 = vpop.f32.mrf.mxu1  ;;  %v3816_v23 = vpop.f32.mrf.mxu0 }
 0x18e   : > { %v1691_v2 = vadd.f32 %v5267_v21, %v3727_v51 }
 0x18f   : > { %v3729_v16 = vpop.f32.mrf.mxu1  ;;  %v3817_v18 = vpop.f32.mrf.mxu0 }
 0x190   : > { %v3730_v40 = vadd.f32 %v3729_v16, %v3728_v35  ;;  %v5326_v56 = vadd.f32 %v3817_v18, %v3816_v23  ;;  %v5329_v52 = vadd.f32 %v1691_v2, %v5193_v47 }
 0x191   : > { %v3731_v24 = vpop.f32.mrf.mxu1  ;;  %v5331_v13 = vpop.f32.mrf.mxu0 }
 0x192   : > { %v1696_v11 = vadd.f32 %v3730_v40, %v1695_v53 }
 0x193   : > { %v3732_v33 = vpop.f32.mrf.mxu1  ;;  %v5333_v22 = vpop.f32.mrf.mxu0 }
 0x194   : > { %v3733_v46 = vadd.f32 %v3732_v33, %v3731_v24  ;;  %v5336_v58 = vadd.f32 %v1696_v11, %v5197_v63 }
 0x195   : > { %v3734_v21 = vpop.f32.mrf.mxu1  ;;  %v5338_v51 = vpop.f32.mrf.mxu0 }
 0x196   : > { %v1699_v35 = vadd.f32 %v3733_v46, %v1698_v42 }
 0x197   : > { %v3735_v23 = vpop.f32.mrf.mxu1  ;;  %v5340_v16 = vpop.f32.mrf.mxu0 }
 0x198   : > { %v3736_v47 = vadd.f32 %v3735_v23, %v3734_v21  ;;  %v5343_v2 = vadd.f32 %v1699_v35, %v5201_v26 }
 0x199   : > { %v3737_v18 = vpop.f32.mrf.mxu1  ;;  %v5345_v53 = vpop.f32.mrf.mxu0 }
 0x19a   : > { %6218 = vst [vmem:[#allocation4_spill] sm:$0xff] %v5343_v2  ;;  %v1704_v40 = vadd.f32 %v5272_v62, %v3736_v47 }
 0x19b   : > { %v3738_v24 = vpop.f32.mrf.mxu1  ;;  %v5348_v33 = vpop.f32.mrf.mxu0 }
 0x19c   : > { %v3739_v63 = vadd.f32 %v3738_v24, %v3737_v18  ;;  %v5351_v11 = vadd.f32 %v1704_v40, %v5205_v19 }
 0x19d   : > { %v3740_v42 = vpop.f32.mrf.mxu1  ;;  %v5353_v46 = vpop.f32.mrf.mxu0 }
 0x19e   : > { %6219 = vst [vmem:[#allocation5_spill] sm:$0xff] %v5351_v11  ;;  %v1707_v21 = vadd.f32 %v5277_v41, %v3739_v63 }
 0x19f   : > { %v3741_v23 = vpop.f32.mrf.mxu1  ;;  %v5356_v26 = vpop.f32.mrf.mxu0 }
 0x1a0   : > { %v3742_v35 = vadd.f32 %v3741_v23, %v3740_v42  ;;  %v5359_v2 = vadd.f32 %v1707_v21, %v5209_v38 }
 0x1a1   : > { %v3743_v62 = vpop.f32.mrf.mxu1  ;;  %v5361_v47 = vpop.f32.mrf.mxu0 }
 0x1a2   : > { %6220 = vst [vmem:[#allocation6_spill] sm:$0xff] %v5359_v2  ;;  %v1712_v18 = vadd.f32 %v3742_v35, %v5284_v17 }
 0x1a3   : > { %v3744_v24 = vpop.f32.mrf.mxu1  ;;  %v5364_v19 = vpop.f32.mrf.mxu0 }
 0x1a4   : > { %v3745_v40 = vadd.f32 %v3744_v24, %v3743_v62  ;;  %v5367_v11 = vadd.f32 %v1712_v18, %v5219_v39 }
 0x1a5   : > { %v3746_v41 = vpop.f32.mrf.mxu1  ;;  %v5369_v63 = vpop.f32.mrf.mxu0 }
 0x1a6   : > { %6221 = vst [vmem:[#allocation7_spill] sm:$0xff] %v5367_v11  ;;  %v1715_v42 = vadd.f32 %v3745_v40, %v5291_v4 }
 0x1a7   : > { %v3747_v23 = vpop.f32.mrf.mxu1  ;;  %v5372_v38 = vpop.f32.mrf.mxu0 }
 0x1a8   : > { %v3748_v21 = vadd.f32 %v3747_v23, %v3746_v41  ;;  %v5375_v2 = vadd.f32 %v1715_v42, %v5229_v48 }
 0x1a9   : > { %v3749_v17 = vpop.f32.mrf.mxu1  ;;  %v5377_v35 = vpop.f32.mrf.mxu0 }
 0x1aa   : > { %6222 = vst [vmem:[#allocation8_spill] sm:$0xff] %v5375_v2  ;;  %v1720_v62 = vadd.f32 %v5282_v1, %v3748_v21 }
 0x1ab   : > { %v3750_v24 = vpop.f32.mrf.mxu1  ;;  %v5380_v39 = vpop.f32.mrf.mxu0 }
 0x1ac   : > { %v3751_v18 = vadd.f32 %v3750_v24, %v3749_v17  ;;  %v5383_v11 = vadd.f32 %v1720_v62, %v5237_v57 }
 0x1ad   : > { %v3752_v4 = vpop.f32.mrf.mxu1  ;;  %v5385_v40 = vpop.f32.mrf.mxu0 }
 0x1ae   : > { %6223 = vst [vmem:[#allocation9_spill] sm:$0xff] %v5383_v11  ;;  %v1723_v41 = vadd.f32 %v5289_v59, %v3751_v18 }
 0x1af   : > { %v3753_v23 = vpop.f32.mrf.mxu1  ;;  %v5388_v48 = vpop.f32.mrf.mxu0 }
 0x1b0   : > { %v3754_v42 = vadd.f32 %v3753_v23, %v3752_v4  ;;  %v5391_v2 = vadd.f32 %v1723_v41, %v5245_v32 }
 0x1b1   : > { %v3755_v1 = vpop.f32.mrf.mxu1  ;;  %v5393_v21 = vpop.f32.mrf.mxu0 }
 0x1b2   : > { %6224 = vst [vmem:[#allocation10_spill] sm:$0xff] %v5391_v2  ;;  %v1728_v17 = vadd.f32 %v3754_v42, %v5298_v29 }
 0x1b3   : > { %v3756_v24 = vpop.f32.mrf.mxu1  ;;  %v5396_v57 = vpop.f32.mrf.mxu0 }
 0x1b4   : > { %v3757_v62 = vadd.f32 %v3756_v24, %v3755_v1  ;;  %v5399_v11 = vadd.f32 %v1728_v17, %v5217_v14 }
 0x1b5   : > { %v3758_v59 = vpop.f32.mrf.mxu1  ;;  %v5401_v18 = vpop.f32.mrf.mxu0 }
 0x1b6   : > { %6225 = vst [vmem:[#allocation11_spill] sm:$0xff] %v5399_v11  ;;  %v1731_v4 = vadd.f32 %v3757_v62, %v5305_v49 }
 0x1b7   : > { %v3759_v23 = vpop.f32.mrf.mxu1  ;;  %v5404_v32 = vpop.f32.mrf.mxu0 }
 0x1b8   : > { %v3760_v41 = vadd.f32 %v3759_v23, %v3758_v59  ;;  %v5407_v2 = vadd.f32 %v1731_v4, %v5225_v9 }
 0x1b9   : > { %v3761_v29 = vpop.f32.mrf.mxu1  ;;  %v5409_v42 = vpop.f32.mrf.mxu0 }
 0x1ba   : > { %6226 = vst [vmem:[#allocation12_spill] sm:$0xff] %v5407_v2  ;;  %v1736_v1 = vadd.f32 %v5296_v61, %v3760_v41 }
 0x1bb   : > { %v3762_v24 = vpop.f32.mrf.mxu1  ;;  %v5412_v14 = vpop.f32.mrf.mxu0 }
 0x1bc   : > { %v3763_v17 = vadd.f32 %v3762_v24, %v3761_v29  ;;  %v5415_v11 = vadd.f32 %v1736_v1, %v5212_v3 }
 0x1bd   : > { %v3764_v49 = vpop.f32.mrf.mxu1  ;;  %v5417_v62 = vpop.f32.mrf.mxu0 }
 0x1be   : > { %6227 = vst [vmem:[#allocation13_spill] sm:$0xff] %v5415_v11  ;;  %v1739_v59 = vadd.f32 %v5303_v60, %v3763_v17 }
 0x1bf   : > { %v3765_v23 = vpop.f32.mrf.mxu1  ;;  %v5420_v9 = vpop.f32.mrf.mxu0 }
 0x1c0   : > { %v3766_v4 = vadd.f32 %v3765_v23, %v3764_v49  ;;  %v5423_v2 = vadd.f32 %v1739_v59, %v5222_v50 }
 0x1c1   : > { %v3767_v61 = vpop.f32.mrf.mxu1  ;;  %v5425_v41 = vpop.f32.mrf.mxu0 }
 0x1c2   : > { %6228 = vst [vmem:[#allocation14_spill] sm:$0xff] %v5423_v2  ;;  %v1744_v29 = vadd.f32 %v3766_v4, %v5312_v5 }
 0x1c3   : > { %v3768_v24 = vpop.f32.mrf.mxu1  ;;  %v5428_v3 = vpop.f32.mrf.mxu0 }
 0x1c4   : > { %v3769_v1 = vadd.f32 %v3768_v24, %v3767_v61  ;;  %v5431_v11 = vadd.f32 %v1744_v29, %v5235_v43 }
 0x1c5   : > { %v3770_v60 = vpop.f32.mrf.mxu1  ;;  %v5433_v17 = vpop.f32.mrf.mxu0 }
 0x1c6   : > { %6229 = vst [vmem:[#allocation15_spill] sm:$0xff] %v5431_v11  ;;  %v1747_v49 = vadd.f32 %v3769_v1, %v5320_v27 }
 0x1c7   : > { %v3771_v23 = vpop.f32.mrf.mxu1  ;;  %v5436_v50 = vpop.f32.mrf.mxu0 }
 0x1c8   : > { %v3772_v59 = vadd.f32 %v3771_v23, %v3770_v60  ;;  %v5439_v2 = vadd.f32 %v1747_v49, %v5243_v15  ;;  %v3824_v49 = vadd.f32 %v5340_v16, %v5338_v51 }
 0x1c9   : > { %v3773_v5 = vpop.f32.mrf.mxu1  ;;  %v5441_v4 = vpop.f32.mrf.mxu0 }
 0x1ca   : > { %6230 = vst [vmem:[#allocation16_spill] sm:$0xff] %v5439_v2  ;;  %v1752_v61 = vadd.f32 %v5310_v36, %v3772_v59 }
 0x1cb   : > { %v3774_v24 = vpop.f32.mrf.mxu1  ;;  %v5444_v43 = vpop.f32.mrf.mxu0 }
 0x1cc   : > { %v5447_v29 = vadd.f32 %v1752_v61, %v5232_v37  ;;  %v3775_v11 = vadd.f32 %v3774_v24, %v3773_v5  ;;  %v3821_v5 = vadd.f32 %v5333_v22, %v5331_v13  ;;  %v5478_v22 = vld [vmem:[%s6160_s2] ss:$0 sm:$0xff] }
 0x1cd   : > { %v5449_v27 = vpop.f32.mrf.mxu0  ;;  %v4050_v1 = vpop.f32.mrf.mxu1 }
 0x1ce   : > { %v1755_v60 = vadd.f32 %v5317_v20, %v3775_v11  ;;  %v3827_v20 = vadd.f32 %v5348_v33, %v5345_v53  ;;  %v2187_v11 = vadd.f32 %v4050_v1, %v3824_v49 }
 0x1cf   : > { %v5452_v23 = vpop.f32.mrf.mxu0  ;;  %v2178_v15 = vpop.f32.mrf.mxu1 }
 0x1d0   : > { %v5457_v36 = vadd.f32 %v1755_v60, %v5240_v6  ;;  %v2179_v59 = vadd.f32 %v5326_v56, %v2178_v15  ;;  %v3830_v15 = vadd.f32 %v5356_v26, %v5353_v46 }
 0x1d1   : > { %v5460_v2 = vpop.f32.mrf.mxu0  ;;  %v4051_v37 = vpop.f32.mrf.mxu1 }
 0x1d2   : > { %6231 = vst [vmem:[#allocation17_spill] sm:$0xff] %v5457_v36  ;;  %v2305_v61 = vadd.f32 %v2179_v59, %v5248_v54  ;;  %v2190_v16 = vadd.f32 %v4051_v37, %v3827_v20  ;;  %v2307_v36 = vadd.f32 %v2187_v11, %v5254_v34  ;;  %v3839_v20 = vadd.f32 %v5380_v39, %v5377_v35 }
 0x1d3   : > { %v5467_v24 = vpop.f32.mrf.mxu0  ;;  %v2181_v51 = vpop.f32.mrf.mxu1 }
 0x1d4   : > { %v2182_v6 = vadd.f32 %v3821_v5, %v2181_v51  ;;  %v5483_v33 = vadd.f32 %v5478_v22, %v2305_v61  ;;  %v2308_v1 = vadd.f32 %v2190_v16, %v5257_v8  ;;  %v5494_v59 = vadd.f32 %v5478_v22, %v2307_v36 }
 0x1d5   : > { %v5469_v60 = vpop.f32.mrf.mxu0  ;;  %v4054_v56 = vpop.f32.mrf.mxu1  ;;  %v3833_v8 = vadd.f32 %v5364_v19, %v5361_v47  ;;  %v3842_v47 = vadd.f32 %v5388_v48, %v5385_v40 }
 0x1d6   : > { %v2306_v13 = vadd.f32 %v2182_v6, %v5251_v7  ;;  %v3836_v7 = vadd.f32 %v5372_v38, %v5369_v63  ;;  %v5506_v38 = vadd.f32 %v5478_v22, %v2308_v1 }
 0x1d7   : > { %v5480_v54 = vpop.f32.mrf.mxu0  ;;  %v2194_v53 = vpop.f32.mrf.mxu1 }
 0x1d8   : > { %v5487_v49 = vadd.f32 %v5478_v22, %v2306_v13  ;;  %v2195_v46 = vadd.f32 %v3830_v15, %v2194_v53  ;;  %v2203_v11 = vadd.f32 %v4054_v56, %v3836_v7 }
 0x1d9   : > { %v5491_v34 = vpop.f32.mrf.mxu0  ;;  %v4055_v26 = vpop.f32.mrf.mxu1 }
 0x1da   : > { %v2411_v37 = vadd.f32 %v5487_v49, %v5483_v33  ;;  %v2309_v5 = vadd.f32 %v2195_v46, %v5260_v25  ;;  %v2206_v51 = vadd.f32 %v4055_v26, %v3839_v20  ;;  %v2311_v39 = vadd.f32 %v2203_v11, %v5270_v12 }
 0x1db   : > { %v5503_v61 = vpop.f32.mrf.mxu0  ;;  %v2197_v63 = vpop.f32.mrf.mxu1  ;;  %v3848_v46 = vadd.f32 %v5404_v32, %v5401_v18  ;;  %v3851_v12 = vadd.f32 %v5412_v14, %v5409_v42  ;;  %v3854_v14 = vadd.f32 %v5420_v9, %v5417_v62 }
 0x1dc   : > { %v2412_v36 = vadd.f32 %v2411_v37, %v5494_v59  ;;  %v2198_v16 = vadd.f32 %v3833_v8, %v2197_v63  ;;  %v5514_v19 = vadd.f32 %v5478_v22, %v2309_v5  ;;  %v2312_v40 = vadd.f32 %v2206_v51, %v5275_v55 }
 0x1dd   : > { %v5509_v6 = vpop.f32.mrf.mxu0  ;;  %v4058_v25 = vpop.f32.mrf.mxu1  ;;  %v5535_v37 = vadd.f32 %v5478_v22, %v2311_v39 }
 0x1de   : > { %v2413_v35 = vadd.f32 %v2412_v36, %v5506_v38  ;;  %v2310_v56 = vadd.f32 %v2198_v16, %v5265_v10  ;;  %v3845_v10 = vadd.f32 %v5396_v57, %v5393_v21  ;;  %v2219_v18 = vadd.f32 %v4058_v25, %v3848_v46 }
 0x1df   : > { %v5519_v15 = vpop.f32.mrf.mxu0  ;;  %v2210_v13 = vpop.f32.mrf.mxu1  ;;  %v5542_v11 = vadd.f32 %v5478_v22, %v2312_v40 }
 0x1e0   : > { %v2414_v53 = vadd.f32 %v2413_v35, %v5514_v19  ;;  %v2211_v1 = vadd.f32 %v3842_v47, %v2210_v13  ;;  %v5526_v48 = vadd.f32 %v5478_v22, %v2310_v56  ;;  %v3860_v56 = vadd.f32 %v5436_v50, %v5433_v17 }
 0x1e1   : > { %v5528_v7 = vpop.f32.mrf.mxu0  ;;  %v4059_v26 = vpop.f32.mrf.mxu1  ;;  %v3857_v13 = vadd.f32 %v5428_v3, %v5425_v41 }
 0x1e2   : > { %v2415_v5 = vadd.f32 %v2414_v53, %v5526_v48  ;;  %v2313_v55 = vadd.f32 %v2211_v1, %v5280_v30  ;;  %v2222_v57 = vadd.f32 %v4059_v26, %v3851_v12  ;;  %v2315_v30 = vadd.f32 %v2219_v18, %v5294_v45 }
 0x1e3   : > { %v5539_v32 = vpop.f32.mrf.mxu0  ;;  %v2213_v8 = vpop.f32.mrf.mxu1  ;;  %v3863_v53 = vadd.f32 %v5444_v43, %v5441_v4  ;;  %v3866_v4 = vadd.f32 %v5452_v23, %v5449_v27  ;;  %v6232_v43 = vld [vmem:[#allocation3_spill] sm:$0xff] }
 0x1e4   : > { %v2214_v20 = vadd.f32 %v3845_v10, %v2213_v8  ;;  %v2416_v21 = vadd.f32 %v2415_v5, %v5535_v37  ;;  %v5552_v51 = vadd.f32 %v5478_v22, %v2313_v55  ;;  %v5567_v1 = vadd.f32 %v5478_v22, %v2315_v30 }
 0x1e5   : > { %v5545_v63 = vpop.f32.mrf.mxu0  ;;  %v4062_v42 = vpop.f32.mrf.mxu1  ;;  %v3869_v30 = vadd.f32 %v5467_v24, %v5460_v2 }
 0x1e6   : > { %v2314_v36 = vadd.f32 %v2214_v20, %v5287_v0  ;;  %v2417_v16 = vadd.f32 %v2416_v21, %v5542_v11  ;;  %v2316_v0 = vadd.f32 %v2222_v57, %v5301_v28  ;;  %v2235_v40 = vadd.f32 %v4062_v42, %v3860_v56 }
 0x1e7   : > { %v3883_v25 = vpop.f32.mrf.mxu0  ;;  %v2226_v47 = vpop.f32.mrf.mxu1 }
 0x1e8   : > { %v5556_v35 = vadd.f32 %v5478_v22, %v2314_v36  ;;  %v2227_v39 = vadd.f32 %v3854_v14, %v2226_v47  ;;  %v2418_v62 = vadd.f32 %v2417_v16, %v5552_v51  ;;  %v5572_v28 = vadd.f32 %v5478_v22, %v2316_v0 }
 0x1e9   : > { %v3885_v9 = vpop.f32.mrf.mxu0  ;;  %v4063_v45 = vpop.f32.mrf.mxu1  ;;  %v2319_v55 = vadd.f32 %v2235_v40, %v5323_v31  ;;  %v3872_v14 = vadd.f32 %v5480_v54, %v5469_v60  ;;  %v3875_v16 = vadd.f32 %v5503_v61, %v5491_v34  ;;  %v3878_v34 = vadd.f32 %v5519_v15, %v5509_v6  ;;  %v6233_v61 = vld [vmem:[#allocation4_spill] sm:$0xff]  ;;  %v6235_v6 = vld [vmem:[#allocation6_spill] sm:$0xff] }
 0x1ea   : > { %v2419_v46 = vadd.f32 %v2418_v62, %v5556_v35  ;;  %v2317_v17 = vadd.f32 %v2227_v39, %v5308_v44  ;;  %v2238_v41 = vadd.f32 %v4063_v45, %v3863_v53 }
 0x1eb   : > { %v3886_v50 = vpop.f32.mrf.mxu0  ;;  %v2229_v26 = vpop.f32.mrf.mxu1  ;;  %v5595_v47 = vadd.f32 %v5478_v22, %v2319_v55  ;;  %v3881_v55 = vadd.f32 %v5539_v32, %v5528_v7 }
 0x1ec   : > { %v2230_v10 = vadd.f32 %v3857_v13, %v2229_v26  ;;  %v2420_v12 = vadd.f32 %v2419_v46, %v5567_v1  ;;  %v5580_v44 = vadd.f32 %v5478_v22, %v2317_v17  ;;  %v2320_v23 = vadd.f32 %v2238_v41, %v5329_v52  ;;  %v6234_v46 = vld [vmem:[#allocation5_spill] sm:$0xff] }
 0x1ed   : > { %v3888_v3 = vpop.f32.mrf.mxu0  ;;  %v4066_v5 = vpop.f32.mrf.mxu1 }
 0x1ee   : > { %v2318_v18 = vadd.f32 %v2230_v10, %v6232_v43  ;;  %v2421_v8 = vadd.f32 %v2420_v12, %v5572_v28  ;;  %v2251_v56 = vadd.f32 %v4066_v5, %v3872_v14  ;;  %v5600_v52 = vadd.f32 %v5478_v22, %v2320_v23 }
 0x1ef   : > { %v3889_v20 = vpop.f32.mrf.mxu0  ;;  %v2242_v21 = vpop.f32.mrf.mxu1  ;;  %v3884_v12 = vadd.f32 %v3883_v25, %v5545_v63  ;;  %v6236_v25 = vld [vmem:[#allocation7_spill] sm:$0xff] }
 0x1f0   : > { %v5584_v57 = vadd.f32 %v5478_v22, %v2318_v18  ;;  %v2243_v42 = vadd.f32 %v3866_v4, %v2242_v21  ;;  %v2422_v27 = vadd.f32 %v2421_v8, %v5580_v44  ;;  %v2323_v40 = vadd.f32 %v2251_v56, %v6234_v46 }
 0x1f1   : > { %v3891_v36 = vpop.f32.mrf.mxu0  ;;  %v4067_v31 = vpop.f32.mrf.mxu1  ;;  %v3887_v21 = vadd.f32 %v3886_v50, %v3885_v9  ;;  %v3890_v32 = vadd.f32 %v3889_v20, %v3888_v3  ;;  %v6237_v9 = vld [vmem:[#allocation9_spill] sm:$0xff] }
 0x1f2   : > { %v2423_v39 = vadd.f32 %v2422_v27, %v5584_v57  ;;  %v2321_v60 = vadd.f32 %v2243_v42, %v5336_v58  ;;  %v2254_v2 = vadd.f32 %v4067_v31, %v3875_v16  ;;  %v5620_v42 = vadd.f32 %v5478_v22, %v2323_v40  ;;  %v6239_v40 = vld [vmem:[#allocation10_spill] sm:$0xff] }
 0x1f3   : > { %v3892_v54 = vpop.f32.mrf.mxu0  ;;  %v2245_v62 = vpop.f32.mrf.mxu1 }
 0x1f4   : > { %v2246_v0 = vadd.f32 %v3869_v30, %v2245_v62  ;;  %v2424_v45 = vadd.f32 %v2423_v39, %v5595_v47  ;;  %v5608_v58 = vadd.f32 %v5478_v22, %v2321_v60  ;;  %v2324_v15 = vadd.f32 %v2254_v2, %v6235_v6  ;;  %v6238_v60 = vld [vmem:[#allocation8_spill] sm:$0xff] }
 0x1f5   : > { %v3894_v24 = vpop.f32.mrf.mxu0  ;;  %v4070_v13 = vpop.f32.mrf.mxu1 }
 0x1f6   : > { %v2322_v53 = vadd.f32 %v2246_v0, %v6233_v61  ;;  %v2425_v17 = vadd.f32 %v2424_v45, %v5600_v52  ;;  %v2267_v8 = vadd.f32 %v4070_v13, %v3884_v12  ;;  %v5625_v30 = vadd.f32 %v5478_v22, %v2324_v15  ;;  %v6240_v15 = vld [vmem:[#allocation11_spill] sm:$0xff] }
 0x1f7   : > { %v3895_v26 = vpop.f32.mrf.mxu0  ;;  %v2258_v10 = vpop.f32.mrf.mxu1 }
 0x1f8   : > { %v5613_v41 = vadd.f32 %v5478_v22, %v2322_v53  ;;  %v2259_v5 = vadd.f32 %v3878_v34, %v2258_v10  ;;  %v2426_v4 = vadd.f32 %v2425_v17, %v5608_v58  ;;  %v2327_v50 = vadd.f32 %v2267_v8, %v6237_v9 }
 0x1f9   : > { %v3897_v43 = vpop.f32.mrf.mxu0  ;;  %v4071_v18 = vpop.f32.mrf.mxu1  ;;  %v3896_v53 = vadd.f32 %v3895_v26, %v3894_v24  ;;  %v3893_v10 = vadd.f32 %v3892_v54, %v3891_v36 }
 0x1fa   : > { %v2427_v63 = vadd.f32 %v2426_v4, %v5613_v41  ;;  %v2325_v14 = vadd.f32 %v2259_v5, %v6236_v25  ;;  %v2270_v39 = vadd.f32 %v4071_v18, %v3887_v21  ;;  %v5640_v12 = vadd.f32 %v5478_v22, %v2327_v50 }
 0x1fb   : > { %v3898_v27 = vpop.f32.mrf.mxu0  ;;  %v2261_v23 = vpop.f32.mrf.mxu1 }
 0x1fc   : > { %v2262_v31 = vadd.f32 %v3881_v55, %v2261_v23  ;;  %v2428_v16 = vadd.f32 %v2427_v63, %v5620_v42  ;;  %v5631_v0 = vadd.f32 %v5478_v22, %v2325_v14  ;;  %v2328_v3 = vadd.f32 %v2270_v39, %v6239_v40  ;;  %v6241_v14 = vld [vmem:[#allocation12_spill] sm:$0xff]  ;;  %v6244_v40 = vld [vmem:[#allocation15_spill] sm:$0xff] }
 0x1fd   : > { %v3900_v56 = vpop.f32.mrf.mxu0  ;;  %v4074_v7 = vpop.f32.mrf.mxu1  ;;  %v3899_v5 = vadd.f32 %v3898_v27, %v3897_v43  ;;  %v6242_v43 = vld [vmem:[#allocation13_spill] sm:$0xff] }
 0x1fe   : > { %v2326_v62 = vadd.f32 %v2262_v31, %v6238_v60  ;;  %v2429_v45 = vadd.f32 %v2428_v16, %v5625_v30  ;;  %v2283_v6 = vadd.f32 %v4074_v7, %v3896_v53  ;;  %v5645_v24 = vadd.f32 %v5478_v22, %v2328_v3 }
 0x1ff   : > { %v3901_v2 = vpop.f32.mrf.mxu0  ;;  %v2274_v13 = vpop.f32.mrf.mxu1 }
 0x200   : > { %v5635_v34 = vadd.f32 %v5478_v22, %v2326_v62  ;;  %v2275_v61 = vadd.f32 %v3890_v32, %v2274_v13  ;;  %v2430_v46 = vadd.f32 %v2429_v45, %v5631_v0  ;;  %v3902_v54 = vadd.f32 %v3901_v2, %v3900_v56  ;;  %v6243_v62 = vld [vmem:[#allocation14_spill] sm:$0xff] }
 0x201   : > { %v3903_v20 = vpop.f32.mrf.mxu0  ;;  %v4075_v17 = vpop.f32.mrf.mxu1  ;;  %v2331_v27 = vadd.f32 %v2283_v6, %v6242_v43 }
 0x202   : > { %v2431_v4 = vadd.f32 %v2430_v46, %v5635_v34  ;;  %v2329_v18 = vadd.f32 %v2275_v61, %v6240_v15  ;;  %v2286_v63 = vadd.f32 %v4075_v17, %v3899_v5 }
 0x203   : > { %v3904_v55 = vpop.f32.mrf.mxu0  ;;  %v2277_v8 = vpop.f32.mrf.mxu1  ;;  %v2405_v2 = vadd.f32 %v5478_v22, %v2331_v27 }
 0x204   : > { %v2278_v21 = vadd.f32 %v3893_v10, %v2277_v8  ;;  %v2432_v26 = vadd.f32 %v2431_v4, %v5640_v12  ;;  %v2403_v31 = vadd.f32 %v5478_v22, %v2329_v18  ;;  %v2332_v45 = vadd.f32 %v2286_v63, %v6243_v62  ;;  %v6245_v8 = vld [vmem:[#allocation16_spill] sm:$0xff] }
 0x205   : > { %v3906_v25 = vpop.f32.mrf.mxu0  ;;  %v4078_v36 = vpop.f32.mrf.mxu1  ;;  %v3905_v56 = vadd.f32 %v3904_v55, %v3903_v20 }
 0x206   : > { %v2330_v23 = vadd.f32 %v2278_v21, %v6241_v14  ;;  %v2433_v16 = vadd.f32 %v2432_v26, %v5645_v24  ;;  %v2406_v6 = vadd.f32 %v5478_v22, %v2332_v45 }
 0x207   : > { %v3907_v39 = vpop.f32.mrf.mxu0  ;;  %v2290_v7 = vpop.f32.mrf.mxu1 }
 0x208   : > { %v2404_v32 = vadd.f32 %v5478_v22, %v2330_v23  ;;  %v3908_v9 = vadd.f32 %v3907_v39, %v3906_v25  ;;  %v2291_v50 = vadd.f32 %v3902_v54, %v2290_v7  ;;  %v2434_v60 = vadd.f32 %v2433_v16, %v2403_v31 }
 0x209   : > { %v3909_v13 = vpop.f32.mrf.mxu0  ;;  %v4079_v61 = vpop.f32.mrf.mxu1 }
 0x20a   : > { %v2435_v53 = vadd.f32 %v2434_v60, %v2404_v32  ;;  %v2299_v46 = vadd.f32 %v4078_v36, %v3908_v9  ;;  %v2333_v3 = vadd.f32 %v2291_v50, %v6244_v40  ;;  %v6246_v36 = vld [vmem:[#allocation17_spill] sm:$0xff] }
 0x20b   : > { %v3910_v17 = vpop.f32.mrf.mxu0  ;;  %v2293_v10 = vpop.f32.mrf.mxu1 }
 0x20c   : > { %v3911_v5 = vadd.f32 %v3910_v17, %v3909_v13  ;;  %v2294_v4 = vadd.f32 %v3905_v56, %v2293_v10  ;;  %v2436_v15 = vadd.f32 %v2435_v53, %v2405_v2  ;;  %v2335_v26 = vadd.f32 %v2299_v46, %v5447_v29 }
 0x20d   : > { %v2407_v20 = vadd.f32 %v5478_v22, %v2333_v3 }
 0x20e   : > { %v2302_v18 = vadd.f32 %v4079_v61, %v3911_v5  ;;  %v2334_v21 = vadd.f32 %v2294_v4, %v6245_v8  ;;  %v2437_v55 = vadd.f32 %v2436_v15, %v2406_v6  ;;  %v2409_v14 = vadd.f32 %v5478_v22, %v2335_v26 }
 0x210   : > { %v2408_v63 = vadd.f32 %v5478_v22, %v2334_v21  ;;  %v2438_v25 = vadd.f32 %v2437_v55, %v2407_v20  ;;  %v2336_v54 = vadd.f32 %v2302_v18, %v6246_v36 }
 0x212   : > { %v2439_v23 = vadd.f32 %v2438_v25, %v2408_v63  ;;  %v2410_v43 = vadd.f32 %v5478_v22, %v2336_v54 }
 0x214   : > { %v2440_v27 = vadd.f32 %v2439_v23, %v2409_v14 }
 0x216   : > { %v2441_v16 = vadd.f32 %v2440_v27, %v2410_v43 }
 0x218   : > { %v2442_v39 = vrot.slane %v2441_v16, 4 }
 0x21a   : > { %v2443_v7 = vadd.f32 %v2442_v39, %v2441_v16 }
 0x21c   : > { %v2444_v9 = vrot.slane %v2443_v7, 2 }
 0x21e   : > { %v2445_v50 = vadd.f32 %v2444_v9, %v2443_v7 }
 0x220   : > { %v2446_v29 = vrot.slane %v2445_v50, 1 }
 0x222   : > { %v2447_v60 = vadd.f32 %v2446_v29, %v2445_v50 }
 0x224   : > { %v2448_v62 = vmul.f32 0.00390625, %v2447_v60 }
 0x226   : > { %v5665_v45 = vsub.f32 %v5552_v51, %v2448_v62  ;;  %v5668_v13 = vsub.f32 %v5556_v35, %v2448_v62  ;;  %v5671_v61 = vsub.f32 %v5567_v1, %v2448_v62  ;;  %v5674_v22 = vsub.f32 %v5572_v28, %v2448_v62 }
 0x227   : > { %v5677_v56 = vsub.f32 %v5580_v44, %v2448_v62  ;;  %v5680_v53 = vsub.f32 %v5584_v57, %v2448_v62  ;;  %v5683_v46 = vsub.f32 %v5595_v47, %v2448_v62  ;;  %v5686_v51 = vsub.f32 %v5600_v52, %v2448_v62 }
 0x228   : > { %v5689_v35 = vsub.f32 %v5608_v58, %v2448_v62  ;;  %v5692_v1 = vsub.f32 %v5613_v41, %v2448_v62  ;;  %v5695_v28 = vsub.f32 %v5620_v42, %v2448_v62  ;;  %v5698_v44 = vsub.f32 %v5625_v30, %v2448_v62 }
 0x229   : > { %v5701_v57 = vsub.f32 %v5631_v0, %v2448_v62  ;;  %v5704_v47 = vsub.f32 %v5635_v34, %v2448_v62  ;;  %v5707_v52 = vsub.f32 %v5640_v12, %v2448_v62  ;;  %v5710_v58 = vsub.f32 %v5645_v24, %v2448_v62 }
 0x22a   : > { %v5712_v41 = vsub.f32 %v2403_v31, %v2448_v62  ;;  %v5714_v40 = vsub.f32 %v2404_v32, %v2448_v62  ;;  %v5716_v42 = vsub.f32 %v2405_v2, %v2448_v62  ;;  %v5718_v30 = vsub.f32 %v2406_v6, %v2448_v62 }
 0x22b   : > { %v5720_v3 = vsub.f32 %v2407_v20, %v2448_v62  ;;  %v5722_v0 = vsub.f32 %v2408_v63, %v2448_v62  ;;  %v5724_v34 = vsub.f32 %v2409_v14, %v2448_v62  ;;  %v5726_v17 = vsub.f32 %v2410_v43, %v2448_v62 }
 0x22c   : > { %v5729_v12 = vsub.f32 %v5483_v33, %v2448_v62  ;;  %v5732_v24 = vsub.f32 %v5487_v49, %v2448_v62  ;;  %v5735_v31 = vsub.f32 %v5494_v59, %v2448_v62  ;;  %v5742_v10 = vsub.f32 %v5506_v38, %v2448_v62 }
 0x22d   : > { %v5745_v5 = vsub.f32 %v5514_v19, %v2448_v62  ;;  %v5750_v4 = vsub.f32 %v5526_v48, %v2448_v62  ;;  %v5755_v15 = vsub.f32 %v5535_v37, %v2448_v62  ;;  %v5760_v19 = vsub.f32 %v5542_v11, %v2448_v62 }
 0x22e   : > { %v2481_v32 = vmul.f32 %v5729_v12, %v5729_v12  ;;  %v2482_v2 = vmul.f32 %v5732_v24, %v5732_v24  ;;  %v2483_v33 = vmul.f32 %v5735_v31, %v5735_v31  ;;  %v2484_v59 = vmul.f32 %v5742_v10, %v5742_v10 }
 0x22f   : > { %v2485_v38 = vmul.f32 %v5745_v5, %v5745_v5  ;;  %v2486_v8 = vmul.f32 %v5750_v4, %v5750_v4  ;;  %v2487_v48 = vmul.f32 %v5755_v15, %v5755_v15  ;;  %v2488_v20 = vmul.f32 %v5760_v19, %v5760_v19 }
 0x230   : > { %v2513_v49 = vadd.f32 %v2482_v2, %v2481_v32  ;;  %v2489_v55 = vmul.f32 %v5665_v45, %v5665_v45  ;;  %v2490_v11 = vmul.f32 %v5668_v13, %v5668_v13  ;;  %v2491_v36 = vmul.f32 %v5671_v61, %v5671_v61 }
 0x231   : > { %v2492_v14 = vmul.f32 %v5674_v22, %v5674_v22  ;;  %v2493_v43 = vmul.f32 %v5677_v56, %v5677_v56  ;;  %v2494_v16 = vmul.f32 %v5680_v53, %v5680_v53  ;;  %v2495_v7 = vmul.f32 %v5683_v46, %v5683_v46 }
 0x232   : > { %v2514_v6 = vadd.f32 %v2513_v49, %v2483_v33  ;;  %v2496_v50 = vmul.f32 %v5686_v51, %v5686_v51  ;;  %v2497_v60 = vmul.f32 %v5689_v35, %v5689_v35  ;;  %v2498_v32 = vmul.f32 %v5692_v1, %v5692_v1 }
 0x233   : > { %v2499_v33 = vmul.f32 %v5695_v28, %v5695_v28 }
 0x234   : > { %v2515_v18 = vadd.f32 %v2514_v6, %v2484_v59  ;;  %v2500_v59 = vmul.f32 %v5698_v44, %v5698_v44 }
 0x236   : > { %v2516_v21 = vadd.f32 %v2515_v18, %v2485_v38  ;;  %v2501_v38 = vmul.f32 %v5701_v57, %v5701_v57 }
 0x238   : > { %v2517_v26 = vadd.f32 %v2516_v21, %v2486_v8  ;;  %v2502_v8 = vmul.f32 %v5704_v47, %v5704_v47 }
 0x23a   : > { %v2518_v37 = vadd.f32 %v2517_v26, %v2487_v48  ;;  %v2503_v48 = vmul.f32 %v5707_v52, %v5707_v52 }
 0x23c   : > { %v2519_v63 = vadd.f32 %v2518_v37, %v2488_v20  ;;  %v2504_v20 = vmul.f32 %v5710_v58, %v5710_v58 }
 0x23e   : > { %v2520_v25 = vadd.f32 %v2519_v63, %v2489_v55  ;;  %v2505_v55 = vmul.f32 %v5712_v41, %v5712_v41 }
 0x240   : > { %v2521_v54 = vadd.f32 %v2520_v25, %v2490_v11  ;;  %v2506_v11 = vmul.f32 %v5714_v40, %v5714_v40 }
 0x242   : > { %v2522_v23 = vadd.f32 %v2521_v54, %v2491_v36  ;;  %v2507_v36 = vmul.f32 %v5716_v42, %v5716_v42 }
 0x244   : > { %v2523_v27 = vadd.f32 %v2522_v23, %v2492_v14  ;;  %v2508_v14 = vmul.f32 %v5718_v30, %v5718_v30 }
 0x246   : > { %v2524_v39 = vadd.f32 %v2523_v27, %v2493_v43  ;;  %v2509_v43 = vmul.f32 %v5720_v3, %v5720_v3 }
 0x248   : > { %v2525_v9 = vadd.f32 %v2524_v39, %v2494_v16  ;;  %v2510_v16 = vmul.f32 %v5722_v0, %v5722_v0 }
 0x24a   : > { %v2526_v29 = vadd.f32 %v2525_v9, %v2495_v7  ;;  %v2511_v7 = vmul.f32 %v5724_v34, %v5724_v34 }
 0x24c   : > { %v2527_v62 = vadd.f32 %v2526_v29, %v2496_v50  ;;  %v2512_v50 = vmul.f32 %v5726_v17, %v5726_v17 }
 0x24e   : > { %v2528_v2 = vadd.f32 %v2527_v62, %v2497_v60 }
 0x250   : > { %v2529_v49 = vadd.f32 %v2528_v2, %v2498_v32 }
 0x252   : > { %v2530_v6 = vadd.f32 %v2529_v49, %v2499_v33 }
 0x254   : > { %v2531_v18 = vadd.f32 %v2530_v6, %v2500_v59 }
 0x256   : > { %v2532_v21 = vadd.f32 %v2531_v18, %v2501_v38 }
 0x258   : > { %v2533_v26 = vadd.f32 %v2532_v21, %v2502_v8 }
 0x25a   : > { %v2534_v37 = vadd.f32 %v2533_v26, %v2503_v48 }
 0x25c   : > { %v2535_v63 = vadd.f32 %v2534_v37, %v2504_v20 }
 0x25e   : > { %v2536_v25 = vadd.f32 %v2535_v63, %v2505_v55 }
 0x260   : > { %v2537_v54 = vadd.f32 %v2536_v25, %v2506_v11 }
 0x262   : > { %v2538_v23 = vadd.f32 %v2537_v54, %v2507_v36 }
 0x264   : > { %v2539_v27 = vadd.f32 %v2538_v23, %v2508_v14 }
 0x266   : > { %v2540_v39 = vadd.f32 %v2539_v27, %v2509_v43 }
 0x268   : > { %v2541_v9 = vadd.f32 %v2540_v39, %v2510_v16 }
 0x26a   : > { %v2542_v29 = vadd.f32 %v2541_v9, %v2511_v7 }
 0x26c   : > { %v2543_v60 = vadd.f32 %v2542_v29, %v2512_v50 }
 0x26e   : > { %v2544_v62 = vrot.slane %v2543_v60, 4 }
 0x270   : > { %v2545_v32 = vadd.f32 %v2544_v62, %v2543_v60 }
 0x272   : > { %v2546_v2 = vrot.slane %v2545_v32, 2 }
 0x274   : > { %v2547_v33 = vadd.f32 %v2546_v2, %v2545_v32 }
 0x276   : > { %v2548_v49 = vrot.slane %v2547_v33, 1 }
 0x278   : > { %v2549_v59 = vadd.f32 %v2548_v49, %v2547_v33 }
 0x27a   : > { %v2550_v6 = vmul.f32 0.00390625, %v2549_v59 }
 0x27c   : > { %v2551_v38 = vadd.f32 1e-05, %v2550_v6 }
 0x27e   : > { %4224 = vrsqrt.f32 %v2551_v38 }
 0x28b   : > { %v4225_v18 = vpop.eup %4224 }
 0x28c   : > { %v5817_v8 = vmul.f32 %v4225_v18, %v5729_v12  ;;  %v5820_v21 = vmul.f32 %v4225_v18, %v5732_v24  ;;  %v5823_v48 = vmul.f32 %v4225_v18, %v5735_v31  ;;  %v5826_v26 = vmul.f32 %v4225_v18, %v5742_v10 }
 0x28d   : > { %v5829_v20 = vmul.f32 %v4225_v18, %v5745_v5  ;;  %v5832_v37 = vmul.f32 %v4225_v18, %v5750_v4  ;;  %v5835_v55 = vmul.f32 %v4225_v18, %v5755_v15  ;;  %v5838_v12 = vmul.f32 %v4225_v18, %v5760_v19 }
 0x28e   : > { %6247 = vst [vmem:[#allocation3_spill] sm:$0xff] %v5817_v8  ;;  %6248 = vst [vmem:[#allocation4_spill] sm:$0xff] %v5820_v21  ;;  %v5841_v24 = vmul.f32 %v4225_v18, %v5665_v45  ;;  %v5844_v31 = vmul.f32 %v4225_v18, %v5668_v13  ;;  %v5847_v10 = vmul.f32 %v4225_v18, %v5671_v61  ;;  %v2617_v54 = vmul.f32 0.044715, %v5817_v8 }
 0x28f   : > { %6249 = vst [vmem:[#allocation5_spill] sm:$0xff] %v5823_v48  ;;  %6250 = vst [vmem:[#allocation6_spill] sm:$0xff] %v5826_v26  ;;  %v5850_v5 = vmul.f32 %v4225_v18, %v5674_v22  ;;  %v5853_v4 = vmul.f32 %v4225_v18, %v5677_v56  ;;  %v5856_v15 = vmul.f32 %v4225_v18, %v5680_v53  ;;  %v5931_v63 = vmul.f32 0.5, %v5838_v12 }
 0x290   : > { %6251 = vst [vmem:[#allocation7_spill] sm:$0xff] %v5829_v20  ;;  %6252 = vst [vmem:[#allocation9_spill] sm:$0xff] %v5832_v37  ;;  %v5859_v19 = vmul.f32 %v4225_v18, %v5683_v46  ;;  %v5862_v45 = vmul.f32 %v4225_v18, %v5686_v51  ;;  %v5865_v13 = vmul.f32 %v4225_v18, %v5689_v35  ;;  %v5934_v11 = vmul.f32 0.5, %v5841_v24 }
 0x291   : > { %6253 = vst [vmem:[#allocation8_spill] sm:$0xff] %v5835_v55  ;;  %6254 = vst [vmem:[#allocation10_spill] sm:$0xff] %v5838_v12  ;;  %v5868_v61 = vmul.f32 %v4225_v18, %v5692_v1  ;;  %v5871_v22 = vmul.f32 %v4225_v18, %v5695_v28  ;;  %v5874_v56 = vmul.f32 %v4225_v18, %v5698_v44  ;;  %v5937_v25 = vmul.f32 0.5, %v5844_v31 }
 0x292   : > { %6255 = vst [vmem:[#allocation11_spill] sm:$0xff] %v5841_v24  ;;  %6256 = vst [vmem:[#allocation12_spill] sm:$0xff] %v5853_v4  ;;  %v5877_v53 = vmul.f32 %v4225_v18, %v5701_v57  ;;  %v5880_v46 = vmul.f32 %v4225_v18, %v5704_v47  ;;  %v5883_v51 = vmul.f32 %v4225_v18, %v5707_v52  ;;  %v5940_v36 = vmul.f32 0.5, %v5847_v10 }
 0x293   : > { %6257 = vst [vmem:[#allocation13_spill] sm:$0xff] %v5856_v15  ;;  %6258 = vst [vmem:[#allocation14_spill] sm:$0xff] %v5865_v13  ;;  %v5886_v35 = vmul.f32 %v4225_v18, %v5710_v58  ;;  %v5889_v1 = vmul.f32 %v4225_v18, %v5712_v41  ;;  %v5892_v28 = vmul.f32 %v4225_v18, %v5714_v40  ;;  %v5910_v41 = vmul.f32 0.5, %v5817_v8 }
 0x294   : > { %6259 = vst [vmem:[#allocation15_spill] sm:$0xff] %v5868_v61  ;;  %6260 = vst [vmem:[#allocation16_spill] sm:$0xff] %v5871_v22  ;;  %v5895_v44 = vmul.f32 %v4225_v18, %v5716_v42  ;;  %v5898_v57 = vmul.f32 %v4225_v18, %v5718_v30  ;;  %v5901_v47 = vmul.f32 %v4225_v18, %v5720_v3  ;;  %v5913_v40 = vmul.f32 0.5, %v5820_v21 }
 0x295   : > { %6261 = vst [vmem:[#allocation17_spill] sm:$0xff] %v5874_v56  ;;  %6262 = vst [vmem:[#allocation18_spill] sm:$0xff] %v5877_v53  ;;  %v5904_v52 = vmul.f32 %v4225_v18, %v5722_v0  ;;  %v5907_v58 = vmul.f32 %v4225_v18, %v5724_v34  ;;  %v5916_v42 = vmul.f32 0.5, %v5823_v48  ;;  %v5919_v30 = vmul.f32 0.5, %v5826_v26 }
 0x296   : > { %6263 = vst [vmem:[#allocation19_spill] sm:$0xff] %v5880_v46  ;;  %6264 = vst [vmem:[#allocation20_spill] sm:$0xff] %v5883_v51  ;;  %v5922_v3 = vmul.f32 0.5, %v5829_v20  ;;  %v5925_v0 = vmul.f32 0.5, %v5832_v37  ;;  %v5928_v34 = vmul.f32 0.5, %v5835_v55  ;;  %v5944_v14 = vmul.f32 0.5, %v5850_v5 }
 0x297   : > { %6265 = vst [vmem:[#allocation21_spill] sm:$0xff] %v5886_v35  ;;  %6266 = vst [vmem:[#allocation22_spill] sm:$0xff] %v5889_v1  ;;  %v5947_v23 = vmul.f32 0.5, %v5853_v4  ;;  %v5950_v43 = vmul.f32 0.5, %v5856_v15  ;;  %v2618_v27 = vmul.f32 0.044715, %v5820_v21  ;;  %v5962_v50 = vmul.f32 %v4225_v18, %v5726_v17 }
 0x298   : > { %6267 = vst [vmem:[#allocation23_spill] sm:$0xff] %v5892_v28  ;;  %6268 = vst [vmem:[#allocation24_spill] sm:$0xff] %v5895_v44  ;;  %v5954_v16 = vmul.f32 0.5, %v5859_v19  ;;  %v5957_v39 = vmul.f32 0.5, %v5862_v45  ;;  %v2619_v7 = vmul.f32 0.044715, %v5823_v48  ;;  %v2649_v49 = vmul.f32 %v2617_v54, %v5817_v8 }
 0x299   : > { %6269 = vst [vmem:[#allocation25_spill] sm:$0xff] %v5898_v57  ;;  %6270 = vst [vmem:[#allocation26_spill] sm:$0xff] %v5901_v47  ;;  %v2620_v9 = vmul.f32 0.044715, %v5826_v26  ;;  %v2621_v29 = vmul.f32 0.044715, %v5829_v20  ;;  %v2650_v38 = vmul.f32 %v2618_v27, %v5820_v21 }
 0x29a   : > { %6271 = vst [vmem:[#allocation27_spill] sm:$0xff] %v5904_v52  ;;  %6272 = vst [vmem:[#allocation28_spill] sm:$0xff] %v5907_v58  ;;  %v2622_v60 = vmul.f32 0.044715, %v5832_v37  ;;  %v2623_v62 = vmul.f32 0.044715, %v5835_v55 }
 0x29b   : > { %6273 = vst [vmem:[#allocation29_spill] sm:$0xff] %v5910_v41  ;;  %6274 = vst [vmem:[#allocation30_spill] sm:$0xff] %v5913_v40  ;;  %v2624_v32 = vmul.f32 0.044715, %v5838_v12  ;;  %v2625_v2 = vmul.f32 0.044715, %v5841_v24 }
 0x29c   : > { %6275 = vst [vmem:[#allocation31_spill] sm:$0xff] %v5916_v42  ;;  %6276 = vst [vmem:[#allocation32_spill] sm:$0xff] %v5919_v30  ;;  %v2626_v33 = vmul.f32 0.044715, %v5844_v31  ;;  %v2627_v59 = vmul.f32 0.044715, %v5847_v10  ;;  %v2655_v40 = vmul.f32 %v2623_v62, %v5835_v55 }
 0x29d   : > { %6277 = vst [vmem:[#allocation33_spill] sm:$0xff] %v5922_v3  ;;  %6278 = vst [vmem:[#allocation34_spill] sm:$0xff] %v5925_v0  ;;  %v2628_v6 = vmul.f32 0.044715, %v5850_v5  ;;  %v2629_v17 = vmul.f32 0.044715, %v5853_v4  ;;  %v2654_v3 = vmul.f32 %v2622_v60, %v5832_v37  ;;  %v2657_v60 = vmul.f32 %v2625_v2, %v5841_v24 }
 0x29e   : > { %6279 = vst [vmem:[#allocation35_spill] sm:$0xff] %v5928_v34  ;;  %6280 = vst [vmem:[#allocation36_spill] sm:$0xff] %v5931_v63  ;;  %v2630_v18 = vmul.f32 0.044715, %v5856_v15  ;;  %v2634_v54 = vmul.f32 0.044715, %v5868_v61  ;;  %v2653_v63 = vmul.f32 %v2621_v29, %v5829_v20  ;;  %v2658_v37 = vmul.f32 %v2626_v33, %v5844_v31 }
 0x29f   : > { %6281 = vst [vmem:[#allocation37_spill] sm:$0xff] %v5934_v11  ;;  %6282 = vst [vmem:[#allocation38_spill] sm:$0xff] %v5937_v25  ;;  %v2636_v25 = vmul.f32 0.044715, %v5874_v56  ;;  %v2637_v27 = vmul.f32 0.044715, %v5877_v53  ;;  %v2659_v21 = vmul.f32 %v2627_v59, %v5847_v10  ;;  %v2660_v8 = vmul.f32 %v2628_v6, %v5850_v5 }
 0x2a0   : > { %6283 = vst [vmem:[#allocation39_spill] sm:$0xff] %v5940_v36  ;;  %6284 = vst [vmem:[#allocation40_spill] sm:$0xff] %v5944_v14  ;;  %v2635_v14 = vmul.f32 0.044715, %v5871_v22  ;;  %v2652_v36 = vmul.f32 %v2620_v9, %v5826_v26  ;;  %v2638_v11 = vmul.f32 0.044715, %v5880_v46  ;;  %v2656_v26 = vmul.f32 %v2624_v32, %v5838_v12 }
 0x2a1   : > { %6285 = vst [vmem:[#allocation41_spill] sm:$0xff] %v5947_v23  ;;  %6286 = vst [vmem:[#allocation42_spill] sm:$0xff] %v5950_v43  ;;  %v2651_v43 = vmul.f32 %v2619_v7, %v5823_v48  ;;  %v2633_v23 = vmul.f32 0.044715, %v5865_v13  ;;  %v2639_v34 = vmul.f32 0.044715, %v5883_v51  ;;  %v2661_v62 = vmul.f32 %v2629_v17, %v5853_v4 }
 0x2a2   : > { %6287 = vst [vmem:[#allocation43_spill] sm:$0xff] %v5954_v16  ;;  %6288 = vst [vmem:[#allocation44_spill] sm:$0xff] %v5957_v39  ;;  %v2631_v39 = vmul.f32 0.044715, %v5859_v19  ;;  %v2632_v16 = vmul.f32 0.044715, %v5862_v45  ;;  %v2662_v55 = vmul.f32 %v2630_v18, %v5856_v15  ;;  %v2666_v12 = vmul.f32 %v2634_v54, %v5868_v61 }
 0x2a3   : > { %6289 = vst [vmem:[#allocation45_spill] sm:$0xff] %v5962_v50  ;;  %v2640_v7 = vmul.f32 0.044715, %v5886_v35  ;;  %v2641_v0 = vmul.f32 0.044715, %v5889_v1  ;;  %v2665_v32 = vmul.f32 %v2633_v23, %v5865_v13  ;;  %v2667_v2 = vmul.f32 %v2635_v14, %v5871_v22  ;;  %v6290_v22 = vld [vmem:[#allocation27_spill] sm:$0xff] }
 0x2a4   : > { %v2642_v30 = vmul.f32 0.044715, %v5892_v28  ;;  %v2643_v9 = vmul.f32 0.044715, %v5895_v44  ;;  %v2644_v42 = vmul.f32 0.044715, %v5898_v57  ;;  %v2668_v33 = vmul.f32 %v2636_v25, %v5874_v56 }
 0x2a5   : > { %v2645_v41 = vmul.f32 0.044715, %v5901_v47  ;;  %v2646_v29 = vmul.f32 0.044715, %v5904_v52  ;;  %v2647_v20 = vmul.f32 0.044715, %v5907_v58  ;;  %v2663_v52 = vmul.f32 %v2631_v39, %v5859_v19 }
 0x2a6   : > { %v2648_v48 = vmul.f32 0.044715, %v5962_v50  ;;  %v2664_v58 = vmul.f32 %v2632_v16, %v5862_v45  ;;  %v2669_v59 = vmul.f32 %v2637_v27, %v5877_v53  ;;  %v2670_v6 = vmul.f32 %v2638_v11, %v5880_v46  ;;  %v6291_v56 = vld [vmem:[#allocation28_spill] sm:$0xff]  ;;  %v6292_v46 = vld [vmem:[#allocation3_spill] sm:$0xff] }
 0x2a7   : > { %v2671_v17 = vmul.f32 %v2639_v34, %v5883_v51  ;;  %v2672_v18 = vmul.f32 %v2640_v7, %v5886_v35  ;;  %v2673_v39 = vmul.f32 %v2641_v0, %v5889_v1  ;;  %v2674_v16 = vmul.f32 %v2642_v30, %v5892_v28  ;;  %v6293_v51 = vld [vmem:[#allocation4_spill] sm:$0xff]  ;;  %v6294_v35 = vld [vmem:[#allocation5_spill] sm:$0xff]  ;;  %v6295_v1 = vld [vmem:[#allocation6_spill] sm:$0xff] }
 0x2a8   : > { %v2675_v23 = vmul.f32 %v2643_v9, %v5895_v44  ;;  %v2676_v54 = vmul.f32 %v2644_v42, %v5898_v57  ;;  %v2677_v14 = vmul.f32 %v2645_v41, %v5901_v47  ;;  %v2678_v25 = vmul.f32 %v2646_v29, %v6290_v22  ;;  %v6296_v28 = vld [vmem:[#allocation7_spill] sm:$0xff]  ;;  %v6297_v44 = vld [vmem:[#allocation9_spill] sm:$0xff]  ;;  %v6298_v57 = vld [vmem:[#allocation8_spill] sm:$0xff] }
 0x2a9   : > { %v2679_v27 = vmul.f32 %v2647_v20, %v6291_v56  ;;  %v2680_v11 = vmul.f32 %v2648_v48, %v5962_v50  ;;  %v2681_v34 = vmul.f32 %v2649_v49, %v6292_v46  ;;  %v2682_v7 = vmul.f32 %v2650_v38, %v6293_v51  ;;  %v6299_v47 = vld [vmem:[#allocation10_spill] sm:$0xff]  ;;  %v6300_v50 = vld [vmem:[#allocation16_spill] sm:$0xff] }
 0x2aa   : > { %v2683_v0 = vmul.f32 %v2651_v43, %v6294_v35  ;;  %v2684_v30 = vmul.f32 %v2652_v36, %v6295_v1  ;;  %v2685_v9 = vmul.f32 %v2653_v63, %v6296_v28  ;;  %v2686_v42 = vmul.f32 %v2654_v3, %v6297_v44 }
 0x2ab   : > { %v2687_v41 = vmul.f32 %v2655_v40, %v6298_v57  ;;  %v2688_v29 = vmul.f32 %v2656_v26, %v6299_v47  ;;  %v2689_v20 = vmul.f32 %v2657_v60, %v5841_v24  ;;  %v2690_v48 = vmul.f32 %v2658_v37, %v5844_v31  ;;  %v6301_v24 = vld [vmem:[#allocation17_spill] sm:$0xff] }
 0x2ac   : > { %v2691_v49 = vmul.f32 %v2659_v21, %v5847_v10  ;;  %v2692_v38 = vmul.f32 %v2660_v8, %v5850_v5  ;;  %v2693_v43 = vmul.f32 %v2661_v62, %v5853_v4  ;;  %v2694_v36 = vmul.f32 %v2662_v55, %v5856_v15  ;;  %v6302_v4 = vld [vmem:[#allocation19_spill] sm:$0xff]  ;;  %v6303_v15 = vld [vmem:[#allocation20_spill] sm:$0xff] }
 0x2ad   : > { %v2695_v63 = vmul.f32 %v2663_v52, %v5859_v19  ;;  %v2696_v3 = vmul.f32 %v2664_v58, %v5862_v45  ;;  %v2697_v40 = vmul.f32 %v2665_v32, %v5865_v13  ;;  %v2698_v26 = vmul.f32 %v2666_v12, %v5868_v61  ;;  %v6304_v13 = vld [vmem:[#allocation21_spill] sm:$0xff]  ;;  %v6305_v61 = vld [vmem:[#allocation22_spill] sm:$0xff] }
 0x2ae   : > { %v2699_v60 = vmul.f32 %v2667_v2, %v6300_v50  ;;  %v2700_v37 = vmul.f32 %v2668_v33, %v6301_v24  ;;  %v2701_v21 = vmul.f32 %v2669_v59, %v5877_v53  ;;  %v2713_v8 = vadd.f32 %v2681_v34, %v6292_v46  ;;  %v6306_v50 = vld [vmem:[#allocation23_spill] sm:$0xff]  ;;  %v6307_v53 = vld [vmem:[#allocation24_spill] sm:$0xff]  ;;  %v6308_v34 = vld [vmem:[#allocation25_spill] sm:$0xff] }
 0x2af   : > { %v2714_v62 = vadd.f32 %v2682_v7, %v6293_v51  ;;  %v2702_v55 = vmul.f32 %v2670_v6, %v6302_v4  ;;  %v2703_v52 = vmul.f32 %v2671_v17, %v6303_v15  ;;  %v2715_v58 = vadd.f32 %v2683_v0, %v6294_v35  ;;  %v6309_v7 = vld [vmem:[#allocation26_spill] sm:$0xff] }
 0x2b0   : > { %v2716_v32 = vadd.f32 %v2684_v30, %v6295_v1  ;;  %v2704_v12 = vmul.f32 %v2672_v18, %v6304_v13  ;;  %v2705_v2 = vmul.f32 %v2673_v39, %v6305_v61  ;;  %v2706_v33 = vmul.f32 %v2674_v16, %v6306_v50 }
 0x2b1   : > { %v2717_v59 = vadd.f32 %v2685_v9, %v6296_v28  ;;  %v2707_v46 = vmul.f32 %v2675_v23, %v6307_v53  ;;  %v2708_v51 = vmul.f32 %v2676_v54, %v6308_v34  ;;  %v2709_v6 = vmul.f32 %v2677_v14, %v6309_v7  ;;  %v6310_v9 = vld [vmem:[#allocation45_spill] sm:$0xff]  ;;  %v6311_v53 = vld [vmem:[#allocation11_spill] sm:$0xff] }
 0x2b2   : > { %v2718_v17 = vadd.f32 %v2686_v42, %v6297_v44  ;;  %v2710_v35 = vmul.f32 %v2678_v25, %v6290_v22  ;;  %v2719_v1 = vadd.f32 %v2687_v41, %v6298_v57  ;;  %v2745_v0 = vmul.f32 0.7978846, %v2713_v8  ;;  %v6312_v42 = vld [vmem:[#allocation12_spill] sm:$0xff] }
 0x2b3   : > { %v2746_v18 = vmul.f32 0.7978846, %v2714_v62  ;;  %v2711_v39 = vmul.f32 %v2679_v27, %v6291_v56  ;;  %v2720_v16 = vadd.f32 %v2688_v29, %v6299_v47  ;;  %v2747_v30 = vmul.f32 0.7978846, %v2715_v58  ;;  %v6313_v47 = vld [vmem:[#allocation13_spill] sm:$0xff]  ;;  %v6316_v62 = vld [vmem:[#allocation16_spill] sm:$0xff] }
 0x2b4   : > { %v2748_v28 = vmul.f32 0.7978846, %v2716_v32  ;;  %v2712_v23 = vmul.f32 %v2680_v11, %v6310_v9  ;;  %v2721_v54 = vadd.f32 %v2689_v20, %v6311_v53  ;;  %v2749_v34 = vmul.f32 0.7978846, %v2717_v59  ;;  %v6314_v20 = vld [vmem:[#allocation14_spill] sm:$0xff]  ;;  %v6318_v59 = vld [vmem:[#allocation24_spill] sm:$0xff] }
 0x2b5   : > { %4226 = vtanh.f32 %v2745_v0  ;;  %v2722_v44 = vadd.f32 %v2690_v48, %v5844_v31  ;;  %v2723_v14 = vadd.f32 %v2691_v49, %v5847_v10  ;;  %v2750_v25 = vmul.f32 0.7978846, %v2718_v17  ;;  %v6315_v10 = vld [vmem:[#allocation15_spill] sm:$0xff]  ;;  %v6317_v58 = vld [vmem:[#allocation18_spill] sm:$0xff] }
 0x2b6   : > { %4228 = vtanh.f32 %v2746_v18  ;;  %v2724_v57 = vadd.f32 %v2692_v38, %v5850_v5  ;;  %v2725_v27 = vadd.f32 %v2693_v43, %v6312_v42  ;;  %v2751_v41 = vmul.f32 0.7978846, %v2719_v1 }
 0x2b7   : > { %4230 = vtanh.f32 %v2747_v30  ;;  %v2726_v29 = vadd.f32 %v2694_v36, %v6313_v47  ;;  %v2727_v11 = vadd.f32 %v2695_v63, %v5859_v19  ;;  %v2752_v8 = vmul.f32 0.7978846, %v2720_v16 }
 0x2b8   : > { %4232 = vtanh.f32 %v2748_v28  ;;  %v2728_v53 = vadd.f32 %v2696_v3, %v5862_v45  ;;  %v2729_v31 = vadd.f32 %v2697_v40, %v6314_v20  ;;  %v2753_v48 = vmul.f32 0.7978846, %v2721_v54 }
 0x2b9   : > { %4234 = vtanh.f32 %v2749_v34  ;;  %v2730_v49 = vadd.f32 %v2698_v26, %v6315_v10  ;;  %v2731_v5 = vadd.f32 %v2699_v60, %v6316_v62  ;;  %v2754_v38 = vmul.f32 0.7978846, %v2722_v44 }
 0x2ba   : > { %4236 = vtanh.f32 %v2750_v25  ;;  %v2732_v43 = vadd.f32 %v2700_v37, %v6301_v24  ;;  %v2733_v36 = vadd.f32 %v2701_v21, %v6317_v58  ;;  %v2755_v32 = vmul.f32 0.7978846, %v2723_v14  ;;  %v6319_v21 = vld [vmem:[#allocation25_spill] sm:$0xff] }
 0x2bb   : > { %4238 = vtanh.f32 %v2751_v41  ;;  %v2734_v19 = vadd.f32 %v2702_v55, %v6302_v4  ;;  %v2735_v45 = vadd.f32 %v2703_v52, %v6303_v15  ;;  %v2756_v63 = vmul.f32 0.7978846, %v2724_v57 }
 0x2bc   : > { %4240 = vtanh.f32 %v2752_v8  ;;  %v2736_v3 = vadd.f32 %v2704_v12, %v6304_v13  ;;  %v2737_v40 = vadd.f32 %v2705_v2, %v6305_v61  ;;  %v2757_v26 = vmul.f32 0.7978846, %v2725_v27  ;;  %v6320_v27 = vld [vmem:[#allocation29_spill] sm:$0xff]  ;;  %v6321_v8 = vld [vmem:[#allocation30_spill] sm:$0xff] }
 0x2bd   : > { %4242 = vtanh.f32 %v2753_v48  ;;  %v2738_v60 = vadd.f32 %v2706_v33, %v6306_v50  ;;  %v2739_v37 = vadd.f32 %v2707_v46, %v6318_v59  ;;  %v2758_v34 = vmul.f32 0.7978846, %v2726_v29 }
 0x2be   : > { %4244 = vtanh.f32 %v2754_v38  ;;  %v2740_v17 = vadd.f32 %v2708_v51, %v6319_v21  ;;  %v2741_v55 = vadd.f32 %v2709_v6, %v6309_v7  ;;  %v2759_v1 = vmul.f32 0.7978846, %v2727_v11 }
 0x2bf   : > { %4246 = vtanh.f32 %v2755_v32  ;;  %v2742_v52 = vadd.f32 %v2710_v35, %v6290_v22  ;;  %v6087_v12 = vadd.f32 %v2711_v39, %v6291_v56  ;;  %v2760_v2 = vmul.f32 0.7978846, %v2728_v53  ;;  %v6323_v32 = vld [vmem:[#allocation32_spill] sm:$0xff] }
 0x2c0   : > { %4248 = vtanh.f32 %v2756_v63  ;;  %v6090_v0 = vadd.f32 %v2712_v23, %v6310_v9  ;;  %v2761_v33 = vmul.f32 0.7978846, %v2729_v31  ;;  %v2762_v46 = vmul.f32 0.7978846, %v2730_v49 }
 0x2c1   : > { %4250 = vtanh.f32 %v2757_v26  ;;  %v2763_v16 = vmul.f32 0.7978846, %v2731_v5  ;;  %v2764_v51 = vmul.f32 0.7978846, %v2732_v43  ;;  %v2765_v30 = vmul.f32 0.7978846, %v2733_v36 }
 0x2c2   : > { %v4227_v18 = vpop.eup %4226  ;;  %4252 = vtanh.f32 %v2758_v34  ;;  %v2766_v28 = vmul.f32 0.7978846, %v2734_v19  ;;  %v2767_v54 = vmul.f32 0.7978846, %v2735_v45  ;;  %v2768_v44 = vmul.f32 0.7978846, %v2736_v3 }
 0x2c3   : > { %v4229_v6 = vpop.eup %4228  ;;  %4254 = vtanh.f32 %v2759_v1  ;;  %v2809_v35 = vadd.f32 1.0, %v4227_v18  ;;  %v2769_v14 = vmul.f32 0.7978846, %v2737_v40  ;;  %v2770_v57 = vmul.f32 0.7978846, %v2738_v60  ;;  %v6322_v5 = vld [vmem:[#allocation31_spill] sm:$0xff] }
 0x2c4   : > { %v4231_v39 = vpop.eup %4230  ;;  %4256 = vtanh.f32 %v2760_v2  ;;  %v2810_v23 = vadd.f32 1.0, %v4229_v6  ;;  %v2771_v29 = vmul.f32 0.7978846, %v2739_v37  ;;  %v2772_v48 = vmul.f32 0.7978846, %v2740_v17  ;;  %v6324_v26 = vld [vmem:[#allocation33_spill] sm:$0xff] }
 0x2c5   : > { %v4233_v25 = vpop.eup %4232  ;;  %4258 = vtanh.f32 %v2761_v33  ;;  %v2811_v42 = vadd.f32 1.0, %v4231_v39  ;;  %v2841_v41 = vmul.f32 %v2809_v35, %v6320_v27  ;;  %v2773_v3 = vmul.f32 0.7978846, %v2741_v55  ;;  %v6325_v17 = vld [vmem:[#allocation34_spill] sm:$0xff]  ;;  %v6327_v6 = vld [vmem:[#allocation36_spill] sm:$0xff] }
 0x2c6   : > { %v4235_v47 = vpop.eup %4234  ;;  %4260 = vtanh.f32 %v2762_v46  ;;  %v2812_v11 = vadd.f32 1.0, %v4233_v25  ;;  %v2842_v53 = vmul.f32 %v2810_v23, %v6321_v8  ;;  %v2774_v46 = vmul.f32 0.7978846, %v2742_v52 }
 0x2c7   : > { %v4237_v31 = vpop.eup %4236  ;;  %4262 = vtanh.f32 %v2763_v16  ;;  %v2813_v49 = vadd.f32 1.0, %v4235_v47  ;;  %v2843_v38 = vmul.f32 %v2811_v42, %v6322_v5  ;;  %v6326_v16 = vld [vmem:[#allocation35_spill] sm:$0xff]  ;;  %v2775_v23 = vmul.f32 0.7978846, %v6087_v12  ;;  %v6328_v42 = vld [vmem:[#allocation37_spill] sm:$0xff]  ;;  %v6331_v5 = vld [vmem:[#allocation40_spill] sm:$0xff] }
 0x2c8   : > { %v4239_v43 = vpop.eup %4238  ;;  %4264 = vtanh.f32 %v2764_v51  ;;  %v2814_v36 = vadd.f32 1.0, %v4237_v31  ;;  %v2844_v19 = vmul.f32 %v2812_v11, %v6323_v32  ;;  %v3436_v45 = vpack.c.bf16 %v2842_v53, %v2841_v41  ;;  %v6329_v41 = vld [vmem:[#allocation38_spill] sm:$0xff]  ;;  %v6330_v31 = vld [vmem:[#allocation39_spill] sm:$0xff] }
 0x2c9   : > { %v4241_v63 = vpop.eup %4240  ;;  %4266 = vtanh.f32 %v2765_v30  ;;  %v2815_v40 = vadd.f32 1.0, %v4239_v43  ;;  %v2845_v60 = vmul.f32 %v2813_v49, %v6324_v26  ;;  %v2776_v8 = vmul.f32 0.7978846, %v6090_v0 }
 0x2ca   : > { %v4243_v37 = vpop.eup %4242  ;;  %4268 = vtanh.f32 %v2766_v28  ;;  %v2816_v34 = vadd.f32 1.0, %v4241_v63  ;;  %v2846_v1 = vmul.f32 %v2814_v36, %v6325_v17  ;;  %3437 = vst [vmem:[%s6099_s16] sm:$0xff] %v3436_v45   ;;  %v3441_v2 = vpack.c.bf16 %v2844_v19, %v2843_v38  ;;  %v6332_v19 = vld [vmem:[#allocation41_spill] sm:$0xff]  ;;  %v6333_v63 = vld [vmem:[#allocation42_spill] sm:$0xff] }
 0x2cb   : > { %v4245_v33 = vpop.eup %4244  ;;  %4270 = vtanh.f32 %v2767_v54  ;;  %v2817_v18 = vadd.f32 1.0, %v4243_v37  ;;  %v2847_v51 = vmul.f32 %v2815_v40, %v6326_v16  ;;  %v2601_v36 = vmul.f32 0.5, %v6314_v20 }
 0x2cc   : > { %v4247_v55 = vpop.eup %4246  ;;  %4272 = vtanh.f32 %v2768_v44  ;;  %v2818_v30 = vadd.f32 1.0, %v4245_v33  ;;  %v2848_v35 = vmul.f32 %v2816_v34, %v6327_v6  ;;  %3513 = vst [vmem:[%s6099_s16 + $0x8] sm:$0xff] %v3441_v2   ;;  %v3446_v39 = vpack.c.bf16 %v2846_v1, %v2845_v60  ;;  %v6334_v34 = vld [vmem:[#allocation43_spill] sm:$0xff]  ;;  %v6335_v1 = vld [vmem:[#allocation44_spill] sm:$0xff] }
 0x2cd   : > { %v4249_v28 = vpop.eup %4248  ;;  %4274 = vtanh.f32 %v2769_v14  ;;  %v2819_v25 = vadd.f32 1.0, %v4247_v55  ;;  %v2849_v27 = vmul.f32 %v2817_v18, %v6328_v42  ;;  %v2602_v60 = vmul.f32 0.5, %v6315_v10 }
 0x2ce   : > { %v4251_v52 = vpop.eup %4250  ;;  %4276 = vtanh.f32 %v2770_v57  ;;  %v2820_v54 = vadd.f32 1.0, %v4249_v28  ;;  %v2850_v47 = vmul.f32 %v2818_v30, %v6329_v41  ;;  %3514 = vst [vmem:[%s6099_s16 + $0x10] sm:$0xff] %v3446_v39   ;;  %v3451_v44 = vpack.c.bf16 %v2848_v35, %v2847_v51 }
 0x2cf   : > { %v4253_v11 = vpop.eup %4252  ;;  %4278 = vtanh.f32 %v2771_v29  ;;  %v2821_v53 = vadd.f32 1.0, %v4251_v52  ;;  %v2851_v49 = vmul.f32 %v2819_v25, %v6330_v31  ;;  %v2603_v18 = vmul.f32 0.5, %v6316_v62 }
 0x2d0   : > { %v4255_v12 = vpop.eup %4254  ;;  %4280 = vtanh.f32 %v2772_v48  ;;  %v2822_v14 = vadd.f32 1.0, %v4253_v11  ;;  %v2852_v38 = vmul.f32 %v2820_v54, %v6331_v5  ;;  %3515 = vst [vmem:[%s6099_s16 + $0x18] sm:$0xff] %v3451_v44   ;;  %v3456_v57 = vpack.c.bf16 %v2850_v47, %v2849_v27 }
 0x2d1   : > { %v4257_v43 = vpop.eup %4256  ;;  %4282 = vtanh.f32 %v2773_v3  ;;  %v2823_v32 = vadd.f32 1.0, %v4255_v12  ;;  %v2853_v45 = vmul.f32 %v2821_v53, %v6332_v19  ;;  %v2604_v10 = vmul.f32 0.5, %v6301_v24 }
 0x2d2   : > { %v4259_v0 = vpop.eup %4258  ;;  %4284 = vtanh.f32 %v2774_v46  ;;  %v2824_v29 = vadd.f32 1.0, %v4257_v43  ;;  %v2854_v40 = vmul.f32 %v2822_v14, %v6333_v63  ;;  %3516 = vst [vmem:[%s6099_s16 + $0x20] sm:$0xff] %v3456_v57   ;;  %v3461_v48 = vpack.c.bf16 %v2852_v38, %v2851_v49 }
 0x2d3   : > { %v4261_v26 = vpop.eup %4260  ;;  %4286 = vtanh.f32 %v2775_v23  ;;  %v2825_v37 = vadd.f32 1.0, %v4259_v0  ;;  %v2855_v20 = vmul.f32 %v2823_v32, %v6334_v34  ;;  %v2605_v28 = vmul.f32 0.5, %v6317_v58 }
 0x2d4   : > { %v4263_v3 = vpop.eup %4262  ;;  %4288 = vtanh.f32 %v2776_v8  ;;  %v2826_v17 = vadd.f32 1.0, %v4261_v26  ;;  %v2856_v2 = vmul.f32 %v2824_v29, %v6335_v1  ;;  %3517 = vst [vmem:[%s6099_s16 + $0x28] sm:$0xff] %v3461_v48   ;;  %v3466_v33 = vpack.c.bf16 %v2854_v40, %v2853_v45 }
 0x2d5   : > { %v4265_v46 = vpop.eup %4264  ;;  %v2827_v16 = vadd.f32 1.0, %v4263_v3  ;;  %v2857_v51 = vmul.f32 %v2825_v37, %v2601_v36  ;;  %v2606_v27 = vmul.f32 0.5, %v6302_v4  ;;  %v2607_v24 = vmul.f32 0.5, %v6303_v15 }
 0x2d6   : > { %v4267_v55 = vpop.eup %4266  ;;  %v2828_v30 = vadd.f32 1.0, %v4265_v46  ;;  %v2858_v6 = vmul.f32 %v2826_v17, %v2602_v60  ;;  %3518 = vst [vmem:[%s6099_s16 + $0x30] sm:$0xff] %v3466_v33   ;;  %v3471_v35 = vpack.c.bf16 %v2856_v2, %v2855_v20  ;;  %v2608_v8 = vmul.f32 0.5, %v6304_v13 }
 0x2d7   : > { %v4269_v39 = vpop.eup %4268  ;;  %v2829_v23 = vadd.f32 1.0, %v4267_v55  ;;  %v2859_v25 = vmul.f32 %v2827_v16, %v2603_v18  ;;  %v2609_v4 = vmul.f32 0.5, %v6305_v61  ;;  %v2610_v38 = vmul.f32 0.5, %v6306_v50 }
 0x2d8   : > { %v4271_v42 = vpop.eup %4270  ;;  %v2830_v62 = vadd.f32 1.0, %v4269_v39  ;;  %v2860_v52 = vmul.f32 %v2828_v30, %v2604_v10  ;;  %3519 = vst [vmem:[%s6099_s16 + $0x38] sm:$0xff] %v3471_v35   ;;  %v3476_v54 = vpack.c.bf16 %v2858_v6, %v2857_v51  ;;  %v2611_v13 = vmul.f32 0.5, %v6318_v59 }
 0x2d9   : > { %v4273_v41 = vpop.eup %4272  ;;  %v2831_v47 = vadd.f32 1.0, %v4271_v42  ;;  %v2861_v44 = vmul.f32 %v2829_v23, %v2605_v28  ;;  %v2612_v0 = vmul.f32 0.5, %v6319_v21  ;;  %v2613_v50 = vmul.f32 0.5, %v6309_v7 }
 0x2da   : > { %v4275_v11 = vpop.eup %4274  ;;  %v2832_v58 = vadd.f32 1.0, %v4273_v41  ;;  %v2862_v53 = vmul.f32 %v2830_v62, %v2606_v27  ;;  %3520 = vst [vmem:[%s6099_s16 + $0x40] sm:$0xff] %v3476_v54   ;;  %v3481_v31 = vpack.c.bf16 %v2860_v52, %v2859_v25  ;;  %v2614_v37 = vmul.f32 0.5, %v6290_v22 }
 0x2db   : > { %v4277_v49 = vpop.eup %4276  ;;  %v2833_v12 = vadd.f32 1.0, %v4275_v11  ;;  %v2863_v14 = vmul.f32 %v2831_v47, %v2607_v24  ;;  %v2615_v3 = vmul.f32 0.5, %v6291_v56  ;;  %v2616_v7 = vmul.f32 0.5, %v6310_v9 }
 0x2dc   : > { %v4279_v5 = vpop.eup %4278  ;;  %v2834_v15 = vadd.f32 1.0, %v4277_v49  ;;  %v2864_v57 = vmul.f32 %v2832_v58, %v2608_v8  ;;  %3521 = vst [vmem:[%s6099_s16 + $0x48] sm:$0xff] %v3481_v31   ;;  %v3486_v43 = vpack.c.bf16 %v2862_v53, %v2861_v44 }
 0x2dd   : > { %v4281_v36 = vpop.eup %4280  ;;  %v2835_v32 = vadd.f32 1.0, %v4279_v5  ;;  %v2865_v19 = vmul.f32 %v2833_v12, %v2609_v4 }
 0x2de   : > { %v4283_v45 = vpop.eup %4282  ;;  %v2836_v61 = vadd.f32 1.0, %v4281_v36  ;;  %v2866_v29 = vmul.f32 %v2834_v15, %v2610_v38  ;;  %3522 = vst [vmem:[%s6099_s16 + $0x50] sm:$0xff] %v3486_v43   ;;  %v3491_v63 = vpack.c.bf16 %v2864_v57, %v2863_v14 }
 0x2df   : > { %v4285_v40 = vpop.eup %4284  ;;  %v2837_v48 = vadd.f32 1.0, %v4283_v45  ;;  %v2867_v26 = vmul.f32 %v2835_v32, %v2611_v13 }
 0x2e0   : > { %v4287_v60 = vpop.eup %4286  ;;  %v2838_v59 = vadd.f32 1.0, %v4285_v40  ;;  %v2868_v34 = vmul.f32 %v2836_v61, %v2612_v0  ;;  %3523 = vst [vmem:[%s6099_s16 + $0x58] sm:$0xff] %v3491_v63   ;;  %v3496_v20 = vpack.c.bf16 %v2866_v29, %v2865_v19 }
 0x2e1   : > { %v4289_v21 = vpop.eup %4288  ;;  %v2839_v17 = vadd.f32 1.0, %v4287_v60  ;;  %v2869_v1 = vmul.f32 %v2837_v48, %v2613_v50 }
 0x2e2   : > { %v2840_v2 = vadd.f32 1.0, %v4289_v21  ;;  %v2870_v33 = vmul.f32 %v2838_v59, %v2614_v37  ;;  %3524 = vst [vmem:[%s6099_s16 + $0x60] sm:$0xff] %v3496_v20   ;;  %v3501_v46 = vpack.c.bf16 %v2868_v34, %v2867_v26 }
 0x2e3   : > { %v2871_v18 = vmul.f32 %v2839_v17, %v2615_v3 }
 0x2e4   : > { %v2872_v22 = vmul.f32 %v2840_v2, %v2616_v7  ;;  %3525 = vst [vmem:[%s6099_s16 + $0x68] sm:$0xff] %v3501_v46   ;;  %v3506_v16 = vpack.c.bf16 %v2870_v33, %v2869_v1 }
 0x2e6   : > { %3526 = vst [vmem:[%s6099_s16 + $0x70] sm:$0xff] %v3506_v16   ;;  %v3511_v51 = vpack.c.bf16 %v2872_v22, %v2871_v18 }
 0x2e8   : > { %3527 = vst [vmem:[%s6099_s16 + $0x78] sm:$0xff] %v3511_v51  }
 0x2e9 PF: > { %s13_s14 = sadd.s32 1, %s4312_s14   ;;  %s6336_s12 = smov %s4308_s13 }
 0x2ea   : > { %p10_p5 = scmp.ge.s32.totalorder %s13_s14, 4   ;;  %s6337_s13 = smov %s6339_s15 }
 0x2ec   :  { %12 = sbr.rel (!%p10_p5) target bundleno = 2 (0x2), region = 78 }

// kernel: ginka_decoder_forward.9
= control target key start
LH: loop header
LB: loop body
LE: loop exit
PB: predicated region body
PF: predicated region fallthrough
CT: control target
= control target key end

     0   :  { %s4265_s18 = smov 0   ;;  %s4267_s19 = smov 0   ;;  %s6294_s0 = inlined_call_operand.vmem [shape: bf16[2,16,16,128], index: 0, kind: input, shape index: {}]   ;;  %s6295_s1 = inlined_call_operand.vmem [shape: bf16[3,1,384,128], index: 1, kind: input, shape index: {}]   ;;  %s6296_s2 = inlined_call_operand.vmem [shape: f32[1,128], index: 2, kind: input, shape index: {}]   ;;  %s6297_s3 = inlined_call_operand.vmem [shape: f32[2,1,128], index: 3, kind: input, shape index: {}]   ;;  %s6298_s4 = inlined_call_operand.vmem [shape: f32[2,1,128], index: 4, kind: input, shape index: {}]   ;;  %s6299_s5 = inlined_call_operand.vmem [shape: f32[2,256,128], index: 5, kind: output, shape index: {}]  }
   0x1   :  { %s4269_s20 = smov 0  }
   0x2 LB: > { %s34_s21 = sadd.s32 1, %s4229_s19  ;;  %p3238_p0 = scmp.ge.s32.totalorder %s4233_s20, 1  ;;  %s4233_s20 = sphi %s4269_s20, %s15_s20   ;;  %s4229_s19 = sphi %s4267_s19, %s6518_s19   ;;  %s4225_s18 = sphi %s4265_s18, %s6517_s18  }
   0x3   : > { %p36_p1 = scmp.ge.s32.totalorder %s34_s21, 2  ;;  %p262_p2 = scmp.lt.s32.totalorder %s4233_s20, 3 }
   0x5   : > { %s6520_s21 = smov (%p36_p1, %s34_s21), 0  ;;  %p263_p3 = pnand %p3238_p0, %p262_p2 }
   0x7   : > { %266 = sbr.rel (%p263_p3) target bundleno = 764 (0x2fc), region = 40 }
   0xc   : > { %v4041_v0 = vld [vmem:[%s6295_s1 + $0x78] sm:$0xff]   ;;  %v4043_v2 = vld [vmem:[%s6295_s1 + $0x70] sm:$0xff]   ;;  %p319_p4 = scmp.lt.s32.totalorder %s4225_s18, 1  ;;  %v4045_v4 = vld [vmem:[%s6295_s1 + $0x68] sm:$0xff]   ;;  %vm654_vm0 = vcmask 1040384   ;;  %vm747_vm3 = vcmask 1047552  }
   0xd   : > { %v4042_v1 = vld [vmem:[%s6295_s1 + $0x38] sm:$0xff]   ;;  %3449 = vmatprep.subr.bf16.mxu0 %v4041_v0  ;;  %4001 = vmatprep.subr.bf16.mxu1 %v4041_v0  ;;  %v4044_v3 = vld [vmem:[%s6295_s1 + $0x30] sm:$0xff]   ;;  %v4046_v5 = vld [vmem:[%s6295_s1 + $0x28] sm:$0xff]   ;;  %vm655_vm1 = vsmask.f32 256 }
   0xe   : > { %3450 = vmatpush3.bf16.msra.mxu0 %v4042_v1  ;;  %4009 = vmatpush3.bf16.msra.mxu1 %v4042_v1  ;;  %s6522_s18 = smov (!%p319_p4, %s4225_s18), 1  ;;  %v4047_v6 = vld [vmem:[%s6295_s1 + $0x60] sm:$0xff]   ;;  %v4049_v8 = vld [vmem:[%s6295_s1 + $0x58] sm:$0xff]   ;;  %v4051_v10 = vld [vmem:[%s6295_s1 + $0x50] sm:$0xff]   ;;  %vm748_vm4 = vsmask.f32 7424 }
   0xf   : > { %3451 = vmatprep.subr.bf16.mxu0 %v4043_v2  ;;  %4002 = vmatprep.subr.bf16.mxu1 %v4043_v2  ;;  %s3447_s11 = sshll.u32 %s6522_s18, 7  ;;  %v4048_v7 = vld [vmem:[%s6295_s1 + $0x20] sm:$0xff]   ;;  %v4050_v9 = vld [vmem:[%s6295_s1 + $0x18] sm:$0xff]   ;;  %v4052_v17 = vld [vmem:[%s6295_s1 + $0x10] sm:$0xff]   ;;  %s343_s30 = scalar_lea.vmem %s6297_s3, %s6522_s18 }
  0x10   : > { %s4316_s22 = scalar_lea.vmem %s6294_s0, %s3447_s11  ;;  %v4053_v19 = vld [vmem:[%s6295_s1 + $0x48] sm:$0xff]   ;;  %v4055_v29 = vld [vmem:[%s6295_s1 + $0x40] sm:$0xff]   ;;  %v4059_v33 = vld [vmem:[%s6295_s1 + $0xb8] sm:$0xff]   ;;  %s349_s8 = scalar_lea.vmem %s6298_s4, %s6522_s18 }
  0x11   : > { %v395_v11 = vld [vmem:[%s4316_s22] sm:$0xf]  ;;  %v4326_v12 = vld [vmem:[%s4316_s22 + $0x4] sm:$0xf]  ;;  %v417_v14 = vld [vmem:[%s4316_s22 + $0x58] sm:$0xf] }
  0x12   : > { %3452 = vmatpush3.bf16.msra.mxu0 %v4044_v3  ;;  %4010 = vmatpush3.bf16.msra.mxu1 %v4044_v3  ;;  %v4329_v13 = vcombine.low %v395_v11, %v4326_v12  ;;  %v4333_v15 = vld [vmem:[%s4316_s22 + $0x5c] sm:$0xf]  ;;  %v4054_v21 = vld [vmem:[%s6295_s1 + $0x8] sm:$0xff]   ;;  %v4354_v24 = vld [vmem:[%s4316_s22 + $0x60] sm:$0xf]  ;;  %s3448_s9 = sshll.u32 %s6522_s18, 8 }
  0x13   : > { %3453 = vmatprep.subr.bf16.mxu0 %v4045_v4  ;;  %4003 = vmatprep.subr.bf16.mxu1 %v4045_v4  ;;  %v4336_v16 = vcombine.low %v417_v14, %v4333_v15  ;;  %v4361_v27 = vld [vmem:[%s4316_s22 + $0x64] sm:$0xf]  ;;  %v4375_v32 = vld [vmem:[%s4316_s22 + $0x8] sm:$0xf]  ;;  %v4381_v34 = vld [vmem:[%s4316_s22 + $0xc] sm:$0xf]  ;;  %v3269_v3 = vcombine.low %v4333_v15, %v4333_v15  ;;  %s6151_s11 = scalar_lea.vmem %s6299_s5, %s3448_s9 }
  0x14   : > { %v535_v18 = vshrl.u32 %v4329_v13, 16  ;;  %1004 = vmatprep.mubr.bf16.mxu0 %v4329_v13  ;;  %v538_v22 = vshll.u32 %v4329_v13, 16  ;;  %v4365_v28 = vcombine.low %v4354_v24, %v4361_v27  ;;  %v4056_v30 = vld [vmem:[%s6295_s1] sm:$0xff]   ;;  %v4384_v35 = vld [vmem:[%s4316_s22 + $0x68] sm:$0xf]  ;;  %vm4394_vm2 = vmand %vm654_vm0, %vm655_vm1  ;;  %v4403_v41 = vcombine.low %v4375_v32, %v4381_v34 }
  0x15   : > { %v612_v20 = vshrl.u32 %v4336_v16, 16  ;;  %1100 = vmatprep.mubr.bf16.mxu1 %v4336_v16  ;;  %v615_v23 = vshll.u32 %v4336_v16, 16  ;;  %v4391_v38 = vld [vmem:[%s4316_s22 + $0x6c] sm:$0xf]  ;;  %v4060_v40 = vld [vmem:[%s6295_s1 + $0x178] sm:$0xff]   ;;  %v4061_v47 = vld [vmem:[%s6295_s1 + $0xb0] sm:$0xff]   ;;  %v3270_v15 = vcombine.low %v4361_v27, %v4361_v27 }
  0x16   : > { %3454 = vmatpush3.bf16.msra.mxu0 %v4046_v5  ;;  %4011 = vmatpush3.bf16.msra.mxu1 %v4046_v5  ;;  %v537_v25 = vrot.slane %v535_v18, 7  ;;  %v619_v31 = vshrl.u32 %v4365_v28, 16  ;;  %v4407_v42 = vcombine.low %v4384_v35, %v4391_v38  ;;  %v622_v46 = vshll.u32 %v4365_v28, 16  ;;  %v4065_v48 = vld [vmem:[%s6295_s1 + $0x170] sm:$0xff]   ;;  %v4063_v50 = vld [vmem:[%s6295_s1 + $0xa8] sm:$0xff]   ;;  %v4064_v1 = vld [vmem:[%s6295_s1 + $0xa0] sm:$0xff]  }
  0x17   : > { %3455 = vmatprep.subr.bf16.mxu0 %v4047_v6  ;;  %4004 = vmatprep.subr.bf16.mxu1 %v4047_v6  ;;  %v614_v26 = vrot.slane %v612_v20, 7  ;;  %v542_v49 = vshrl.u32 %v4403_v41, 16  ;;  %v4434_v52 = vld [vmem:[%s4316_s22 + $0x10] sm:$0xf]  ;;  %v4437_v53 = vld [vmem:[%s4316_s22 + $0x14] sm:$0xf]  ;;  %vm4477_vm5 = vmand %vm747_vm3, %vm748_vm4 }
  0x18   : > { %v540_v36 = vor.u32 %v538_v22, %v537_v25  ;;  %v621_v45 = vrot.slane %v619_v31, 7  ;;  %v626_v51 = vshrl.u32 %v4407_v42, 16  ;;  %v4440_v55 = vld [vmem:[%s4316_s22 + $0x70] sm:$0xf]  ;;  %v4443_v56 = vld [vmem:[%s4316_s22 + $0x74] sm:$0xf]  ;;  %v4458_v62 = vcombine.low %v4434_v52, %v4437_v53 }
  0x19   : > { %v617_v37 = vor.u32 %v615_v23, %v614_v26  ;;  %v545_v57 = vshll.u32 %v4403_v41, 16  ;;  %v4073_v58 = vld [vmem:[%s6295_s1 + $0x168] sm:$0xff]   ;;  %v544_v59 = vrot.slane %v542_v49, 7  ;;  %v629_v60 = vshll.u32 %v4407_v42, 16  ;;  %v4124_v39 = vld [vmem:[%s6295_s1 + $0x230] sm:$0xff]  }
  0x1a   : > { %3456 = vmatpush3.bf16.msra.mxu0 %v4048_v7  ;;  %4012 = vmatpush3.bf16.msra.mxu1 %v4048_v7  ;;  %v4411_v43 = vsel %vm4394_vm2, %v395_v11, %v540_v36  ;;  %v624_v54 = vor.u32 %v622_v46, %v621_v45  ;;  %v628_v61 = vrot.slane %v626_v51, 7  ;;  %v694_v63 = vrot.slane %v615_v23, 1  ;;  %v4072_v45 = vld [vmem:[%s6295_s1 + $0x88] sm:$0xff]  }
  0x1b   : > { %3457 = vmatprep.subr.bf16.mxu0 %v4049_v8  ;;  %4005 = vmatprep.subr.bf16.mxu1 %v4049_v8  ;;  %v4415_v44 = vsel %vm4394_vm2, %v417_v14, %v617_v37  ;;  %v4472_v2 = vcombine.low %v4440_v55, %v4443_v56  ;;  %v547_v6 = vor.u32 %v545_v57, %v544_v59  ;;  %v549_v8 = vshrl.u32 %v4458_v62, 16  ;;  %v4090_v37 = vld [vmem:[%s6295_s1 + $0x158] sm:$0xff]  }
  0x1c   : > { %v4465_v0 = vsel %vm4394_vm2, %v4354_v24, %v624_v54  ;;  %v695_v5 = vor.u32 %v694_v63, %v612_v20  ;;  %v631_v7 = vor.u32 %v629_v60, %v628_v61  ;;  %v696_v14 = vrot.slane %v622_v46, 1  ;;  %v4507_v20 = vld [vmem:[%s4316_s22 + $0x1c] sm:$0xf]  ;;  %v4074_v63 = vld [vmem:[%s6295_s1 + $0x80] sm:$0xff]  }
  0x1d   : > { %v4515_v24 = vsel %vm4394_vm2, %v4375_v32, %v547_v6  ;;  %v551_v26 = vrot.slane %v549_v8, 7  ;;  %v636_v27 = vshll.u32 %v4472_v2, 16  ;;  %v698_v32 = vrot.slane %v629_v60, 1  ;;  %v4109_v6 = vld [vmem:[%s6295_s1 + $0x148] sm:$0xff]  }
  0x1e   : > { %3458 = vmatpush3.bf16.msra.mxu0 %v4050_v9  ;;  %4013 = vmatpush3.bf16.msra.mxu1 %v4050_v9  ;;  %v4079_v9 = vld [vmem:[%s6295_s1 + $0x160] sm:$0xff]   ;;  %v4495_v11 = vsel %vm4477_vm5, %v695_v5, %v3269_v3  ;;  %v697_v23 = vor.u32 %v696_v14, %v619_v31  ;;  %v4520_v25 = vsel %vm4394_vm2, %v4384_v35, %v631_v7  ;;  %v672_v36 = vrot.slane %v538_v22, 1  ;;  %v4609_v5 = vld [vmem:[%s4316_s22 + $0x2c] sm:$0xf]  ;;  %v4077_v7 = vld [vmem:[%s6295_s1 + $0x138] sm:$0xff]  }
  0x1f   : > { %3459 = vmatprep.subr.bf16.mxu0 %v4051_v10  ;;  %4006 = vmatprep.subr.bf16.mxu1 %v4051_v10  ;;  %v633_v10 = vshrl.u32 %v4472_v2, 16  ;;  %v3271_v35 = vcombine.low %v4391_v38, %v4391_v38  ;;  %v4553_v38 = vld [vmem:[%s4316_s22 + $0x20] sm:$0xf]  ;;  %v4078_v14 = vld [vmem:[%s6295_s1 + $0xf8] sm:$0xff]  }
  0x20   : > { %v4533_v31 = vsel %vm4477_vm5, %v697_v23, %v3270_v15  ;;  %v673_v54 = vor.u32 %v672_v36, %v535_v18 }
  0x22   : > { %3460 = vmatpush3.bf16.msra.mxu0 %v4052_v17  ;;  %4014 = vmatpush3.bf16.msra.mxu1 %v4052_v17  ;;  %v4068_v17 = vld [vmem:[%s6295_s1 + $0x98] sm:$0xff]  }
  0x23   : > { %3461 = vmatprep.subr.bf16.mxu0 %v4053_v19  ;;  %4007 = vmatprep.subr.bf16.mxu1 %v4053_v19  ;;  %v4504_v19 = vld [vmem:[%s4316_s22 + $0x18] sm:$0xf] }
  0x26   : > { %3462 = vmatpush3.bf16.msra.mxu0 %v4054_v21  ;;  %4015 = vmatpush3.bf16.msra.mxu1 %v4054_v21  ;;  %v552_v21 = vshll.u32 %v4458_v62, 16 }
  0x27   : > { %3463 = vmatprep.subr.bf16.mxu0 %v4055_v29  ;;  %4008 = vmatprep.subr.bf16.mxu1 %v4055_v29  ;;  %v635_v29 = vrot.slane %v633_v10, 7 }
  0x28   : > { %v554_v22 = vor.u32 %v552_v21, %v551_v26  ;;  %v3272_v26 = vcombine.low %v4443_v56, %v4443_v56 }
  0x29   : > { %v638_v46 = vor.u32 %v636_v27, %v635_v29 }
  0x2a   : > { %3464 = vmatpush3.bf16.msra.mxu0 %v4056_v30  ;;  %4016 = vmatpush3.bf16.msra.mxu1 %v4056_v30  ;;  %v4529_v30 = vcombine.low %v4504_v19, %v4507_v20  ;;  %v4583_v60 = vsel %vm4394_vm2, %v4434_v52, %v554_v22  ;;  %v674_v52 = vrot.slane %v545_v57, 1 }
  0x2b   : > { %3857 = vmatprep.subr.bf16.mxu1 %v4059_v33  ;;  %3905 = vmatprep.subr.bf16.mxu0 %v4060_v40  ;;  %v4588_v18 = vsel %vm4394_vm2, %v4440_v55, %v638_v46  ;;  %v4603_v55 = vld [vmem:[%s4316_s22 + $0x28] sm:$0xf] }
  0x2c   : > { %v559_v61 = vshll.u32 %v4529_v30, 16  ;;  %v675_v15 = vor.u32 %v674_v52, %v542_v49  ;;  %v4630_v23 = vcombine.low %v4603_v55, %v4609_v5  ;;  %v4083_v49 = vld [vmem:[%s6295_s1 + $0x130] sm:$0xff]  }
  0x2d   : > { %1005 = vmatmul.mubr.bf16.vlgmr.msra.gmra.mxu0 %v4411_v43  ;;  %1101 = vmatmul.mubr.bf16.vlgmr.msra.gmra.mxu1 %v4415_v44 }
  0x2e   : > { %3858 = vmatpush3.bf16.msra.mxu1 %v4059_v33  ;;  %3906 = vmatpush3.bf16.msra.mxu0 %v4060_v40  ;;  %v4069_v33 = vld [vmem:[%s6295_s1 + $0x90] sm:$0xff]   ;;  %v699_v40 = vor.u32 %v698_v32, %v626_v51  ;;  %v678_v32 = vrot.slane %v559_v61, 1 }
  0x2f   : > { %3859 = vmatprep.subr.bf16.mxu1 %v4061_v47  ;;  %1012 = vmatprep.mubr.bf16.mxu0 %v4329_v13 }
  0x30   : > { %1108 = vmatprep.mubr.bf16.mxu1 %v4365_v28  ;;  %3907 = vmatprep.subr.bf16.mxu0 %v4065_v48  ;;  %v4570_v51 = vsel %vm4477_vm5, %v699_v40, %v3271_v35  ;;  %v4651_v35 = vld [vmem:[%s4316_s22 + $0x34] sm:$0xf]  ;;  %v570_v40 = vshrl.u32 %v4630_v23, 16 }
  0x32   : > { %3860 = vmatpush3.bf16.msra.mxu1 %v4061_v47  ;;  %3908 = vmatpush3.bf16.msra.mxu0 %v4065_v48  ;;  %v556_v47 = vshrl.u32 %v4529_v30, 16  ;;  %v4562_v48 = vld [vmem:[%s4316_s22 + $0x24] sm:$0xf] }
  0x33   : > { %3861 = vmatprep.subr.bf16.mxu1 %v4063_v50  ;;  %3909 = vmatprep.subr.bf16.mxu0 %v4073_v58  ;;  %v4578_v59 = vcombine.low %v4553_v38, %v4562_v48 }
  0x35   : > { %1013 = vmatmul.mubr.bf16.gmra.mxu0 %v4411_v43  ;;  %1109 = vmatmul.mubr.bf16.gmra.mxu1 %v4465_v0  ;;  %v563_v3 = vshrl.u32 %v4578_v59, 16  ;;  %v566_v29 = vshll.u32 %v4578_v59, 16 }
  0x36   : > { %3862 = vmatpush3.bf16.msra.mxu1 %v4063_v50  ;;  %1020 = vmatprep.mubr.bf16.mxu0 %v4403_v41  ;;  %v4096_v50 = vld [vmem:[%s6295_s1 + $0x150] sm:$0xff]  }
  0x37   : > { %3863 = vmatprep.subr.bf16.mxu1 %v4064_v1  ;;  %1116 = vmatprep.mubr.bf16.mxu1 %v4407_v42  ;;  %v680_v52 = vrot.slane %v566_v29, 1 }
  0x38   : > { %3910 = vmatpush3.bf16.msra.mxu0 %v4073_v58  ;;  %v3258_v58 = vcombine.low %v4326_v12, %v4326_v12  ;;  %v558_v12 = vrot.slane %v556_v47, 7 }
  0x39   : > { %3911 = vmatprep.subr.bf16.mxu0 %v4079_v9 }
  0x3a   : > { %3864 = vmatpush3.bf16.msra.mxu1 %v4064_v1  ;;  %v4600_v1 = vsel %vm4477_vm5, %v673_v54, %v3258_v58  ;;  %v561_v57 = vor.u32 %v559_v61, %v558_v12  ;;  %v3260_v54 = vcombine.low %v4437_v53, %v4437_v53  ;;  %v4120_v58 = vld [vmem:[%s6295_s1 + $0x1f8] sm:$0xff]   ;;  %v679_v12 = vor.u32 %v678_v32, %v556_v47 }
  0x3b   : > { %3865 = vmatprep.subr.bf16.mxu1 %v4068_v17  ;;  %v3261_v61 = vcombine.low %v4507_v20, %v4507_v20  ;;  %v573_v53 = vshll.u32 %v4630_v23, 16  ;;  %v681_v32 = vor.u32 %v680_v52, %v563_v3  ;;  %v4107_v52 = vld [vmem:[%s6295_s1 + $0x110] sm:$0xff]  }
  0x3c   : > { %3912 = vmatpush3.bf16.msra.mxu0 %v4079_v9  ;;  %v3259_v9 = vcombine.low %v4381_v34, %v4381_v34  ;;  %v565_v34 = vrot.slane %v563_v3, 7  ;;  %v4645_v56 = vsel %vm4394_vm2, %v4504_v19, %v561_v57  ;;  %v4114_v19 = vld [vmem:[%s6295_s1 + $0x140] sm:$0xff]   ;;  %v4089_v57 = vld [vmem:[%s6295_s1 + $0xe8] sm:$0xff]  }
  0x3d   : > { %1021 = vmatmul.mubr.bf16.gmra.mxu0 %v4515_v24  ;;  %1117 = vmatmul.mubr.bf16.gmra.mxu1 %v4520_v25 }
  0x3e   : > { %3866 = vmatpush3.bf16.msra.mxu1 %v4068_v17  ;;  %1028 = vmatprep.mubr.bf16.mxu0 %v4458_v62  ;;  %v676_v17 = vrot.slane %v552_v21, 1  ;;  %v700_v21 = vrot.slane %v636_v27, 1  ;;  %v4084_v27 = vld [vmem:[%s6295_s1 + $0xf0] sm:$0xff]   ;;  %v568_v46 = vor.u32 %v566_v29, %v565_v34  ;;  %v4095_v34 = vld [vmem:[%s6295_s1 + $0xe0] sm:$0xff]  }
  0x3f   : > { %3867 = vmatprep.subr.bf16.mxu1 %v4069_v33  ;;  %1124 = vmatprep.mubr.bf16.mxu1 %v4472_v2  ;;  %v4733_v29 = vld [vmem:[%s4316_s22 + $0x44] sm:$0xf] }
  0x40   : > { %3913 = vmatprep.subr.bf16.mxu0 %v4090_v37  ;;  %v701_v36 = vor.u32 %v700_v21, %v633_v10  ;;  %v4088_v10 = vld [vmem:[%s6295_s1 + $0x128] sm:$0xff]   ;;  %v4705_v20 = vsel %vm4394_vm2, %v4553_v38, %v568_v46  ;;  %v3262_v21 = vcombine.low %v4562_v48, %v4562_v48 }
  0x41   : > { %3914 = vmatpush3.bf16.msra.mxu0 %v4090_v37  ;;  %v4657_v37 = vsel %vm4477_vm5, %v675_v15, %v3259_v9  ;;  %v4094_v9 = vld [vmem:[%s6295_s1 + $0x120] sm:$0xff]   ;;  %v4720_v15 = vsel %vm4477_vm5, %v679_v12, %v3261_v61  ;;  %v4748_v46 = vld [vmem:[%s4316_s22 + $0x48] sm:$0xf] }
  0x42   : > { %3868 = vmatpush3.bf16.msra.mxu1 %v4069_v33  ;;  %3915 = vmatprep.subr.bf16.mxu0 %v4096_v50  ;;  %v4648_v33 = vld [vmem:[%s4316_s22 + $0x30] sm:$0xf]  ;;  %v4676_v22 = vsel %vm4477_vm5, %v701_v36, %v3272_v26  ;;  %v4725_v26 = vld [vmem:[%s4316_s22 + $0x40] sm:$0xf] }
  0x43   : > { %3869 = vmatprep.subr.bf16.mxu1 %v4072_v45  ;;  %v4755_v48 = vcombine.low %v4725_v26, %v4733_v29 }
  0x45   : > { %1029 = vmatmul.mubr.bf16.gmra.mxu0 %v4583_v60  ;;  %1125 = vmatmul.mubr.bf16.gmra.mxu1 %v4588_v18 }
  0x46   : > { %3870 = vmatpush3.bf16.msra.mxu1 %v4072_v45  ;;  %1036 = vmatprep.mubr.bf16.mxu0 %v4529_v30  ;;  %v4672_v45 = vld [vmem:[%s4316_s22 + $0x38] sm:$0xf] }
  0x47   : > { %3871 = vmatprep.subr.bf16.mxu1 %v4074_v63  ;;  %3873 = vmatprep.mubr.bf16.mxu1 %v4600_v1 }
  0x48   : > { %3916 = vmatpush3.bf16.msra.mxu0 %v4096_v50  ;;  %v677_v50 = vor.u32 %v676_v17, %v549_v8  ;;  %v4696_v8 = vld [vmem:[%s4316_s22 + $0x3c] sm:$0xf] }
  0x49   : > { %3917 = vmatprep.subr.bf16.mxu0 %v4109_v6 }
  0x4a   : > { %3872 = vmatpush3.bf16.msra.mxu1 %v4074_v63  ;;  %v4693_v63 = vcombine.low %v4648_v33, %v4651_v35  ;;  %v4709_v47 = vsel %vm4477_vm5, %v677_v50, %v3260_v54  ;;  %v4751_v50 = vld [vmem:[%s4316_s22 + $0x4c] sm:$0xf] }
  0x4b   : > { %3585 = vmatprep.subr.bf16.mxu1 %v4077_v7  ;;  %v682_v7 = vrot.slane %v573_v53, 1 }
  0x4c   : > { %3918 = vmatpush3.bf16.msra.mxu0 %v4109_v6  ;;  %v572_v6 = vrot.slane %v570_v40, 7  ;;  %v577_v38 = vshrl.u32 %v4693_v63, 16  ;;  %v580_v17 = vshll.u32 %v4693_v63, 16 }
  0x4d   : > { %1037 = vmatmul.mubr.bf16.gmra.mxu0 %v4645_v56  ;;  %3874 = vmatmul.mubr.bf16.vlgmr.msra.gmra.mxu1 %v4600_v1 }
  0x4e   : > { %3586 = vmatpush3.bf16.msra.mxu1 %v4078_v14  ;;  %1044 = vmatprep.mubr.bf16.mxu0 %v4578_v59  ;;  %v4716_v14 = vcombine.low %v4672_v45, %v4696_v8  ;;  %v579_v3 = vrot.slane %v577_v38, 7 }
  0x4f   : > { %3877 = vmatprep.mubr.bf16.mxu1 %v4657_v37  ;;  %3587 = vmatprep.subr.bf16.mxu1 %v4083_v49  ;;  %v575_v49 = vor.u32 %v573_v53, %v572_v6  ;;  %v4102_v53 = vld [vmem:[%s6295_s1 + $0xd8] sm:$0xff]  }
  0x50   : > { %3919 = vmatprep.subr.bf16.mxu0 %v4114_v19  ;;  %v587_v36 = vshll.u32 %v4716_v14, 16  ;;  %v582_v6 = vor.u32 %v580_v17, %v579_v3 }
  0x51   : > { %3920 = vmatpush3.bf16.msra.mxu0 %v4114_v19  ;;  %v683_v19 = vor.u32 %v682_v7, %v570_v40  ;;  %v4760_v54 = vsel %vm4394_vm2, %v4603_v55, %v575_v49  ;;  %v4764_v40 = vsel %vm4477_vm5, %v681_v32, %v3262_v21  ;;  %v4776_v55 = vcombine.low %v4748_v46, %v4751_v50  ;;  %v4785_v7 = vld [vmem:[%s4316_s22 + $0x50] sm:$0xf]  ;;  %v416_v49 = vld [vmem:[%s4316_s22 + $0x54] sm:$0xf] }
  0x52   : > { %3588 = vmatpush3.bf16.msra.mxu1 %v4084_v27  ;;  %3721 = vmatprep.subr.bf16.mxu0 %v4120_v58  ;;  %v4101_v27 = vld [vmem:[%s6295_s1 + $0x118] sm:$0xff]   ;;  %v584_v58 = vshrl.u32 %v4716_v14, 16  ;;  %v686_v61 = vrot.slane %v587_v36, 1  ;;  %v3265_v21 = vcombine.low %v4696_v8, %v4696_v8  ;;  %v591_v8 = vshrl.u32 %v4755_v48, 16 }
  0x53   : > { %3589 = vmatprep.subr.bf16.mxu1 %v4088_v10  ;;  %v3263_v10 = vcombine.low %v4609_v5, %v4609_v5  ;;  %v684_v5 = vrot.slane %v580_v17, 1  ;;  %v601_v17 = vshll.u32 %v4776_v55, 16 }
  0x54   : > { %v687_v32 = vor.u32 %v686_v61, %v584_v58  ;;  %v4813_v61 = vcombine.low %v4785_v7, %v416_v49 }
  0x55   : > { %1045 = vmatmul.mubr.bf16.gmra.mxu0 %v4705_v20  ;;  %3878 = vmatmul.mubr.bf16.gmra.mxu1 %v4709_v47  ;;  %v4769_v12 = vsel %vm4477_vm5, %v683_v19, %v3263_v10  ;;  %v586_v19 = vrot.slane %v584_v58, 7  ;;  %v4117_v58 = vld [vmem:[%s6295_s1 + $0x100] sm:$0xff]  }
  0x56   : > { %1052 = vmatprep.mubr.bf16.mxu0 %v4630_v23  ;;  %3881 = vmatprep.mubr.bf16.mxu1 %v4720_v15 }
  0x57   : > { %3590 = vmatpush3.bf16.msra.mxu1 %v4089_v57  ;;  %v594_v57 = vshll.u32 %v4755_v48, 16 }
  0x58   : > { %3591 = vmatprep.subr.bf16.mxu1 %v4094_v9  ;;  %v685_v9 = vor.u32 %v684_v5, %v577_v38  ;;  %v4112_v38 = vld [vmem:[%s6295_s1 + $0x108] sm:$0xff]   ;;  %v598_v5 = vshrl.u32 %v4776_v55, 16 }
  0x59   : > { %v688_v3 = vrot.slane %v594_v57, 1 }
  0x5b   : > { %3592 = vmatpush3.bf16.msra.mxu1 %v4095_v34  ;;  %v3264_v34 = vcombine.low %v4651_v35, %v4651_v35  ;;  %v4804_v35 = vsel %vm4394_vm2, %v4648_v33, %v582_v6  ;;  %v4113_v33 = vld [vmem:[%s6295_s1 + $0xc8] sm:$0xff]   ;;  %v589_v6 = vor.u32 %v587_v36, %v586_v19  ;;  %v4119_v36 = vld [vmem:[%s6295_s1 + $0x238] sm:$0xff]   ;;  %v593_v19 = vrot.slane %v591_v8, 7 }
  0x5c   : > { %3593 = vmatprep.subr.bf16.mxu1 %v4101_v27  ;;  %v4108_v27 = vld [vmem:[%s6295_s1 + $0xd0] sm:$0xff]  }
  0x5d   : > { %1053 = vmatmul.mubr.bf16.gmra.mxu0 %v4760_v54  ;;  %3882 = vmatmul.mubr.bf16.gmra.mxu1 %v4764_v40  ;;  %v4809_v10 = vsel %vm4477_vm5, %v685_v9, %v3264_v34  ;;  %v689_v9 = vor.u32 %v688_v3, %v591_v8  ;;  %v3266_v34 = vcombine.low %v4733_v29, %v4733_v29 }
  0x5e   : > { %1060 = vmatprep.mubr.bf16.mxu0 %v4693_v63  ;;  %3885 = vmatprep.mubr.bf16.mxu1 %v4769_v12  ;;  %v4843_v29 = vsel %vm4394_vm2, %v4672_v45, %v589_v6  ;;  %v596_v45 = vor.u32 %v594_v57, %v593_v19 }
  0x5f   : > { %3594 = vmatpush3.bf16.msra.mxu1 %v4102_v53  ;;  %v4817_v53 = vsel %vm4477_vm5, %v687_v32, %v3265_v21  ;;  %v608_v32 = vshll.u32 %v4813_v61, 16  ;;  %v4847_v3 = vsel %vm4477_vm5, %v689_v9, %v3266_v34  ;;  %v600_v34 = vrot.slane %v598_v5, 7 }
  0x60   : > { %3595 = vmatprep.subr.bf16.mxu1 %v4107_v52  ;;  %v690_v52 = vrot.slane %v601_v17, 1  ;;  %v4861_v6 = vsel %vm4394_vm2, %v4725_v26, %v596_v45 }
  0x61   : > { %v603_v57 = vor.u32 %v601_v17, %v600_v34  ;;  %v4128_v34 = vld [vmem:[%s6295_s1 + $0x1a0] sm:$0xff]  }
  0x62   : > { %v691_v21 = vor.u32 %v690_v52, %v598_v5  ;;  %v692_v52 = vrot.slane %v608_v32, 1 }
  0x63   : > { %3596 = vmatpush3.bf16.msra.mxu1 %v4108_v27  ;;  %v3267_v27 = vcombine.low %v4751_v50, %v4751_v50  ;;  %v605_v50 = vshrl.u32 %v4813_v61, 16  ;;  %v4878_v26 = vsel %vm4394_vm2, %v4748_v46, %v603_v57  ;;  %v4130_v57 = vld [vmem:[%s6295_s1 + $0x1d8] sm:$0xff]  }
  0x64   : > { %3597 = vmatprep.subr.bf16.mxu1 %v4112_v38  ;;  %v4118_v38 = vld [vmem:[%s6295_s1 + $0xc0] sm:$0xff]  }
  0x65   : > { %1061 = vmatmul.mubr.bf16.gmra.mxu0 %v4804_v35  ;;  %3886 = vmatmul.mubr.bf16.gmra.mxu1 %v4809_v10  ;;  %v693_v8 = vor.u32 %v692_v52, %v605_v50 }
  0x66   : > { %1068 = vmatprep.mubr.bf16.mxu0 %v4716_v14  ;;  %3889 = vmatprep.mubr.bf16.mxu1 %v4817_v53 }
  0x67   : > { %3598 = vmatpush3.bf16.msra.mxu1 %v4113_v33  ;;  %v4852_v33 = vsel %vm4477_vm5, %v691_v21, %v3267_v27  ;;  %v4873_v21 = vld [vmem:[%s4316_s22 + $0x7c] sm:$0xf]  ;;  %v607_v27 = vrot.slane %v605_v50, 7 }
  0x68   : > { %3599 = vmatprep.subr.bf16.mxu1 %v4117_v58  ;;  %v3268_v58 = vcombine.low %v416_v49, %v416_v49  ;;  %v425_v49 = vld [vmem:[%s4316_s22 + $0x78] sm:$0xf] }
  0x69   : > { %v4881_v5 = vcombine.low %v425_v49, %v4873_v21  ;;  %v610_v17 = vor.u32 %v608_v32, %v607_v27  ;;  %v4122_v32 = vld [vmem:[%s6295_s1 + $0x1f0] sm:$0xff]   ;;  %v4131_v27 = vld [vmem:[%s6295_s1 + $0x198] sm:$0xff]  }
  0x6a   : > { %v4865_v9 = vsel %vm4477_vm5, %v693_v8, %v3268_v58  ;;  %v4127_v8 = vld [vmem:[%s6295_s1 + $0x1e0] sm:$0xff]  }
  0x6b   : > { %3600 = vmatpush3.bf16.msra.mxu1 %v4118_v38  ;;  %v1332_v38 = vshrl.u32 %v4881_v5, 16  ;;  %v1335_v19 = vshll.u32 %v4881_v5, 16  ;;  %v4894_v50 = vsel %vm4394_vm2, %v4785_v7, %v610_v17  ;;  %v4121_v7 = vld [vmem:[%s6295_s1 + $0x1b8] sm:$0xff]   ;;  %v4134_v58 = vld [vmem:[%s6295_s1 + $0x220] sm:$0xff]   ;;  %v4132_v17 = vld [vmem:[%s6295_s1 + $0x1d0] sm:$0xff]  }
  0x6c   : > { %3953 = vmatprep.subr.bf16.mxu1 %v4119_v36 }
  0x6d   : > { %1069 = vmatmul.mubr.bf16.gmra.mxu0 %v4843_v29  ;;  %3890 = vmatmul.mubr.bf16.gmra.mxu1 %v4847_v3  ;;  %v1334_v46 = vrot.slane %v1332_v38, 7 }
  0x6e   : > { %1076 = vmatprep.mubr.bf16.mxu0 %v4755_v48  ;;  %3893 = vmatprep.mubr.bf16.mxu1 %v4852_v33 }
  0x6f   : > { %v1337_v52 = vor.u32 %v1335_v19, %v1334_v46  ;;  %v4142_v46 = vld [vmem:[%s6295_s1 + $0x210] sm:$0xff]  }
  0x71   : > { %v4900_v45 = vsel %vm4394_vm2, %v425_v49, %v1337_v52  ;;  %v4141_v49 = vld [vmem:[%s6295_s1 + $0x218] sm:$0xff]   ;;  %v4133_v52 = vld [vmem:[%s6295_s1 + $0x190] sm:$0xff]  }
  0x75   : > { %1077 = vmatmul.mubr.bf16.gmra.mxu0 %v4861_v6  ;;  %3894 = vmatmul.mubr.bf16.gmra.mxu1 %v4865_v9 }
  0x76   : > { %1084 = vmatprep.mubr.bf16.mxu0 %v4776_v55  ;;  %3897 = vmatprep.mubr.bf16.mxu1 %v4495_v11 }
  0x7d   : > { %1085 = vmatmul.mubr.bf16.gmra.mxu0 %v4878_v26  ;;  %3898 = vmatmul.mubr.bf16.gmra.mxu1 %v4533_v31 }
  0x7e   : > { %1092 = vmatprep.mubr.bf16.mxu0 %v4813_v61  ;;  %3901 = vmatprep.mubr.bf16.mxu1 %v4570_v51 }
  0x85   : > { %1093 = vmatmul.mubr.bf16.gmra.mxu0 %v4894_v50  ;;  %3902 = vmatmul.mubr.bf16.gmra.mxu1 %v4676_v22 }
  0x86   : > { %1572 = vmatprep.mubr.bf16.mxu1 %v4329_v13  ;;  %3921 = vmatprep.mubr.bf16.mxu0 %v4600_v1  ;;  %v4123_v13 = vld [vmem:[%s6295_s1 + $0x1b0] sm:$0xff]   ;;  %v4125_v1 = vld [vmem:[%s6295_s1 + $0x1e8] sm:$0xff]  }
  0x8d   : > { %1573 = vmatmul.mubr.bf16.vlgmr.msra.gmra.mxu1 %v4411_v43  ;;  %3922 = vmatmul.mubr.bf16.vlgmr.msra.gmra.mxu0 %v4657_v37  ;;  %v4129_v43 = vld [vmem:[%s6295_s1 + $0x228] sm:$0xff]  }
  0x8e   : > { %3954 = vmatpush3.bf16.msra.mxu1 %v4119_v36  ;;  %3722 = vmatpush3.bf16.msra.mxu0 %v4121_v7  ;;  %v4126_v36 = vld [vmem:[%s6295_s1 + $0x1a8] sm:$0xff]  }
  0x8f   : > { %1580 = vmatprep.mubr.bf16.mxu1 %v4403_v41  ;;  %3925 = vmatprep.mubr.bf16.mxu0 %v4709_v47  ;;  %v4135_v7 = vld [vmem:[%s6295_s1 + $0x1c8] sm:$0xff]  }
  0x90   : > { %3723 = vmatprep.subr.bf16.mxu0 %v4122_v32  ;;  %3955 = vmatprep.subr.bf16.mxu1 %v4124_v39  ;;  %v4143_v32 = vld [vmem:[%s6295_s1 + $0x208] sm:$0xff]  }
  0x92   : > { %3724 = vmatpush3.bf16.msra.mxu0 %v4123_v13  ;;  %3956 = vmatpush3.bf16.msra.mxu1 %v4124_v39  ;;  %v4136_v39 = vld [vmem:[%s6295_s1 + $0x188] sm:$0xff]   ;;  %v4139_v13 = vld [vmem:[%s6295_s1 + $0x1c0] sm:$0xff]  }
  0x93   : > { %3725 = vmatprep.subr.bf16.mxu0 %v4125_v1  ;;  %3957 = vmatprep.subr.bf16.mxu1 %v4129_v43  ;;  %v4144_v1 = vld [vmem:[%s6295_s1 + $0x200] sm:$0xff]  }
  0x95   : > { %1581 = vmatmul.mubr.bf16.gmra.mxu1 %v4515_v24  ;;  %3926 = vmatmul.mubr.bf16.gmra.mxu0 %v4720_v15 }
  0x96   : > { %1588 = vmatprep.mubr.bf16.mxu1 %v4458_v62  ;;  %3929 = vmatprep.mubr.bf16.mxu0 %v4764_v40 }
  0x97   : > { %3726 = vmatpush3.bf16.msra.mxu0 %v4126_v36  ;;  %3958 = vmatpush3.bf16.msra.mxu1 %v4129_v43  ;;  %v4140_v43 = vld [vmem:[%s6295_s1 + $0x180] sm:$0xff]   ;;  %v1340_v36 = vrot.slane %v1335_v19, 1 }
  0x98   : > { %3727 = vmatprep.subr.bf16.mxu0 %v4127_v8  ;;  %3959 = vmatprep.subr.bf16.mxu1 %v4134_v58 }
  0x99   : > { %v1341_v8 = vor.u32 %v1340_v36, %v1332_v38 }
  0x9b   : > { %3728 = vmatpush3.bf16.msra.mxu0 %v4128_v34  ;;  %3960 = vmatpush3.bf16.msra.mxu1 %v4134_v58  ;;  %v3298_v58 = vcombine.low %v4873_v21, %v4873_v21 }
  0x9c   : > { %3729 = vmatprep.subr.bf16.mxu0 %v4130_v57  ;;  %3961 = vmatprep.subr.bf16.mxu1 %v4141_v49 }
  0x9d   : > { %1589 = vmatmul.mubr.bf16.gmra.mxu1 %v4583_v60  ;;  %3930 = vmatmul.mubr.bf16.gmra.mxu0 %v4769_v12  ;;  %v5008_v34 = vsel %vm4477_vm5, %v1341_v8, %v3298_v58 }
  0x9e   : > { %1596 = vmatprep.mubr.bf16.mxu1 %v4529_v30  ;;  %3933 = vmatprep.mubr.bf16.mxu0 %v4809_v10 }
  0x9f   : > { %3730 = vmatpush3.bf16.msra.mxu0 %v4131_v27  ;;  %3962 = vmatpush3.bf16.msra.mxu1 %v4141_v49 }
  0xa0   : > { %3731 = vmatprep.subr.bf16.mxu0 %v4132_v17  ;;  %3963 = vmatprep.subr.bf16.mxu1 %v4142_v46 }
  0xa3   : > { %3732 = vmatpush3.bf16.msra.mxu0 %v4133_v52  ;;  %3964 = vmatpush3.bf16.msra.mxu1 %v4142_v46 }
  0xa4   : > { %3733 = vmatprep.subr.bf16.mxu0 %v4135_v7  ;;  %3965 = vmatprep.subr.bf16.mxu1 %v4143_v32 }
  0xa5   : > { %1597 = vmatmul.mubr.bf16.gmra.mxu1 %v4645_v56  ;;  %3934 = vmatmul.mubr.bf16.gmra.mxu0 %v4817_v53 }
  0xa6   : > { %1604 = vmatprep.mubr.bf16.mxu1 %v4578_v59  ;;  %3937 = vmatprep.mubr.bf16.mxu0 %v4847_v3 }
  0xa7   : > { %3734 = vmatpush3.bf16.msra.mxu0 %v4136_v39  ;;  %3966 = vmatpush3.bf16.msra.mxu1 %v4143_v32 }
  0xa8   : > { %3735 = vmatprep.subr.bf16.mxu0 %v4139_v13  ;;  %3967 = vmatprep.subr.bf16.mxu1 %v4144_v1 }
  0xab   : > { %3736 = vmatpush3.bf16.msra.mxu0 %v4140_v43  ;;  %3968 = vmatpush3.bf16.msra.mxu1 %v4144_v1 }
  0xad   : > { %1605 = vmatmul.mubr.bf16.gmra.mxu1 %v4705_v20  ;;  %3938 = vmatmul.mubr.bf16.gmra.mxu0 %v4852_v33 }
  0xae   : > { %1612 = vmatprep.mubr.bf16.mxu1 %v4630_v23  ;;  %3941 = vmatprep.mubr.bf16.mxu0 %v4865_v9 }
  0xb5   : > { %1613 = vmatmul.mubr.bf16.gmra.mxu1 %v4760_v54  ;;  %3942 = vmatmul.mubr.bf16.gmra.mxu0 %v4495_v11 }
  0xb6   : > { %1620 = vmatprep.mubr.bf16.mxu1 %v4693_v63  ;;  %3945 = vmatprep.mubr.bf16.mxu0 %v4533_v31 }
  0xbd   : > { %1621 = vmatmul.mubr.bf16.gmra.mxu1 %v4804_v35  ;;  %3946 = vmatmul.mubr.bf16.gmra.mxu0 %v4570_v51 }
  0xbe   : > { %1628 = vmatprep.mubr.bf16.mxu1 %v4716_v14  ;;  %3949 = vmatprep.mubr.bf16.mxu0 %v4676_v22 }
  0xc5   : > { %1629 = vmatmul.mubr.bf16.gmra.mxu1 %v4843_v29  ;;  %3950 = vmatmul.mubr.bf16.gmra.mxu0 %v5008_v34 }
  0xc6   : > { %1636 = vmatprep.mubr.bf16.mxu1 %v4755_v48  ;;  %2119 = vmatprep.mubr.bf16.mxu0 %v4403_v41 }
  0xcd   : > { %1637 = vmatmul.mubr.bf16.gmra.mxu1 %v4861_v6  ;;  %2120 = vmatmul.mubr.bf16.vlgmr.msra.gmra.mxu0 %v4515_v24 }
  0xce   : > { %1644 = vmatprep.mubr.bf16.mxu1 %v4776_v55  ;;  %2127 = vmatprep.mubr.bf16.mxu0 %v4458_v62 }
  0xd5   : > { %1645 = vmatmul.mubr.bf16.gmra.mxu1 %v4878_v26  ;;  %2128 = vmatmul.mubr.bf16.gmra.mxu0 %v4583_v60 }
  0xd6   : > { %1652 = vmatprep.mubr.bf16.mxu1 %v4813_v61  ;;  %2135 = vmatprep.mubr.bf16.mxu0 %v4529_v30 }
  0xdd   : > { %1653 = vmatmul.mubr.bf16.gmra.mxu1 %v4894_v50  ;;  %2136 = vmatmul.mubr.bf16.gmra.mxu0 %v4645_v56 }
  0xde   : > { %1660 = vmatprep.mubr.bf16.mxu1 %v4336_v16  ;;  %2143 = vmatprep.mubr.bf16.mxu0 %v4578_v59 }
  0xe5   : > { %1661 = vmatmul.mubr.bf16.gmra.mxu1 %v4415_v44  ;;  %2144 = vmatmul.mubr.bf16.gmra.mxu0 %v4705_v20 }
  0xe6   : > { %1668 = vmatprep.mubr.bf16.mxu1 %v4365_v28  ;;  %2151 = vmatprep.mubr.bf16.mxu0 %v4630_v23 }
  0xed   : > { %v3465_v41 = vpop.f32.mrf.mxu0  ;;  %v3537_v62 = vpop.f32.mrf.mxu1  ;;  %1669 = vmatmul.mubr.bf16.gmra.mxu1 %v4465_v0  ;;  %2152 = vmatmul.mubr.bf16.gmra.mxu0 %v4760_v54 }
  0xee   : > { %1676 = vmatprep.mubr.bf16.mxu1 %v4407_v42  ;;  %2159 = vmatprep.mubr.bf16.mxu0 %v4693_v63 }
  0xef   : > { %v3466_v4 = vpop.f32.mrf.mxu0  ;;  %v3538_v24 = vpop.f32.mrf.mxu1 }
  0xf0   : > { %v5034_v30 = vadd.f32 %v3466_v4, %v3465_v41  ;;  %v5036_v59 = vadd.f32 %v3538_v24, %v3537_v62 }
  0xf1   : > { %v3468_v60 = vpop.f32.mrf.mxu0  ;;  %v3540_v56 = vpop.f32.mrf.mxu1 }
  0xf3   : > { %v3469_v20 = vpop.f32.mrf.mxu0  ;;  %v3541_v23 = vpop.f32.mrf.mxu1 }
  0xf4   : > { %v5038_v21 = vadd.f32 %v3469_v20, %v3468_v60  ;;  %v5040_v38 = vadd.f32 %v3541_v23, %v3540_v56 }
  0xf5   : > { %v3471_v19 = vpop.f32.mrf.mxu0  ;;  %v3543_v54 = vpop.f32.mrf.mxu1  ;;  %1677 = vmatmul.mubr.bf16.gmra.mxu1 %v4520_v25  ;;  %2160 = vmatmul.mubr.bf16.gmra.mxu0 %v4804_v35 }
  0xf6   : > { %1684 = vmatprep.mubr.bf16.mxu1 %v4472_v2  ;;  %2167 = vmatprep.mubr.bf16.mxu0 %v4716_v14 }
  0xf7   : > { %v3472_v63 = vpop.f32.mrf.mxu0  ;;  %v3544_v57 = vpop.f32.mrf.mxu1 }
  0xf8   : > { %v3473_v49 = vadd.f32 %v3472_v63, %v3471_v19  ;;  %v5046_v27 = vadd.f32 %v3544_v57, %v3543_v54 }
  0xf9   : > { %v3474_v17 = vpop.f32.mrf.mxu0  ;;  %v3546_v46 = vpop.f32.mrf.mxu1 }
  0xfb   : > { %v3475_v52 = vpop.f32.mrf.mxu0  ;;  %v3547_v7 = vpop.f32.mrf.mxu1 }
  0xfc   : > { %v3476_v32 = vadd.f32 %v3475_v52, %v3474_v17  ;;  %v5048_v39 = vadd.f32 %v3547_v7, %v3546_v46 }
  0xfd   : > { %v3477_v13 = vpop.f32.mrf.mxu0  ;;  %v3549_v1 = vpop.f32.mrf.mxu1  ;;  %1685 = vmatmul.mubr.bf16.gmra.mxu1 %v4588_v18  ;;  %2168 = vmatmul.mubr.bf16.gmra.mxu0 %v4843_v29 }
  0xfe   : > { %1692 = vmatprep.mubr.bf16.mxu1 %v4881_v5  ;;  %2175 = vmatprep.mubr.bf16.mxu0 %v4755_v48 }
  0xff   : > { %v3478_v14 = vpop.f32.mrf.mxu0  ;;  %v3550_v35 = vpop.f32.mrf.mxu1 }
 0x100   : > { %v3479_v43 = vadd.f32 %v3478_v14, %v3477_v13  ;;  %v5054_v36 = vadd.f32 %v3550_v35, %v3549_v1 }
 0x101   : > { %v3480_v8 = vpop.f32.mrf.mxu0  ;;  %v3552_v58 = vpop.f32.mrf.mxu1 }
 0x103   : > { %v3481_v41 = vpop.f32.mrf.mxu0  ;;  %v3553_v62 = vpop.f32.mrf.mxu1 }
 0x104   : > { %v3482_v4 = vadd.f32 %v3481_v41, %v3480_v8  ;;  %v5056_v24 = vadd.f32 %v3553_v62, %v3552_v58 }
 0x105   : > { %v3483_v60 = vpop.f32.mrf.mxu0  ;;  %v3555_v56 = vpop.f32.mrf.mxu1  ;;  %1693 = vmatmul.mubr.bf16.gmra.mxu1 %v4900_v45  ;;  %2176 = vmatmul.mubr.bf16.gmra.mxu0 %v4861_v6 }
 0x106   : > { %2183 = vmatprep.mubr.bf16.mxu0 %v4776_v55  ;;  %3969 = vmatprep.mubr.bf16.mxu1 %v4657_v37 }
 0x107   : > { %v3484_v48 = vpop.f32.mrf.mxu0  ;;  %v3556_v29 = vpop.f32.mrf.mxu1 }
 0x108   : > { %v3485_v20 = vadd.f32 %v3484_v48, %v3483_v60  ;;  %v5062_v23 = vadd.f32 %v3556_v29, %v3555_v56 }
 0x109   : > { %v3486_v19 = vpop.f32.mrf.mxu0  ;;  %v3558_v54 = vpop.f32.mrf.mxu1 }
 0x10b   : > { %v3487_v63 = vpop.f32.mrf.mxu0  ;;  %v3559_v57 = vpop.f32.mrf.mxu1 }
 0x10c   : > { %v3488_v17 = vadd.f32 %v3487_v63, %v3486_v19  ;;  %v5064_v46 = vadd.f32 %v3559_v57, %v3558_v54 }
 0x10d   : > { %v3489_v52 = vpop.f32.mrf.mxu0  ;;  %v3875_v7 = vpop.f32.mrf.mxu1  ;;  %2184 = vmatmul.mubr.bf16.gmra.mxu0 %v4878_v26  ;;  %3970 = vmatmul.mubr.bf16.vlgmr.msra.gmra.mxu1 %v4709_v47 }
 0x10e   : > { %v5068_v55 = vadd.f32 %v3875_v7, %v3473_v49  ;;  %2191 = vmatprep.mubr.bf16.mxu0 %v4813_v61  ;;  %3973 = vmatprep.mubr.bf16.mxu1 %v4720_v15 }
 0x10f   : > { %v3490_v37 = vpop.f32.mrf.mxu0  ;;  %v1167_v6 = vpop.f32.mrf.mxu1 }
 0x110   : > { %v3491_v13 = vadd.f32 %v3490_v37, %v3489_v52  ;;  %v5073_v1 = vadd.f32 %v5034_v30, %v1167_v6 }
 0x111   : > { %v3492_v14 = vpop.f32.mrf.mxu0  ;;  %v3876_v35 = vpop.f32.mrf.mxu1 }
 0x112   : > { %v5075_v8 = vadd.f32 %v3876_v35, %v3476_v32 }
 0x113   : > { %v3493_v58 = vpop.f32.mrf.mxu0  ;;  %v1170_v26 = vpop.f32.mrf.mxu1 }
 0x114   : > { %v3494_v41 = vadd.f32 %v3493_v58, %v3492_v14  ;;  %v5078_v47 = vadd.f32 %v5038_v21, %v1170_v26 }
 0x115   : > { %v3495_v49 = vpop.f32.mrf.mxu0  ;;  %v3879_v61 = vpop.f32.mrf.mxu1  ;;  %2192 = vmatmul.mubr.bf16.gmra.mxu0 %v4894_v50  ;;  %3974 = vmatmul.mubr.bf16.gmra.mxu1 %v4764_v40 }
 0x116   : > { %v5082_v15 = vadd.f32 %v3879_v61, %v3485_v20  ;;  %2199 = vmatprep.mubr.bf16.mxu0 %v4336_v16  ;;  %3977 = vmatprep.mubr.bf16.mxu1 %v4769_v12 }
 0x117   : > { %v3496_v30 = vpop.f32.mrf.mxu0  ;;  %v1183_v32 = vpop.f32.mrf.mxu1 }
 0x118   : > { %v3497_v62 = vadd.f32 %v3496_v30, %v3495_v49  ;;  %v5086_v60 = vadd.f32 %v3479_v43, %v1183_v32 }
 0x119   : > { %v3498_v56 = vpop.f32.mrf.mxu0  ;;  %v3880_v21 = vpop.f32.mrf.mxu1 }
 0x11a   : > { %v5088_v48 = vadd.f32 %v3880_v21, %v3488_v17 }
 0x11b   : > { %v3499_v29 = vpop.f32.mrf.mxu0  ;;  %v1186_v19 = vpop.f32.mrf.mxu1 }
 0x11c   : > { %v3500_v50 = vadd.f32 %v3499_v29, %v3498_v56  ;;  %v5090_v54 = vadd.f32 %v3482_v4, %v1186_v19 }
 0x11d   : > { %v3501_v40 = vpop.f32.mrf.mxu0  ;;  %v3883_v20 = vpop.f32.mrf.mxu1  ;;  %2200 = vmatmul.mubr.bf16.gmra.mxu0 %v4415_v44  ;;  %3978 = vmatmul.mubr.bf16.gmra.mxu1 %v4809_v10 }
 0x11e   : > { %v5094_v16 = vadd.f32 %v3883_v20, %v3497_v62  ;;  %2207 = vmatprep.mubr.bf16.mxu0 %v4365_v28  ;;  %3981 = vmatprep.mubr.bf16.mxu1 %v4817_v53 }
 0x11f   : > { %v3502_v12 = vpop.f32.mrf.mxu0  ;;  %v1199_v43 = vpop.f32.mrf.mxu1 }
 0x120   : > { %v3503_v63 = vadd.f32 %v3502_v12, %v3501_v40  ;;  %v5098_v57 = vadd.f32 %v3491_v13, %v1199_v43 }
 0x121   : > { %v3504_v17 = vpop.f32.mrf.mxu0  ;;  %v3884_v4 = vpop.f32.mrf.mxu1 }
 0x122   : > { %v5100_v52 = vadd.f32 %v3884_v4, %v3500_v50 }
 0x123   : > { %v3505_v7 = vpop.f32.mrf.mxu0  ;;  %v1202_v37 = vpop.f32.mrf.mxu1 }
 0x124   : > { %v3506_v44 = vadd.f32 %v3505_v7, %v3504_v17  ;;  %v5102_v6 = vadd.f32 %v3494_v41, %v1202_v37 }
 0x125   : > { %v3507_v10 = vpop.f32.mrf.mxu0  ;;  %v3887_v14 = vpop.f32.mrf.mxu1  ;;  %2208 = vmatmul.mubr.bf16.gmra.mxu0 %v4465_v0  ;;  %3982 = vmatmul.mubr.bf16.gmra.mxu1 %v4847_v3 }
 0x126   : > { %2215 = vmatprep.mubr.bf16.mxu0 %v4407_v42  ;;  %3985 = vmatprep.mubr.bf16.mxu1 %v4852_v33 }
 0x127   : > { %v3508_v28 = vpop.f32.mrf.mxu0  ;;  %v1215_v53 = vpop.f32.mrf.mxu1 }
 0x128   : > { %v3509_v13 = vadd.f32 %v3508_v28, %v3507_v10  ;;  %v5108_v35 = vadd.f32 %v3503_v63, %v1215_v53 }
 0x129   : > { %v3510_v58 = vpop.f32.mrf.mxu0  ;;  %v3888_v26 = vpop.f32.mrf.mxu1 }
 0x12a   : > { %v5110_v49 = vadd.f32 %v3887_v14, %v3509_v13 }
 0x12b   : > { %v3511_v41 = vpop.f32.mrf.mxu0  ;;  %v1218_v61 = vpop.f32.mrf.mxu1 }
 0x12c   : > { %v3512_v30 = vadd.f32 %v3511_v41, %v3510_v58  ;;  %v5112_v32 = vadd.f32 %v3506_v44, %v1218_v61 }
 0x12d   : > { %v3513_v0 = vpop.f32.mrf.mxu0  ;;  %v3891_v3 = vpop.f32.mrf.mxu1  ;;  %2216 = vmatmul.mubr.bf16.gmra.mxu0 %v4520_v25  ;;  %3986 = vmatmul.mubr.bf16.gmra.mxu1 %v4865_v9 }
 0x12e   : > { %v5116_v42 = vadd.f32 %v3888_v26, %v3512_v30  ;;  %2223 = vmatprep.mubr.bf16.mxu0 %v4472_v2  ;;  %3989 = vmatprep.mubr.bf16.mxu1 %v4495_v11 }
 0x12f   : > { %v3514_v33 = vpop.f32.mrf.mxu0  ;;  %v1231_v62 = vpop.f32.mrf.mxu1 }
 0x130   : > { %v3515_v56 = vadd.f32 %v3514_v33, %v3513_v0 }
 0x131   : > { %v3516_v21 = vpop.f32.mrf.mxu0  ;;  %v3892_v29 = vpop.f32.mrf.mxu1 }
 0x132   : > { %v5120_v19 = vadd.f32 %v3515_v56, %v1231_v62 }
 0x133   : > { %v3517_v50 = vpop.f32.mrf.mxu0  ;;  %v1234_v40 = vpop.f32.mrf.mxu1 }
 0x134   : > { %v3518_v20 = vadd.f32 %v3517_v50, %v3516_v21 }
 0x135   : > { %v3519_v12 = vpop.f32.mrf.mxu0  ;;  %v3895_v25 = vpop.f32.mrf.mxu1  ;;  %2224 = vmatmul.mubr.bf16.gmra.mxu0 %v4588_v18  ;;  %3990 = vmatmul.mubr.bf16.gmra.mxu1 %v4533_v31 }
 0x136   : > { %v5124_v9 = vadd.f32 %v3518_v20, %v1234_v40  ;;  %2231 = vmatprep.mubr.bf16.mxu0 %v4881_v5  ;;  %3993 = vmatprep.mubr.bf16.mxu1 %v4570_v51 }
 0x137   : > { %v3520_v2 = vpop.f32.mrf.mxu0  ;;  %v1247_v11 = vpop.f32.mrf.mxu1 }
 0x138   : > { %v3521_v43 = vadd.f32 %v3520_v2, %v3519_v12 }
 0x139   : > { %v3522_v63 = vpop.f32.mrf.mxu0  ;;  %v3896_v17 = vpop.f32.mrf.mxu1 }
 0x13a   : > { %v5128_v4 = vadd.f32 %v3891_v3, %v3521_v43 }
 0x13b   : > { %v3523_v7 = vpop.f32.mrf.mxu0  ;;  %v1250_v37 = vpop.f32.mrf.mxu1 }
 0x13c   : > { %v3524_v44 = vadd.f32 %v3523_v7, %v3522_v63 }
 0x13d   : > { %v3525_v10 = vpop.f32.mrf.mxu0  ;;  %v3899_v18 = vpop.f32.mrf.mxu1  ;;  %2232 = vmatmul.mubr.bf16.gmra.mxu0 %v4900_v45  ;;  %3994 = vmatmul.mubr.bf16.gmra.mxu1 %v4676_v22 }
 0x13e   : > { %v5132_v31 = vadd.f32 %v3892_v29, %v3524_v44  ;;  %v5135_v51 = vadd.f32 %v3899_v18, %v5046_v27  ;;  %2239 = vmatprep.mubr.bf16.mxu0 %v4881_v5  ;;  %3997 = vmatprep.mubr.bf16.mxu1 %v5008_v34 }
 0x13f   : > { %v3526_v14 = vpop.f32.mrf.mxu0  ;;  %v1263_v28 = vpop.f32.mrf.mxu1 }
 0x140   : > { %v3527_v53 = vadd.f32 %v3526_v14, %v3525_v10  ;;  %v5140_v13 = vadd.f32 %v5036_v59, %v1263_v28 }
 0x141   : > { %v3528_v58 = vpop.f32.mrf.mxu0  ;;  %v3900_v26 = vpop.f32.mrf.mxu1 }
 0x142   : > { %v5142_v41 = vadd.f32 %v3527_v53, %v1247_v11  ;;  %v5145_v22 = vadd.f32 %v3900_v26, %v5048_v39 }
 0x143   : > { %v3529_v61 = vpop.f32.mrf.mxu0  ;;  %v1266_v27 = vpop.f32.mrf.mxu1 }
 0x144   : > { %v3530_v30 = vadd.f32 %v3529_v61, %v3528_v58  ;;  %v5148_v5 = vadd.f32 %v5040_v38, %v1266_v27 }
 0x145   : > { %v3531_v0 = vpop.f32.mrf.mxu0  ;;  %v3903_v3 = vpop.f32.mrf.mxu1  ;;  %2240 = vmatmul.mubr.bf16.gmra.mxu0 %v4900_v45  ;;  %3998 = vmatmul.mubr.bf16.gmra.mxu1 %v5008_v34 }
 0x146   : > { %v5152_v59 = vadd.f32 %v3530_v30, %v1250_v37  ;;  %v5155_v33 = vadd.f32 %v3903_v3, %v5062_v23 }
 0x147   : > { %v3532_v62 = vpop.f32.mrf.mxu0  ;;  %v1279_v39 = vpop.f32.mrf.mxu1 }
 0x148   : > { %v3533_v56 = vadd.f32 %v3532_v62, %v3531_v0  ;;  %v5158_v21 = vadd.f32 %v5054_v36, %v1279_v39 }
 0x149   : > { %v3534_v29 = vpop.f32.mrf.mxu0  ;;  %v3904_v38 = vpop.f32.mrf.mxu1 }
 0x14a   : > { %v5160_v50 = vadd.f32 %v3895_v25, %v3533_v56  ;;  %v5163_v40 = vadd.f32 %v3904_v38, %v5064_v46 }
 0x14b   : > { %v3535_v45 = vpop.f32.mrf.mxu0  ;;  %v1282_v34 = vpop.f32.mrf.mxu1 }
 0x14c   : > { %v3536_v20 = vadd.f32 %v3535_v45, %v3534_v29  ;;  %v5166_v12 = vadd.f32 %v5056_v24, %v1282_v34 }
 0x14d   : > { %v3601_v23 = vpop.f32.mrf.mxu1  ;;  %v3923_v2 = vpop.f32.mrf.mxu0 }
 0x14e   : > { %v5168_v11 = vadd.f32 %v3896_v17, %v3536_v20 }
 0x14f   : > { %v3602_v43 = vpop.f32.mrf.mxu1  ;;  %v1735_v36 = vpop.f32.mrf.mxu0 }
 0x150   : > { %v3603_v63 = vadd.f32 %v3602_v43, %v3601_v23 }
 0x151   : > { %v3604_v7 = vpop.f32.mrf.mxu1  ;;  %v3924_v37 = vpop.f32.mrf.mxu0 }
 0x152   : > { %v1736_v25 = vadd.f32 %v3603_v63, %v1735_v36 }
 0x153   : > { %v3605_v44 = vpop.f32.mrf.mxu1  ;;  %v1738_v10 = vpop.f32.mrf.mxu0 }
 0x154   : > { %v5171_v46 = vadd.f32 %v1736_v25, %v5073_v1  ;;  %v3606_v18 = vadd.f32 %v3605_v44, %v3604_v7 }
 0x155   : > { %v3607_v14 = vpop.f32.mrf.mxu1  ;;  %v3927_v28 = vpop.f32.mrf.mxu0 }
 0x156   : > { %v1739_v24 = vadd.f32 %v3606_v18, %v1738_v10 }
 0x157   : > { %v3608_v53 = vpop.f32.mrf.mxu1  ;;  %v1751_v58 = vpop.f32.mrf.mxu0 }
 0x158   : > { %v5174_v17 = vadd.f32 %v1739_v24, %v5078_v47  ;;  %v3609_v26 = vadd.f32 %v3608_v53, %v3607_v14 }
 0x159   : > { %v3610_v61 = vpop.f32.mrf.mxu1  ;;  %v3928_v27 = vpop.f32.mrf.mxu0 }
 0x15a   : > { %v1744_v30 = vadd.f32 %v3923_v2, %v3609_v26 }
 0x15b   : > { %v3611_v0 = vpop.f32.mrf.mxu1  ;;  %v1754_v3 = vpop.f32.mrf.mxu0 }
 0x15c   : > { %v3612_v62 = vadd.f32 %v3611_v0, %v3610_v61  ;;  %v5177_v39 = vadd.f32 %v1744_v30, %v5068_v55 }
 0x15d   : > { %v3613_v1 = vpop.f32.mrf.mxu1  ;;  %v3931_v56 = vpop.f32.mrf.mxu0 }
 0x15e   : > { %v1747_v29 = vadd.f32 %v3924_v37, %v3612_v62 }
 0x15f   : > { %v3614_v38 = vpop.f32.mrf.mxu1  ;;  %v1767_v45 = vpop.f32.mrf.mxu0 }
 0x160   : > { %v3615_v34 = vadd.f32 %v3614_v38, %v3613_v1  ;;  %v5180_v20 = vadd.f32 %v1747_v29, %v5075_v8 }
 0x161   : > { %v3616_v47 = vpop.f32.mrf.mxu1  ;;  %v3932_v23 = vpop.f32.mrf.mxu0 }
 0x162   : > { %v1752_v43 = vadd.f32 %v3615_v34, %v1751_v58 }
 0x163   : > { %v3617_v36 = vpop.f32.mrf.mxu1  ;;  %v1770_v2 = vpop.f32.mrf.mxu0 }
 0x164   : > { %v3618_v63 = vadd.f32 %v3617_v36, %v3616_v47  ;;  %v5183_v7 = vadd.f32 %v1752_v43, %v5086_v60 }
 0x165   : > { %v3619_v55 = vpop.f32.mrf.mxu1  ;;  %v5185_v25 = vpop.f32.mrf.mxu0 }
 0x166   : > { %v1755_v44 = vadd.f32 %v3618_v63, %v1754_v3 }
 0x167   : > { %v3620_v37 = vpop.f32.mrf.mxu1  ;;  %v1783_v10 = vpop.f32.mrf.mxu0 }
 0x168   : > { %v3621_v18 = vadd.f32 %v3620_v37, %v3619_v55  ;;  %v5188_v14 = vadd.f32 %v1755_v44, %v5090_v54 }
 0x169   : > { %v3622_v8 = vpop.f32.mrf.mxu1  ;;  %v5190_v24 = vpop.f32.mrf.mxu0 }
 0x16a   : > { %v1760_v53 = vadd.f32 %v3927_v28, %v3621_v18 }
 0x16b   : > { %v3623_v58 = vpop.f32.mrf.mxu1  ;;  %v1786_v26 = vpop.f32.mrf.mxu0 }
 0x16c   : > { %v3624_v61 = vadd.f32 %v3623_v58, %v3622_v8  ;;  %v5193_v60 = vadd.f32 %v1760_v53, %v5082_v15 }
 0x16d   : > { %v3625_v30 = vpop.f32.mrf.mxu1  ;;  %v5195_v0 = vpop.f32.mrf.mxu0 }
 0x16e   : > { %v1763_v3 = vadd.f32 %v3928_v27, %v3624_v61 }
 0x16f   : > { %v3626_v62 = vpop.f32.mrf.mxu1  ;;  %v1799_v1 = vpop.f32.mrf.mxu0 }
 0x170   : > { %v3627_v29 = vadd.f32 %v3626_v62, %v3625_v30  ;;  %v5198_v54 = vadd.f32 %v1763_v3, %v5088_v48 }
 0x171   : > { %v3628_v38 = vpop.f32.mrf.mxu1  ;;  %v5200_v34 = vpop.f32.mrf.mxu0 }
 0x172   : > { %v1768_v28 = vadd.f32 %v3627_v29, %v1767_v45 }
 0x173   : > { %v3629_v47 = vpop.f32.mrf.mxu1  ;;  %v1802_v43 = vpop.f32.mrf.mxu0 }
 0x174   : > { %v3630_v36 = vadd.f32 %v3629_v47, %v3628_v38  ;;  %v5203_v15 = vadd.f32 %v1768_v28, %v5098_v57 }
 0x175   : > { %v3631_v63 = vpop.f32.mrf.mxu1  ;;  %v5205_v55 = vpop.f32.mrf.mxu0 }
 0x176   : > { %v1771_v27 = vadd.f32 %v3630_v36, %v1770_v2 }
 0x177   : > { %v3632_v44 = vpop.f32.mrf.mxu1  ;;  %v5207_v37 = vpop.f32.mrf.mxu0 }
 0x178   : > { %v3633_v18 = vadd.f32 %v3632_v44, %v3631_v63  ;;  %v5210_v48 = vadd.f32 %v1771_v27, %v5102_v6 }
 0x179   : > { %v3634_v8 = vpop.f32.mrf.mxu1  ;;  %v5212_v53 = vpop.f32.mrf.mxu0 }
 0x17a   : > { %v1776_v45 = vadd.f32 %v3931_v56, %v3633_v18 }
 0x17b   : > { %v3635_v58 = vpop.f32.mrf.mxu1  ;;  %v5214_v61 = vpop.f32.mrf.mxu0 }
 0x17c   : > { %v3636_v57 = vadd.f32 %v3635_v58, %v3634_v8  ;;  %v5217_v30 = vadd.f32 %v1776_v45, %v5094_v16 }
 0x17d   : > { %v3637_v3 = vpop.f32.mrf.mxu1  ;;  %v5219_v2 = vpop.f32.mrf.mxu0 }
 0x17e   : > { %v1779_v62 = vadd.f32 %v3932_v23, %v3636_v57 }
 0x17f   : > { %v3638_v29 = vpop.f32.mrf.mxu1  ;;  %v5221_v38 = vpop.f32.mrf.mxu0 }
 0x180   : > { %v3639_v6 = vadd.f32 %v3638_v29, %v3637_v3  ;;  %v5224_v28 = vadd.f32 %v1779_v62, %v5100_v52 }
 0x181   : > { %v3640_v47 = vpop.f32.mrf.mxu1  ;;  %v5226_v56 = vpop.f32.mrf.mxu0 }
 0x182   : > { %v1784_v36 = vadd.f32 %v3639_v6, %v1783_v10 }
 0x183   : > { %v3641_v63 = vpop.f32.mrf.mxu1  ;;  %v5228_v27 = vpop.f32.mrf.mxu0 }
 0x184   : > { %v3642_v16 = vadd.f32 %v3641_v63, %v3640_v47  ;;  %v5231_v44 = vadd.f32 %v1784_v36, %v5108_v35 }
 0x185   : > { %v3643_v18 = vpop.f32.mrf.mxu1  ;;  %v5233_v23 = vpop.f32.mrf.mxu0 }
 0x186   : > { %v1787_v8 = vadd.f32 %v3642_v16, %v1786_v26 }
 0x187   : > { %v3644_v45 = vpop.f32.mrf.mxu1  ;;  %v5235_v58 = vpop.f32.mrf.mxu0 }
 0x188   : > { %v3645_v52 = vadd.f32 %v3644_v45, %v3643_v18  ;;  %v5238_v57 = vadd.f32 %v1787_v8, %v5112_v32 }
 0x189   : > { %v3646_v3 = vpop.f32.mrf.mxu1  ;;  %v5240_v10 = vpop.f32.mrf.mxu0 }
 0x18a   : > { %6357 = vst [vmem:[#allocation3_spill] sm:$0xff] %v5238_v57  ;;  %v1792_v62 = vadd.f32 %v5185_v25, %v3645_v52 }
 0x18b   : > { %v3647_v29 = vpop.f32.mrf.mxu1  ;;  %v5243_v6 = vpop.f32.mrf.mxu0 }
 0x18c   : > { %v3648_v35 = vadd.f32 %v3647_v29, %v3646_v3  ;;  %v5246_v47 = vadd.f32 %v1792_v62, %v5110_v49 }
 0x18d   : > { %v3649_v26 = vpop.f32.mrf.mxu1  ;;  %v3737_v36 = vpop.f32.mrf.mxu0 }
 0x18e   : > { %v1795_v63 = vadd.f32 %v5190_v24, %v3648_v35 }
 0x18f   : > { %v3650_v16 = vpop.f32.mrf.mxu1  ;;  %v3738_v18 = vpop.f32.mrf.mxu0 }
 0x190   : > { %v3651_v32 = vadd.f32 %v3650_v16, %v3649_v26  ;;  %v5249_v8 = vadd.f32 %v3738_v18, %v3737_v36  ;;  %v5252_v45 = vadd.f32 %v1795_v63, %v5116_v42 }
 0x191   : > { %v3652_v25 = vpop.f32.mrf.mxu1  ;;  %v5254_v52 = vpop.f32.mrf.mxu0 }
 0x192   : > { %v1800_v57 = vadd.f32 %v3651_v32, %v1799_v1 }
 0x193   : > { %v3653_v3 = vpop.f32.mrf.mxu1  ;;  %v5256_v29 = vpop.f32.mrf.mxu0 }
 0x194   : > { %v3654_v49 = vadd.f32 %v3653_v3, %v3652_v25  ;;  %v5259_v62 = vadd.f32 %v1800_v57, %v5120_v19 }
 0x195   : > { %v3655_v24 = vpop.f32.mrf.mxu1  ;;  %v5261_v35 = vpop.f32.mrf.mxu0 }
 0x196   : > { %v1803_v26 = vadd.f32 %v3654_v49, %v1802_v43 }
 0x197   : > { %v3656_v36 = vpop.f32.mrf.mxu1  ;;  %v5263_v16 = vpop.f32.mrf.mxu0 }
 0x198   : > { %v3657_v42 = vadd.f32 %v3656_v36, %v3655_v24  ;;  %v5266_v63 = vadd.f32 %v1803_v26, %v5124_v9 }
 0x199   : > { %v3658_v18 = vpop.f32.mrf.mxu1  ;;  %v5268_v1 = vpop.f32.mrf.mxu0 }
 0x19a   : > { %6358 = vst [vmem:[#allocation4_spill] sm:$0xff] %v5266_v63  ;;  %v1808_v32 = vadd.f32 %v5195_v0, %v3657_v42 }
 0x19b   : > { %v3659_v25 = vpop.f32.mrf.mxu1  ;;  %v5271_v3 = vpop.f32.mrf.mxu0 }
 0x19c   : > { %v3660_v19 = vadd.f32 %v3659_v25, %v3658_v18  ;;  %v5274_v57 = vadd.f32 %v1808_v32, %v5128_v4 }
 0x19d   : > { %v3661_v43 = vpop.f32.mrf.mxu1  ;;  %v5276_v49 = vpop.f32.mrf.mxu0 }
 0x19e   : > { %6359 = vst [vmem:[#allocation5_spill] sm:$0xff] %v5274_v57  ;;  %v1811_v24 = vadd.f32 %v5200_v34, %v3660_v19 }
 0x19f   : > { %v3662_v36 = vpop.f32.mrf.mxu1  ;;  %v5279_v9 = vpop.f32.mrf.mxu0 }
 0x1a0   : > { %v3663_v26 = vadd.f32 %v3662_v36, %v3661_v43  ;;  %v5282_v63 = vadd.f32 %v1811_v24, %v5132_v31 }
 0x1a1   : > { %v3664_v0 = vpop.f32.mrf.mxu1  ;;  %v5284_v42 = vpop.f32.mrf.mxu0 }
 0x1a2   : > { %6360 = vst [vmem:[#allocation6_spill] sm:$0xff] %v5282_v63  ;;  %v1816_v18 = vadd.f32 %v3663_v26, %v5207_v37 }
 0x1a3   : > { %v3665_v25 = vpop.f32.mrf.mxu1  ;;  %v5287_v4 = vpop.f32.mrf.mxu0 }
 0x1a4   : > { %v3666_v32 = vadd.f32 %v3665_v25, %v3664_v0  ;;  %v5290_v57 = vadd.f32 %v1816_v18, %v5142_v41 }
 0x1a5   : > { %v3667_v34 = vpop.f32.mrf.mxu1  ;;  %v5292_v19 = vpop.f32.mrf.mxu0 }
 0x1a6   : > { %6361 = vst [vmem:[#allocation7_spill] sm:$0xff] %v5290_v57  ;;  %v1819_v43 = vadd.f32 %v3666_v32, %v5214_v61 }
 0x1a7   : > { %v3668_v36 = vpop.f32.mrf.mxu1  ;;  %v5295_v31 = vpop.f32.mrf.mxu0 }
 0x1a8   : > { %v3669_v24 = vadd.f32 %v3668_v36, %v3667_v34  ;;  %v5298_v63 = vadd.f32 %v1819_v43, %v5152_v59 }
 0x1a9   : > { %v3670_v37 = vpop.f32.mrf.mxu1  ;;  %v5300_v26 = vpop.f32.mrf.mxu0 }
 0x1aa   : > { %6362 = vst [vmem:[#allocation8_spill] sm:$0xff] %v5298_v63  ;;  %v1824_v0 = vadd.f32 %v5205_v55, %v3669_v24 }
 0x1ab   : > { %v3671_v25 = vpop.f32.mrf.mxu1  ;;  %v5303_v41 = vpop.f32.mrf.mxu0 }
 0x1ac   : > { %v3672_v18 = vadd.f32 %v3671_v25, %v3670_v37  ;;  %v5306_v57 = vadd.f32 %v1824_v0, %v5160_v50 }
 0x1ad   : > { %v3673_v61 = vpop.f32.mrf.mxu1  ;;  %v5308_v32 = vpop.f32.mrf.mxu0 }
 0x1ae   : > { %6363 = vst [vmem:[#allocation9_spill] sm:$0xff] %v5306_v57  ;;  %v1827_v34 = vadd.f32 %v5212_v53, %v3672_v18 }
 0x1af   : > { %v3674_v36 = vpop.f32.mrf.mxu1  ;;  %v5311_v59 = vpop.f32.mrf.mxu0 }
 0x1b0   : > { %v3675_v43 = vadd.f32 %v3674_v36, %v3673_v61  ;;  %v5314_v63 = vadd.f32 %v1827_v34, %v5168_v11 }
 0x1b1   : > { %v3676_v55 = vpop.f32.mrf.mxu1  ;;  %v5316_v24 = vpop.f32.mrf.mxu0 }
 0x1b2   : > { %6364 = vst [vmem:[#allocation10_spill] sm:$0xff] %v5314_v63  ;;  %v1832_v37 = vadd.f32 %v3675_v43, %v5221_v38 }
 0x1b3   : > { %v3677_v25 = vpop.f32.mrf.mxu1  ;;  %v5319_v50 = vpop.f32.mrf.mxu0 }
 0x1b4   : > { %v3678_v0 = vadd.f32 %v3677_v25, %v3676_v55  ;;  %v5322_v57 = vadd.f32 %v1832_v37, %v5140_v13 }
 0x1b5   : > { %v3679_v53 = vpop.f32.mrf.mxu1  ;;  %v5324_v18 = vpop.f32.mrf.mxu0 }
 0x1b6   : > { %6365 = vst [vmem:[#allocation11_spill] sm:$0xff] %v5322_v57  ;;  %v1835_v61 = vadd.f32 %v3678_v0, %v5228_v27 }
 0x1b7   : > { %v3680_v36 = vpop.f32.mrf.mxu1  ;;  %v5327_v11 = vpop.f32.mrf.mxu0 }
 0x1b8   : > { %v3681_v34 = vadd.f32 %v3680_v36, %v3679_v53  ;;  %v5330_v63 = vadd.f32 %v1835_v61, %v5148_v5 }
 0x1b9   : > { %v3682_v38 = vpop.f32.mrf.mxu1  ;;  %v5332_v43 = vpop.f32.mrf.mxu0 }
 0x1ba   : > { %6366 = vst [vmem:[#allocation12_spill] sm:$0xff] %v5330_v63  ;;  %v1840_v55 = vadd.f32 %v5219_v2, %v3681_v34 }
 0x1bb   : > { %v3683_v25 = vpop.f32.mrf.mxu1  ;;  %v5335_v13 = vpop.f32.mrf.mxu0 }
 0x1bc   : > { %v3684_v37 = vadd.f32 %v3683_v25, %v3682_v38  ;;  %v5338_v57 = vadd.f32 %v1840_v55, %v5135_v51 }
 0x1bd   : > { %v3685_v27 = vpop.f32.mrf.mxu1  ;;  %v5340_v0 = vpop.f32.mrf.mxu0 }
 0x1be   : > { %6367 = vst [vmem:[#allocation13_spill] sm:$0xff] %v5338_v57  ;;  %v1843_v53 = vadd.f32 %v5226_v56, %v3684_v37 }
 0x1bf   : > { %v3686_v36 = vpop.f32.mrf.mxu1  ;;  %v5343_v5 = vpop.f32.mrf.mxu0 }
 0x1c0   : > { %v3687_v61 = vadd.f32 %v3686_v36, %v3685_v27  ;;  %v5346_v63 = vadd.f32 %v1843_v53, %v5145_v22 }
 0x1c1   : > { %v3688_v2 = vpop.f32.mrf.mxu1  ;;  %v5348_v34 = vpop.f32.mrf.mxu0 }
 0x1c2   : > { %6368 = vst [vmem:[#allocation14_spill] sm:$0xff] %v5346_v63  ;;  %v1848_v38 = vadd.f32 %v3687_v61, %v5235_v58 }
 0x1c3   : > { %v3689_v25 = vpop.f32.mrf.mxu1  ;;  %v5351_v51 = vpop.f32.mrf.mxu0 }
 0x1c4   : > { %v3690_v55 = vadd.f32 %v3689_v25, %v3688_v2  ;;  %v5354_v57 = vadd.f32 %v1848_v38, %v5158_v21 }
 0x1c5   : > { %v3691_v56 = vpop.f32.mrf.mxu1  ;;  %v5356_v37 = vpop.f32.mrf.mxu0 }
 0x1c6   : > { %6369 = vst [vmem:[#allocation15_spill] sm:$0xff] %v5354_v57  ;;  %v1851_v27 = vadd.f32 %v3690_v55, %v5243_v6 }
 0x1c7   : > { %v3692_v36 = vpop.f32.mrf.mxu1  ;;  %v5359_v22 = vpop.f32.mrf.mxu0 }
 0x1c8   : > { %v3693_v53 = vadd.f32 %v3692_v36, %v3691_v56  ;;  %v5362_v63 = vadd.f32 %v1851_v27, %v5166_v12  ;;  %v3745_v27 = vadd.f32 %v5263_v16, %v5261_v35 }
 0x1c9   : > { %v3694_v58 = vpop.f32.mrf.mxu1  ;;  %v5364_v61 = vpop.f32.mrf.mxu0 }
 0x1ca   : > { %6370 = vst [vmem:[#allocation16_spill] sm:$0xff] %v5362_v63  ;;  %v1856_v2 = vadd.f32 %v5233_v23, %v3693_v53 }
 0x1cb   : > { %v3695_v25 = vpop.f32.mrf.mxu1  ;;  %v5367_v21 = vpop.f32.mrf.mxu0 }
 0x1cc   : > { %v5370_v38 = vadd.f32 %v1856_v2, %v5155_v33  ;;  %v3696_v57 = vadd.f32 %v3695_v25, %v3694_v58  ;;  %v3742_v58 = vadd.f32 %v5256_v29, %v5254_v52  ;;  %v5401_v29 = vld [vmem:[%s6296_s2] ss:$0 sm:$0xff] }
 0x1cd   : > { %v5372_v6 = vpop.f32.mrf.mxu0  ;;  %v3971_v55 = vpop.f32.mrf.mxu1 }
 0x1ce   : > { %v1859_v56 = vadd.f32 %v5240_v10, %v3696_v57  ;;  %v3748_v10 = vadd.f32 %v5271_v3, %v5268_v1  ;;  %v2291_v57 = vadd.f32 %v3971_v55, %v3745_v27 }
 0x1cf   : > { %v5375_v36 = vpop.f32.mrf.mxu0  ;;  %v2282_v12 = vpop.f32.mrf.mxu1 }
 0x1d0   : > { %v5380_v23 = vadd.f32 %v1859_v56, %v5163_v40  ;;  %v2283_v53 = vadd.f32 %v5249_v8, %v2282_v12  ;;  %v3751_v12 = vadd.f32 %v5279_v9, %v5276_v49 }
 0x1d1   : > { %v5383_v63 = vpop.f32.mrf.mxu0  ;;  %v3972_v33 = vpop.f32.mrf.mxu1 }
 0x1d2   : > { %6371 = vst [vmem:[#allocation17_spill] sm:$0xff] %v5380_v23  ;;  %v2409_v2 = vadd.f32 %v2283_v53, %v5171_v46  ;;  %v2294_v16 = vadd.f32 %v3972_v33, %v3748_v10  ;;  %v2411_v23 = vadd.f32 %v2291_v57, %v5177_v39  ;;  %v3760_v10 = vadd.f32 %v5303_v41, %v5300_v26 }
 0x1d3   : > { %v5390_v25 = vpop.f32.mrf.mxu0  ;;  %v2285_v35 = vpop.f32.mrf.mxu1 }
 0x1d4   : > { %v2286_v40 = vadd.f32 %v3742_v58, %v2285_v35  ;;  %v5406_v3 = vadd.f32 %v5401_v29, %v2409_v2  ;;  %v2412_v55 = vadd.f32 %v2294_v16, %v5180_v20  ;;  %v5417_v53 = vadd.f32 %v5401_v29, %v2411_v23 }
 0x1d5   : > { %v5392_v56 = vpop.f32.mrf.mxu0  ;;  %v3975_v8 = vpop.f32.mrf.mxu1  ;;  %v3754_v20 = vadd.f32 %v5287_v4, %v5284_v42  ;;  %v3763_v42 = vadd.f32 %v5311_v59, %v5308_v32 }
 0x1d6   : > { %v2410_v52 = vadd.f32 %v2286_v40, %v5174_v17  ;;  %v3757_v17 = vadd.f32 %v5295_v31, %v5292_v19  ;;  %v5429_v31 = vadd.f32 %v5401_v29, %v2412_v55 }
 0x1d7   : > { %v5403_v46 = vpop.f32.mrf.mxu0  ;;  %v2298_v1 = vpop.f32.mrf.mxu1 }
 0x1d8   : > { %v5410_v27 = vadd.f32 %v5401_v29, %v2410_v52  ;;  %v2299_v49 = vadd.f32 %v3751_v12, %v2298_v1  ;;  %v2307_v57 = vadd.f32 %v3975_v8, %v3757_v17 }
 0x1d9   : > { %v5414_v39 = vpop.f32.mrf.mxu0  ;;  %v3976_v9 = vpop.f32.mrf.mxu1 }
 0x1da   : > { %v2515_v33 = vadd.f32 %v5410_v27, %v5406_v3  ;;  %v2413_v58 = vadd.f32 %v2299_v49, %v5183_v7  ;;  %v2310_v35 = vadd.f32 %v3976_v9, %v3760_v10  ;;  %v2415_v41 = vadd.f32 %v2307_v57, %v5193_v60 }
 0x1db   : > { %v5426_v2 = vpop.f32.mrf.mxu0  ;;  %v2301_v19 = vpop.f32.mrf.mxu1  ;;  %v3769_v49 = vadd.f32 %v5327_v11, %v5324_v18  ;;  %v3772_v60 = vadd.f32 %v5335_v13, %v5332_v43  ;;  %v3775_v13 = vadd.f32 %v5343_v5, %v5340_v0 }
 0x1dc   : > { %v2516_v23 = vadd.f32 %v2515_v33, %v5417_v53  ;;  %v2302_v16 = vadd.f32 %v3754_v20, %v2301_v19  ;;  %v5437_v4 = vadd.f32 %v5401_v29, %v2413_v58  ;;  %v2416_v32 = vadd.f32 %v2310_v35, %v5198_v54 }
 0x1dd   : > { %v5432_v40 = vpop.f32.mrf.mxu0  ;;  %v3979_v7 = vpop.f32.mrf.mxu1  ;;  %v5458_v33 = vadd.f32 %v5401_v29, %v2415_v41 }
 0x1de   : > { %v2517_v26 = vadd.f32 %v2516_v23, %v5429_v31  ;;  %v2414_v8 = vadd.f32 %v2302_v16, %v5188_v14  ;;  %v3766_v14 = vadd.f32 %v5319_v50, %v5316_v24  ;;  %v2323_v18 = vadd.f32 %v3979_v7, %v3769_v49 }
 0x1df   : > { %v5442_v12 = vpop.f32.mrf.mxu0  ;;  %v2314_v52 = vpop.f32.mrf.mxu1  ;;  %v5465_v57 = vadd.f32 %v5401_v29, %v2416_v32 }
 0x1e0   : > { %v2518_v1 = vadd.f32 %v2517_v26, %v5437_v4  ;;  %v2315_v55 = vadd.f32 %v3763_v42, %v2314_v52  ;;  %v5449_v59 = vadd.f32 %v5401_v29, %v2414_v8  ;;  %v3781_v8 = vadd.f32 %v5359_v22, %v5356_v37 }
 0x1e1   : > { %v5451_v17 = vpop.f32.mrf.mxu0  ;;  %v3980_v9 = vpop.f32.mrf.mxu1  ;;  %v3778_v52 = vadd.f32 %v5351_v51, %v5348_v34 }
 0x1e2   : > { %v2519_v58 = vadd.f32 %v2518_v1, %v5449_v59  ;;  %v2417_v54 = vadd.f32 %v2315_v55, %v5203_v15  ;;  %v2326_v50 = vadd.f32 %v3980_v9, %v3772_v60  ;;  %v2419_v15 = vadd.f32 %v2323_v18, %v5217_v30 }
 0x1e3   : > { %v5462_v11 = vpop.f32.mrf.mxu0  ;;  %v2317_v20 = vpop.f32.mrf.mxu1  ;;  %v3784_v1 = vadd.f32 %v5367_v21, %v5364_v61  ;;  %v3787_v61 = vadd.f32 %v5375_v36, %v5372_v6  ;;  %v6372_v21 = vld [vmem:[#allocation3_spill] sm:$0xff] }
 0x1e4   : > { %v2318_v10 = vadd.f32 %v3766_v14, %v2317_v20  ;;  %v2520_v24 = vadd.f32 %v2519_v58, %v5458_v33  ;;  %v5475_v35 = vadd.f32 %v5401_v29, %v2417_v54  ;;  %v5490_v55 = vadd.f32 %v5401_v29, %v2419_v15 }
 0x1e5   : > { %v5468_v19 = vpop.f32.mrf.mxu0  ;;  %v3983_v43 = vpop.f32.mrf.mxu1  ;;  %v3790_v15 = vadd.f32 %v5390_v25, %v5383_v63 }
 0x1e6   : > { %v2418_v23 = vadd.f32 %v2318_v10, %v5210_v48  ;;  %v2521_v16 = vadd.f32 %v2520_v24, %v5465_v57  ;;  %v2420_v48 = vadd.f32 %v2326_v50, %v5224_v28  ;;  %v2339_v32 = vadd.f32 %v3983_v43, %v3781_v8 }
 0x1e7   : > { %v3804_v7 = vpop.f32.mrf.mxu0  ;;  %v2330_v42 = vpop.f32.mrf.mxu1 }
 0x1e8   : > { %v5479_v26 = vadd.f32 %v5401_v29, %v2418_v23  ;;  %v2331_v41 = vadd.f32 %v3775_v13, %v2330_v42  ;;  %v2522_v0 = vadd.f32 %v2521_v16, %v5475_v35  ;;  %v5495_v28 = vadd.f32 %v5401_v29, %v2420_v48 }
 0x1e9   : > { %v3806_v5 = vpop.f32.mrf.mxu0  ;;  %v3984_v30 = vpop.f32.mrf.mxu1  ;;  %v2423_v54 = vadd.f32 %v2339_v32, %v5246_v47  ;;  %v3793_v13 = vadd.f32 %v5403_v46, %v5392_v56  ;;  %v3796_v16 = vadd.f32 %v5426_v2, %v5414_v39  ;;  %v3799_v39 = vadd.f32 %v5442_v12, %v5432_v40  ;;  %v6373_v2 = vld [vmem:[#allocation4_spill] sm:$0xff]  ;;  %v6375_v40 = vld [vmem:[#allocation6_spill] sm:$0xff] }
 0x1ea   : > { %v2523_v49 = vadd.f32 %v2522_v0, %v5479_v26  ;;  %v2421_v37 = vadd.f32 %v2331_v41, %v5231_v44  ;;  %v2342_v34 = vadd.f32 %v3984_v30, %v3784_v1 }
 0x1eb   : > { %v3807_v22 = vpop.f32.mrf.mxu0  ;;  %v2333_v9 = vpop.f32.mrf.mxu1  ;;  %v5518_v42 = vadd.f32 %v5401_v29, %v2423_v54  ;;  %v3802_v54 = vadd.f32 %v5462_v11, %v5451_v17 }
 0x1ec   : > { %v2334_v14 = vadd.f32 %v3778_v52, %v2333_v9  ;;  %v2524_v60 = vadd.f32 %v2523_v49, %v5490_v55  ;;  %v5503_v44 = vadd.f32 %v5401_v29, %v2421_v37  ;;  %v2424_v36 = vadd.f32 %v2342_v34, %v5252_v45  ;;  %v6374_v49 = vld [vmem:[#allocation5_spill] sm:$0xff] }
 0x1ed   : > { %v3809_v51 = vpop.f32.mrf.mxu0  ;;  %v3987_v58 = vpop.f32.mrf.mxu1 }
 0x1ee   : > { %v2422_v18 = vadd.f32 %v2334_v14, %v6372_v21  ;;  %v2525_v20 = vadd.f32 %v2524_v60, %v5495_v28  ;;  %v2355_v8 = vadd.f32 %v3987_v58, %v3793_v13  ;;  %v5523_v45 = vadd.f32 %v5401_v29, %v2424_v36 }
 0x1ef   : > { %v3810_v10 = vpop.f32.mrf.mxu0  ;;  %v2346_v24 = vpop.f32.mrf.mxu1  ;;  %v3805_v60 = vadd.f32 %v3804_v7, %v5468_v19  ;;  %v6376_v7 = vld [vmem:[#allocation7_spill] sm:$0xff] }
 0x1f0   : > { %v5507_v50 = vadd.f32 %v5401_v29, %v2422_v18  ;;  %v2347_v43 = vadd.f32 %v3787_v61, %v2346_v24  ;;  %v2526_v6 = vadd.f32 %v2525_v20, %v5503_v44  ;;  %v2427_v32 = vadd.f32 %v2355_v8, %v6374_v49 }
 0x1f1   : > { %v3812_v23 = vpop.f32.mrf.mxu0  ;;  %v3988_v47 = vpop.f32.mrf.mxu1  ;;  %v3808_v24 = vadd.f32 %v3807_v22, %v3806_v5  ;;  %v3811_v11 = vadd.f32 %v3810_v10, %v3809_v51  ;;  %v6377_v5 = vld [vmem:[#allocation9_spill] sm:$0xff] }
 0x1f2   : > { %v2527_v41 = vadd.f32 %v2526_v6, %v5507_v50  ;;  %v2425_v56 = vadd.f32 %v2347_v43, %v5259_v62  ;;  %v2358_v63 = vadd.f32 %v3988_v47, %v3796_v16  ;;  %v5543_v43 = vadd.f32 %v5401_v29, %v2427_v32  ;;  %v6379_v32 = vld [vmem:[#allocation10_spill] sm:$0xff] }
 0x1f3   : > { %v3813_v46 = vpop.f32.mrf.mxu0  ;;  %v2349_v0 = vpop.f32.mrf.mxu1 }
 0x1f4   : > { %v2350_v48 = vadd.f32 %v3790_v15, %v2349_v0  ;;  %v2528_v30 = vadd.f32 %v2527_v41, %v5518_v42  ;;  %v5531_v62 = vadd.f32 %v5401_v29, %v2425_v56  ;;  %v2428_v12 = vadd.f32 %v2358_v63, %v6375_v40  ;;  %v6378_v56 = vld [vmem:[#allocation8_spill] sm:$0xff] }
 0x1f5   : > { %v3815_v25 = vpop.f32.mrf.mxu0  ;;  %v3991_v52 = vpop.f32.mrf.mxu1 }
 0x1f6   : > { %v2426_v1 = vadd.f32 %v2350_v48, %v6373_v2  ;;  %v2529_v37 = vadd.f32 %v2528_v30, %v5523_v45  ;;  %v2371_v20 = vadd.f32 %v3991_v52, %v3805_v60  ;;  %v5548_v15 = vadd.f32 %v5401_v29, %v2428_v12  ;;  %v6380_v12 = vld [vmem:[#allocation11_spill] sm:$0xff] }
 0x1f7   : > { %v3816_v9 = vpop.f32.mrf.mxu0  ;;  %v2362_v14 = vpop.f32.mrf.mxu1 }
 0x1f8   : > { %v5536_v34 = vadd.f32 %v5401_v29, %v2426_v1  ;;  %v2363_v58 = vadd.f32 %v3799_v39, %v2362_v14  ;;  %v2530_v61 = vadd.f32 %v2529_v37, %v5531_v62  ;;  %v2431_v22 = vadd.f32 %v2371_v20, %v6377_v5 }
 0x1f9   : > { %v3818_v21 = vpop.f32.mrf.mxu0  ;;  %v3992_v18 = vpop.f32.mrf.mxu1  ;;  %v3817_v1 = vadd.f32 %v3816_v9, %v3815_v25  ;;  %v3814_v14 = vadd.f32 %v3813_v46, %v3812_v23 }
 0x1fa   : > { %v2531_v19 = vadd.f32 %v2530_v61, %v5536_v34  ;;  %v2429_v13 = vadd.f32 %v2363_v58, %v6376_v7  ;;  %v2374_v41 = vadd.f32 %v3992_v18, %v3808_v24  ;;  %v5563_v60 = vadd.f32 %v5401_v29, %v2431_v22 }
 0x1fb   : > { %v3819_v6 = vpop.f32.mrf.mxu0  ;;  %v2365_v36 = vpop.f32.mrf.mxu1 }
 0x1fc   : > { %v2366_v47 = vadd.f32 %v3802_v54, %v2365_v36  ;;  %v2532_v16 = vadd.f32 %v2531_v19, %v5543_v43  ;;  %v5554_v48 = vadd.f32 %v5401_v29, %v2429_v13  ;;  %v2432_v51 = vadd.f32 %v2374_v41, %v6379_v32  ;;  %v6381_v13 = vld [vmem:[#allocation12_spill] sm:$0xff]  ;;  %v6384_v32 = vld [vmem:[#allocation15_spill] sm:$0xff] }
 0x1fd   : > { %v3821_v8 = vpop.f32.mrf.mxu0  ;;  %v3995_v17 = vpop.f32.mrf.mxu1  ;;  %v3820_v58 = vadd.f32 %v3819_v6, %v3818_v21  ;;  %v6382_v21 = vld [vmem:[#allocation13_spill] sm:$0xff] }
 0x1fe   : > { %v2430_v0 = vadd.f32 %v2366_v47, %v6378_v56  ;;  %v2533_v30 = vadd.f32 %v2532_v16, %v5548_v15  ;;  %v2387_v40 = vadd.f32 %v3995_v17, %v3817_v1  ;;  %v5568_v25 = vadd.f32 %v5401_v29, %v2432_v51 }
 0x1ff   : > { %v3822_v63 = vpop.f32.mrf.mxu0  ;;  %v2378_v52 = vpop.f32.mrf.mxu1 }
 0x200   : > { %v5558_v39 = vadd.f32 %v5401_v29, %v2430_v0  ;;  %v2379_v2 = vadd.f32 %v3811_v11, %v2378_v52  ;;  %v2534_v49 = vadd.f32 %v2533_v30, %v5554_v48  ;;  %v3823_v46 = vadd.f32 %v3822_v63, %v3821_v8  ;;  %v6383_v0 = vld [vmem:[#allocation14_spill] sm:$0xff] }
 0x201   : > { %v3824_v10 = vpop.f32.mrf.mxu0  ;;  %v3996_v37 = vpop.f32.mrf.mxu1  ;;  %v2435_v6 = vadd.f32 %v2387_v40, %v6382_v21 }
 0x202   : > { %v2535_v61 = vadd.f32 %v2534_v49, %v5558_v39  ;;  %v2433_v18 = vadd.f32 %v2379_v2, %v6380_v12  ;;  %v2390_v19 = vadd.f32 %v3996_v37, %v3820_v58 }
 0x203   : > { %v3825_v54 = vpop.f32.mrf.mxu0  ;;  %v2381_v20 = vpop.f32.mrf.mxu1  ;;  %v2509_v63 = vadd.f32 %v5401_v29, %v2435_v6 }
 0x204   : > { %v2382_v24 = vadd.f32 %v3814_v14, %v2381_v20  ;;  %v2536_v9 = vadd.f32 %v2535_v61, %v5563_v60  ;;  %v2507_v47 = vadd.f32 %v5401_v29, %v2433_v18  ;;  %v2436_v30 = vadd.f32 %v2390_v19, %v6383_v0  ;;  %v6385_v20 = vld [vmem:[#allocation16_spill] sm:$0xff] }
 0x205   : > { %v3827_v7 = vpop.f32.mrf.mxu0  ;;  %v3999_v23 = vpop.f32.mrf.mxu1  ;;  %v3826_v8 = vadd.f32 %v3825_v54, %v3824_v10 }
 0x206   : > { %v2434_v36 = vadd.f32 %v2382_v24, %v6381_v13  ;;  %v2537_v16 = vadd.f32 %v2536_v9, %v5568_v25  ;;  %v2510_v40 = vadd.f32 %v5401_v29, %v2436_v30 }
 0x207   : > { %v3828_v41 = vpop.f32.mrf.mxu0  ;;  %v2394_v17 = vpop.f32.mrf.mxu1 }
 0x208   : > { %v2508_v11 = vadd.f32 %v5401_v29, %v2434_v36  ;;  %v3829_v5 = vadd.f32 %v3828_v41, %v3827_v7  ;;  %v2395_v22 = vadd.f32 %v3823_v46, %v2394_v17  ;;  %v2538_v56 = vadd.f32 %v2537_v16, %v2507_v47 }
 0x209   : > { %v3830_v52 = vpop.f32.mrf.mxu0  ;;  %v4000_v2 = vpop.f32.mrf.mxu1 }
 0x20a   : > { %v2539_v1 = vadd.f32 %v2538_v56, %v2508_v11  ;;  %v2403_v49 = vadd.f32 %v3999_v23, %v3829_v5  ;;  %v2437_v51 = vadd.f32 %v2395_v22, %v6384_v32  ;;  %v6386_v23 = vld [vmem:[#allocation17_spill] sm:$0xff] }
 0x20b   : > { %v3831_v37 = vpop.f32.mrf.mxu0  ;;  %v2397_v14 = vpop.f32.mrf.mxu1 }
 0x20c   : > { %v3832_v58 = vadd.f32 %v3831_v37, %v3830_v52  ;;  %v2398_v61 = vadd.f32 %v3826_v8, %v2397_v14  ;;  %v2540_v12 = vadd.f32 %v2539_v1, %v2509_v63  ;;  %v2439_v9 = vadd.f32 %v2403_v49, %v5370_v38 }
 0x20d   : > { %v2511_v10 = vadd.f32 %v5401_v29, %v2437_v51 }
 0x20e   : > { %v2406_v18 = vadd.f32 %v4000_v2, %v3832_v58  ;;  %v2438_v24 = vadd.f32 %v2398_v61, %v6385_v20  ;;  %v2541_v54 = vadd.f32 %v2540_v12, %v2510_v40  ;;  %v2513_v13 = vadd.f32 %v5401_v29, %v2439_v9 }
 0x210   : > { %v2512_v19 = vadd.f32 %v5401_v29, %v2438_v24  ;;  %v2542_v7 = vadd.f32 %v2541_v54, %v2511_v10  ;;  %v2440_v46 = vadd.f32 %v2406_v18, %v6386_v23 }
 0x212   : > { %v2543_v36 = vadd.f32 %v2542_v7, %v2512_v19  ;;  %v2514_v21 = vadd.f32 %v5401_v29, %v2440_v46 }
 0x214   : > { %v2544_v6 = vadd.f32 %v2543_v36, %v2513_v13 }
 0x216   : > { %v2545_v16 = vadd.f32 %v2544_v6, %v2514_v21 }
 0x218   : > { %v2546_v41 = vrot.slane %v2545_v16, 4 }
 0x21a   : > { %v2547_v17 = vadd.f32 %v2546_v41, %v2545_v16 }
 0x21c   : > { %v2548_v5 = vrot.slane %v2547_v17, 2 }
 0x21e   : > { %v2549_v22 = vadd.f32 %v2548_v5, %v2547_v17 }
 0x220   : > { %v2550_v38 = vrot.slane %v2549_v22, 1 }
 0x222   : > { %v2551_v56 = vadd.f32 %v2550_v38, %v2549_v22 }
 0x224   : > { %v2552_v0 = vmul.f32 0.00390625, %v2551_v56 }
 0x226   : > { %v5588_v30 = vsub.f32 %v5475_v35, %v2552_v0  ;;  %v5591_v52 = vsub.f32 %v5479_v26, %v2552_v0  ;;  %v5594_v2 = vsub.f32 %v5490_v55, %v2552_v0  ;;  %v5597_v29 = vsub.f32 %v5495_v28, %v2552_v0 }
 0x227   : > { %v5600_v8 = vsub.f32 %v5503_v44, %v2552_v0  ;;  %v5603_v1 = vsub.f32 %v5507_v50, %v2552_v0  ;;  %v5606_v49 = vsub.f32 %v5518_v42, %v2552_v0  ;;  %v5609_v35 = vsub.f32 %v5523_v45, %v2552_v0 }
 0x228   : > { %v5612_v26 = vsub.f32 %v5531_v62, %v2552_v0  ;;  %v5615_v55 = vsub.f32 %v5536_v34, %v2552_v0  ;;  %v5618_v28 = vsub.f32 %v5543_v43, %v2552_v0  ;;  %v5621_v44 = vsub.f32 %v5548_v15, %v2552_v0 }
 0x229   : > { %v5624_v50 = vsub.f32 %v5554_v48, %v2552_v0  ;;  %v5627_v42 = vsub.f32 %v5558_v39, %v2552_v0  ;;  %v5630_v45 = vsub.f32 %v5563_v60, %v2552_v0  ;;  %v5633_v62 = vsub.f32 %v5568_v25, %v2552_v0 }
 0x22a   : > { %v5635_v34 = vsub.f32 %v2507_v47, %v2552_v0  ;;  %v5637_v32 = vsub.f32 %v2508_v11, %v2552_v0  ;;  %v5639_v43 = vsub.f32 %v2509_v63, %v2552_v0  ;;  %v5641_v15 = vsub.f32 %v2510_v40, %v2552_v0 }
 0x22b   : > { %v5643_v51 = vsub.f32 %v2511_v10, %v2552_v0  ;;  %v5645_v48 = vsub.f32 %v2512_v19, %v2552_v0  ;;  %v5647_v39 = vsub.f32 %v2513_v13, %v2552_v0  ;;  %v5649_v37 = vsub.f32 %v2514_v21, %v2552_v0 }
 0x22c   : > { %v5652_v60 = vsub.f32 %v5406_v3, %v2552_v0  ;;  %v5655_v25 = vsub.f32 %v5410_v27, %v2552_v0  ;;  %v5658_v47 = vsub.f32 %v5417_v53, %v2552_v0  ;;  %v5665_v14 = vsub.f32 %v5429_v31, %v2552_v0 }
 0x22d   : > { %v5668_v58 = vsub.f32 %v5437_v4, %v2552_v0  ;;  %v5673_v61 = vsub.f32 %v5449_v59, %v2552_v0  ;;  %v5678_v12 = vsub.f32 %v5458_v33, %v2552_v0  ;;  %v5683_v4 = vsub.f32 %v5465_v57, %v2552_v0 }
 0x22e   : > { %v2585_v11 = vmul.f32 %v5652_v60, %v5652_v60  ;;  %v2586_v63 = vmul.f32 %v5655_v25, %v5655_v25  ;;  %v2587_v3 = vmul.f32 %v5658_v47, %v5658_v47  ;;  %v2588_v53 = vmul.f32 %v5665_v14, %v5665_v14 }
 0x22f   : > { %v2589_v31 = vmul.f32 %v5668_v58, %v5668_v58  ;;  %v2590_v20 = vmul.f32 %v5673_v61, %v5673_v61  ;;  %v2591_v59 = vmul.f32 %v5678_v12, %v5678_v12  ;;  %v2592_v10 = vmul.f32 %v5683_v4, %v5683_v4 }
 0x230   : > { %v2617_v27 = vadd.f32 %v2586_v63, %v2585_v11  ;;  %v2593_v54 = vmul.f32 %v5588_v30, %v5588_v30  ;;  %v2594_v57 = vmul.f32 %v5591_v52, %v5591_v52  ;;  %v2595_v23 = vmul.f32 %v5594_v2, %v5594_v2 }
 0x231   : > { %v2596_v13 = vmul.f32 %v5597_v29, %v5597_v29  ;;  %v2597_v21 = vmul.f32 %v5600_v8, %v5600_v8  ;;  %v2598_v16 = vmul.f32 %v5603_v1, %v5603_v1  ;;  %v2599_v17 = vmul.f32 %v5606_v49, %v5606_v49 }
 0x232   : > { %v2618_v40 = vadd.f32 %v2617_v27, %v2587_v3  ;;  %v2600_v22 = vmul.f32 %v5609_v35, %v5609_v35  ;;  %v2601_v56 = vmul.f32 %v5612_v26, %v5612_v26  ;;  %v2602_v11 = vmul.f32 %v5615_v55, %v5615_v55 }
 0x233   : > { %v2603_v3 = vmul.f32 %v5618_v28, %v5618_v28 }
 0x234   : > { %v2619_v18 = vadd.f32 %v2618_v40, %v2588_v53  ;;  %v2604_v53 = vmul.f32 %v5621_v44, %v5621_v44 }
 0x236   : > { %v2620_v24 = vadd.f32 %v2619_v18, %v2589_v31  ;;  %v2605_v31 = vmul.f32 %v5624_v50, %v5624_v50 }
 0x238   : > { %v2621_v9 = vadd.f32 %v2620_v24, %v2590_v20  ;;  %v2606_v20 = vmul.f32 %v5627_v42, %v5627_v42 }
 0x23a   : > { %v2622_v33 = vadd.f32 %v2621_v9, %v2591_v59  ;;  %v2607_v59 = vmul.f32 %v5630_v45, %v5630_v45 }
 0x23c   : > { %v2623_v19 = vadd.f32 %v2622_v33, %v2592_v10  ;;  %v2608_v10 = vmul.f32 %v5633_v62, %v5633_v62 }
 0x23e   : > { %v2624_v7 = vadd.f32 %v2623_v19, %v2593_v54  ;;  %v2609_v54 = vmul.f32 %v5635_v34, %v5635_v34 }
 0x240   : > { %v2625_v46 = vadd.f32 %v2624_v7, %v2594_v57  ;;  %v2610_v57 = vmul.f32 %v5637_v32, %v5637_v32 }
 0x242   : > { %v2626_v36 = vadd.f32 %v2625_v46, %v2595_v23  ;;  %v2611_v23 = vmul.f32 %v5639_v43, %v5639_v43 }
 0x244   : > { %v2627_v6 = vadd.f32 %v2626_v36, %v2596_v13  ;;  %v2612_v13 = vmul.f32 %v5641_v15, %v5641_v15 }
 0x246   : > { %v2628_v41 = vadd.f32 %v2627_v6, %v2597_v21  ;;  %v2613_v21 = vmul.f32 %v5643_v51, %v5643_v51 }
 0x248   : > { %v2629_v5 = vadd.f32 %v2628_v41, %v2598_v16  ;;  %v2614_v16 = vmul.f32 %v5645_v48, %v5645_v48 }
 0x24a   : > { %v2630_v38 = vadd.f32 %v2629_v5, %v2599_v17  ;;  %v2615_v17 = vmul.f32 %v5647_v39, %v5647_v39 }
 0x24c   : > { %v2631_v0 = vadd.f32 %v2630_v38, %v2600_v22  ;;  %v2616_v22 = vmul.f32 %v5649_v37, %v5649_v37 }
 0x24e   : > { %v2632_v63 = vadd.f32 %v2631_v0, %v2601_v56 }
 0x250   : > { %v2633_v27 = vadd.f32 %v2632_v63, %v2602_v11 }
 0x252   : > { %v2634_v40 = vadd.f32 %v2633_v27, %v2603_v3 }
 0x254   : > { %v2635_v18 = vadd.f32 %v2634_v40, %v2604_v53 }
 0x256   : > { %v2636_v24 = vadd.f32 %v2635_v18, %v2605_v31  ;;  %v2980_v18 = vlaneseq }
 0x258   : > { %v2637_v9 = vadd.f32 %v2636_v24, %v2606_v20  ;;  %v5743_v20 = vshrl.u32 %v2980_v18, 7 }
 0x25a   : > { %v2638_v33 = vadd.f32 %v2637_v9, %v2607_v59  ;;  %v2977_v59 = vld [vmem:[%s343_s30] sm:$0x1] }
 0x25b   : > { %v5745_v9 = vadd.f32 1.0, %v2977_v59 }
 0x25c   : > { %v2639_v19 = vadd.f32 %v2638_v33, %v2608_v10 }
 0x25e   : > { %v2640_v7 = vadd.f32 %v2639_v19, %v2609_v54 }
 0x260   : > { %v2641_v46 = vadd.f32 %v2640_v7, %v2610_v57 }
 0x262   : > { %v2642_v36 = vadd.f32 %v2641_v46, %v2611_v23 }
 0x264   : > { %v2643_v6 = vadd.f32 %v2642_v36, %v2612_v13 }
 0x266   : > { %v2644_v41 = vadd.f32 %v2643_v6, %v2613_v21 }
 0x268   : > { %v2645_v5 = vadd.f32 %v2644_v41, %v2614_v16 }
 0x26a   : > { %v2646_v38 = vadd.f32 %v2645_v5, %v2615_v17 }
 0x26c   : > { %v2647_v56 = vadd.f32 %v2646_v38, %v2616_v22 }
 0x26e   : > { %v2648_v0 = vrot.slane %v2647_v56, 4 }
 0x270   : > { %v2649_v11 = vadd.f32 %v2648_v0, %v2647_v56 }
 0x272   : > { %v2650_v63 = vrot.slane %v2649_v11, 2 }
 0x274   : > { %v2651_v3 = vadd.f32 %v2650_v63, %v2649_v11 }
 0x276   : > { %v2652_v27 = vrot.slane %v2651_v3, 1 }
 0x278   : > { %v2653_v53 = vadd.f32 %v2652_v27, %v2651_v3 }
 0x27a   : > { %v2654_v40 = vmul.f32 0.00390625, %v2653_v53 }
 0x27c   : > { %v2655_v31 = vadd.f32 1e-05, %v2654_v40 }
 0x27e   : > { %4145 = vrsqrt.f32 %v2655_v31 }
 0x28b   : > { %v4146_v24 = vpop.eup %4145 }
 0x28c   : > { %v5749_v33 = vmul.f32 %v4146_v24, %v5652_v60  ;;  %v5752_v54 = vmul.f32 %v4146_v24, %v5655_v25  ;;  %v5755_v19 = vmul.f32 %v4146_v24, %v5658_v47  ;;  %v5758_v57 = vmul.f32 %v4146_v24, %v5637_v32 }
 0x28d   : > { %v5761_v7 = vmul.f32 %v4146_v24, %v5639_v43  ;;  %v5764_v23 = vmul.f32 %v4146_v24, %v5641_v15  ;;  %v5767_v46 = vmul.f32 %v4146_v24, %v5643_v51  ;;  %v5770_v60 = vmul.f32 %v4146_v24, %v5645_v48 }
 0x28e   : > { %6387 = vst [vmem:[#allocation3_spill] sm:$0xff] %v5749_v33  ;;  %6388 = vst [vmem:[#allocation4_spill] sm:$0xff] %v5752_v54  ;;  %v5773_v25 = vmul.f32 %v4146_v24, %v5647_v39  ;;  %v5776_v47 = vmul.f32 %v4146_v24, %v5649_v37  ;;  %v5779_v32 = vmul.f32 %v4146_v24, %v5665_v14  ;;  %v5920_v31 = vmul.f32 0.5, %v5758_v57 }
 0x28f   : > { %6389 = vst [vmem:[#allocation5_spill] sm:$0xff] %v5755_v19  ;;  %6390 = vst [vmem:[#allocation6_spill] sm:$0xff] %v5758_v57  ;;  %v5782_v43 = vmul.f32 %v4146_v24, %v5668_v58  ;;  %v5785_v15 = vmul.f32 %v4146_v24, %v5673_v61  ;;  %v5788_v51 = vmul.f32 %v4146_v24, %v5678_v12  ;;  %v5923_v18 = vmul.f32 0.5, %v5761_v7 }
 0x290   : > { %6391 = vst [vmem:[#allocation7_spill] sm:$0xff] %v5761_v7  ;;  %6392 = vst [vmem:[#allocation9_spill] sm:$0xff] %v5764_v23  ;;  %v5791_v48 = vmul.f32 %v4146_v24, %v5683_v4  ;;  %v5794_v39 = vmul.f32 %v4146_v24, %v5588_v30  ;;  %v5797_v37 = vmul.f32 %v4146_v24, %v5591_v52  ;;  %v5929_v59 = vmul.f32 0.5, %v5767_v46 }
 0x291   : > { %6393 = vst [vmem:[#allocation8_spill] sm:$0xff] %v5767_v46  ;;  %6394 = vst [vmem:[#allocation10_spill] sm:$0xff] %v5770_v60  ;;  %v5800_v14 = vmul.f32 %v4146_v24, %v5594_v2  ;;  %v5803_v58 = vmul.f32 %v4146_v24, %v5597_v29  ;;  %v5806_v61 = vmul.f32 %v4146_v24, %v5600_v8  ;;  %v2721_v10 = vmul.f32 0.044715, %v5749_v33 }
 0x292   : > { %6395 = vst [vmem:[#allocation11_spill] sm:$0xff] %v5773_v25  ;;  %6396 = vst [vmem:[#allocation12_spill] sm:$0xff] %v5776_v47  ;;  %v5809_v12 = vmul.f32 %v4146_v24, %v5603_v1  ;;  %v5812_v4 = vmul.f32 %v4146_v24, %v5606_v49  ;;  %v5815_v30 = vmul.f32 %v4146_v24, %v5609_v35  ;;  %v5866_v13 = vmul.f32 0.5, %v5791_v48 }
 0x293   : > { %6397 = vst [vmem:[#allocation13_spill] sm:$0xff] %v5779_v32  ;;  %6398 = vst [vmem:[#allocation14_spill] sm:$0xff] %v5782_v43  ;;  %v5818_v52 = vmul.f32 %v4146_v24, %v5612_v26  ;;  %v5821_v2 = vmul.f32 %v4146_v24, %v5615_v55  ;;  %v5824_v29 = vmul.f32 %v4146_v24, %v5618_v28  ;;  %v5845_v28 = vmul.f32 0.5, %v5749_v33 }
 0x294   : > { %6399 = vst [vmem:[#allocation15_spill] sm:$0xff] %v5785_v15  ;;  %6400 = vst [vmem:[#allocation16_spill] sm:$0xff] %v5788_v51  ;;  %v5827_v8 = vmul.f32 %v4146_v24, %v5621_v44  ;;  %v5830_v1 = vmul.f32 %v4146_v24, %v5624_v50  ;;  %v5833_v49 = vmul.f32 %v4146_v24, %v5627_v42  ;;  %v5848_v44 = vmul.f32 0.5, %v5752_v54 }
 0x295   : > { %6401 = vst [vmem:[#allocation17_spill] sm:$0xff] %v5794_v39  ;;  %6402 = vst [vmem:[#allocation18_spill] sm:$0xff] %v5797_v37  ;;  %v5836_v35 = vmul.f32 %v4146_v24, %v5630_v45  ;;  %v5839_v26 = vmul.f32 %v4146_v24, %v5633_v62  ;;  %v5842_v55 = vmul.f32 %v4146_v24, %v5635_v34  ;;  %v5851_v50 = vmul.f32 0.5, %v5755_v19 }
 0x296   : > { %6403 = vst [vmem:[#allocation19_spill] sm:$0xff] %v5800_v14  ;;  %6404 = vst [vmem:[#allocation20_spill] sm:$0xff] %v5803_v58  ;;  %v5854_v42 = vmul.f32 0.5, %v5779_v32  ;;  %v5857_v45 = vmul.f32 0.5, %v5782_v43  ;;  %v5860_v62 = vmul.f32 0.5, %v5785_v15  ;;  %v5863_v34 = vmul.f32 0.5, %v5788_v51 }
 0x297   : > { %6405 = vst [vmem:[#allocation21_spill] sm:$0xff] %v5806_v61  ;;  %6406 = vst [vmem:[#allocation22_spill] sm:$0xff] %v5809_v12  ;;  %v5869_v36 = vmul.f32 0.5, %v5794_v39  ;;  %v5872_v21 = vmul.f32 0.5, %v5797_v37  ;;  %v5875_v6 = vmul.f32 0.5, %v5800_v14  ;;  %v5878_v16 = vmul.f32 0.5, %v5803_v58 }
 0x298   : > { %6407 = vst [vmem:[#allocation23_spill] sm:$0xff] %v5812_v4  ;;  %6408 = vst [vmem:[#allocation24_spill] sm:$0xff] %v5821_v2  ;;  %v5881_v41 = vmul.f32 0.5, %v5806_v61  ;;  %v5884_v17 = vmul.f32 0.5, %v5809_v12  ;;  %v5887_v5 = vmul.f32 0.5, %v5812_v4  ;;  %v5890_v22 = vmul.f32 0.5, %v5815_v30 }
 0x299   : > { %6409 = vst [vmem:[#allocation25_spill] sm:$0xff] %v5824_v29  ;;  %6410 = vst [vmem:[#allocation26_spill] sm:$0xff] %v5827_v8  ;;  %v5893_v38 = vmul.f32 0.5, %v5818_v52  ;;  %v5896_v56 = vmul.f32 0.5, %v5821_v2  ;;  %v5899_v0 = vmul.f32 0.5, %v5824_v29  ;;  %v5902_v11 = vmul.f32 0.5, %v5827_v8 }
 0x29a   : > { %6411 = vst [vmem:[#allocation27_spill] sm:$0xff] %v5830_v1  ;;  %6412 = vst [vmem:[#allocation28_spill] sm:$0xff] %v5833_v49  ;;  %v5905_v63 = vmul.f32 0.5, %v5830_v1  ;;  %v5908_v3 = vmul.f32 0.5, %v5833_v49  ;;  %v5911_v27 = vmul.f32 0.5, %v5836_v35  ;;  %v5914_v53 = vmul.f32 0.5, %v5839_v26 }
 0x29b   : > { %6413 = vst [vmem:[#allocation29_spill] sm:$0xff] %v5836_v35  ;;  %6414 = vst [vmem:[#allocation30_spill] sm:$0xff] %v5839_v26  ;;  %v5917_v40 = vmul.f32 0.5, %v5842_v55  ;;  %v5926_v24 = vmul.f32 0.5, %v5764_v23 }
 0x29c   : > { %6415 = vst [vmem:[#allocation31_spill] sm:$0xff] %v5842_v55  ;;  %6416 = vst [vmem:[#allocation32_spill] sm:$0xff] %v5845_v28 }
 0x29d   : > { %6417 = vst [vmem:[#allocation33_spill] sm:$0xff] %v5848_v44  ;;  %6418 = vst [vmem:[#allocation34_spill] sm:$0xff] %v5851_v50  ;;  %v2747_v50 = vmul.f32 0.044715, %v5761_v7  ;;  %v2749_v44 = vmul.f32 0.044715, %v5767_v46 }
 0x29e   : > { %6419 = vst [vmem:[#allocation35_spill] sm:$0xff] %v5854_v42  ;;  %6420 = vst [vmem:[#allocation36_spill] sm:$0xff] %v5857_v45  ;;  %v2744_v45 = vmul.f32 0.044715, %v5839_v26  ;;  %v2746_v42 = vmul.f32 0.044715, %v5758_v57 }
 0x29f   : > { %6421 = vst [vmem:[#allocation37_spill] sm:$0xff] %v5860_v62  ;;  %6422 = vst [vmem:[#allocation38_spill] sm:$0xff] %v5863_v34  ;;  %v2743_v34 = vmul.f32 0.044715, %v5836_v35 }
 0x2a0   : > { %6423 = vst [vmem:[#allocation39_spill] sm:$0xff] %v5866_v13  ;;  %6424 = vst [vmem:[#allocation40_spill] sm:$0xff] %v5869_v36  ;;  %v2741_v13 = vmul.f32 0.044715, %v5830_v1 }
 0x2a1   : > { %6425 = vst [vmem:[#allocation41_spill] sm:$0xff] %v5872_v21  ;;  %6426 = vst [vmem:[#allocation42_spill] sm:$0xff] %v5875_v6  ;;  %v2738_v6 = vmul.f32 0.044715, %v5821_v2  ;;  %v2740_v21 = vmul.f32 0.044715, %v5827_v8 }
 0x2a2   : > { %6427 = vst [vmem:[#allocation43_spill] sm:$0xff] %v5878_v16  ;;  %6428 = vst [vmem:[#allocation44_spill] sm:$0xff] %v5881_v41  ;;  %v2737_v41 = vmul.f32 0.044715, %v5818_v52 }
 0x2a3   : > { %6429 = vst [vmem:[#allocation45_spill] sm:$0xff] %v5884_v17  ;;  %6430 = vst [vmem:[#allocation46_spill] sm:$0xff] %v5887_v5  ;;  %v2735_v5 = vmul.f32 0.044715, %v5812_v4  ;;  %v2736_v17 = vmul.f32 0.044715, %v5815_v30 }
 0x2a4   : > { %6431 = vst [vmem:[#allocation47_spill] sm:$0xff] %v5890_v22  ;;  %6432 = vst [vmem:[#allocation48_spill] sm:$0xff] %v5893_v38  ;;  %v2753_v38 = vmul.f32 %v2721_v10, %v5749_v33  ;;  %v2732_v22 = vmul.f32 0.044715, %v5803_v58  ;;  %v2739_v10 = vmul.f32 0.044715, %v5824_v29 }
 0x2a5   : > { %6433 = vst [vmem:[#allocation49_spill] sm:$0xff] %v5896_v56  ;;  %6434 = vst [vmem:[#allocation50_spill] sm:$0xff] %v5899_v0  ;;  %v2730_v0 = vmul.f32 0.044715, %v5797_v37  ;;  %v2731_v56 = vmul.f32 0.044715, %v5800_v14 }
 0x2a6   : > { %6435 = vst [vmem:[#allocation51_spill] sm:$0xff] %v5902_v11  ;;  %6436 = vst [vmem:[#allocation52_spill] sm:$0xff] %v5905_v63  ;;  %v2728_v11 = vmul.f32 0.044715, %v5791_v48  ;;  %v2764_v33 = vmul.f32 %v2732_v22, %v5803_v58 }
 0x2a7   : > { %6437 = vst [vmem:[#allocation53_spill] sm:$0xff] %v5908_v3  ;;  %6438 = vst [vmem:[#allocation54_spill] sm:$0xff] %v5911_v27  ;;  %v5933_v27 = vmul.f32 0.5, %v5770_v60  ;;  %v2725_v3 = vmul.f32 0.044715, %v5782_v43 }
 0x2a8   : > { %6439 = vst [vmem:[#allocation55_spill] sm:$0xff] %v5914_v53  ;;  %6440 = vst [vmem:[#allocation56_spill] sm:$0xff] %v5917_v40  ;;  %v5936_v53 = vmul.f32 0.5, %v5773_v25  ;;  %v5939_v40 = vmul.f32 0.5, %v5776_v47 }
 0x2a9   : > { %6441 = vst [vmem:[#allocation57_spill] sm:$0xff] %v5920_v31  ;;  %6442 = vst [vmem:[#allocation58_spill] sm:$0xff] %v5923_v18  ;;  %v2722_v31 = vmul.f32 0.044715, %v5752_v54  ;;  %v2723_v18 = vmul.f32 0.044715, %v5755_v19  ;;  %v2757_v62 = vmul.f32 %v2725_v3, %v5782_v43 }
 0x2aa   : > { %6443 = vst [vmem:[#allocation59_spill] sm:$0xff] %v5926_v24  ;;  %6444 = vst [vmem:[#allocation60_spill] sm:$0xff] %v5929_v59  ;;  %v2724_v24 = vmul.f32 0.044715, %v5779_v32  ;;  %v6448_v59 = vsub.s32 0, %v5743_v20 }
 0x2ab   : > { %6445 = vst [vmem:[#allocation61_spill] sm:$0xff] %v5933_v27  ;;  %6446 = vst [vmem:[#allocation62_spill] sm:$0xff] %v5936_v53  ;;  %v2726_v27 = vmul.f32 0.044715, %v5785_v15  ;;  %v2727_v53 = vmul.f32 0.044715, %v5788_v51  ;;  %v2755_v16 = vmul.f32 %v2723_v18, %v5755_v19  ;;  %v2760_v19 = vmul.f32 %v2728_v11, %v5791_v48 }
 0x2ac   : > { %6447 = vst [vmem:[#allocation63_spill] sm:$0xff] %v5939_v40  ;;  %v5948_v63 = vrot.slane %v5745_v9, %v6448_v59  ;;  %v2729_v40 = vmul.f32 0.044715, %v5794_v39  ;;  %v2733_v20 = vmul.f32 0.044715, %v5806_v61  ;;  %v2754_v59 = vmul.f32 %v2722_v31, %v5752_v54 }
 0x2ad   : > { %v2734_v9 = vmul.f32 0.044715, %v5809_v12  ;;  %v2756_v36 = vmul.f32 %v2724_v24, %v5779_v32  ;;  %v2742_v31 = vmul.f32 0.044715, %v5833_v49  ;;  %v2745_v18 = vmul.f32 0.044715, %v5842_v55 }
 0x2ae   : > { %6449 = vst [vmem:[#allocation64_spill] sm:$0xff] %v5948_v63  ;;  %v2758_v63 = vmul.f32 %v2726_v27, %v5785_v15  ;;  %v2748_v24 = vmul.f32 0.044715, %v5764_v23  ;;  %v2759_v28 = vmul.f32 %v2727_v53, %v5788_v51  ;;  %v2750_v32 = vmul.f32 0.044715, %v5770_v60 }
 0x2af   : > { %v2751_v3 = vmul.f32 0.044715, %v5773_v25  ;;  %v2752_v43 = vmul.f32 0.044715, %v5776_v47  ;;  %v2761_v54 = vmul.f32 %v2729_v40, %v5794_v39  ;;  %v2762_v27 = vmul.f32 %v2730_v0, %v5797_v37 }
 0x2b0   : > { %v2763_v15 = vmul.f32 %v2731_v56, %v5800_v14  ;;  %v2765_v46 = vmul.f32 %v2733_v20, %v5806_v61  ;;  %v2766_v53 = vmul.f32 %v2734_v9, %v5809_v12  ;;  %v2767_v51 = vmul.f32 %v2735_v5, %v5812_v4 }
 0x2b1   : > { %v2768_v25 = vmul.f32 %v2736_v17, %v5815_v30  ;;  %v2769_v47 = vmul.f32 %v2737_v41, %v5818_v52  ;;  %v2770_v11 = vmul.f32 %v2738_v6, %v5821_v2  ;;  %v2771_v40 = vmul.f32 %v2739_v10, %v5824_v29  ;;  %v6450_v2 = vld [vmem:[#allocation8_spill] sm:$0xff] }
 0x2b2   : > { %v2772_v0 = vmul.f32 %v2740_v21, %v5827_v8  ;;  %v2773_v56 = vmul.f32 %v2741_v13, %v5830_v1  ;;  %v2774_v22 = vmul.f32 %v2742_v31, %v5833_v49  ;;  %v2775_v20 = vmul.f32 %v2743_v34, %v5836_v35  ;;  %v6451_v8 = vld [vmem:[#allocation11_spill] sm:$0xff]  ;;  %v6452_v1 = vld [vmem:[#allocation12_spill] sm:$0xff] }
 0x2b3   : > { %v2776_v9 = vmul.f32 %v2744_v45, %v5839_v26  ;;  %v2777_v5 = vmul.f32 %v2745_v18, %v5842_v55  ;;  %v2778_v17 = vmul.f32 %v2746_v42, %v5758_v57  ;;  %v2779_v41 = vmul.f32 %v2747_v50, %v5761_v7  ;;  %v6453_v49 = vld [vmem:[#allocation3_spill] sm:$0xff]  ;;  %v6454_v35 = vld [vmem:[#allocation4_spill] sm:$0xff]  ;;  %v6455_v26 = vld [vmem:[#allocation5_spill] sm:$0xff] }
 0x2b4   : > { %v2780_v6 = vmul.f32 %v2748_v24, %v5764_v23  ;;  %v2781_v10 = vmul.f32 %v2749_v44, %v6450_v2  ;;  %v2782_v21 = vmul.f32 %v2750_v32, %v5770_v60  ;;  %v2783_v13 = vmul.f32 %v2751_v3, %v6451_v8  ;;  %v6456_v55 = vld [vmem:[#allocation13_spill] sm:$0xff]  ;;  %v6457_v57 = vld [vmem:[#allocation14_spill] sm:$0xff]  ;;  %v6458_v7 = vld [vmem:[#allocation15_spill] sm:$0xff] }
 0x2b5   : > { %v2784_v31 = vmul.f32 %v2752_v43, %v6452_v1  ;;  %v2785_v34 = vmul.f32 %v2753_v38, %v6453_v49  ;;  %v2786_v45 = vmul.f32 %v2754_v59, %v6454_v35  ;;  %v2787_v18 = vmul.f32 %v2755_v16, %v6455_v26  ;;  %v6459_v23 = vld [vmem:[#allocation16_spill] sm:$0xff] }
 0x2b6   : > { %v2788_v42 = vmul.f32 %v2756_v36, %v6456_v55  ;;  %v2789_v50 = vmul.f32 %v2757_v62, %v6457_v57  ;;  %v2790_v24 = vmul.f32 %v2758_v63, %v6458_v7  ;;  %v2791_v44 = vmul.f32 %v2759_v28, %v6459_v23  ;;  %v6460_v23 = vld [vmem:[#allocation24_spill] sm:$0xff] }
 0x2b7   : > { %v2792_v32 = vmul.f32 %v2760_v19, %v5791_v48  ;;  %v2793_v3 = vmul.f32 %v2761_v54, %v5794_v39  ;;  %v2794_v43 = vmul.f32 %v2762_v27, %v5797_v37  ;;  %v2795_v38 = vmul.f32 %v2763_v15, %v5800_v14  ;;  %v6461_v39 = vld [vmem:[#allocation26_spill] sm:$0xff]  ;;  %v6462_v37 = vld [vmem:[#allocation27_spill] sm:$0xff]  ;;  %v6463_v14 = vld [vmem:[#allocation28_spill] sm:$0xff] }
 0x2b8   : > { %v2796_v59 = vmul.f32 %v2764_v33, %v5803_v58  ;;  %v2797_v16 = vmul.f32 %v2765_v46, %v5806_v61  ;;  %v2798_v36 = vmul.f32 %v2766_v53, %v5809_v12  ;;  %v2799_v62 = vmul.f32 %v2767_v51, %v5812_v4  ;;  %v6464_v58 = vld [vmem:[#allocation29_spill] sm:$0xff]  ;;  %v6465_v61 = vld [vmem:[#allocation30_spill] sm:$0xff]  ;;  %v6466_v12 = vld [vmem:[#allocation31_spill] sm:$0xff] }
 0x2b9   : > { %v2800_v63 = vmul.f32 %v2768_v25, %v5815_v30  ;;  %v2801_v28 = vmul.f32 %v2769_v47, %v5818_v52  ;;  %v2802_v19 = vmul.f32 %v2770_v11, %v6460_v23  ;;  %v2803_v54 = vmul.f32 %v2771_v40, %v5824_v29  ;;  %v6467_v4 = vld [vmem:[#allocation6_spill] sm:$0xff]  ;;  %v6468_v23 = vld [vmem:[#allocation7_spill] sm:$0xff]  ;;  %v6469_v29 = vld [vmem:[#allocation9_spill] sm:$0xff] }
 0x2ba   : > { %v2804_v27 = vmul.f32 %v2772_v0, %v6461_v39  ;;  %v2805_v15 = vmul.f32 %v2773_v56, %v6462_v37  ;;  %v2806_v33 = vmul.f32 %v2774_v22, %v6463_v14  ;;  %v2807_v46 = vmul.f32 %v2775_v20, %v6464_v58 }
 0x2bb   : > { %v2808_v53 = vmul.f32 %v2776_v9, %v6465_v61  ;;  %v2809_v51 = vmul.f32 %v2777_v5, %v6466_v12  ;;  %v2810_v25 = vmul.f32 %v2778_v17, %v6467_v4  ;;  %v2817_v47 = vadd.f32 %v2785_v34, %v6453_v49  ;;  %v6470_v34 = vld [vmem:[#allocation16_spill] sm:$0xff] }
 0x2bc   : > { %v2818_v11 = vadd.f32 %v2786_v45, %v6454_v35  ;;  %v2811_v40 = vmul.f32 %v2779_v41, %v6468_v23  ;;  %v2812_v0 = vmul.f32 %v2780_v6, %v6469_v29  ;;  %v2819_v56 = vadd.f32 %v2787_v18, %v6455_v26  ;;  %v6471_v45 = vld [vmem:[#allocation17_spill] sm:$0xff]  ;;  %v6472_v18 = vld [vmem:[#allocation18_spill] sm:$0xff] }
 0x2bd   : > { %v2820_v22 = vadd.f32 %v2788_v42, %v6456_v55  ;;  %v2813_v20 = vmul.f32 %v2781_v10, %v6450_v2  ;;  %v2814_v9 = vmul.f32 %v2782_v21, %v5770_v60  ;;  %v2815_v5 = vmul.f32 %v2783_v13, %v6451_v8  ;;  %v6473_v2 = vld [vmem:[#allocation19_spill] sm:$0xff]  ;;  %v6474_v60 = vld [vmem:[#allocation20_spill] sm:$0xff] }
 0x2be   : > { %v2821_v17 = vadd.f32 %v2789_v50, %v6457_v57  ;;  %v2816_v49 = vmul.f32 %v2784_v31, %v6452_v1  ;;  %v2822_v35 = vadd.f32 %v2790_v24, %v6458_v7  ;;  %v2823_v41 = vadd.f32 %v2791_v44, %v6470_v34  ;;  %v6475_v50 = vld [vmem:[#allocation21_spill] sm:$0xff]  ;;  %v6476_v1 = vld [vmem:[#allocation22_spill] sm:$0xff]  ;;  %v6477_v44 = vld [vmem:[#allocation23_spill] sm:$0xff] }
 0x2bf   : > { %v2824_v6 = vadd.f32 %v2792_v32, %v5791_v48  ;;  %v2825_v26 = vadd.f32 %v2793_v3, %v6471_v45  ;;  %v2826_v55 = vadd.f32 %v2794_v43, %v6472_v18  ;;  %v2849_v42 = vmul.f32 0.7978846, %v2817_v47  ;;  %v6478_v47 = vld [vmem:[#allocation24_spill] sm:$0xff] }
 0x2c0   : > { %v2850_v10 = vmul.f32 0.7978846, %v2818_v11  ;;  %v2827_v21 = vadd.f32 %v2795_v38, %v6473_v2  ;;  %v2828_v13 = vadd.f32 %v2796_v59, %v6474_v60  ;;  %v2851_v8 = vmul.f32 0.7978846, %v2819_v56  ;;  %v6479_v60 = vld [vmem:[#allocation25_spill] sm:$0xff] }
 0x2c1   : > { %v2852_v57 = vmul.f32 0.7978846, %v2820_v22  ;;  %v2829_v31 = vadd.f32 %v2797_v16, %v6475_v50  ;;  %v2830_v7 = vadd.f32 %v2798_v36, %v6476_v1  ;;  %v2853_v24 = vmul.f32 0.7978846, %v2821_v17 }
 0x2c2   : > { %4147 = vtanh.f32 %v2849_v42  ;;  %v2831_v48 = vadd.f32 %v2799_v62, %v6477_v44  ;;  %v2832_v32 = vadd.f32 %v2800_v63, %v5815_v30  ;;  %v2854_v3 = vmul.f32 0.7978846, %v2822_v35 }
 0x2c3   : > { %4149 = vtanh.f32 %v2850_v10  ;;  %v2833_v43 = vadd.f32 %v2801_v28, %v5818_v52  ;;  %v2834_v2 = vadd.f32 %v2802_v19, %v6478_v47  ;;  %v2855_v38 = vmul.f32 0.7978846, %v2823_v41  ;;  %v6487_v47 = vld [vmem:[#allocation64_spill] sm:$0xff] }
 0x2c4   : > { %4151 = vtanh.f32 %v2851_v8  ;;  %v2835_v59 = vadd.f32 %v2803_v54, %v6479_v60  ;;  %v2836_v16 = vadd.f32 %v2804_v27, %v6461_v39  ;;  %v2856_v11 = vmul.f32 0.7978846, %v2824_v6 }
 0x2c5   : > { %4153 = vtanh.f32 %v2852_v57  ;;  %v2837_v1 = vadd.f32 %v2805_v15, %v6462_v37  ;;  %v2838_v36 = vadd.f32 %v2806_v33, %v6463_v14  ;;  %v2857_v62 = vmul.f32 0.7978846, %v2825_v26  ;;  %v6480_v14 = vld [vmem:[#allocation8_spill] sm:$0xff]  ;;  %v6481_v15 = vld [vmem:[#allocation10_spill] sm:$0xff] }
 0x2c6   : > { %4155 = vtanh.f32 %v2853_v24  ;;  %v2839_v30 = vadd.f32 %v2807_v46, %v6464_v58  ;;  %v2840_v52 = vadd.f32 %v2808_v53, %v6465_v61  ;;  %v2858_v63 = vmul.f32 0.7978846, %v2826_v55  ;;  %v6482_v61 = vld [vmem:[#allocation11_spill] sm:$0xff]  ;;  %v6483_v53 = vld [vmem:[#allocation12_spill] sm:$0xff]  ;;  %v6485_v24 = vld [vmem:[#allocation33_spill] sm:$0xff] }
 0x2c7   : > { %4157 = vtanh.f32 %v2854_v3  ;;  %v2841_v8 = vadd.f32 %v2809_v51, %v6466_v12  ;;  %v2842_v28 = vadd.f32 %v2810_v25, %v6467_v4  ;;  %v2859_v19 = vmul.f32 0.7978846, %v2827_v21  ;;  %v6486_v3 = vld [vmem:[#allocation34_spill] sm:$0xff] }
 0x2c8   : > { %4159 = vtanh.f32 %v2855_v38  ;;  %v2843_v39 = vadd.f32 %v2811_v40, %v6468_v23  ;;  %v2844_v37 = vadd.f32 %v2812_v0, %v6469_v29  ;;  %v2860_v54 = vmul.f32 0.7978846, %v2828_v13  ;;  %v6484_v13 = vld [vmem:[#allocation32_spill] sm:$0xff] }
 0x2c9   : > { %4161 = vtanh.f32 %v2856_v11  ;;  %v2845_v27 = vadd.f32 %v2813_v20, %v6480_v14  ;;  %v2846_v58 = vadd.f32 %v2814_v9, %v6481_v15  ;;  %v2861_v33 = vmul.f32 0.7978846, %v2829_v31  ;;  %v6491_v14 = vld [vmem:[#allocation38_spill] sm:$0xff] }
 0x2ca   : > { %4163 = vtanh.f32 %v2857_v62  ;;  %v2847_v46 = vadd.f32 %v2815_v5, %v6482_v61  ;;  %v2848_v12 = vadd.f32 %v2816_v49, %v6483_v53  ;;  %v2862_v51 = vmul.f32 0.7978846, %v2830_v7  ;;  %v6489_v62 = vld [vmem:[#allocation36_spill] sm:$0xff]  ;;  %v6492_v61 = vld [vmem:[#allocation39_spill] sm:$0xff] }
 0x2cb   : > { %4165 = vtanh.f32 %v2858_v63  ;;  %v2863_v4 = vmul.f32 0.7978846, %v2831_v48  ;;  %v2864_v25 = vmul.f32 0.7978846, %v2832_v32  ;;  %v2865_v56 = vmul.f32 0.7978846, %v2833_v43 }
 0x2cc   : > { %4167 = vtanh.f32 %v2859_v19  ;;  %v2866_v23 = vmul.f32 0.7978846, %v2834_v2  ;;  %v2867_v29 = vmul.f32 0.7978846, %v2835_v59  ;;  %v2868_v40 = vmul.f32 0.7978846, %v2836_v16 }
 0x2cd   : > { %4169 = vtanh.f32 %v2860_v54  ;;  %v2869_v0 = vmul.f32 0.7978846, %v2837_v1  ;;  %v2870_v22 = vmul.f32 0.7978846, %v2838_v36  ;;  %v2871_v20 = vmul.f32 0.7978846, %v2839_v30 }
 0x2ce   : > { %4171 = vtanh.f32 %v2861_v33  ;;  %v2872_v17 = vmul.f32 0.7978846, %v2840_v52  ;;  %v2873_v35 = vmul.f32 0.7978846, %v2841_v8  ;;  %v2874_v5 = vmul.f32 0.7978846, %v2842_v28 }
 0x2cf   : > { %v4148_v9 = vpop.eup %4147  ;;  %4173 = vtanh.f32 %v2862_v51  ;;  %v2875_v34 = vmul.f32 0.7978846, %v2843_v39  ;;  %v6073_v41 = vmul.f32 0.7978846, %v2844_v37  ;;  %v6075_v26 = vmul.f32 0.7978846, %v2845_v27 }
 0x2d0   : > { %v4150_v49 = vpop.eup %4149  ;;  %4175 = vtanh.f32 %v2863_v4  ;;  %v2913_v6 = vadd.f32 1.0, %v4148_v9  ;;  %v6077_v18 = vmul.f32 0.7978846, %v2846_v58  ;;  %v6079_v10 = vmul.f32 0.7978846, %v2847_v46  ;;  %v6488_v59 = vld [vmem:[#allocation35_spill] sm:$0xff] }
 0x2d1   : > { %v4152_v45 = vpop.eup %4151  ;;  %4177 = vtanh.f32 %v2864_v25  ;;  %v2914_v55 = vadd.f32 1.0, %v4150_v49  ;;  %v6082_v31 = vmul.f32 0.7978846, %v2848_v12  ;;  %v6490_v28 = vld [vmem:[#allocation37_spill] sm:$0xff]  ;;  %v6493_v4 = vld [vmem:[#allocation40_spill] sm:$0xff] }
 0x2d2   : > { %v4154_v42 = vpop.eup %4153  ;;  %4179 = vtanh.f32 %v2865_v56  ;;  %v2915_v21 = vadd.f32 1.0, %v4152_v45  ;;  %v2945_v57 = vmul.f32 %v2913_v6, %v6484_v13  ;;  %v6496_v45 = vld [vmem:[#allocation43_spill] sm:$0xff]  ;;  %v6497_v13 = vld [vmem:[#allocation44_spill] sm:$0xff] }
 0x2d3   : > { %v4156_v50 = vpop.eup %4155  ;;  %4181 = vtanh.f32 %v2866_v23  ;;  %v2916_v7 = vadd.f32 1.0, %v4154_v42  ;;  %v2946_v44 = vmul.f32 %v2914_v55, %v6485_v24  ;;  %v6498_v24 = vld [vmem:[#allocation45_spill] sm:$0xff] }
 0x2d4   : > { %v4158_v48 = vpop.eup %4157  ;;  %4183 = vtanh.f32 %v2867_v29  ;;  %v2917_v32 = vadd.f32 1.0, %v4156_v50  ;;  %v2947_v43 = vmul.f32 %v2915_v21, %v6486_v3  ;;  %v6087_v2 = vmul.f32 %v6487_v47, %v2945_v57 }
 0x2d5   : > { %v4160_v38 = vpop.eup %4159  ;;  %4185 = vtanh.f32 %v2868_v40  ;;  %v2918_v60 = vadd.f32 1.0, %v4158_v48  ;;  %v2948_v16 = vmul.f32 %v2916_v7, %v6488_v59  ;;  %v6091_v11 = vmul.f32 %v6487_v47, %v2946_v44  ;;  %v6494_v40 = vld [vmem:[#allocation41_spill] sm:$0xff] }
 0x2d6   : > { %v4162_v1 = vpop.eup %4161  ;;  %4187 = vtanh.f32 %v2869_v0  ;;  %v2919_v36 = vadd.f32 1.0, %v4160_v38  ;;  %v2949_v30 = vmul.f32 %v2917_v32, %v6489_v62  ;;  %v6095_v52 = vmul.f32 %v6487_v47, %v2947_v43  ;;  %v6141_v32 = vld [vmem:[%s349_s8] ss:$0 sm:$0xff]  ;;  %v6499_v43 = vld [vmem:[#allocation46_spill] sm:$0xff] }
 0x2d7   : > { %v4164_v63 = vpop.eup %4163  ;;  %4189 = vtanh.f32 %v2870_v22  ;;  %v2920_v8 = vadd.f32 1.0, %v4162_v1  ;;  %v2950_v19 = vmul.f32 %v2918_v60, %v6490_v28  ;;  %v6099_v39 = vmul.f32 %v6487_v47, %v2948_v16  ;;  %v6500_v16 = vld [vmem:[#allocation47_spill] sm:$0xff] }
 0x2d8   : > { %v4166_v37 = vpop.eup %4165  ;;  %4191 = vtanh.f32 %v2871_v20  ;;  %v2921_v54 = vadd.f32 1.0, %v4164_v63  ;;  %v2951_v27 = vmul.f32 %v2919_v36, %v6491_v14  ;;  %v6103_v15 = vmul.f32 %v6487_v47, %v2949_v30  ;;  %v6501_v30 = vld [vmem:[#allocation48_spill] sm:$0xff] }
 0x2d9   : > { %v4168_v58 = vpop.eup %4167  ;;  %4193 = vtanh.f32 %v2872_v17  ;;  %v2922_v33 = vadd.f32 1.0, %v4166_v37  ;;  %v2952_v46 = vmul.f32 %v2920_v8, %v6492_v61  ;;  %v6107_v53 = vmul.f32 %v6487_v47, %v2950_v19  ;;  %v6495_v17 = vld [vmem:[#allocation42_spill] sm:$0xff]  ;;  %v6502_v37 = vld [vmem:[#allocation49_spill] sm:$0xff] }
 0x2da   : > { %v4170_v12 = vpop.eup %4169  ;;  %4195 = vtanh.f32 %v2873_v35  ;;  %v2923_v51 = vadd.f32 1.0, %v4168_v58  ;;  %v2953_v25 = vmul.f32 %v2921_v54, %v6493_v4  ;;  %v6111_v56 = vmul.f32 %v6487_v47, %v2951_v27  ;;  %v6503_v61 = vld [vmem:[#allocation50_spill] sm:$0xff] }
 0x2db   : > { %v4172_v23 = vpop.eup %4171  ;;  %4197 = vtanh.f32 %v2874_v5  ;;  %v2924_v29 = vadd.f32 1.0, %v4170_v12  ;;  %v2954_v0 = vmul.f32 %v2922_v33, %v6494_v40  ;;  %v6115_v22 = vmul.f32 %v6487_v47, %v2952_v46 }
 0x2dc   : > { %v4174_v20 = vpop.eup %4173  ;;  %4199 = vtanh.f32 %v2875_v34  ;;  %v2925_v9 = vadd.f32 1.0, %v4172_v23  ;;  %v2955_v35 = vmul.f32 %v2923_v51, %v6495_v17  ;;  %v6123_v49 = vmul.f32 %v6487_v47, %v2953_v25  ;;  %v6504_v25 = vld [vmem:[#allocation51_spill] sm:$0xff] }
 0x2dd   : > { %v4176_v5 = vpop.eup %4175  ;;  %4201 = vtanh.f32 %v6073_v41  ;;  %v2926_v6 = vadd.f32 1.0, %v4174_v20  ;;  %v2956_v55 = vmul.f32 %v2924_v29, %v6496_v45  ;;  %v6128_v42 = vmul.f32 %v6487_v47, %v2954_v0  ;;  %v6505_v20 = vld [vmem:[#allocation52_spill] sm:$0xff] }
 0x2de   : > { %v4178_v21 = vpop.eup %4177  ;;  %4203 = vtanh.f32 %v6075_v26  ;;  %v2927_v34 = vadd.f32 1.0, %v4176_v5  ;;  %v2957_v57 = vmul.f32 %v2925_v9, %v6497_v13  ;;  %v6134_v50 = vmul.f32 %v6487_v47, %v2955_v35  ;;  %v6507_v13 = vld [vmem:[#allocation54_spill] sm:$0xff] }
 0x2df   : > { %v4180_v7 = vpop.eup %4179  ;;  %4205 = vtanh.f32 %v6077_v18  ;;  %v2928_v41 = vadd.f32 1.0, %v4178_v21  ;;  %v2958_v44 = vmul.f32 %v2926_v6, %v6498_v24  ;;  %v6139_v48 = vmul.f32 %v6487_v47, %v2956_v55  ;;  %v6506_v6 = vld [vmem:[#allocation53_spill] sm:$0xff] }
 0x2e0   : > { %v4182_v3 = vpop.eup %4181  ;;  %4207 = vtanh.f32 %v6079_v10  ;;  %v2929_v26 = vadd.f32 1.0, %v4180_v7  ;;  %v2959_v38 = vmul.f32 %v2927_v34, %v6499_v43  ;;  %v6146_v60 = vmul.f32 %v6487_v47, %v2957_v57 }
 0x2e1   : > { %v4184_v59 = vpop.eup %4183  ;;  %4209 = vtanh.f32 %v6082_v31  ;;  %v2930_v18 = vadd.f32 1.0, %v4182_v3  ;;  %v2960_v1 = vmul.f32 %v2928_v41, %v6500_v16  ;;  %v6156_v36 = vmul.f32 %v6487_v47, %v2958_v44  ;;  %v6508_v44 = vld [vmem:[#allocation55_spill] sm:$0xff] }
 0x2e2   : > { %v4186_v10 = vpop.eup %4185  ;;  %v2931_v62 = vadd.f32 1.0, %v4184_v59  ;;  %v2961_v63 = vmul.f32 %v2929_v26, %v6501_v30  ;;  %v6160_v8 = vmul.f32 %v6487_v47, %v2959_v38  ;;  %v3024_v28 = vadd.f32 %v6141_v32, %v6087_v2  ;;  %v6509_v59 = vld [vmem:[#allocation56_spill] sm:$0xff] }
 0x2e3   : > { %v4188_v19 = vpop.eup %4187  ;;  %v2932_v31 = vadd.f32 1.0, %v4186_v10  ;;  %v2962_v54 = vmul.f32 %v2930_v18, %v6502_v37  ;;  %v6166_v14 = vmul.f32 %v6487_v47, %v2960_v1  ;;  %v3025_v27 = vadd.f32 %v6141_v32, %v6091_v11 }
 0x2e4   : > { %v4190_v58 = vpop.eup %4189  ;;  %v2933_v33 = vadd.f32 1.0, %v4188_v19  ;;  %v2963_v46 = vmul.f32 %v2931_v62, %v6503_v61  ;;  %v6172_v12 = vmul.f32 %v6487_v47, %v2961_v63  ;;  %v3026_v2 = vadd.f32 %v6141_v32, %v6095_v52  ;;  %3056 = vst [vmem:[%s6151_s11] sm:$0xff] %v3024_v28  ;;  %v6510_v62 = vld [vmem:[#allocation57_spill] sm:$0xff] }
 0x2e5   : > { %v4192_v51 = vpop.eup %4191  ;;  %v2934_v4 = vadd.f32 1.0, %v4190_v58  ;;  %v2964_v23 = vmul.f32 %v2932_v31, %v6504_v25  ;;  %v6179_v29 = vmul.f32 %v6487_v47, %v2962_v54  ;;  %v3027_v11 = vadd.f32 %v6141_v32, %v6099_v39  ;;  %3057 = vst [vmem:[%s6151_s11 + $0x8] sm:$0xff] %v3025_v27  ;;  %v6511_v31 = vld [vmem:[#allocation58_spill] sm:$0xff] }
 0x2e6   : > { %v4194_v40 = vpop.eup %4193  ;;  %v2935_v0 = vadd.f32 1.0, %v4192_v51  ;;  %v2965_v9 = vmul.f32 %v2933_v33, %v6505_v20  ;;  %v6186_v52 = vmul.f32 %v6487_v47, %v2963_v46  ;;  %v3028_v17 = vadd.f32 %v6141_v32, %v6103_v15  ;;  %3058 = vst [vmem:[%s6151_s11 + $0x10] sm:$0xff] %v3026_v2  ;;  %v6512_v33 = vld [vmem:[#allocation59_spill] sm:$0xff] }
 0x2e7   : > { %v4196_v35 = vpop.eup %4195  ;;  %v2936_v5 = vadd.f32 1.0, %v4194_v40  ;;  %v2966_v45 = vmul.f32 %v2934_v4, %v6506_v6  ;;  %v3004_v39 = vmul.f32 %v6487_v47, %v2964_v23  ;;  %v3029_v55 = vadd.f32 %v6141_v32, %v6107_v53  ;;  %3059 = vst [vmem:[%s6151_s11 + $0x18] sm:$0xff] %v3027_v11  ;;  %v6513_v4 = vld [vmem:[#allocation60_spill] sm:$0xff]  ;;  %v6514_v40 = vld [vmem:[#allocation61_spill] sm:$0xff]  ;;  %v6516_v6 = vld [vmem:[#allocation63_spill] sm:$0xff] }
 0x2e8   : > { %v4198_v21 = vpop.eup %4197  ;;  %v2937_v34 = vadd.f32 1.0, %v4196_v35  ;;  %v2967_v57 = vmul.f32 %v2935_v0, %v6507_v13  ;;  %v3005_v7 = vmul.f32 %v6487_v47, %v2965_v9  ;;  %v3030_v15 = vadd.f32 %v6141_v32, %v6111_v56  ;;  %3060 = vst [vmem:[%s6151_s11 + $0x20] sm:$0xff] %v3028_v17  ;;  %v6515_v9 = vld [vmem:[#allocation62_spill] sm:$0xff] }
 0x2e9   : > { %v4200_v41 = vpop.eup %4199  ;;  %v2938_v24 = vadd.f32 1.0, %v4198_v21  ;;  %v2968_v3 = vmul.f32 %v2936_v5, %v6508_v44  ;;  %v3006_v26 = vmul.f32 %v6487_v47, %v2966_v45  ;;  %v3031_v53 = vadd.f32 %v6141_v32, %v6115_v22  ;;  %3061 = vst [vmem:[%s6151_s11 + $0x28] sm:$0xff] %v3029_v55 }
 0x2ea   : > { %v4202_v43 = vpop.eup %4201  ;;  %v2939_v38 = vadd.f32 1.0, %v4200_v41  ;;  %v2969_v18 = vmul.f32 %v2937_v34, %v6509_v59  ;;  %v3007_v16 = vmul.f32 %v6487_v47, %v2967_v57  ;;  %v3032_v56 = vadd.f32 %v6141_v32, %v6123_v49  ;;  %3062 = vst [vmem:[%s6151_s11 + $0x30] sm:$0xff] %v3030_v15 }
 0x2eb   : > { %v4204_v1 = vpop.eup %4203  ;;  %v2940_v10 = vadd.f32 1.0, %v4202_v43  ;;  %v2970_v30 = vmul.f32 %v2938_v24, %v6510_v62  ;;  %v3008_v63 = vmul.f32 %v6487_v47, %v2968_v3  ;;  %v3033_v22 = vadd.f32 %v6141_v32, %v6128_v42  ;;  %3063 = vst [vmem:[%s6151_s11 + $0x38] sm:$0xff] %v3031_v53 }
 0x2ec   : > { %v4206_v28 = vpop.eup %4205  ;;  %v2941_v19 = vadd.f32 1.0, %v4204_v1  ;;  %v2971_v37 = vmul.f32 %v2939_v38, %v6511_v31  ;;  %v3009_v54 = vmul.f32 %v6487_v47, %v2969_v18  ;;  %v3034_v49 = vadd.f32 %v6141_v32, %v6134_v50  ;;  %3064 = vst [vmem:[%s6151_s11 + $0x40] sm:$0xff] %v3032_v56 }
 0x2ed   : > { %v4208_v27 = vpop.eup %4207  ;;  %v2942_v58 = vadd.f32 1.0, %v4206_v28  ;;  %v2972_v61 = vmul.f32 %v2940_v10, %v6512_v33  ;;  %v3010_v46 = vmul.f32 %v6487_v47, %v2970_v30  ;;  %v3035_v42 = vadd.f32 %v6141_v32, %v6139_v48  ;;  %3065 = vst [vmem:[%s6151_s11 + $0x48] sm:$0xff] %v3033_v22 }
 0x2ee   : > { %v4210_v2 = vpop.eup %4209  ;;  %v2943_v51 = vadd.f32 1.0, %v4208_v27  ;;  %v2973_v25 = vmul.f32 %v2941_v19, %v6513_v4  ;;  %v3011_v23 = vmul.f32 %v6487_v47, %v2971_v37  ;;  %v3036_v50 = vadd.f32 %v6141_v32, %v6146_v60  ;;  %3066 = vst [vmem:[%s6151_s11 + $0x50] sm:$0xff] %v3034_v49 }
 0x2ef   : > { %v2944_v11 = vadd.f32 1.0, %v4210_v2  ;;  %v2974_v0 = vmul.f32 %v2942_v58, %v6514_v40  ;;  %v3012_v20 = vmul.f32 %v6487_v47, %v2972_v61  ;;  %v3037_v48 = vadd.f32 %v6141_v32, %v6156_v36  ;;  %3067 = vst [vmem:[%s6151_s11 + $0x58] sm:$0xff] %v3035_v42 }
 0x2f0   : > { %v2975_v17 = vmul.f32 %v2943_v51, %v6515_v9  ;;  %v3013_v35 = vmul.f32 %v6487_v47, %v2973_v25  ;;  %v3038_v60 = vadd.f32 %v6141_v32, %v6160_v8  ;;  %v3039_v5 = vadd.f32 %v6141_v32, %v6166_v14  ;;  %3068 = vst [vmem:[%s6151_s11 + $0x60] sm:$0xff] %v3036_v50 }
 0x2f1   : > { %v2976_v45 = vmul.f32 %v2944_v11, %v6516_v6  ;;  %v3014_v36 = vmul.f32 %v6487_v47, %v2974_v0  ;;  %v3040_v55 = vadd.f32 %v6141_v32, %v6172_v12  ;;  %v3041_v21 = vadd.f32 %v6141_v32, %v6179_v29  ;;  %3069 = vst [vmem:[%s6151_s11 + $0x68] sm:$0xff] %v3037_v48 }
 0x2f2   : > { %v3015_v34 = vmul.f32 %v6487_v47, %v2975_v17  ;;  %v3042_v8 = vadd.f32 %v6141_v32, %v6186_v52  ;;  %v3043_v14 = vadd.f32 %v6141_v32, %v3004_v39  ;;  %v3044_v13 = vadd.f32 %v6141_v32, %v3005_v7  ;;  %3070 = vst [vmem:[%s6151_s11 + $0x70] sm:$0xff] %v3038_v60 }
 0x2f3   : > { %3071 = vst [vmem:[%s6151_s11 + $0x78] sm:$0xff] %v3039_v5  ;;  %v3016_v12 = vmul.f32 %v6487_v47, %v2976_v45  ;;  %v3045_v57 = vadd.f32 %v6141_v32, %v3006_v26  ;;  %v3046_v29 = vadd.f32 %v6141_v32, %v3007_v16  ;;  %v3047_v15 = vadd.f32 %v6141_v32, %v3008_v63 }
 0x2f4   : > { %3072 = vst [vmem:[%s6151_s11 + $0x80] sm:$0xff] %v3040_v55  ;;  %3073 = vst [vmem:[%s6151_s11 + $0x88] sm:$0xff] %v3041_v21  ;;  %v3048_v52 = vadd.f32 %v6141_v32, %v3009_v54  ;;  %v3049_v39 = vadd.f32 %v6141_v32, %v3010_v46  ;;  %v3050_v47 = vadd.f32 %v6141_v32, %v3011_v23 }
 0x2f5   : > { %v3051_v7 = vadd.f32 %v6141_v32, %v3012_v20  ;;  %3074 = vst [vmem:[%s6151_s11 + $0x90] sm:$0xff] %v3042_v8  ;;  %3075 = vst [vmem:[%s6151_s11 + $0x98] sm:$0xff] %v3043_v14  ;;  %v3052_v41 = vadd.f32 %v6141_v32, %v3013_v35  ;;  %v3053_v24 = vadd.f32 %v6141_v32, %v3014_v36 }
 0x2f6   : > { %3076 = vst [vmem:[%s6151_s11 + $0xa0] sm:$0xff] %v3044_v13  ;;  %v3054_v44 = vadd.f32 %v6141_v32, %v3015_v34  ;;  %v3055_v3 = vadd.f32 %v6141_v32, %v3016_v12  ;;  %3077 = vst [vmem:[%s6151_s11 + $0xa8] sm:$0xff] %v3045_v57 }
 0x2f7   : > { %3078 = vst [vmem:[%s6151_s11 + $0xb0] sm:$0xff] %v3046_v29  ;;  %3079 = vst [vmem:[%s6151_s11 + $0xb8] sm:$0xff] %v3047_v15 }
 0x2f8   : > { %3080 = vst [vmem:[%s6151_s11 + $0xc0] sm:$0xff] %v3048_v52  ;;  %3081 = vst [vmem:[%s6151_s11 + $0xc8] sm:$0xff] %v3049_v39 }
 0x2f9   : > { %3082 = vst [vmem:[%s6151_s11 + $0xd0] sm:$0xff] %v3050_v47  ;;  %3083 = vst [vmem:[%s6151_s11 + $0xd8] sm:$0xff] %v3051_v7 }
 0x2fa   : > { %3084 = vst [vmem:[%s6151_s11 + $0xe0] sm:$0xff] %v3052_v41  ;;  %3085 = vst [vmem:[%s6151_s11 + $0xe8] sm:$0xff] %v3053_v24 }
 0x2fb   : > { %3086 = vst [vmem:[%s6151_s11 + $0xf0] sm:$0xff] %v3054_v44  ;;  %3087 = vst [vmem:[%s6151_s11 + $0xf8] sm:$0xff] %v3055_v3 }
 0x2fc PF: > { %s15_s20 = sadd.s32 1, %s4233_s20   ;;  %s6517_s18 = smov %s4229_s19 }
 0x2fd   : > { %p12_p5 = scmp.ge.s32.totalorder %s15_s20, 4   ;;  %s6518_s19 = smov %s6520_s21 }
 0x2ff   :  { %14 = sbr.rel (!%p12_p5) target bundleno = 2 (0x2), region = 92 }

</bundles_post_ra>
